<compile_context>
chip_gen: v6e
topology: v6e:2x2x1
jax: 0.10.0
libtpu: 0.0.40
codegen_flags: <defaults>
</compile_context>

<pallas_src>
import functools

import jax
import jax.numpy as jnp
from jax import lax
from jax.experimental import pallas as pl
from jax.experimental.pallas import tpu as pltpu

NEG_SLOPE = 0.01  # nn.LeakyReLU default negative_slope


def _round_up(x, m):
    return ((x + m - 1) // m) * m


# ----------------------------------------------------------------------------
# Pallas kernels
# ----------------------------------------------------------------------------
def _conv_gemm_kernel(x_ref, w_ref, o_ref, acc_ref, *, KH, KW, Wp, M):
    """Direct conv as implicit GEMM with an in-kernel KH*KW tap reduction.

    x_ref : (1, Lp, Cin_p)     f32  flattened spatially-padded image (1 item)
    w_ref : (KH*KW, Cin_p, TN) bf16 per-tap weight matrices (Cout tile)
    o_ref : (1, M, TN)         f32  M = Ho*Wp "wide" flattened output rows
    acc_ref: (M, TN)           f32  VMEM accumulator
    """
    for kh in range(KH):
        for kw in range(KW):
            t = kh * KW + kw
            start = kh * Wp + kw
            # Static shifted slice of the flattened image; cast to bf16 for MXU.
            xs = x_ref[0, start:start + M, :].astype(jnp.bfloat16)
            contrib = jnp.dot(xs, w_ref[t], preferred_element_type=jnp.float32)
            if t == 0:
                acc_ref[...] = contrib
            else:
                acc_ref[...] += contrib
    a = acc_ref[...]
    o_ref[0] = jnp.where(a > 0, a, NEG_SLOPE * a).astype(o_ref.dtype)


def _maxpool_kernel(x_ref, o_ref, *, C):
    """2x2/stride-2 max pool.  x_ref: (1, Ho, 2, Wo, 2*C) -> o_ref: (1, Ho, Wo, C)."""
    x = x_ref[0]                            # (Ho, 2, Wo, 2C)
    v = jnp.maximum(x[:, 0], x[:, 1])       # vertical max    -> (Ho, Wo, 2C)
    o_ref[0] = jnp.maximum(v[..., :C], v[..., C:])   # horizontal max -> (Ho, Wo, C)


# ----------------------------------------------------------------------------
# Pallas wrappers
# ----------------------------------------------------------------------------
def conv2d_leaky_nhwc(x, w, padding, halving=0):
    """Bias-free stride-1 conv + LeakyReLU.  x: (N,H,W,Cin) f32, w: (KH,KW,Cin,Cout)."""
    N0, H0, W0, Cin = x.shape
    KH, KW, _, Cout = w.shape

    chunks = 2 ** halving if halving else 1
    if chunks > 1:
        # FocalConv2d: fold the H-chunks into the batch axis (single pallas_call).
        assert H0 % chunks == 0, "FocalConv2d requires H divisible by 2**halving"
        x = x.reshape(N0 * chunks, H0 // chunks, W0, Cin)

    N, H, W, _ = x.shape
    Hp, Wp = H + 2 * padding, W + 2 * padding
    Ho, Wo = Hp - KH + 1, Wp - KW + 1
    M = Ho * Wp                       # "wide" rows: KW-1 junk columns per output row
    Lp = Hp * Wp + (KW - 1)           # flattened length + overrun slack

    Cin_p = _round_up(Cin, 8)         # clean sublane/K size
    Cout_p = _round_up(Cout, 128)     # lane-dense output
    TN = 256 if Cout_p % 256 == 0 else 128
    n_co = Cout_p // TN

    # Layout plumbing (cheap, XLA side): spatial pad, channel pad, flatten H*W.
    xp = jnp.pad(x, ((0, 0), (padding, padding), (padding, padding),
                     (0, Cin_p - Cin)))
    xflat = jnp.pad(xp.reshape(N, Hp * Wp, Cin_p), ((0, 0), (0, KW - 1), (0, 0)))

    wp = jnp.pad(w, ((0, 0), (0, 0), (0, Cin_p - Cin), (0, Cout_p - Cout)))
    wm = wp.reshape(KH * KW, Cin_p, Cout_p).astype(jnp.bfloat16)

    flops = 2 * N * M * Cin_p * Cout_p * KH * KW
    bytes_accessed = (xflat.size * 4 * n_co + wm.size * 2 * N + N * M * Cout_p * 4)

    out = pl.pallas_call(
        functools.partial(_conv_gemm_kernel, KH=KH, KW=KW, Wp=Wp, M=M),
        out_shape=jax.ShapeDtypeStruct((N, M, Cout_p), jnp.float32),
        grid=(N, n_co),
        in_specs=[
            pl.BlockSpec((1, Lp, Cin_p), lambda n, c: (n, 0, 0)),
            pl.BlockSpec((KH * KW, Cin_p, TN), lambda n, c: (0, 0, c)),
        ],
        out_specs=pl.BlockSpec((1, M, TN), lambda n, c: (n, 0, c)),
        scratch_shapes=[pltpu.VMEM((M, TN), jnp.float32)],
        compiler_params=pltpu.CompilerParams(
            dimension_semantics=("parallel", "parallel")),
        cost_estimate=pl.CostEstimate(flops=flops, transcendentals=0,
                                      bytes_accessed=bytes_accessed),
    )(xflat, wm)

    # Drop the junk columns and the channel padding.
    out = out.reshape(N, Ho, Wp, Cout_p)[:, :, :Wo, :Cout]
    if chunks > 1:
        out = out.reshape(N0, chunks * Ho, Wo, Cout)
    return out
    # TODO(synk): for very large images, tile Ho with halo DMA instead of
    # per-image VMEM blocks.


def maxpool2x2_nhwc(x):
    """MaxPool2d(kernel=2, stride=2), tiled over the batch axis."""
    N, H, W, C = x.shape
    Ho, Wo = H // 2, W // 2
    # Free row-major reshape: (N, 2Ho, 2Wo, C) -> (N, Ho, 2, Wo, 2C)
    xr = x[:, :2 * Ho, :2 * Wo, :].reshape(N, Ho, 2, Wo, 2 * C)
    return pl.pallas_call(
        functools.partial(_maxpool_kernel, C=C),
        out_shape=jax.ShapeDtypeStruct((N, Ho, Wo, C), x.dtype),
        grid=(N,),
        in_specs=[pl.BlockSpec((1, Ho, 2, Wo, 2 * C), lambda n: (n, 0, 0, 0, 0))],
        out_specs=pl.BlockSpec((1, Ho, Wo, C), lambda n: (n, 0, 0, 0)),
        compiler_params=pltpu.CompilerParams(dimension_semantics=("parallel",)),
    )(xr)


# ----------------------------------------------------------------------------
# Plain module: params + forward
# ----------------------------------------------------------------------------
def init_plain_params(key, layers_cfg, in_channels):
    """Deterministic weights, shapes per PyTorch __init__ (stored as HWIO)."""
    params = []
    in_c = in_channels
    ksize = 5  # first conv layer uses kernel 5; the rest use 3
    for cfg in layers_cfg:
        if cfg == 'M':
            continue
        out_c = int(cfg.split('-')[1])
        key, sub = jax.random.split(key)
        fan_in = in_c * ksize * ksize
        w = jax.random.normal(sub, (ksize, ksize, in_c, out_c),
                              jnp.float32) / jnp.sqrt(float(fan_in))
        params.append(w)
        in_c = out_c
        ksize = 3
    return params


def plain_forward(seqs_nchw, params, layers_cfg):
    """Forward of Plain.  seqs_nchw: (N, C, H, W) -> (N, C_out, H_out, W_out)."""
    x = jnp.transpose(seqs_nchw, (0, 2, 3, 1))  # NCHW -> NHWC
    pi = 0
    first = True
    for cfg in layers_cfg:
        if cfg == 'M':
            x = maxpool2x2_nhwc(x)
            continue
        parts = cfg.split('-')
        w = params[pi]
        pi += 1
        pad = 2 if first else 1
        halving = int(parts[2]) if parts[0] == 'FC' else 0
        x = conv2d_leaky_nhwc(x, w, pad, halving=halving)
        first = False
    return jnp.transpose(x, (0, 3, 1, 2))       # NHWC -> NCHW


# ----------------------------------------------------------------------------
# Pure-JAX reference (lax.conv / reduce_window) for verification.
# Uses the same bf16-operand / f32-accumulation arithmetic as the kernel.
# ----------------------------------------------------------------------------
def plain_reference(seqs_nchw, params, layers_cfg):
    x = jnp.transpose(seqs_nchw, (0, 2, 3, 1))
    pi = 0
    first = True
    for cfg in layers_cfg:
        if cfg == 'M':
            x = lax.reduce_window(x, -jnp.inf, lax.max,
                                  (1, 2, 2, 1), (1, 2, 2, 1), 'VALID')
            continue
        parts = cfg.split('-')
        w = params[pi]
        pi += 1
        pad = 2 if first else 1
        halving = int(parts[2]) if parts[0] == 'FC' else 0
        xb = x.astype(jnp.bfloat16)
        wb = w.astype(jnp.bfloat16)

        def conv(z):
            return lax.conv_general_dilated(
                z, wb, (1, 1), [(pad, pad), (pad, pad)],
                dimension_numbers=('NHWC', 'HWIO', 'NHWC'),
                preferred_element_type=jnp.float32)

        if halving == 0:
            y = conv(xb)
        else:
            chunks = 2 ** halving
            split = x.shape[1] // chunks
            y = jnp.concatenate(
                [conv(xb[:, i * split:(i + 1) * split]) for i in range(chunks)],
                axis=1)
        x = jnp.where(y > 0, y, NEG_SLOPE * y)
        first = False
    return jnp.transpose(x, (0, 3, 1, 2))


# ----------------------------------------------------------------------------
if __name__ == "__main__":
    layers_cfg = ['BC-4', 'M', 'FC-8-1']   # exercises BasicConv, MaxPool, FocalConv
    in_channels = 1

    key = jax.random.PRNGKey(0)
    key, kx = jax.random.split(key)
    seqs = jax.random.normal(kx, (2, in_channels, 16, 16), jnp.float32)  # NCHW

    params = init_plain_params(key, layers_cfg, in_channels)

    fwd = jax.jit(functools.partial(plain_forward, layers_cfg=layers_cfg))
    out = jax.block_until_ready(fwd(seqs, params))

    ref = jax.block_until_ready(plain_reference(seqs, params, layers_cfg))
    assert out.shape == ref.shape == (2, 8, 8, 8), (out.shape, ref.shape)
    max_err = float(jnp.max(jnp.abs(out - ref)))
    assert jnp.allclose(out, ref, rtol=1e-2, atol=1e-2), f"mismatch: {max_err}"

    print("KERNEL_OK")
</pallas_src>

<mosaic_0001>
module attributes {stable_mosaic.version = 11 : i64} {
  func.func @_conv_gemm_kernel(%arg0: i32, %arg1: i32, %arg2: memref<1x404x8xf32, #tpu.memory_space<vmem>>, %arg3: memref<25x8x128xbf16, #tpu.memory_space<vmem>>, %arg4: memref<1x320x128xf32, #tpu.memory_space<vmem>>, %arg5: memref<320x128xf32, #tpu.memory_space<vmem>>) attributes {dimension_semantics = [#tpu.dimension_semantics<parallel>, #tpu.dimension_semantics<parallel>], iteration_bounds = array<i64: 2, 1>, scalar_prefetch = 0 : i64, scratch_operands = 1 : i64, tpu.core_type = #tpu.core_type<tc>, window_params = [{transform_indices = @transform_0, window_bounds = array<i64: 1, 404, 8>}, {transform_indices = @transform_1, window_bounds = array<i64: 25, 8, 128>}, {transform_indices = @transform_2, window_bounds = array<i64: 1, 320, 128>}]} {
    %c0 = arith.constant 0 : index
    %c0_0 = arith.constant 0 : index
    %c0_1 = arith.constant 0 : index
    %0 = vector.load %arg2[%c0, %c0_0, %c0_1] : memref<1x404x8xf32, #tpu.memory_space<vmem>>, vector<1x320x8xf32>
    %1 = vector.shape_cast %0 : vector<1x320x8xf32> to vector<320x8xf32>
    %2 = arith.truncf %1 : vector<320x8xf32> to vector<320x8xbf16>
    %c0_2 = arith.constant 0 : index
    %c0_3 = arith.constant 0 : index
    %c0_4 = arith.constant 0 : index
    %3 = vector.load %arg3[%c0_2, %c0_3, %c0_4] : memref<25x8x128xbf16, #tpu.memory_space<vmem>>, vector<1x8x128xbf16>
    %4 = vector.shape_cast %3 : vector<1x8x128xbf16> to vector<8x128xbf16>
    %cst = arith.constant dense<0.000000e+00> : vector<320x128xf32>
    %5 = tpu.matmul %2, %4, %cst {dimension_numbers = #tpu.dot_dimension_numbers<[1], [0], [0], [1], [0, 0, 1, 1], [], []>} : vector<320x8xbf16>, vector<8x128xbf16>, vector<320x128xf32> -> vector<320x128xf32>
    %c0_5 = arith.constant 0 : index
    %c0_6 = arith.constant 0 : index
    %6 = vector.load %arg5[%c0_5, %c0_6] : memref<320x128xf32, #tpu.memory_space<vmem>>, vector<320x128xf32>
    tpu.vector_store %arg5[%c0_5, %c0_6], %5 {strides = array<i32>} : memref<320x128xf32, #tpu.memory_space<vmem>>, vector<320x128xf32>,
    %c0_7 = arith.constant 0 : index
    %c1 = arith.constant 1 : index
    %c0_8 = arith.constant 0 : index
    %7 = vector.load %arg2[%c0_7, %c1, %c0_8] : memref<1x404x8xf32, #tpu.memory_space<vmem>>, vector<1x320x8xf32>
    %8 = vector.shape_cast %7 : vector<1x320x8xf32> to vector<320x8xf32>
    %9 = arith.truncf %8 : vector<320x8xf32> to vector<320x8xbf16>
    %c1_9 = arith.constant 1 : index
    %c0_10 = arith.constant 0 : index
    %c0_11 = arith.constant 0 : index
    %10 = vector.load %arg3[%c1_9, %c0_10, %c0_11] : memref<25x8x128xbf16, #tpu.memory_space<vmem>>, vector<1x8x128xbf16>
    %11 = vector.shape_cast %10 : vector<1x8x128xbf16> to vector<8x128xbf16>
    %cst_12 = arith.constant dense<0.000000e+00> : vector<320x128xf32>
    %12 = tpu.matmul %9, %11, %cst_12 {dimension_numbers = #tpu.dot_dimension_numbers<[1], [0], [0], [1], [0, 0, 1, 1], [], []>} : vector<320x8xbf16>, vector<8x128xbf16>, vector<320x128xf32> -> vector<320x128xf32>
    %c0_13 = arith.constant 0 : index
    %c0_14 = arith.constant 0 : index
    %13 = vector.load %arg5[%c0_13, %c0_14] : memref<320x128xf32, #tpu.memory_space<vmem>>, vector<320x128xf32>
    %14 = arith.addf %13, %12 : vector<320x128xf32>
    %c0_15 = arith.constant 0 : index
    %c0_16 = arith.constant 0 : index
    %15 = vector.load %arg5[%c0_15, %c0_16] : memref<320x128xf32, #tpu.memory_space<vmem>>, vector<320x128xf32>
    tpu.vector_store %arg5[%c0_15, %c0_16], %14 {strides = array<i32>} : memref<320x128xf32, #tpu.memory_space<vmem>>, vector<320x128xf32>,
    %c0_17 = arith.constant 0 : index
    %c2 = arith.constant 2 : index
    %c0_18 = arith.constant 0 : index
    %16 = vector.load %arg2[%c0_17, %c2, %c0_18] : memref<1x404x8xf32, #tpu.memory_space<vmem>>, vector<1x320x8xf32>
    %17 = vector.shape_cast %16 : vector<1x320x8xf32> to vector<320x8xf32>
    %18 = arith.truncf %17 : vector<320x8xf32> to vector<320x8xbf16>
    %c2_19 = arith.constant 2 : index
    %c0_20 = arith.constant 0 : index
    %c0_21 = arith.constant 0 : index
    %19 = vector.load %arg3[%c2_19, %c0_20, %c0_21] : memref<25x8x128xbf16, #tpu.memory_space<vmem>>, vector<1x8x128xbf16>
    %20 = vector.shape_cast %19 : vector<1x8x128xbf16> to vector<8x128xbf16>
    %cst_22 = arith.constant dense<0.000000e+00> : vector<320x128xf32>
    %21 = tpu.matmul %18, %20, %cst_22 {dimension_numbers = #tpu.dot_dimension_numbers<[1], [0], [0], [1], [0, 0, 1, 1], [], []>} : vector<320x8xbf16>, vector<8x128xbf16>, vector<320x128xf32> -> vector<320x128xf32>
    %c0_23 = arith.constant 0 : index
    %c0_24 = arith.constant 0 : index
    %22 = vector.load %arg5[%c0_23, %c0_24] : memref<320x128xf32, #tpu.memory_space<vmem>>, vector<320x128xf32>
    %23 = arith.addf %22, %21 : vector<320x128xf32>
    %c0_25 = arith.constant 0 : index
    %c0_26 = arith.constant 0 : index
    %24 = vector.load %arg5[%c0_25, %c0_26] : memref<320x128xf32, #tpu.memory_space<vmem>>, vector<320x128xf32>
    tpu.vector_store %arg5[%c0_25, %c0_26], %23 {strides = array<i32>} : memref<320x128xf32, #tpu.memory_space<vmem>>, vector<320x128xf32>,
    %c0_27 = arith.constant 0 : index
    %c3 = arith.constant 3 : index
    %c0_28 = arith.constant 0 : index
    %25 = vector.load %arg2[%c0_27, %c3, %c0_28] : memref<1x404x8xf32, #tpu.memory_space<vmem>>, vector<1x320x8xf32>
    %26 = vector.shape_cast %25 : vector<1x320x8xf32> to vector<320x8xf32>
    %27 = arith.truncf %26 : vector<320x8xf32> to vector<320x8xbf16>
    %c3_29 = arith.constant 3 : index
    %c0_30 = arith.constant 0 : index
    %c0_31 = arith.constant 0 : index
    %28 = vector.load %arg3[%c3_29, %c0_30, %c0_31] : memref<25x8x128xbf16, #tpu.memory_space<vmem>>, vector<1x8x128xbf16>
    %29 = vector.shape_cast %28 : vector<1x8x128xbf16> to vector<8x128xbf16>
    %cst_32 = arith.constant dense<0.000000e+00> : vector<320x128xf32>
    %30 = tpu.matmul %27, %29, %cst_32 {dimension_numbers = #tpu.dot_dimension_numbers<[1], [0], [0], [1], [0, 0, 1, 1], [], []>} : vector<320x8xbf16>, vector<8x128xbf16>, vector<320x128xf32> -> vector<320x128xf32>
    %c0_33 = arith.constant 0 : index
    %c0_34 = arith.constant 0 : index
    %31 = vector.load %arg5[%c0_33, %c0_34] : memref<320x128xf32, #tpu.memory_space<vmem>>, vector<320x128xf32>
    %32 = arith.addf %31, %30 : vector<320x128xf32>
    %c0_35 = arith.constant 0 : index
    %c0_36 = arith.constant 0 : index
    %33 = vector.load %arg5[%c0_35, %c0_36] : memref<320x128xf32, #tpu.memory_space<vmem>>, vector<320x128xf32>
    tpu.vector_store %arg5[%c0_35, %c0_36], %32 {strides = array<i32>} : memref<320x128xf32, #tpu.memory_space<vmem>>, vector<320x128xf32>,
    %c0_37 = arith.constant 0 : index
    %c4 = arith.constant 4 : index
    %c0_38 = arith.constant 0 : index
    %34 = vector.load %arg2[%c0_37, %c4, %c0_38] : memref<1x404x8xf32, #tpu.memory_space<vmem>>, vector<1x320x8xf32>
    %35 = vector.shape_cast %34 : vector<1x320x8xf32> to vector<320x8xf32>
    %36 = arith.truncf %35 : vector<320x8xf32> to vector<320x8xbf16>
    %c4_39 = arith.constant 4 : index
    %c0_40 = arith.constant 0 : index
    %c0_41 = arith.constant 0 : index
    %37 = vector.load %arg3[%c4_39, %c0_40, %c0_41] : memref<25x8x128xbf16, #tpu.memory_space<vmem>>, vector<1x8x128xbf16>
    %38 = vector.shape_cast %37 : vector<1x8x128xbf16> to vector<8x128xbf16>
    %cst_42 = arith.constant dense<0.000000e+00> : vector<320x128xf32>
    %39 = tpu.matmul %36, %38, %cst_42 {dimension_numbers = #tpu.dot_dimension_numbers<[1], [0], [0], [1], [0, 0, 1, 1], [], []>} : vector<320x8xbf16>, vector<8x128xbf16>, vector<320x128xf32> -> vector<320x128xf32>
    %c0_43 = arith.constant 0 : index
    %c0_44 = arith.constant 0 : index
    %40 = vector.load %arg5[%c0_43, %c0_44] : memref<320x128xf32, #tpu.memory_space<vmem>>, vector<320x128xf32>
    %41 = arith.addf %40, %39 : vector<320x128xf32>
    %c0_45 = arith.constant 0 : index
    %c0_46 = arith.constant 0 : index
    %42 = vector.load %arg5[%c0_45, %c0_46] : memref<320x128xf32, #tpu.memory_space<vmem>>, vector<320x128xf32>
    tpu.vector_store %arg5[%c0_45, %c0_46], %41 {strides = array<i32>} : memref<320x128xf32, #tpu.memory_space<vmem>>, vector<320x128xf32>,
    %c0_47 = arith.constant 0 : index
    %c20 = arith.constant 20 : index
    %c0_48 = arith.constant 0 : index
    %43 = vector.load %arg2[%c0_47, %c20, %c0_48] : memref<1x404x8xf32, #tpu.memory_space<vmem>>, vector<1x320x8xf32>
    %44 = vector.shape_cast %43 : vector<1x320x8xf32> to vector<320x8xf32>
    %45 = arith.truncf %44 : vector<320x8xf32> to vector<320x8xbf16>
    %c5 = arith.constant 5 : index
    %c0_49 = arith.constant 0 : index
    %c0_50 = arith.constant 0 : index
    %46 = vector.load %arg3[%c5, %c0_49, %c0_50] : memref<25x8x128xbf16, #tpu.memory_space<vmem>>, vector<1x8x128xbf16>
    %47 = vector.shape_cast %46 : vector<1x8x128xbf16> to vector<8x128xbf16>
    %cst_51 = arith.constant dense<0.000000e+00> : vector<320x128xf32>
    %48 = tpu.matmul %45, %47, %cst_51 {dimension_numbers = #tpu.dot_dimension_numbers<[1], [0], [0], [1], [0, 0, 1, 1], [], []>} : vector<320x8xbf16>, vector<8x128xbf16>, vector<320x128xf32> -> vector<320x128xf32>
    %c0_52 = arith.constant 0 : index
    %c0_53 = arith.constant 0 : index
    %49 = vector.load %arg5[%c0_52, %c0_53] : memref<320x128xf32, #tpu.memory_space<vmem>>, vector<320x128xf32>
    %50 = arith.addf %49, %48 : vector<320x128xf32>
    %c0_54 = arith.constant 0 : index
    %c0_55 = arith.constant 0 : index
    %51 = vector.load %arg5[%c0_54, %c0_55] : memref<320x128xf32, #tpu.memory_space<vmem>>, vector<320x128xf32>
    tpu.vector_store %arg5[%c0_54, %c0_55], %50 {strides = array<i32>} : memref<320x128xf32, #tpu.memory_space<vmem>>, vector<320x128xf32>,
    %c0_56 = arith.constant 0 : index
    %c21 = arith.constant 21 : index
    %c0_57 = arith.constant 0 : index
    %52 = vector.load %arg2[%c0_56, %c21, %c0_57] : memref<1x404x8xf32, #tpu.memory_space<vmem>>, vector<1x320x8xf32>
    %53 = vector.shape_cast %52 : vector<1x320x8xf32> to vector<320x8xf32>
    %54 = arith.truncf %53 : vector<320x8xf32> to vector<320x8xbf16>
    %c6 = arith.constant 6 : index
    %c0_58 = arith.constant 0 : index
    %c0_59 = arith.constant 0 : index
    %55 = vector.load %arg3[%c6, %c0_58, %c0_59] : memref<25x8x128xbf16, #tpu.memory_space<vmem>>, vector<1x8x128xbf16>
    %56 = vector.shape_cast %55 : vector<1x8x128xbf16> to vector<8x128xbf16>
    %cst_60 = arith.constant dense<0.000000e+00> : vector<320x128xf32>
    %57 = tpu.matmul %54, %56, %cst_60 {dimension_numbers = #tpu.dot_dimension_numbers<[1], [0], [0], [1], [0, 0, 1, 1], [], []>} : vector<320x8xbf16>, vector<8x128xbf16>, vector<320x128xf32> -> vector<320x128xf32>
    %c0_61 = arith.constant 0 : index
    %c0_62 = arith.constant 0 : index
    %58 = vector.load %arg5[%c0_61, %c0_62] : memref<320x128xf32, #tpu.memory_space<vmem>>, vector<320x128xf32>
    %59 = arith.addf %58, %57 : vector<320x128xf32>
    %c0_63 = arith.constant 0 : index
    %c0_64 = arith.constant 0 : index
    %60 = vector.load %arg5[%c0_63, %c0_64] : memref<320x128xf32, #tpu.memory_space<vmem>>, vector<320x128xf32>
    tpu.vector_store %arg5[%c0_63, %c0_64], %59 {strides = array<i32>} : memref<320x128xf32, #tpu.memory_space<vmem>>, vector<320x128xf32>,
    %c0_65 = arith.constant 0 : index
    %c22 = arith.constant 22 : index
    %c0_66 = arith.constant 0 : index
    %61 = vector.load %arg2[%c0_65, %c22, %c0_66] : memref<1x404x8xf32, #tpu.memory_space<vmem>>, vector<1x320x8xf32>
    %62 = vector.shape_cast %61 : vector<1x320x8xf32> to vector<320x8xf32>
    %63 = arith.truncf %62 : vector<320x8xf32> to vector<320x8xbf16>
    %c7 = arith.constant 7 : index
    %c0_67 = arith.constant 0 : index
    %c0_68 = arith.constant 0 : index
    %64 = vector.load %arg3[%c7, %c0_67, %c0_68] : memref<25x8x128xbf16, #tpu.memory_space<vmem>>, vector<1x8x128xbf16>
    %65 = vector.shape_cast %64 : vector<1x8x128xbf16> to vector<8x128xbf16>
    %cst_69 = arith.constant dense<0.000000e+00> : vector<320x128xf32>
    %66 = tpu.matmul %63, %65, %cst_69 {dimension_numbers = #tpu.dot_dimension_numbers<[1], [0], [0], [1], [0, 0, 1, 1], [], []>} : vector<320x8xbf16>, vector<8x128xbf16>, vector<320x128xf32> -> vector<320x128xf32>
    %c0_70 = arith.constant 0 : index
    %c0_71 = arith.constant 0 : index
    %67 = vector.load %arg5[%c0_70, %c0_71] : memref<320x128xf32, #tpu.memory_space<vmem>>, vector<320x128xf32>
    %68 = arith.addf %67, %66 : vector<320x128xf32>
    %c0_72 = arith.constant 0 : index
    %c0_73 = arith.constant 0 : index
    %69 = vector.load %arg5[%c0_72, %c0_73] : memref<320x128xf32, #tpu.memory_space<vmem>>, vector<320x128xf32>
    tpu.vector_store %arg5[%c0_72, %c0_73], %68 {strides = array<i32>} : memref<320x128xf32, #tpu.memory_space<vmem>>, vector<320x128xf32>,
    %c0_74 = arith.constant 0 : index
    %c23 = arith.constant 23 : index
    %c0_75 = arith.constant 0 : index
    %70 = vector.load %arg2[%c0_74, %c23, %c0_75] : memref<1x404x8xf32, #tpu.memory_space<vmem>>, vector<1x320x8xf32>
    %71 = vector.shape_cast %70 : vector<1x320x8xf32> to vector<320x8xf32>
    %72 = arith.truncf %71 : vector<320x8xf32> to vector<320x8xbf16>
    %c8 = arith.constant 8 : index
    %c0_76 = arith.constant 0 : index
    %c0_77 = arith.constant 0 : index
    %73 = vector.load %arg3[%c8, %c0_76, %c0_77] : memref<25x8x128xbf16, #tpu.memory_space<vmem>>, vector<1x8x128xbf16>
    %74 = vector.shape_cast %73 : vector<1x8x128xbf16> to vector<8x128xbf16>
    %cst_78 = arith.constant dense<0.000000e+00> : vector<320x128xf32>
    %75 = tpu.matmul %72, %74, %cst_78 {dimension_numbers = #tpu.dot_dimension_numbers<[1], [0], [0], [1], [0, 0, 1, 1], [], []>} : vector<320x8xbf16>, vector<8x128xbf16>, vector<320x128xf32> -> vector<320x128xf32>
    %c0_79 = arith.constant 0 : index
    %c0_80 = arith.constant 0 : index
    %76 = vector.load %arg5[%c0_79, %c0_80] : memref<320x128xf32, #tpu.memory_space<vmem>>, vector<320x128xf32>
    %77 = arith.addf %76, %75 : vector<320x128xf32>
    %c0_81 = arith.constant 0 : index
    %c0_82 = arith.constant 0 : index
    %78 = vector.load %arg5[%c0_81, %c0_82] : memref<320x128xf32, #tpu.memory_space<vmem>>, vector<320x128xf32>
    tpu.vector_store %arg5[%c0_81, %c0_82], %77 {strides = array<i32>} : memref<320x128xf32, #tpu.memory_space<vmem>>, vector<320x128xf32>,
    %c0_83 = arith.constant 0 : index
    %c24 = arith.constant 24 : index
    %c0_84 = arith.constant 0 : index
    %79 = vector.load %arg2[%c0_83, %c24, %c0_84] : memref<1x404x8xf32, #tpu.memory_space<vmem>>, vector<1x320x8xf32>
    %80 = vector.shape_cast %79 : vector<1x320x8xf32> to vector<320x8xf32>
    %81 = arith.truncf %80 : vector<320x8xf32> to vector<320x8xbf16>
    %c9 = arith.constant 9 : index
    %c0_85 = arith.constant 0 : index
    %c0_86 = arith.constant 0 : index
    %82 = vector.load %arg3[%c9, %c0_85, %c0_86] : memref<25x8x128xbf16, #tpu.memory_space<vmem>>, vector<1x8x128xbf16>
    %83 = vector.shape_cast %82 : vector<1x8x128xbf16> to vector<8x128xbf16>
    %cst_87 = arith.constant dense<0.000000e+00> : vector<320x128xf32>
    %84 = tpu.matmul %81, %83, %cst_87 {dimension_numbers = #tpu.dot_dimension_numbers<[1], [0], [0], [1], [0, 0, 1, 1], [], []>} : vector<320x8xbf16>, vector<8x128xbf16>, vector<320x128xf32> -> vector<320x128xf32>
    %c0_88 = arith.constant 0 : index
    %c0_89 = arith.constant 0 : index
    %85 = vector.load %arg5[%c0_88, %c0_89] : memref<320x128xf32, #tpu.memory_space<vmem>>, vector<320x128xf32>
    %86 = arith.addf %85, %84 : vector<320x128xf32>
    %c0_90 = arith.constant 0 : index
    %c0_91 = arith.constant 0 : index
    %87 = vector.load %arg5[%c0_90, %c0_91] : memref<320x128xf32, #tpu.memory_space<vmem>>, vector<320x128xf32>
    tpu.vector_store %arg5[%c0_90, %c0_91], %86 {strides = array<i32>} : memref<320x128xf32, #tpu.memory_space<vmem>>, vector<320x128xf32>,
    %c0_92 = arith.constant 0 : index
    %c40 = arith.constant 40 : index
    %c0_93 = arith.constant 0 : index
    %88 = vector.load %arg2[%c0_92, %c40, %c0_93] : memref<1x404x8xf32, #tpu.memory_space<vmem>>, vector<1x320x8xf32>
    %89 = vector.shape_cast %88 : vector<1x320x8xf32> to vector<320x8xf32>
    %90 = arith.truncf %89 : vector<320x8xf32> to vector<320x8xbf16>
    %c10 = arith.constant 10 : index
    %c0_94 = arith.constant 0 : index
    %c0_95 = arith.constant 0 : index
    %91 = vector.load %arg3[%c10, %c0_94, %c0_95] : memref<25x8x128xbf16, #tpu.memory_space<vmem>>, vector<1x8x128xbf16>
    %92 = vector.shape_cast %91 : vector<1x8x128xbf16> to vector<8x128xbf16>
    %cst_96 = arith.constant dense<0.000000e+00> : vector<320x128xf32>
    %93 = tpu.matmul %90, %92, %cst_96 {dimension_numbers = #tpu.dot_dimension_numbers<[1], [0], [0], [1], [0, 0, 1, 1], [], []>} : vector<320x8xbf16>, vector<8x128xbf16>, vector<320x128xf32> -> vector<320x128xf32>
    %c0_97 = arith.constant 0 : index
    %c0_98 = arith.constant 0 : index
    %94 = vector.load %arg5[%c0_97, %c0_98] : memref<320x128xf32, #tpu.memory_space<vmem>>, vector<320x128xf32>
    %95 = arith.addf %94, %93 : vector<320x128xf32>
    %c0_99 = arith.constant 0 : index
    %c0_100 = arith.constant 0 : index
    %96 = vector.load %arg5[%c0_99, %c0_100] : memref<320x128xf32, #tpu.memory_space<vmem>>, vector<320x128xf32>
    tpu.vector_store %arg5[%c0_99, %c0_100], %95 {strides = array<i32>} : memref<320x128xf32, #tpu.memory_space<vmem>>, vector<320x128xf32>,
    %c0_101 = arith.constant 0 : index
    %c41 = arith.constant 41 : index
    %c0_102 = arith.constant 0 : index
    %97 = vector.load %arg2[%c0_101, %c41, %c0_102] : memref<1x404x8xf32, #tpu.memory_space<vmem>>, vector<1x320x8xf32>
    %98 = vector.shape_cast %97 : vector<1x320x8xf32> to vector<320x8xf32>
    %99 = arith.truncf %98 : vector<320x8xf32> to vector<320x8xbf16>
    %c11 = arith.constant 11 : index
    %c0_103 = arith.constant 0 : index
    %c0_104 = arith.constant 0 : index
    %100 = vector.load %arg3[%c11, %c0_103, %c0_104] : memref<25x8x128xbf16, #tpu.memory_space<vmem>>, vector<1x8x128xbf16>
    %101 = vector.shape_cast %100 : vector<1x8x128xbf16> to vector<8x128xbf16>
    %cst_105 = arith.constant dense<0.000000e+00> : vector<320x128xf32>
    %102 = tpu.matmul %99, %101, %cst_105 {dimension_numbers = #tpu.dot_dimension_numbers<[1], [0], [0], [1], [0, 0, 1, 1], [], []>} : vector<320x8xbf16>, vector<8x128xbf16>, vector<320x128xf32> -> vector<320x128xf32>
    %c0_106 = arith.constant 0 : index
    %c0_107 = arith.constant 0 : index
    %103 = vector.load %arg5[%c0_106, %c0_107] : memref<320x128xf32, #tpu.memory_space<vmem>>, vector<320x128xf32>
    %104 = arith.addf %103, %102 : vector<320x128xf32>
    %c0_108 = arith.constant 0 : index
    %c0_109 = arith.constant 0 : index
    %105 = vector.load %arg5[%c0_108, %c0_109] : memref<320x128xf32, #tpu.memory_space<vmem>>, vector<320x128xf32>
    tpu.vector_store %arg5[%c0_108, %c0_109], %104 {strides = array<i32>} : memref<320x128xf32, #tpu.memory_space<vmem>>, vector<320x128xf32>,
    %c0_110 = arith.constant 0 : index
    %c42 = arith.constant 42 : index
    %c0_111 = arith.constant 0 : index
    %106 = vector.load %arg2[%c0_110, %c42, %c0_111] : memref<1x404x8xf32, #tpu.memory_space<vmem>>, vector<1x320x8xf32>
    %107 = vector.shape_cast %106 : vector<1x320x8xf32> to vector<320x8xf32>
    %108 = arith.truncf %107 : vector<320x8xf32> to vector<320x8xbf16>
    %c12 = arith.constant 12 : index
    %c0_112 = arith.constant 0 : index
    %c0_113 = arith.constant 0 : index
    %109 = vector.load %arg3[%c12, %c0_112, %c0_113] : memref<25x8x128xbf16, #tpu.memory_space<vmem>>, vector<1x8x128xbf16>
    %110 = vector.shape_cast %109 : vector<1x8x128xbf16> to vector<8x128xbf16>
    %cst_114 = arith.constant dense<0.000000e+00> : vector<320x128xf32>
    %111 = tpu.matmul %108, %110, %cst_114 {dimension_numbers = #tpu.dot_dimension_numbers<[1], [0], [0], [1], [0, 0, 1, 1], [], []>} : vector<320x8xbf16>, vector<8x128xbf16>, vector<320x128xf32> -> vector<320x128xf32>
    %c0_115 = arith.constant 0 : index
    %c0_116 = arith.constant 0 : index
    %112 = vector.load %arg5[%c0_115, %c0_116] : memref<320x128xf32, #tpu.memory_space<vmem>>, vector<320x128xf32>
    %113 = arith.addf %112, %111 : vector<320x128xf32>
    %c0_117 = arith.constant 0 : index
    %c0_118 = arith.constant 0 : index
    %114 = vector.load %arg5[%c0_117, %c0_118] : memref<320x128xf32, #tpu.memory_space<vmem>>, vector<320x128xf32>
    tpu.vector_store %arg5[%c0_117, %c0_118], %113 {strides = array<i32>} : memref<320x128xf32, #tpu.memory_space<vmem>>, vector<320x128xf32>,
    %c0_119 = arith.constant 0 : index
    %c43 = arith.constant 43 : index
    %c0_120 = arith.constant 0 : index
    %115 = vector.load %arg2[%c0_119, %c43, %c0_120] : memref<1x404x8xf32, #tpu.memory_space<vmem>>, vector<1x320x8xf32>
    %116 = vector.shape_cast %115 : vector<1x320x8xf32> to vector<320x8xf32>
    %117 = arith.truncf %116 : vector<320x8xf32> to vector<320x8xbf16>
    %c13 = arith.constant 13 : index
    %c0_121 = arith.constant 0 : index
    %c0_122 = arith.constant 0 : index
    %118 = vector.load %arg3[%c13, %c0_121, %c0_122] : memref<25x8x128xbf16, #tpu.memory_space<vmem>>, vector<1x8x128xbf16>
    %119 = vector.shape_cast %118 : vector<1x8x128xbf16> to vector<8x128xbf16>
    %cst_123 = arith.constant dense<0.000000e+00> : vector<320x128xf32>
    %120 = tpu.matmul %117, %119, %cst_123 {dimension_numbers = #tpu.dot_dimension_numbers<[1], [0], [0], [1], [0, 0, 1, 1], [], []>} : vector<320x8xbf16>, vector<8x128xbf16>, vector<320x128xf32> -> vector<320x128xf32>
    %c0_124 = arith.constant 0 : index
    %c0_125 = arith.constant 0 : index
    %121 = vector.load %arg5[%c0_124, %c0_125] : memref<320x128xf32, #tpu.memory_space<vmem>>, vector<320x128xf32>
    %122 = arith.addf %121, %120 : vector<320x128xf32>
    %c0_126 = arith.constant 0 : index
    %c0_127 = arith.constant 0 : index
    %123 = vector.load %arg5[%c0_126, %c0_127] : memref<320x128xf32, #tpu.memory_space<vmem>>, vector<320x128xf32>
    tpu.vector_store %arg5[%c0_126, %c0_127], %122 {strides = array<i32>} : memref<320x128xf32, #tpu.memory_space<vmem>>, vector<320x128xf32>,
    %c0_128 = arith.constant 0 : index
    %c44 = arith.constant 44 : index
    %c0_129 = arith.constant 0 : index
    %124 = vector.load %arg2[%c0_128, %c44, %c0_129] : memref<1x404x8xf32, #tpu.memory_space<vmem>>, vector<1x320x8xf32>
    %125 = vector.shape_cast %124 : vector<1x320x8xf32> to vector<320x8xf32>
    %126 = arith.truncf %125 : vector<320x8xf32> to vector<320x8xbf16>
    %c14 = arith.constant 14 : index
    %c0_130 = arith.constant 0 : index
    %c0_131 = arith.constant 0 : index
    %127 = vector.load %arg3[%c14, %c0_130, %c0_131] : memref<25x8x128xbf16, #tpu.memory_space<vmem>>, vector<1x8x128xbf16>
    %128 = vector.shape_cast %127 : vector<1x8x128xbf16> to vector<8x128xbf16>
    %cst_132 = arith.constant dense<0.000000e+00> : vector<320x128xf32>
    %129 = tpu.matmul %126, %128, %cst_132 {dimension_numbers = #tpu.dot_dimension_numbers<[1], [0], [0], [1], [0, 0, 1, 1], [], []>} : vector<320x8xbf16>, vector<8x128xbf16>, vector<320x128xf32> -> vector<320x128xf32>
    %c0_133 = arith.constant 0 : index
    %c0_134 = arith.constant 0 : index
    %130 = vector.load %arg5[%c0_133, %c0_134] : memref<320x128xf32, #tpu.memory_space<vmem>>, vector<320x128xf32>
    %131 = arith.addf %130, %129 : vector<320x128xf32>
    %c0_135 = arith.constant 0 : index
    %c0_136 = arith.constant 0 : index
    %132 = vector.load %arg5[%c0_135, %c0_136] : memref<320x128xf32, #tpu.memory_space<vmem>>, vector<320x128xf32>
    tpu.vector_store %arg5[%c0_135, %c0_136], %131 {strides = array<i32>} : memref<320x128xf32, #tpu.memory_space<vmem>>, vector<320x128xf32>,
    %c0_137 = arith.constant 0 : index
    %c60 = arith.constant 60 : index
    %c0_138 = arith.constant 0 : index
    %133 = vector.load %arg2[%c0_137, %c60, %c0_138] : memref<1x404x8xf32, #tpu.memory_space<vmem>>, vector<1x320x8xf32>
    %134 = vector.shape_cast %133 : vector<1x320x8xf32> to vector<320x8xf32>
    %135 = arith.truncf %134 : vector<320x8xf32> to vector<320x8xbf16>
    %c15 = arith.constant 15 : index
    %c0_139 = arith.constant 0 : index
    %c0_140 = arith.constant 0 : index
    %136 = vector.load %arg3[%c15, %c0_139, %c0_140] : memref<25x8x128xbf16, #tpu.memory_space<vmem>>, vector<1x8x128xbf16>
    %137 = vector.shape_cast %136 : vector<1x8x128xbf16> to vector<8x128xbf16>
    %cst_141 = arith.constant dense<0.000000e+00> : vector<320x128xf32>
    %138 = tpu.matmul %135, %137, %cst_141 {dimension_numbers = #tpu.dot_dimension_numbers<[1], [0], [0], [1], [0, 0, 1, 1], [], []>} : vector<320x8xbf16>, vector<8x128xbf16>, vector<320x128xf32> -> vector<320x128xf32>
    %c0_142 = arith.constant 0 : index
    %c0_143 = arith.constant 0 : index
    %139 = vector.load %arg5[%c0_142, %c0_143] : memref<320x128xf32, #tpu.memory_space<vmem>>, vector<320x128xf32>
    %140 = arith.addf %139, %138 : vector<320x128xf32>
    %c0_144 = arith.constant 0 : index
    %c0_145 = arith.constant 0 : index
    %141 = vector.load %arg5[%c0_144, %c0_145] : memref<320x128xf32, #tpu.memory_space<vmem>>, vector<320x128xf32>
    tpu.vector_store %arg5[%c0_144, %c0_145], %140 {strides = array<i32>} : memref<320x128xf32, #tpu.memory_space<vmem>>, vector<320x128xf32>,
    %c0_146 = arith.constant 0 : index
    %c61 = arith.constant 61 : index
    %c0_147 = arith.constant 0 : index
    %142 = vector.load %arg2[%c0_146, %c61, %c0_147] : memref<1x404x8xf32, #tpu.memory_space<vmem>>, vector<1x320x8xf32>
    %143 = vector.shape_cast %142 : vector<1x320x8xf32> to vector<320x8xf32>
    %144 = arith.truncf %143 : vector<320x8xf32> to vector<320x8xbf16>
    %c16 = arith.constant 16 : index
    %c0_148 = arith.constant 0 : index
    %c0_149 = arith.constant 0 : index
    %145 = vector.load %arg3[%c16, %c0_148, %c0_149] : memref<25x8x128xbf16, #tpu.memory_space<vmem>>, vector<1x8x128xbf16>
    %146 = vector.shape_cast %145 : vector<1x8x128xbf16> to vector<8x128xbf16>
    %cst_150 = arith.constant dense<0.000000e+00> : vector<320x128xf32>
    %147 = tpu.matmul %144, %146, %cst_150 {dimension_numbers = #tpu.dot_dimension_numbers<[1], [0], [0], [1], [0, 0, 1, 1], [], []>} : vector<320x8xbf16>, vector<8x128xbf16>, vector<320x128xf32> -> vector<320x128xf32>
    %c0_151 = arith.constant 0 : index
    %c0_152 = arith.constant 0 : index
    %148 = vector.load %arg5[%c0_151, %c0_152] : memref<320x128xf32, #tpu.memory_space<vmem>>, vector<320x128xf32>
    %149 = arith.addf %148, %147 : vector<320x128xf32>
    %c0_153 = arith.constant 0 : index
    %c0_154 = arith.constant 0 : index
    %150 = vector.load %arg5[%c0_153, %c0_154] : memref<320x128xf32, #tpu.memory_space<vmem>>, vector<320x128xf32>
    tpu.vector_store %arg5[%c0_153, %c0_154], %149 {strides = array<i32>} : memref<320x128xf32, #tpu.memory_space<vmem>>, vector<320x128xf32>,
    %c0_155 = arith.constant 0 : index
    %c62 = arith.constant 62 : index
    %c0_156 = arith.constant 0 : index
    %151 = vector.load %arg2[%c0_155, %c62, %c0_156] : memref<1x404x8xf32, #tpu.memory_space<vmem>>, vector<1x320x8xf32>
    %152 = vector.shape_cast %151 : vector<1x320x8xf32> to vector<320x8xf32>
    %153 = arith.truncf %152 : vector<320x8xf32> to vector<320x8xbf16>
    %c17 = arith.constant 17 : index
    %c0_157 = arith.constant 0 : index
    %c0_158 = arith.constant 0 : index
    %154 = vector.load %arg3[%c17, %c0_157, %c0_158] : memref<25x8x128xbf16, #tpu.memory_space<vmem>>, vector<1x8x128xbf16>
    %155 = vector.shape_cast %154 : vector<1x8x128xbf16> to vector<8x128xbf16>
    %cst_159 = arith.constant dense<0.000000e+00> : vector<320x128xf32>
    %156 = tpu.matmul %153, %155, %cst_159 {dimension_numbers = #tpu.dot_dimension_numbers<[1], [0], [0], [1], [0, 0, 1, 1], [], []>} : vector<320x8xbf16>, vector<8x128xbf16>, vector<320x128xf32> -> vector<320x128xf32>
    %c0_160 = arith.constant 0 : index
    %c0_161 = arith.constant 0 : index
    %157 = vector.load %arg5[%c0_160, %c0_161] : memref<320x128xf32, #tpu.memory_space<vmem>>, vector<320x128xf32>
    %158 = arith.addf %157, %156 : vector<320x128xf32>
    %c0_162 = arith.constant 0 : index
    %c0_163 = arith.constant 0 : index
    %159 = vector.load %arg5[%c0_162, %c0_163] : memref<320x128xf32, #tpu.memory_space<vmem>>, vector<320x128xf32>
    tpu.vector_store %arg5[%c0_162, %c0_163], %158 {strides = array<i32>} : memref<320x128xf32, #tpu.memory_space<vmem>>, vector<320x128xf32>,
    %c0_164 = arith.constant 0 : index
    %c63 = arith.constant 63 : index
    %c0_165 = arith.constant 0 : index
    %160 = vector.load %arg2[%c0_164, %c63, %c0_165] : memref<1x404x8xf32, #tpu.memory_space<vmem>>, vector<1x320x8xf32>
    %161 = vector.shape_cast %160 : vector<1x320x8xf32> to vector<320x8xf32>
    %162 = arith.truncf %161 : vector<320x8xf32> to vector<320x8xbf16>
    %c18 = arith.constant 18 : index
    %c0_166 = arith.constant 0 : index
    %c0_167 = arith.constant 0 : index
    %163 = vector.load %arg3[%c18, %c0_166, %c0_167] : memref<25x8x128xbf16, #tpu.memory_space<vmem>>, vector<1x8x128xbf16>
    %164 = vector.shape_cast %163 : vector<1x8x128xbf16> to vector<8x128xbf16>
    %cst_168 = arith.constant dense<0.000000e+00> : vector<320x128xf32>
    %165 = tpu.matmul %162, %164, %cst_168 {dimension_numbers = #tpu.dot_dimension_numbers<[1], [0], [0], [1], [0, 0, 1, 1], [], []>} : vector<320x8xbf16>, vector<8x128xbf16>, vector<320x128xf32> -> vector<320x128xf32>
    %c0_169 = arith.constant 0 : index
    %c0_170 = arith.constant 0 : index
    %166 = vector.load %arg5[%c0_169, %c0_170] : memref<320x128xf32, #tpu.memory_space<vmem>>, vector<320x128xf32>
    %167 = arith.addf %166, %165 : vector<320x128xf32>
    %c0_171 = arith.constant 0 : index
    %c0_172 = arith.constant 0 : index
    %168 = vector.load %arg5[%c0_171, %c0_172] : memref<320x128xf32, #tpu.memory_space<vmem>>, vector<320x128xf32>
    tpu.vector_store %arg5[%c0_171, %c0_172], %167 {strides = array<i32>} : memref<320x128xf32, #tpu.memory_space<vmem>>, vector<320x128xf32>,
    %c0_173 = arith.constant 0 : index
    %c64 = arith.constant 64 : index
    %c0_174 = arith.constant 0 : index
    %169 = vector.load %arg2[%c0_173, %c64, %c0_174] : memref<1x404x8xf32, #tpu.memory_space<vmem>>, vector<1x320x8xf32>
    %170 = vector.shape_cast %169 : vector<1x320x8xf32> to vector<320x8xf32>
    %171 = arith.truncf %170 : vector<320x8xf32> to vector<320x8xbf16>
    %c19 = arith.constant 19 : index
    %c0_175 = arith.constant 0 : index
    %c0_176 = arith.constant 0 : index
    %172 = vector.load %arg3[%c19, %c0_175, %c0_176] : memref<25x8x128xbf16, #tpu.memory_space<vmem>>, vector<1x8x128xbf16>
    %173 = vector.shape_cast %172 : vector<1x8x128xbf16> to vector<8x128xbf16>
    %cst_177 = arith.constant dense<0.000000e+00> : vector<320x128xf32>
    %174 = tpu.matmul %171, %173, %cst_177 {dimension_numbers = #tpu.dot_dimension_numbers<[1], [0], [0], [1], [0, 0, 1, 1], [], []>} : vector<320x8xbf16>, vector<8x128xbf16>, vector<320x128xf32> -> vector<320x128xf32>
    %c0_178 = arith.constant 0 : index
    %c0_179 = arith.constant 0 : index
    %175 = vector.load %arg5[%c0_178, %c0_179] : memref<320x128xf32, #tpu.memory_space<vmem>>, vector<320x128xf32>
    %176 = arith.addf %175, %174 : vector<320x128xf32>
    %c0_180 = arith.constant 0 : index
    %c0_181 = arith.constant 0 : index
    %177 = vector.load %arg5[%c0_180, %c0_181] : memref<320x128xf32, #tpu.memory_space<vmem>>, vector<320x128xf32>
    tpu.vector_store %arg5[%c0_180, %c0_181], %176 {strides = array<i32>} : memref<320x128xf32, #tpu.memory_space<vmem>>, vector<320x128xf32>,
    %c0_182 = arith.constant 0 : index
    %c80 = arith.constant 80 : index
    %c0_183 = arith.constant 0 : index
    %178 = vector.load %arg2[%c0_182, %c80, %c0_183] : memref<1x404x8xf32, #tpu.memory_space<vmem>>, vector<1x320x8xf32>
    %179 = vector.shape_cast %178 : vector<1x320x8xf32> to vector<320x8xf32>
    %180 = arith.truncf %179 : vector<320x8xf32> to vector<320x8xbf16>
    %c20_184 = arith.constant 20 : index
    %c0_185 = arith.constant 0 : index
    %c0_186 = arith.constant 0 : index
    %181 = vector.load %arg3[%c20_184, %c0_185, %c0_186] : memref<25x8x128xbf16, #tpu.memory_space<vmem>>, vector<1x8x128xbf16>
    %182 = vector.shape_cast %181 : vector<1x8x128xbf16> to vector<8x128xbf16>
    %cst_187 = arith.constant dense<0.000000e+00> : vector<320x128xf32>
    %183 = tpu.matmul %180, %182, %cst_187 {dimension_numbers = #tpu.dot_dimension_numbers<[1], [0], [0], [1], [0, 0, 1, 1], [], []>} : vector<320x8xbf16>, vector<8x128xbf16>, vector<320x128xf32> -> vector<320x128xf32>
    %c0_188 = arith.constant 0 : index
    %c0_189 = arith.constant 0 : index
    %184 = vector.load %arg5[%c0_188, %c0_189] : memref<320x128xf32, #tpu.memory_space<vmem>>, vector<320x128xf32>
    %185 = arith.addf %184, %183 : vector<320x128xf32>
    %c0_190 = arith.constant 0 : index
    %c0_191 = arith.constant 0 : index
    %186 = vector.load %arg5[%c0_190, %c0_191] : memref<320x128xf32, #tpu.memory_space<vmem>>, vector<320x128xf32>
    tpu.vector_store %arg5[%c0_190, %c0_191], %185 {strides = array<i32>} : memref<320x128xf32, #tpu.memory_space<vmem>>, vector<320x128xf32>,
    %c0_192 = arith.constant 0 : index
    %c81 = arith.constant 81 : index
    %c0_193 = arith.constant 0 : index
    %187 = vector.load %arg2[%c0_192, %c81, %c0_193] : memref<1x404x8xf32, #tpu.memory_space<vmem>>, vector<1x320x8xf32>
    %188 = vector.shape_cast %187 : vector<1x320x8xf32> to vector<320x8xf32>
    %189 = arith.truncf %188 : vector<320x8xf32> to vector<320x8xbf16>
    %c21_194 = arith.constant 21 : index
    %c0_195 = arith.constant 0 : index
    %c0_196 = arith.constant 0 : index
    %190 = vector.load %arg3[%c21_194, %c0_195, %c0_196] : memref<25x8x128xbf16, #tpu.memory_space<vmem>>, vector<1x8x128xbf16>
    %191 = vector.shape_cast %190 : vector<1x8x128xbf16> to vector<8x128xbf16>
    %cst_197 = arith.constant dense<0.000000e+00> : vector<320x128xf32>
    %192 = tpu.matmul %189, %191, %cst_197 {dimension_numbers = #tpu.dot_dimension_numbers<[1], [0], [0], [1], [0, 0, 1, 1], [], []>} : vector<320x8xbf16>, vector<8x128xbf16>, vector<320x128xf32> -> vector<320x128xf32>
    %c0_198 = arith.constant 0 : index
    %c0_199 = arith.constant 0 : index
    %193 = vector.load %arg5[%c0_198, %c0_199] : memref<320x128xf32, #tpu.memory_space<vmem>>, vector<320x128xf32>
    %194 = arith.addf %193, %192 : vector<320x128xf32>
    %c0_200 = arith.constant 0 : index
    %c0_201 = arith.constant 0 : index
    %195 = vector.load %arg5[%c0_200, %c0_201] : memref<320x128xf32, #tpu.memory_space<vmem>>, vector<320x128xf32>
    tpu.vector_store %arg5[%c0_200, %c0_201], %194 {strides = array<i32>} : memref<320x128xf32, #tpu.memory_space<vmem>>, vector<320x128xf32>,
    %c0_202 = arith.constant 0 : index
    %c82 = arith.constant 82 : index
    %c0_203 = arith.constant 0 : index
    %196 = vector.load %arg2[%c0_202, %c82, %c0_203] : memref<1x404x8xf32, #tpu.memory_space<vmem>>, vector<1x320x8xf32>
    %197 = vector.shape_cast %196 : vector<1x320x8xf32> to vector<320x8xf32>
    %198 = arith.truncf %197 : vector<320x8xf32> to vector<320x8xbf16>
    %c22_204 = arith.constant 22 : index
    %c0_205 = arith.constant 0 : index
    %c0_206 = arith.constant 0 : index
    %199 = vector.load %arg3[%c22_204, %c0_205, %c0_206] : memref<25x8x128xbf16, #tpu.memory_space<vmem>>, vector<1x8x128xbf16>
    %200 = vector.shape_cast %199 : vector<1x8x128xbf16> to vector<8x128xbf16>
    %cst_207 = arith.constant dense<0.000000e+00> : vector<320x128xf32>
    %201 = tpu.matmul %198, %200, %cst_207 {dimension_numbers = #tpu.dot_dimension_numbers<[1], [0], [0], [1], [0, 0, 1, 1], [], []>} : vector<320x8xbf16>, vector<8x128xbf16>, vector<320x128xf32> -> vector<320x128xf32>
    %c0_208 = arith.constant 0 : index
    %c0_209 = arith.constant 0 : index
    %202 = vector.load %arg5[%c0_208, %c0_209] : memref<320x128xf32, #tpu.memory_space<vmem>>, vector<320x128xf32>
    %203 = arith.addf %202, %201 : vector<320x128xf32>
    %c0_210 = arith.constant 0 : index
    %c0_211 = arith.constant 0 : index
    %204 = vector.load %arg5[%c0_210, %c0_211] : memref<320x128xf32, #tpu.memory_space<vmem>>, vector<320x128xf32>
    tpu.vector_store %arg5[%c0_210, %c0_211], %203 {strides = array<i32>} : memref<320x128xf32, #tpu.memory_space<vmem>>, vector<320x128xf32>,
    %c0_212 = arith.constant 0 : index
    %c83 = arith.constant 83 : index
    %c0_213 = arith.constant 0 : index
    %205 = vector.load %arg2[%c0_212, %c83, %c0_213] : memref<1x404x8xf32, #tpu.memory_space<vmem>>, vector<1x320x8xf32>
    %206 = vector.shape_cast %205 : vector<1x320x8xf32> to vector<320x8xf32>
    %207 = arith.truncf %206 : vector<320x8xf32> to vector<320x8xbf16>
    %c23_214 = arith.constant 23 : index
    %c0_215 = arith.constant 0 : index
    %c0_216 = arith.constant 0 : index
    %208 = vector.load %arg3[%c23_214, %c0_215, %c0_216] : memref<25x8x128xbf16, #tpu.memory_space<vmem>>, vector<1x8x128xbf16>
    %209 = vector.shape_cast %208 : vector<1x8x128xbf16> to vector<8x128xbf16>
    %cst_217 = arith.constant dense<0.000000e+00> : vector<320x128xf32>
    %210 = tpu.matmul %207, %209, %cst_217 {dimension_numbers = #tpu.dot_dimension_numbers<[1], [0], [0], [1], [0, 0, 1, 1], [], []>} : vector<320x8xbf16>, vector<8x128xbf16>, vector<320x128xf32> -> vector<320x128xf32>
    %c0_218 = arith.constant 0 : index
    %c0_219 = arith.constant 0 : index
    %211 = vector.load %arg5[%c0_218, %c0_219] : memref<320x128xf32, #tpu.memory_space<vmem>>, vector<320x128xf32>
    %212 = arith.addf %211, %210 : vector<320x128xf32>
    %c0_220 = arith.constant 0 : index
    %c0_221 = arith.constant 0 : index
    %213 = vector.load %arg5[%c0_220, %c0_221] : memref<320x128xf32, #tpu.memory_space<vmem>>, vector<320x128xf32>
    tpu.vector_store %arg5[%c0_220, %c0_221], %212 {strides = array<i32>} : memref<320x128xf32, #tpu.memory_space<vmem>>, vector<320x128xf32>,
    %c0_222 = arith.constant 0 : index
    %c84 = arith.constant 84 : index
    %c0_223 = arith.constant 0 : index
    %214 = vector.load %arg2[%c0_222, %c84, %c0_223] : memref<1x404x8xf32, #tpu.memory_space<vmem>>, vector<1x320x8xf32>
    %215 = vector.shape_cast %214 : vector<1x320x8xf32> to vector<320x8xf32>
    %216 = arith.truncf %215 : vector<320x8xf32> to vector<320x8xbf16>
    %c24_224 = arith.constant 24 : index
    %c0_225 = arith.constant 0 : index
    %c0_226 = arith.constant 0 : index
    %217 = vector.load %arg3[%c24_224, %c0_225, %c0_226] : memref<25x8x128xbf16, #tpu.memory_space<vmem>>, vector<1x8x128xbf16>
    %218 = vector.shape_cast %217 : vector<1x8x128xbf16> to vector<8x128xbf16>
    %cst_227 = arith.constant dense<0.000000e+00> : vector<320x128xf32>
    %219 = tpu.matmul %216, %218, %cst_227 {dimension_numbers = #tpu.dot_dimension_numbers<[1], [0], [0], [1], [0, 0, 1, 1], [], []>} : vector<320x8xbf16>, vector<8x128xbf16>, vector<320x128xf32> -> vector<320x128xf32>
    %c0_228 = arith.constant 0 : index
    %c0_229 = arith.constant 0 : index
    %220 = vector.load %arg5[%c0_228, %c0_229] : memref<320x128xf32, #tpu.memory_space<vmem>>, vector<320x128xf32>
    %221 = arith.addf %220, %219 : vector<320x128xf32>
    %c0_230 = arith.constant 0 : index
    %c0_231 = arith.constant 0 : index
    %222 = vector.load %arg5[%c0_230, %c0_231] : memref<320x128xf32, #tpu.memory_space<vmem>>, vector<320x128xf32>
    tpu.vector_store %arg5[%c0_230, %c0_231], %221 {strides = array<i32>} : memref<320x128xf32, #tpu.memory_space<vmem>>, vector<320x128xf32>,
    %c0_232 = arith.constant 0 : index
    %c0_233 = arith.constant 0 : index
    %223 = vector.load %arg5[%c0_232, %c0_233] : memref<320x128xf32, #tpu.memory_space<vmem>>, vector<320x128xf32>
    %cst_234 = arith.constant 0.000000e+00 : f32
    %224 = vector.broadcast %cst_234 : f32 to vector<320x128xf32>
    %225 = arith.cmpf ogt, %223, %224 : vector<320x128xf32>
    %cst_235 = arith.constant 0.00999999977 : f32
    %226 = vector.broadcast %cst_235 : f32 to vector<320x128xf32>
    %227 = arith.mulf %226, %223 : vector<320x128xf32>
    %228 = arith.select %225, %223, %227 : vector<320x128xi1>, vector<320x128xf32>
    %c0_236 = arith.constant 0 : index
    %c0_237 = arith.constant 0 : index
    %c0_238 = arith.constant 0 : index
    %229 = vector.load %arg4[%c0_236, %c0_237, %c0_238] : memref<1x320x128xf32, #tpu.memory_space<vmem>>, vector<1x320x128xf32>
    %230 = vector.shape_cast %229 : vector<1x320x128xf32> to vector<320x128xf32>
    %231 = vector.shape_cast %228 : vector<320x128xf32> to vector<1x320x128xf32>
    tpu.vector_store %arg4[%c0_236, %c0_237, %c0_238], %231 {strides = array<i32>} : memref<1x320x128xf32, #tpu.memory_space<vmem>>, vector<1x320x128xf32>,
    return
  }
  func.func @transform_0(%arg0: i32, %arg1: i32) -> (i32, i32, i32) {
    %c0_i32 = arith.constant 0 : i32
    %c0_i32_0 = arith.constant 0 : i32
    %c0_i32_1 = arith.constant 0 : i32
    return %arg0, %c0_i32, %c0_i32_0 : i32, i32, i32
  }
  func.func @transform_1(%arg0: i32, %arg1: i32) -> (i32, i32, i32) {
    %c0_i32 = arith.constant 0 : i32
    %c0_i32_0 = arith.constant 0 : i32
    %c0_i32_1 = arith.constant 0 : i32
    return %c0_i32, %c0_i32_0, %arg1 : i32, i32, i32
  }
  func.func @transform_2(%arg0: i32, %arg1: i32) -> (i32, i32, i32) {
    %c0_i32 = arith.constant 0 : i32
    %c0_i32_0 = arith.constant 0 : i32
    return %arg0, %c0_i32, %arg1 : i32, i32, i32
  }
}

module attributes {stable_mosaic.version = 11 : i64} {
  func.func @_maxpool_kernel(%arg0: i32, %arg1: memref<1x8x2x8x8xf32, #tpu.memory_space<vmem>>, %arg2: memref<1x8x8x4xf32, #tpu.memory_space<vmem>>) attributes {dimension_semantics = [#tpu.dimension_semantics<parallel>], iteration_bounds = array<i64: 2>, scalar_prefetch = 0 : i64, scratch_operands = 0 : i64, tpu.core_type = #tpu.core_type<tc>, window_params = [{transform_indices = @transform_0, window_bounds = array<i64: 1, 8, 2, 8, 8>}, {transform_indices = @transform_1, window_bounds = array<i64: 1, 8, 8, 4>}]} {
    %c0 = arith.constant 0 : index
    %c0_0 = arith.constant 0 : index
    %c0_1 = arith.constant 0 : index
    %c0_2 = arith.constant 0 : index
    %c0_3 = arith.constant 0 : index
    %0 = vector.load %arg1[%c0, %c0_0, %c0_1, %c0_2, %c0_3] : memref<1x8x2x8x8xf32, #tpu.memory_space<vmem>>, vector<1x8x2x8x8xf32>
    %1 = vector.shape_cast %0 : vector<1x8x2x8x8xf32> to vector<8x2x8x8xf32>
    %2 = vector.extract_strided_slice %1 {offsets = [0, 0, 0, 0], sizes = [8, 1, 8, 8], strides = [1, 1, 1, 1]} : vector<8x2x8x8xf32> to vector<8x1x8x8xf32>
    %3 = vector.shape_cast %2 : vector<8x1x8x8xf32> to vector<8x8x8xf32>
    %4 = vector.extract_strided_slice %1 {offsets = [0, 1, 0, 0], sizes = [8, 1, 8, 8], strides = [1, 1, 1, 1]} : vector<8x2x8x8xf32> to vector<8x1x8x8xf32>
    %5 = vector.shape_cast %4 : vector<8x1x8x8xf32> to vector<8x8x8xf32>
    %6 = arith.maximumf %3, %5 : vector<8x8x8xf32>
    %7 = vector.extract_strided_slice %6 {offsets = [0, 0, 0], sizes = [8, 8, 4], strides = [1, 1, 1]} : vector<8x8x8xf32> to vector<8x8x4xf32>
    %8 = vector.extract_strided_slice %6 {offsets = [0, 0, 4], sizes = [8, 8, 4], strides = [1, 1, 1]} : vector<8x8x8xf32> to vector<8x8x4xf32>
    %9 = arith.maximumf %7, %8 : vector<8x8x4xf32>
    %c0_4 = arith.constant 0 : index
    %c0_5 = arith.constant 0 : index
    %c0_6 = arith.constant 0 : index
    %c0_7 = arith.constant 0 : index
    %10 = vector.load %arg2[%c0_4, %c0_5, %c0_6, %c0_7] : memref<1x8x8x4xf32, #tpu.memory_space<vmem>>, vector<1x8x8x4xf32>
    %11 = vector.shape_cast %10 : vector<1x8x8x4xf32> to vector<8x8x4xf32>
    %12 = vector.shape_cast %9 : vector<8x8x4xf32> to vector<1x8x8x4xf32>
    tpu.vector_store %arg2[%c0_4, %c0_5, %c0_6, %c0_7], %12 {strides = array<i32>} : memref<1x8x8x4xf32, #tpu.memory_space<vmem>>, vector<1x8x8x4xf32>,
    return
  }
  func.func @transform_0(%arg0: i32) -> (i32, i32, i32, i32, i32) {
    %c0_i32 = arith.constant 0 : i32
    %c0_i32_0 = arith.constant 0 : i32
    %c0_i32_1 = arith.constant 0 : i32
    %c0_i32_2 = arith.constant 0 : i32
    %c0_i32_3 = arith.constant 0 : i32
    return %arg0, %c0_i32, %c0_i32_0, %c0_i32_1, %c0_i32_2 : i32, i32, i32, i32, i32
  }
  func.func @transform_1(%arg0: i32) -> (i32, i32, i32, i32) {
    %c0_i32 = arith.constant 0 : i32
    %c0_i32_0 = arith.constant 0 : i32
    %c0_i32_1 = arith.constant 0 : i32
    %c0_i32_2 = arith.constant 0 : i32
    return %arg0, %c0_i32, %c0_i32_0, %c0_i32_1 : i32, i32, i32, i32
  }
}

module attributes {stable_mosaic.version = 11 : i64} {
  func.func @_conv_gemm_kernel(%arg0: i32, %arg1: i32, %arg2: memref<1x62x8xf32, #tpu.memory_space<vmem>>, %arg3: memref<9x8x128xbf16, #tpu.memory_space<vmem>>, %arg4: memref<1x40x128xf32, #tpu.memory_space<vmem>>, %arg5: memref<40x128xf32, #tpu.memory_space<vmem>>) attributes {dimension_semantics = [#tpu.dimension_semantics<parallel>, #tpu.dimension_semantics<parallel>], iteration_bounds = array<i64: 4, 1>, scalar_prefetch = 0 : i64, scratch_operands = 1 : i64, tpu.core_type = #tpu.core_type<tc>, window_params = [{transform_indices = @transform_0, window_bounds = array<i64: 1, 62, 8>}, {transform_indices = @transform_1, window_bounds = array<i64: 9, 8, 128>}, {transform_indices = @transform_2, window_bounds = array<i64: 1, 40, 128>}]} {
    %c0 = arith.constant 0 : index
    %c0_0 = arith.constant 0 : index
    %c0_1 = arith.constant 0 : index
    %0 = vector.load %arg2[%c0, %c0_0, %c0_1] : memref<1x62x8xf32, #tpu.memory_space<vmem>>, vector<1x40x8xf32>
    %1 = vector.shape_cast %0 : vector<1x40x8xf32> to vector<40x8xf32>
    %2 = arith.truncf %1 : vector<40x8xf32> to vector<40x8xbf16>
    %c0_2 = arith.constant 0 : index
    %c0_3 = arith.constant 0 : index
    %c0_4 = arith.constant 0 : index
    %3 = vector.load %arg3[%c0_2, %c0_3, %c0_4] : memref<9x8x128xbf16, #tpu.memory_space<vmem>>, vector<1x8x128xbf16>
    %4 = vector.shape_cast %3 : vector<1x8x128xbf16> to vector<8x128xbf16>
    %cst = arith.constant dense<0.000000e+00> : vector<40x128xf32>
    %5 = tpu.matmul %2, %4, %cst {dimension_numbers = #tpu.dot_dimension_numbers<[1], [0], [0], [1], [0, 0, 1, 1], [], []>} : vector<40x8xbf16>, vector<8x128xbf16>, vector<40x128xf32> -> vector<40x128xf32>
    %c0_5 = arith.constant 0 : index
    %c0_6 = arith.constant 0 : index
    %6 = vector.load %arg5[%c0_5, %c0_6] : memref<40x128xf32, #tpu.memory_space<vmem>>, vector<40x128xf32>
    tpu.vector_store %arg5[%c0_5, %c0_6], %5 {strides = array<i32>} : memref<40x128xf32, #tpu.memory_space<vmem>>, vector<40x128xf32>,
    %c0_7 = arith.constant 0 : index
    %c1 = arith.constant 1 : index
    %c0_8 = arith.constant 0 : index
    %7 = vector.load %arg2[%c0_7, %c1, %c0_8] : memref<1x62x8xf32, #tpu.memory_space<vmem>>, vector<1x40x8xf32>
    %8 = vector.shape_cast %7 : vector<1x40x8xf32> to vector<40x8xf32>
    %9 = arith.truncf %8 : vector<40x8xf32> to vector<40x8xbf16>
    %c1_9 = arith.constant 1 : index
    %c0_10 = arith.constant 0 : index
    %c0_11 = arith.constant 0 : index
    %10 = vector.load %arg3[%c1_9, %c0_10, %c0_11] : memref<9x8x128xbf16, #tpu.memory_space<vmem>>, vector<1x8x128xbf16>
    %11 = vector.shape_cast %10 : vector<1x8x128xbf16> to vector<8x128xbf16>
    %cst_12 = arith.constant dense<0.000000e+00> : vector<40x128xf32>
    %12 = tpu.matmul %9, %11, %cst_12 {dimension_numbers = #tpu.dot_dimension_numbers<[1], [0], [0], [1], [0, 0, 1, 1], [], []>} : vector<40x8xbf16>, vector<8x128xbf16>, vector<40x128xf32> -> vector<40x128xf32>
    %c0_13 = arith.constant 0 : index
    %c0_14 = arith.constant 0 : index
    %13 = vector.load %arg5[%c0_13, %c0_14] : memref<40x128xf32, #tpu.memory_space<vmem>>, vector<40x128xf32>
    %14 = arith.addf %13, %12 : vector<40x128xf32>
    %c0_15 = arith.constant 0 : index
    %c0_16 = arith.constant 0 : index
    %15 = vector.load %arg5[%c0_15, %c0_16] : memref<40x128xf32, #tpu.memory_space<vmem>>, vector<40x128xf32>
    tpu.vector_store %arg5[%c0_15, %c0_16], %14 {strides = array<i32>} : memref<40x128xf32, #tpu.memory_space<vmem>>, vector<40x128xf32>,
    %c0_17 = arith.constant 0 : index
    %c2 = arith.constant 2 : index
    %c0_18 = arith.constant 0 : index
    %16 = vector.load %arg2[%c0_17, %c2, %c0_18] : memref<1x62x8xf32, #tpu.memory_space<vmem>>, vector<1x40x8xf32>
    %17 = vector.shape_cast %16 : vector<1x40x8xf32> to vector<40x8xf32>
    %18 = arith.truncf %17 : vector<40x8xf32> to vector<40x8xbf16>
    %c2_19 = arith.constant 2 : index
    %c0_20 = arith.constant 0 : index
    %c0_21 = arith.constant 0 : index
    %19 = vector.load %arg3[%c2_19, %c0_20, %c0_21] : memref<9x8x128xbf16, #tpu.memory_space<vmem>>, vector<1x8x128xbf16>
    %20 = vector.shape_cast %19 : vector<1x8x128xbf16> to vector<8x128xbf16>
    %cst_22 = arith.constant dense<0.000000e+00> : vector<40x128xf32>
    %21 = tpu.matmul %18, %20, %cst_22 {dimension_numbers = #tpu.dot_dimension_numbers<[1], [0], [0], [1], [0, 0, 1, 1], [], []>} : vector<40x8xbf16>, vector<8x128xbf16>, vector<40x128xf32> -> vector<40x128xf32>
    %c0_23 = arith.constant 0 : index
    %c0_24 = arith.constant 0 : index
    %22 = vector.load %arg5[%c0_23, %c0_24] : memref<40x128xf32, #tpu.memory_space<vmem>>, vector<40x128xf32>
    %23 = arith.addf %22, %21 : vector<40x128xf32>
    %c0_25 = arith.constant 0 : index
    %c0_26 = arith.constant 0 : index
    %24 = vector.load %arg5[%c0_25, %c0_26] : memref<40x128xf32, #tpu.memory_space<vmem>>, vector<40x128xf32>
    tpu.vector_store %arg5[%c0_25, %c0_26], %23 {strides = array<i32>} : memref<40x128xf32, #tpu.memory_space<vmem>>, vector<40x128xf32>,
    %c0_27 = arith.constant 0 : index
    %c10 = arith.constant 10 : index
    %c0_28 = arith.constant 0 : index
    %25 = vector.load %arg2[%c0_27, %c10, %c0_28] : memref<1x62x8xf32, #tpu.memory_space<vmem>>, vector<1x40x8xf32>
    %26 = vector.shape_cast %25 : vector<1x40x8xf32> to vector<40x8xf32>
    %27 = arith.truncf %26 : vector<40x8xf32> to vector<40x8xbf16>
    %c3 = arith.constant 3 : index
    %c0_29 = arith.constant 0 : index
    %c0_30 = arith.constant 0 : index
    %28 = vector.load %arg3[%c3, %c0_29, %c0_30] : memref<9x8x128xbf16, #tpu.memory_space<vmem>>, vector<1x8x128xbf16>
    %29 = vector.shape_cast %28 : vector<1x8x128xbf16> to vector<8x128xbf16>
    %cst_31 = arith.constant dense<0.000000e+00> : vector<40x128xf32>
    %30 = tpu.matmul %27, %29, %cst_31 {dimension_numbers = #tpu.dot_dimension_numbers<[1], [0], [0], [1], [0, 0, 1, 1], [], []>} : vector<40x8xbf16>, vector<8x128xbf16>, vector<40x128xf32> -> vector<40x128xf32>
    %c0_32 = arith.constant 0 : index
    %c0_33 = arith.constant 0 : index
    %31 = vector.load %arg5[%c0_32, %c0_33] : memref<40x128xf32, #tpu.memory_space<vmem>>, vector<40x128xf32>
    %32 = arith.addf %31, %30 : vector<40x128xf32>
    %c0_34 = arith.constant 0 : index
    %c0_35 = arith.constant 0 : index
    %33 = vector.load %arg5[%c0_34, %c0_35] : memref<40x128xf32, #tpu.memory_space<vmem>>, vector<40x128xf32>
    tpu.vector_store %arg5[%c0_34, %c0_35], %32 {strides = array<i32>} : memref<40x128xf32, #tpu.memory_space<vmem>>, vector<40x128xf32>,
    %c0_36 = arith.constant 0 : index
    %c11 = arith.constant 11 : index
    %c0_37 = arith.constant 0 : index
    %34 = vector.load %arg2[%c0_36, %c11, %c0_37] : memref<1x62x8xf32, #tpu.memory_space<vmem>>, vector<1x40x8xf32>
    %35 = vector.shape_cast %34 : vector<1x40x8xf32> to vector<40x8xf32>
    %36 = arith.truncf %35 : vector<40x8xf32> to vector<40x8xbf16>
    %c4 = arith.constant 4 : index
    %c0_38 = arith.constant 0 : index
    %c0_39 = arith.constant 0 : index
    %37 = vector.load %arg3[%c4, %c0_38, %c0_39] : memref<9x8x128xbf16, #tpu.memory_space<vmem>>, vector<1x8x128xbf16>
    %38 = vector.shape_cast %37 : vector<1x8x128xbf16> to vector<8x128xbf16>
    %cst_40 = arith.constant dense<0.000000e+00> : vector<40x128xf32>
    %39 = tpu.matmul %36, %38, %cst_40 {dimension_numbers = #tpu.dot_dimension_numbers<[1], [0], [0], [1], [0, 0, 1, 1], [], []>} : vector<40x8xbf16>, vector<8x128xbf16>, vector<40x128xf32> -> vector<40x128xf32>
    %c0_41 = arith.constant 0 : index
    %c0_42 = arith.constant 0 : index
    %40 = vector.load %arg5[%c0_41, %c0_42] : memref<40x128xf32, #tpu.memory_space<vmem>>, vector<40x128xf32>
    %41 = arith.addf %40, %39 : vector<40x128xf32>
    %c0_43 = arith.constant 0 : index
    %c0_44 = arith.constant 0 : index
    %42 = vector.load %arg5[%c0_43, %c0_44] : memref<40x128xf32, #tpu.memory_space<vmem>>, vector<40x128xf32>
    tpu.vector_store %arg5[%c0_43, %c0_44], %41 {strides = array<i32>} : memref<40x128xf32, #tpu.memory_space<vmem>>, vector<40x128xf32>,
    %c0_45 = arith.constant 0 : index
    %c12 = arith.constant 12 : index
    %c0_46 = arith.constant 0 : index
    %43 = vector.load %arg2[%c0_45, %c12, %c0_46] : memref<1x62x8xf32, #tpu.memory_space<vmem>>, vector<1x40x8xf32>
    %44 = vector.shape_cast %43 : vector<1x40x8xf32> to vector<40x8xf32>
    %45 = arith.truncf %44 : vector<40x8xf32> to vector<40x8xbf16>
    %c5 = arith.constant 5 : index
    %c0_47 = arith.constant 0 : index
    %c0_48 = arith.constant 0 : index
    %46 = vector.load %arg3[%c5, %c0_47, %c0_48] : memref<9x8x128xbf16, #tpu.memory_space<vmem>>, vector<1x8x128xbf16>
    %47 = vector.shape_cast %46 : vector<1x8x128xbf16> to vector<8x128xbf16>
    %cst_49 = arith.constant dense<0.000000e+00> : vector<40x128xf32>
    %48 = tpu.matmul %45, %47, %cst_49 {dimension_numbers = #tpu.dot_dimension_numbers<[1], [0], [0], [1], [0, 0, 1, 1], [], []>} : vector<40x8xbf16>, vector<8x128xbf16>, vector<40x128xf32> -> vector<40x128xf32>
    %c0_50 = arith.constant 0 : index
    %c0_51 = arith.constant 0 : index
    %49 = vector.load %arg5[%c0_50, %c0_51] : memref<40x128xf32, #tpu.memory_space<vmem>>, vector<40x128xf32>
    %50 = arith.addf %49, %48 : vector<40x128xf32>
    %c0_52 = arith.constant 0 : index
    %c0_53 = arith.constant 0 : index
    %51 = vector.load %arg5[%c0_52, %c0_53] : memref<40x128xf32, #tpu.memory_space<vmem>>, vector<40x128xf32>
    tpu.vector_store %arg5[%c0_52, %c0_53], %50 {strides = array<i32>} : memref<40x128xf32, #tpu.memory_space<vmem>>, vector<40x128xf32>,
    %c0_54 = arith.constant 0 : index
    %c20 = arith.constant 20 : index
    %c0_55 = arith.constant 0 : index
    %52 = vector.load %arg2[%c0_54, %c20, %c0_55] : memref<1x62x8xf32, #tpu.memory_space<vmem>>, vector<1x40x8xf32>
    %53 = vector.shape_cast %52 : vector<1x40x8xf32> to vector<40x8xf32>
    %54 = arith.truncf %53 : vector<40x8xf32> to vector<40x8xbf16>
    %c6 = arith.constant 6 : index
    %c0_56 = arith.constant 0 : index
    %c0_57 = arith.constant 0 : index
    %55 = vector.load %arg3[%c6, %c0_56, %c0_57] : memref<9x8x128xbf16, #tpu.memory_space<vmem>>, vector<1x8x128xbf16>
    %56 = vector.shape_cast %55 : vector<1x8x128xbf16> to vector<8x128xbf16>
    %cst_58 = arith.constant dense<0.000000e+00> : vector<40x128xf32>
    %57 = tpu.matmul %54, %56, %cst_58 {dimension_numbers = #tpu.dot_dimension_numbers<[1], [0], [0], [1], [0, 0, 1, 1], [], []>} : vector<40x8xbf16>, vector<8x128xbf16>, vector<40x128xf32> -> vector<40x128xf32>
    %c0_59 = arith.constant 0 : index
    %c0_60 = arith.constant 0 : index
    %58 = vector.load %arg5[%c0_59, %c0_60] : memref<40x128xf32, #tpu.memory_space<vmem>>, vector<40x128xf32>
    %59 = arith.addf %58, %57 : vector<40x128xf32>
    %c0_61 = arith.constant 0 : index
    %c0_62 = arith.constant 0 : index
    %60 = vector.load %arg5[%c0_61, %c0_62] : memref<40x128xf32, #tpu.memory_space<vmem>>, vector<40x128xf32>
    tpu.vector_store %arg5[%c0_61, %c0_62], %59 {strides = array<i32>} : memref<40x128xf32, #tpu.memory_space<vmem>>, vector<40x128xf32>,
    %c0_63 = arith.constant 0 : index
    %c21 = arith.constant 21 : index
    %c0_64 = arith.constant 0 : index
    %61 = vector.load %arg2[%c0_63, %c21, %c0_64] : memref<1x62x8xf32, #tpu.memory_space<vmem>>, vector<1x40x8xf32>
    %62 = vector.shape_cast %61 : vector<1x40x8xf32> to vector<40x8xf32>
    %63 = arith.truncf %62 : vector<40x8xf32> to vector<40x8xbf16>
    %c7 = arith.constant 7 : index
    %c0_65 = arith.constant 0 : index
    %c0_66 = arith.constant 0 : index
    %64 = vector.load %arg3[%c7, %c0_65, %c0_66] : memref<9x8x128xbf16, #tpu.memory_space<vmem>>, vector<1x8x128xbf16>
    %65 = vector.shape_cast %64 : vector<1x8x128xbf16> to vector<8x128xbf16>
    %cst_67 = arith.constant dense<0.000000e+00> : vector<40x128xf32>
    %66 = tpu.matmul %63, %65, %cst_67 {dimension_numbers = #tpu.dot_dimension_numbers<[1], [0], [0], [1], [0, 0, 1, 1], [], []>} : vector<40x8xbf16>, vector<8x128xbf16>, vector<40x128xf32> -> vector<40x128xf32>
    %c0_68 = arith.constant 0 : index
    %c0_69 = arith.constant 0 : index
    %67 = vector.load %arg5[%c0_68, %c0_69] : memref<40x128xf32, #tpu.memory_space<vmem>>, vector<40x128xf32>
    %68 = arith.addf %67, %66 : vector<40x128xf32>
    %c0_70 = arith.constant 0 : index
    %c0_71 = arith.constant 0 : index
    %69 = vector.load %arg5[%c0_70, %c0_71] : memref<40x128xf32, #tpu.memory_space<vmem>>, vector<40x128xf32>
    tpu.vector_store %arg5[%c0_70, %c0_71], %68 {strides = array<i32>} : memref<40x128xf32, #tpu.memory_space<vmem>>, vector<40x128xf32>,
    %c0_72 = arith.constant 0 : index
    %c22 = arith.constant 22 : index
    %c0_73 = arith.constant 0 : index
    %70 = vector.load %arg2[%c0_72, %c22, %c0_73] : memref<1x62x8xf32, #tpu.memory_space<vmem>>, vector<1x40x8xf32>
    %71 = vector.shape_cast %70 : vector<1x40x8xf32> to vector<40x8xf32>
    %72 = arith.truncf %71 : vector<40x8xf32> to vector<40x8xbf16>
    %c8 = arith.constant 8 : index
    %c0_74 = arith.constant 0 : index
    %c0_75 = arith.constant 0 : index
    %73 = vector.load %arg3[%c8, %c0_74, %c0_75] : memref<9x8x128xbf16, #tpu.memory_space<vmem>>, vector<1x8x128xbf16>
    %74 = vector.shape_cast %73 : vector<1x8x128xbf16> to vector<8x128xbf16>
    %cst_76 = arith.constant dense<0.000000e+00> : vector<40x128xf32>
    %75 = tpu.matmul %72, %74, %cst_76 {dimension_numbers = #tpu.dot_dimension_numbers<[1], [0], [0], [1], [0, 0, 1, 1], [], []>} : vector<40x8xbf16>, vector<8x128xbf16>, vector<40x128xf32> -> vector<40x128xf32>
    %c0_77 = arith.constant 0 : index
    %c0_78 = arith.constant 0 : index
    %76 = vector.load %arg5[%c0_77, %c0_78] : memref<40x128xf32, #tpu.memory_space<vmem>>, vector<40x128xf32>
    %77 = arith.addf %76, %75 : vector<40x128xf32>
    %c0_79 = arith.constant 0 : index
    %c0_80 = arith.constant 0 : index
    %78 = vector.load %arg5[%c0_79, %c0_80] : memref<40x128xf32, #tpu.memory_space<vmem>>, vector<40x128xf32>
    tpu.vector_store %arg5[%c0_79, %c0_80], %77 {strides = array<i32>} : memref<40x128xf32, #tpu.memory_space<vmem>>, vector<40x128xf32>,
    %c0_81 = arith.constant 0 : index
    %c0_82 = arith.constant 0 : index
    %79 = vector.load %arg5[%c0_81, %c0_82] : memref<40x128xf32, #tpu.memory_space<vmem>>, vector<40x128xf32>
    %cst_83 = arith.constant 0.000000e+00 : f32
    %80 = vector.broadcast %cst_83 : f32 to vector<40x128xf32>
    %81 = arith.cmpf ogt, %79, %80 : vector<40x128xf32>
    %cst_84 = arith.constant 0.00999999977 : f32
    %82 = vector.broadcast %cst_84 : f32 to vector<40x128xf32>
    %83 = arith.mulf %82, %79 : vector<40x128xf32>
    %84 = arith.select %81, %79, %83 : vector<40x128xi1>, vector<40x128xf32>
    %c0_85 = arith.constant 0 : index
    %c0_86 = arith.constant 0 : index
    %c0_87 = arith.constant 0 : index
    %85 = vector.load %arg4[%c0_85, %c0_86, %c0_87] : memref<1x40x128xf32, #tpu.memory_space<vmem>>, vector<1x40x128xf32>
    %86 = vector.shape_cast %85 : vector<1x40x128xf32> to vector<40x128xf32>
    %87 = vector.shape_cast %84 : vector<40x128xf32> to vector<1x40x128xf32>
    tpu.vector_store %arg4[%c0_85, %c0_86, %c0_87], %87 {strides = array<i32>} : memref<1x40x128xf32, #tpu.memory_space<vmem>>, vector<1x40x128xf32>,
    return
  }
  func.func @transform_0(%arg0: i32, %arg1: i32) -> (i32, i32, i32) {
    %c0_i32 = arith.constant 0 : i32
    %c0_i32_0 = arith.constant 0 : i32
    %c0_i32_1 = arith.constant 0 : i32
    return %arg0, %c0_i32, %c0_i32_0 : i32, i32, i32
  }
  func.func @transform_1(%arg0: i32, %arg1: i32) -> (i32, i32, i32) {
    %c0_i32 = arith.constant 0 : i32
    %c0_i32_0 = arith.constant 0 : i32
    %c0_i32_1 = arith.constant 0 : i32
    return %c0_i32, %c0_i32_0, %arg1 : i32, i32, i32
  }
  func.func @transform_2(%arg0: i32, %arg1: i32) -> (i32, i32, i32) {
    %c0_i32 = arith.constant 0 : i32
    %c0_i32_0 = arith.constant 0 : i32
    return %arg0, %c0_i32, %arg1 : i32, i32, i32
  }
}

</mosaic_0001>

<bundles_post_ra>
// kernel: plain_forward.4
= control target key start
LH: loop header
LB: loop body
LE: loop exit
PB: predicated region body
PF: predicated region fallthrough
CT: control target
= control target key end

     0   :  { %s286_s6 = smov 0   ;;  %s315_s0 = inlined_call_operand.vmem [shape: f32[2,8,2,8,8], index: 0, kind: input, shape index: {}]   ;;  %s316_s1 = inlined_call_operand.vmem [shape: f32[2,8,8,4], index: 1, kind: output, shape index: {}]  }
   0x1 LB: > { %s245_s7 = sadd.s32 4294967295, %s273_s6   ;;  %p249_p0 = scmp.ge.s32.totalorder %s273_s6, 1  ;;  %s273_s6 = sphi %s286_s6, %s11_s6  }
   0x2   : > { %p87_p1 = scmp.lt.s32.totalorder %s273_s6, 3 }
   0x4   : > { %p88_p2 = pnand %p249_p0, %p87_p1 }
   0x5   : > { %p107_p3 = scmp.lt.s32.totalorder (!%p88_p2), %s245_s7, 1  ;;  %s275_s12 = smov (!%p88_p2), 124  }
   0x6   : > { %91 = sbr.rel (%p88_p2) target bundleno = 148 (0x94), region = 24 }
   0xb   : > { %s318_s7 = smov (!%p107_p3, %s245_s7), 1  ;;  %vm181_vm0 = vcmask 31744  }
   0xc   : > { %s256_s8 = sshll.u32 %s318_s7, 7  ;;  %s257_s13 = sshll.u32 %s318_s7, 6 }
   0xd   : > { %s111_s11 = scalar_lea.vmem %s315_s0, %s256_s8  ;;  %s116_s16 = scalar_lea.vmem %s316_s1, %s257_s13 }
   0xe   : > { %v121_v0 = vld [vmem:[%s111_s11 + $0x20] sm:$0xff]  ;;  %v122_v1 = vld [vmem:[%s111_s11 + $0x28] sm:$0xff]  ;;  %v123_v5 = vld [vmem:[%s111_s11 + $0x30] sm:$0xff] }
   0xf   : > { %v117_v2 = vld [vmem:[%s111_s11] sm:$0xff]  ;;  %v135_v3 = vmax.f32 %v121_v0, %v122_v1  ;;  %v118_v4 = vld [vmem:[%s111_s11 + $0x8] sm:$0xff]  ;;  %v124_v6 = vld [vmem:[%s111_s11 + $0x38] sm:$0xff] }
  0x10   : > { %v133_v7 = vmax.f32 %v117_v2, %v118_v4  ;;  %v119_v8 = vld [vmem:[%s111_s11 + $0x10] sm:$0xff]  ;;  %v120_v9 = vld [vmem:[%s111_s11 + $0x18] sm:$0xff]  ;;  %v136_v10 = vmax.f32 %v123_v5, %v124_v6  ;;  %v125_v14 = vld [vmem:[%s111_s11 + $0x40] sm:$0xff] }
  0x11   : > { %153 = vrot.lane.b32.xlu1 %v135_v3, %s275_s12  ;;  %v134_v11 = vmax.f32 %v119_v8, %v120_v9  ;;  %v127_v12 = vld [vmem:[%s111_s11 + $0x50] sm:$0xff]  ;;  %v128_v13 = vld [vmem:[%s111_s11 + $0x58] sm:$0xff]  ;;  %v126_v15 = vld [vmem:[%s111_s11 + $0x48] sm:$0xff] }
  0x12   : > { %149 = vrot.lane.b32.xlu0 %v133_v7, %s275_s12  ;;  %v138_v16 = vmax.f32 %v127_v12, %v128_v13  ;;  %v137_v17 = vmax.f32 %v125_v14, %v126_v15  ;;  %v131_v18 = vld [vmem:[%s111_s11 + $0x70] sm:$0xff]  ;;  %v132_v19 = vld [vmem:[%s111_s11 + $0x78] sm:$0xff]  ;;  %v129_v20 = vld [vmem:[%s111_s11 + $0x60] sm:$0xff] }
  0x13   : > { %v130_v21 = vld [vmem:[%s111_s11 + $0x68] sm:$0xff]  ;;  %v140_v22 = vmax.f32 %v131_v18, %v132_v19 }
  0x14   : > { %v139_v23 = vmax.f32 %v129_v20, %v130_v21 }
  0x15   : > { %155 = vrot.lane.b32.xlu1 %v136_v10, %s275_s12 }
  0x16   : > { %151 = vrot.lane.b32.xlu0 %v134_v11, %s275_s12 }
  0x19   : > { %159 = vrot.lane.b32.xlu1 %v138_v16, %s275_s12 }
  0x1a   : > { %157 = vrot.lane.b32.xlu0 %v137_v17, %s275_s12 }
  0x1d   : > { %163 = vrot.lane.b32.xlu1 %v140_v22, %s275_s12 }
  0x1e   : > { %161 = vrot.lane.b32.xlu0 %v139_v23, %s275_s12 }
  0x83   : > { %v154_v24 = vpop.permute.xlu1 %153 }
  0x84   : > { %v175_v25 = vmax.f32 %v135_v3, %v154_v24  ;;  %v150_v26 = vpop.permute.xlu0 %149 }
  0x85   : > { %v173_v27 = vmax.f32 %v133_v7, %v150_v26 }
  0x86   : > { %184 = vst.msk [vmem:[%s116_s16 + $0x10] sm:$0xff] %vm181_vm0, %v175_v25 }
  0x87   : > { %182 = vst.msk [vmem:[%s116_s16] sm:$0xff] %vm181_vm0, %v173_v27  ;;  %v156_v28 = vpop.permute.xlu1 %155 }
  0x88   : > { %v176_v29 = vmax.f32 %v136_v10, %v156_v28  ;;  %v152_v30 = vpop.permute.xlu0 %151 }
  0x89   : > { %v174_v31 = vmax.f32 %v134_v11, %v152_v30 }
  0x8a   : > { %185 = vst.msk [vmem:[%s116_s16 + $0x18] sm:$0xff] %vm181_vm0, %v176_v29 }
  0x8b   : > { %183 = vst.msk [vmem:[%s116_s16 + $0x8] sm:$0xff] %vm181_vm0, %v174_v31  ;;  %v160_v32 = vpop.permute.xlu1 %159 }
  0x8c   : > { %v178_v33 = vmax.f32 %v138_v16, %v160_v32  ;;  %v158_v34 = vpop.permute.xlu0 %157 }
  0x8d   : > { %v177_v35 = vmax.f32 %v137_v17, %v158_v34 }
  0x8e   : > { %187 = vst.msk [vmem:[%s116_s16 + $0x28] sm:$0xff] %vm181_vm0, %v178_v33 }
  0x8f   : > { %186 = vst.msk [vmem:[%s116_s16 + $0x20] sm:$0xff] %vm181_vm0, %v177_v35  ;;  %v164_v36 = vpop.permute.xlu1 %163 }
  0x90   : > { %v180_v37 = vmax.f32 %v140_v22, %v164_v36  ;;  %v162_v38 = vpop.permute.xlu0 %161 }
  0x91   : > { %v179_v39 = vmax.f32 %v139_v23, %v162_v38 }
  0x92   : > { %189 = vst.msk [vmem:[%s116_s16 + $0x38] sm:$0xff] %vm181_vm0, %v180_v37 }
  0x93   : > { %188 = vst.msk [vmem:[%s116_s16 + $0x30] sm:$0xff] %vm181_vm0, %v179_v39 }
  0x94 PF: > { %s11_s6 = sadd.s32 1, %s273_s6  }
  0x95   : > { %p8_p4 = scmp.ge.s32.totalorder %s11_s6, 4  }
  0x97   :  { %10 = sbr.rel (!%p8_p4) target bundleno = 1 (0x1), region = 54 }

// kernel: plain_forward.5
= control target key start
LH: loop header
LB: loop body
LE: loop exit
PB: predicated region body
PF: predicated region fallthrough
CT: control target
= control target key end

     0   :  { %s1407_s9 = smov 0   ;;  %s1409_s10 = smov 0   ;;  %s1641_s0 = inlined_call_operand.vmem [shape: f32[4,62,8], index: 0, kind: input, shape index: {}]   ;;  %s1642_s1 = inlined_call_operand.vmem [shape: bf16[9,8,128], index: 1, kind: input, shape index: {}]   ;;  %s1643_s2 = inlined_call_operand.vmem [shape: f32[4,40,128], index: 2, kind: output, shape index: {}]  }
   0x1   :  { %s1411_s11 = smov 0  }
   0x2 LB: > { %s24_s12 = sadd.s32 1, %s1384_s10  ;;  %p1133_p0 = scmp.ge.s32.totalorder %s1388_s11, 1  ;;  %s1388_s11 = sphi %s1411_s11, %s12_s11   ;;  %s1384_s10 = sphi %s1409_s10, %s1645_s10   ;;  %s1380_s9 = sphi %s1407_s9, %s1644_s9  }
   0x3   : > { %p26_p1 = scmp.ge.s32.totalorder %s24_s12, 4  ;;  %p135_p2 = scmp.lt.s32.totalorder %s1388_s11, 5 }
   0x5   : > { %s1647_s12 = smov (%p26_p1, %s24_s12), 0  ;;  %p136_p3 = pnand %p1133_p0, %p135_p2 }
   0x6   : > { %p164_p4 = scmp.lt.s32.totalorder (!%p136_p3), %s1380_s9, 3 }
   0x7   : > { %139 = sbr.rel (%p136_p3) target bundleno = 323 (0x143), region = 28 }
   0xc   : > { %v190_v0 = vld [vmem:[%s1642_s1] sm:$0xf]  ;;  %vm201_vm0 = vcmask 1043456   ;;  %v1390_v1 = vmov 0.0   ;;  %vm1391_vm1 = vmmov 0   ;;  %s1649_s9 = smov (!%p164_p4, %s1380_s9), 3 }
   0xd   : > { %1337 = vmatprep.subr.bf16.mxu1 %v1390_v1  ;;  %v203_v2 = vsel %vm201_vm0, %v190_v0, 0  ;;  %1217 = vmatprep.mubr.msk.bf16.mxu1 %vm1391_vm1, %v1390_v1  ;;  %s1174_s15 = sshll.u32 %s1649_s9, 6  ;;  %v1140_v3 = vld [vmem:[%s1642_s1 + $0x4] sm:$0xf]  ;;  %v1144_v4 = vld [vmem:[%s1642_s1 + $0x8] sm:$0xf] }
   0xe   : > { %1338 = vmatpush3.bf16.msra.mxu1 %v203_v2  ;;  %1211 = vmatprep.subr.bf16.mxu0 %v1390_v1  ;;  %s1446_s20 = scalar_lea.vmem %s1641_s0, %s1174_s15  ;;  %vm191_vm2 = vcmask 64512   ;;  %v286_v9 = vsel %vm201_vm0, %v1140_v3, 0  ;;  %v379_v12 = vsel %vm201_vm0, %v1144_v4, 0  ;;  %v1152_v17 = vld [vmem:[%s1642_s1 + $0x10] sm:$0xf]  ;;  %s1339_s7 = smul.u32 40, %s1649_s9 }
   0xf   : > { %1225 = vmatprep.subr.bf16.mxu1 %v1390_v1  ;;  %1212 = vmatpush3.bf16.msra.mxu0 %v203_v2  ;;  %v184_v5 = vld [vmem:[%s1446_s20 + $0x10] sm:$0xff]  ;;  %v185_v6 = vld [vmem:[%s1446_s20 + $0x18] sm:$0xff]  ;;  %v182_v7 = vld [vmem:[%s1446_s20] sm:$0xff]  ;;  %v565_v19 = vsel %vm201_vm0, %v1152_v17, 0 }
  0x10   : > { %1213 = vmatprep.mubr.msk.bf16.mxu0 %vm1391_vm1, %v1390_v1  ;;  %1239 = vmatprep.subr.bf16.mxu0 %v1390_v1  ;;  %v188_v8 = vpack.c.bf16 %v185_v6, %v184_v5  ;;  %v183_v10 = vld [vmem:[%s1446_s20 + $0x8] sm:$0xff]  ;;  %v186_v13 = vld [vmem:[%s1446_s20 + $0x20] sm:$0xff]  ;;  %v361_v22 = vld [vmem:[%s1446_s20 + $0x12] sm:$0xff]  ;;  %s1622_s14 = scalar_lea.vmem %s1643_s2, %s1339_s7 }
  0x11   : > { %v187_v11 = vpack.c.bf16 %v183_v10, %v182_v7  ;;  %v359_v14 = vld [vmem:[%s1446_s20 + $0x2] sm:$0xff]  ;;  %v360_v15 = vld [vmem:[%s1446_s20 + $0xa] sm:$0xff]  ;;  %v189_v16 = vpack.c.bf16 %v186_v13, %v186_v13  ;;  %v362_v23 = vld [vmem:[%s1446_s20 + $0x1a] sm:$0xff] }
  0x12   : > { %1218 = vmatmul.mubr.msk.bf16.vlgmr.msra.gmra.mxu1 %vm191_vm2, %v188_v8  ;;  %v364_v18 = vpack.c.bf16 %v360_v15, %v359_v14  ;;  %v266_v20 = vld [vmem:[%s1446_s20 + $0x1] sm:$0xff]  ;;  %v267_v21 = vld [vmem:[%s1446_s20 + $0x9] sm:$0xff]  ;;  %v365_v26 = vpack.c.bf16 %v362_v23, %v361_v22  ;;  %v268_v28 = vld [vmem:[%s1446_s20 + $0x11] sm:$0xff]  ;;  %v457_v43 = vpack.c.bf16 %v361_v22, %v360_v15 }
  0x13   : > { %1226 = vmatpush3.bf16.msra.mxu1 %v286_v9  ;;  %1214 = vmatmul.mubr.msk.bf16.vlgmr.msra.gmra.mxu0 %vm191_vm2, %v187_v11  ;;  %v1148_v24 = vld [vmem:[%s1642_s1 + $0xc] sm:$0xf]  ;;  %v271_v25 = vpack.c.bf16 %v267_v21, %v266_v20  ;;  %v269_v29 = vld [vmem:[%s1446_s20 + $0x19] sm:$0xff]  ;;  %v363_v30 = vld [vmem:[%s1446_s20 + $0x22] sm:$0xff] }
  0x14   : > { %1221 = vmatprep.mubr.msk.bf16.mxu1 %vm1391_vm1, %v1390_v1  ;;  %1240 = vmatpush3.bf16.msra.mxu0 %v379_v12  ;;  %v472_v27 = vsel %vm201_vm0, %v1148_v24, 0  ;;  %v272_v31 = vpack.c.bf16 %v269_v29, %v268_v28  ;;  %v366_v32 = vpack.c.bf16 %v363_v30, %v363_v30  ;;  %v270_v33 = vld [vmem:[%s1446_s20 + $0x21] sm:$0xff]  ;;  %v545_v34 = vld [vmem:[%s1446_s20 + $0xb] sm:$0xff]  ;;  %v546_v35 = vld [vmem:[%s1446_s20 + $0x13] sm:$0xff]  ;;  %v458_v47 = vpack.c.bf16 %v363_v30, %v362_v23 }
  0x15   : > { %1241 = vmatprep.mubr.msk.bf16.mxu0 %vm1391_vm1, %v1390_v1  ;;  %1253 = vmatprep.subr.bf16.mxu1 %v1390_v1  ;;  %v273_v36 = vpack.c.bf16 %v270_v33, %v270_v33  ;;  %v1160_v37 = vld [vmem:[%s1642_s1 + $0x18] sm:$0xf]  ;;  %v550_v38 = vpack.c.bf16 %v546_v35, %v545_v34  ;;  %v548_v41 = vld [vmem:[%s1446_s20 + $0x23] sm:$0xff]  ;;  %v1156_v42 = vld [vmem:[%s1642_s1 + $0x14] sm:$0xf] }
  0x16   : > { %1267 = vmatprep.subr.bf16.mxu0 %v1390_v1  ;;  %v751_v39 = vsel %vm201_vm0, %v1160_v37, 0  ;;  %v547_v40 = vld [vmem:[%s1446_s20 + $0x1b] sm:$0xff]  ;;  %v658_v45 = vsel %vm201_vm0, %v1156_v42, 0  ;;  %v549_v46 = vld [vmem:[%s1446_s20 + $0x2b] sm:$0xff] }
  0x17   : > { %v551_v44 = vpack.c.bf16 %v548_v41, %v547_v40  ;;  %v552_v48 = vpack.c.bf16 %v549_v46, %v549_v46  ;;  %v456_v49 = vld [vmem:[%s1446_s20 + $0x2a] sm:$0xff]  ;;  %v731_v50 = vld [vmem:[%s1446_s20 + $0x14] sm:$0xff]  ;;  %v732_v51 = vld [vmem:[%s1446_s20 + $0x1c] sm:$0xff] }
  0x18   : > { %v459_v52 = vpack.c.bf16 %v456_v49, %v456_v49  ;;  %v1168_v53 = vld [vmem:[%s1642_s1 + $0x20] sm:$0xf]  ;;  %v736_v54 = vpack.c.bf16 %v732_v51, %v731_v50  ;;  %v638_v56 = vld [vmem:[%s1446_s20 + $0xc] sm:$0xff]  ;;  %v733_v57 = vld [vmem:[%s1446_s20 + $0x24] sm:$0xff] }
  0x19   : > { %v937_v55 = vsel %vm201_vm0, %v1168_v53, 0  ;;  %v734_v58 = vld [vmem:[%s1446_s20 + $0x2c] sm:$0xff]  ;;  %v1164_v59 = vld [vmem:[%s1642_s1 + $0x1c] sm:$0xf]  ;;  %v643_v60 = vpack.c.bf16 %v731_v50, %v638_v56  ;;  %v735_v63 = vld [vmem:[%s1446_s20 + $0x34] sm:$0xff]  ;;  %v644_v0 = vpack.c.bf16 %v733_v57, %v732_v51 }
  0x1a   : > { %1222 = vmatmul.mubr.msk.bf16.gmra.mxu1 %vm191_vm2, %v189_v16  ;;  %v737_v61 = vpack.c.bf16 %v734_v58, %v733_v57  ;;  %v844_v62 = vsel %vm201_vm0, %v1164_v59, 0  ;;  %v738_v2 = vpack.c.bf16 %v735_v63, %v735_v63  ;;  %v917_v3 = vld [vmem:[%s1446_s20 + $0x16] sm:$0xff]  ;;  %v918_v4 = vld [vmem:[%s1446_s20 + $0x1e] sm:$0xff]  ;;  %v645_v5 = vpack.c.bf16 %v734_v58, %v734_v58  ;;  %v919_v9 = vld [vmem:[%s1446_s20 + $0x26] sm:$0xff] }
  0x1b   : > { %1242 = vmatmul.mubr.msk.bf16.vlgmr.msra.gmra.mxu0 %vm191_vm2, %v364_v18  ;;  %1227 = vmatprep.mubr.msk.bf16.mxu1 %vm1391_vm1, %v1390_v1  ;;  %v922_v6 = vpack.c.bf16 %v918_v4, %v917_v3  ;;  %v824_v7 = vld [vmem:[%s1446_s20 + $0x15] sm:$0xff]  ;;  %v825_v8 = vld [vmem:[%s1446_s20 + $0x1d] sm:$0xff]  ;;  %v826_v13 = vld [vmem:[%s1446_s20 + $0x25] sm:$0xff] }
  0x1c   : > { %1268 = vmatpush3.bf16.msra.mxu0 %v565_v19  ;;  %1245 = vmatprep.mubr.msk.bf16.mxu0 %vm1391_vm1, %v1390_v1  ;;  %v920_v10 = vld [vmem:[%s1446_s20 + $0x2e] sm:$0xff]  ;;  %v829_v11 = vpack.c.bf16 %v825_v8, %v824_v7  ;;  %v921_v15 = vld [vmem:[%s1446_s20 + $0x36] sm:$0xff] }
  0x1d   : > { %1295 = vmatprep.subr.bf16.mxu0 %v1390_v1  ;;  %v923_v12 = vpack.c.bf16 %v920_v10, %v919_v9  ;;  %v827_v14 = vld [vmem:[%s1446_s20 + $0x2d] sm:$0xff]  ;;  %v924_v17 = vpack.c.bf16 %v921_v15, %v921_v15  ;;  %v828_v18 = vld [vmem:[%s1446_s20 + $0x35] sm:$0xff] }
  0x1e   : > { %v830_v16 = vpack.c.bf16 %v827_v14, %v826_v13  ;;  %v831_v19 = vpack.c.bf16 %v828_v18, %v828_v18 }
  0x22   : > { %1228 = vmatmul.mubr.msk.bf16.vlgmr.msra.gmra.mxu1 %vm191_vm2, %v271_v25 }
  0x23   : > { %1254 = vmatpush3.bf16.msra.mxu1 %v472_v27  ;;  %1246 = vmatmul.mubr.msk.bf16.gmra.mxu0 %vm191_vm2, %v365_v26 }
  0x24   : > { %1231 = vmatprep.mubr.msk.bf16.mxu1 %vm1391_vm1, %v1390_v1  ;;  %1249 = vmatprep.mubr.msk.bf16.mxu0 %vm1391_vm1, %v1390_v1 }
  0x25   : > { %1281 = vmatprep.subr.bf16.mxu1 %v1390_v1 }
  0x2a   : > { %1232 = vmatmul.mubr.msk.bf16.gmra.mxu1 %vm191_vm2, %v272_v31 }
  0x2b   : > { %1250 = vmatmul.mubr.msk.bf16.gmra.mxu0 %vm191_vm2, %v366_v32  ;;  %1235 = vmatprep.mubr.msk.bf16.mxu1 %vm1391_vm1, %v1390_v1 }
  0x2c   : > { %1269 = vmatprep.mubr.msk.bf16.mxu0 %vm1391_vm1, %v1390_v1 }
  0x32   : > { %1236 = vmatmul.mubr.msk.bf16.gmra.mxu1 %vm191_vm2, %v273_v36 }
  0x33   : > { %1270 = vmatmul.mubr.msk.bf16.vlgmr.msra.gmra.mxu0 %vm191_vm2, %v550_v38  ;;  %1255 = vmatprep.mubr.msk.bf16.mxu1 %vm1391_vm1, %v1390_v1 }
  0x34   : > { %1296 = vmatpush3.bf16.msra.mxu0 %v751_v39  ;;  %1273 = vmatprep.mubr.msk.bf16.mxu0 %vm1391_vm1, %v1390_v1 }
  0x35   : > { %1323 = vmatprep.subr.bf16.mxu0 %v1390_v1 }
  0x3a   : > { %1256 = vmatmul.mubr.msk.bf16.vlgmr.msra.gmra.mxu1 %vm191_vm2, %v457_v43 }
  0x3b   : > { %1282 = vmatpush3.bf16.msra.mxu1 %v658_v45  ;;  %1274 = vmatmul.mubr.msk.bf16.gmra.mxu0 %vm191_vm2, %v551_v44 }
  0x3c   : > { %1259 = vmatprep.mubr.msk.bf16.mxu1 %vm1391_vm1, %v1390_v1  ;;  %1277 = vmatprep.mubr.msk.bf16.mxu0 %vm1391_vm1, %v1390_v1 }
  0x3d   : > { %1309 = vmatprep.subr.bf16.mxu1 %v1390_v1 }
  0x42   : > { %1260 = vmatmul.mubr.msk.bf16.gmra.mxu1 %vm191_vm2, %v458_v47 }
  0x43   : > { %1278 = vmatmul.mubr.msk.bf16.gmra.mxu0 %vm191_vm2, %v552_v48  ;;  %1263 = vmatprep.mubr.msk.bf16.mxu1 %vm1391_vm1, %v1390_v1 }
  0x44   : > { %1297 = vmatprep.mubr.msk.bf16.mxu0 %vm1391_vm1, %v1390_v1 }
  0x4a   : > { %1264 = vmatmul.mubr.msk.bf16.gmra.mxu1 %vm191_vm2, %v459_v52 }
  0x4b   : > { %1298 = vmatmul.mubr.msk.bf16.vlgmr.msra.gmra.mxu0 %vm191_vm2, %v736_v54  ;;  %1283 = vmatprep.mubr.msk.bf16.mxu1 %vm1391_vm1, %v1390_v1 }
  0x4c   : > { %1324 = vmatpush3.bf16.msra.mxu0 %v937_v55  ;;  %1301 = vmatprep.mubr.msk.bf16.mxu0 %vm1391_vm1, %v1390_v1 }
  0x52   : > { %1284 = vmatmul.mubr.msk.bf16.vlgmr.msra.gmra.mxu1 %vm191_vm2, %v643_v60 }
  0x53   : > { %1310 = vmatpush3.bf16.msra.mxu1 %v844_v62  ;;  %1302 = vmatmul.mubr.msk.bf16.gmra.mxu0 %vm191_vm2, %v737_v61 }
  0x54   : > { %1287 = vmatprep.mubr.msk.bf16.mxu1 %vm1391_vm1, %v1390_v1  ;;  %1305 = vmatprep.mubr.msk.bf16.mxu0 %vm1391_vm1, %v1390_v1 }
  0x5a   : > { %1288 = vmatmul.mubr.msk.bf16.gmra.mxu1 %vm191_vm2, %v644_v0 }
  0x5b   : > { %1306 = vmatmul.mubr.msk.bf16.gmra.mxu0 %vm191_vm2, %v738_v2  ;;  %1291 = vmatprep.mubr.msk.bf16.mxu1 %vm1391_vm1, %v1390_v1 }
  0x5c   : > { %1325 = vmatprep.mubr.msk.bf16.mxu0 %vm1391_vm1, %v1390_v1 }
  0x62   : > { %1292 = vmatmul.mubr.msk.bf16.gmra.mxu1 %vm191_vm2, %v645_v5 }
  0x63   : > { %1326 = vmatmul.mubr.msk.bf16.vlgmr.msra.gmra.mxu0 %vm191_vm2, %v922_v6  ;;  %1311 = vmatprep.mubr.msk.bf16.mxu1 %vm1391_vm1, %v1390_v1 }
  0x64   : > { %1329 = vmatprep.mubr.msk.bf16.mxu0 %vm1391_vm1, %v1390_v1 }
  0x6a   : > { %1312 = vmatmul.mubr.msk.bf16.vlgmr.msra.gmra.mxu1 %vm191_vm2, %v829_v11 }
  0x6b   : > { %1330 = vmatmul.mubr.msk.bf16.gmra.mxu0 %vm191_vm2, %v923_v12  ;;  %1315 = vmatprep.mubr.msk.bf16.mxu1 %vm1391_vm1, %v1390_v1 }
  0x6c   : > { %1333 = vmatprep.mubr.msk.bf16.mxu0 %vm1391_vm1, %v1390_v1 }
  0x72   : > { %1316 = vmatmul.mubr.msk.bf16.gmra.mxu1 %vm191_vm2, %v830_v16 }
  0x73   : > { %1334 = vmatmul.mubr.msk.bf16.gmra.mxu0 %vm191_vm2, %v924_v17  ;;  %1319 = vmatprep.mubr.msk.bf16.mxu1 %vm1391_vm1, %v1390_v1 }
  0x7a   : > { %1320 = vmatmul.mubr.msk.bf16.gmra.mxu1 %vm191_vm2, %v831_v19 }
  0xd2   : > { %v247_v20 = vpop.f32.mrf.mxu1 }
  0xd3   : > { %v239_v21 = vpop.f32.mrf.mxu0 }
  0xd4   : > { %v1219_v22 = vpop.f32.mrf.mxu1 }
  0xd5   : > { %v1215_v23 = vpop.f32.mrf.mxu0 }
  0xd6   : > { %v250_v24 = vpop.f32.mrf.mxu1 }
  0xd7   : > { %v242_v25 = vpop.f32.mrf.mxu0 }
  0xd8   : > { %v1220_v26 = vpop.f32.mrf.mxu1 }
  0xd9   : > { %v1216_v27 = vpop.f32.mrf.mxu0 }
  0xda   : > { %v255_v28 = vpop.f32.mrf.mxu1 }
  0xdb   : > { %v415_v29 = vpop.f32.mrf.mxu0 }
  0xdc   : > { %v1223_v30 = vpop.f32.mrf.mxu1 }
  0xdd   : > { %v1243_v31 = vpop.f32.mrf.mxu0 }
  0xde   : > { %v258_v32 = vpop.f32.mrf.mxu1 }
  0xdf   : > { %v418_v33 = vpop.f32.mrf.mxu0 }
  0xe0   : > { %v1224_v34 = vpop.f32.mrf.mxu1 }
  0xe1   : > { %v1244_v1 = vpop.f32.mrf.mxu0 }
  0xe2   : > { %v322_v35 = vpop.f32.mrf.mxu1 }
  0xe3   : > { %v349_v36 = vadd.f32 %v322_v35, %v239_v21  ;;  %v423_v37 = vpop.f32.mrf.mxu0 }
  0xe4   : > { %v1229_v38 = vpop.f32.mrf.mxu1 }
  0xe5   : > { %v1247_v39 = vpop.f32.mrf.mxu0  ;;  %v1597_v40 = vadd.f32 %v415_v29, %v349_v36 }
  0xe6   : > { %v325_v41 = vpop.f32.mrf.mxu1 }
  0xe7   : > { %v350_v42 = vadd.f32 %v325_v41, %v242_v25  ;;  %v426_v43 = vpop.f32.mrf.mxu0 }
  0xe8   : > { %v1230_v44 = vpop.f32.mrf.mxu1 }
  0xe9   : > { %v1248_v45 = vpop.f32.mrf.mxu0  ;;  %v1599_v46 = vadd.f32 %v418_v33, %v350_v42 }
  0xea   : > { %v330_v47 = vpop.f32.mrf.mxu1 }
  0xeb   : > { %v351_v48 = vadd.f32 %v330_v47, %v247_v20  ;;  %v431_v49 = vpop.f32.mrf.mxu0 }
  0xec   : > { %v1233_v50 = vpop.f32.mrf.mxu1 }
  0xed   : > { %v1251_v51 = vpop.f32.mrf.mxu0  ;;  %v1601_v52 = vadd.f32 %v423_v37, %v351_v48 }
  0xee   : > { %v333_v53 = vpop.f32.mrf.mxu1 }
  0xef   : > { %v352_v54 = vadd.f32 %v333_v53, %v250_v24  ;;  %v434_v55 = vpop.f32.mrf.mxu0 }
  0xf0   : > { %v1234_v56 = vpop.f32.mrf.mxu1 }
  0xf1   : > { %v1252_v57 = vpop.f32.mrf.mxu0  ;;  %v1603_v58 = vadd.f32 %v426_v43, %v352_v54 }
  0xf2   : > { %v338_v59 = vpop.f32.mrf.mxu1 }
  0xf3   : > { %v353_v60 = vadd.f32 %v338_v59, %v255_v28  ;;  %v601_v61 = vpop.f32.mrf.mxu0 }
  0xf4   : > { %v1237_v62 = vpop.f32.mrf.mxu1 }
  0xf5   : > { %v1271_v63 = vpop.f32.mrf.mxu0  ;;  %v1605_v0 = vadd.f32 %v431_v49, %v353_v60 }
  0xf6   : > { %v341_v2 = vpop.f32.mrf.mxu1 }
  0xf7   : > { %v604_v3 = vpop.f32.mrf.mxu0 }
  0xf8   : > { %v1238_v4 = vpop.f32.mrf.mxu1 }
  0xf9   : > { %v1272_v5 = vpop.f32.mrf.mxu0 }
  0xfa   : > { %v508_v6 = vpop.f32.mrf.mxu1 }
  0xfb   : > { %v609_v7 = vpop.f32.mrf.mxu0  ;;  %v535_v43 = vadd.f32 %v508_v6, %v1597_v40 }
  0xfc   : > { %v1257_v8 = vpop.f32.mrf.mxu1 }
  0xfd   : > { %v1275_v9 = vpop.f32.mrf.mxu0  ;;  %v628_v50 = vadd.f32 %v601_v61, %v535_v43 }
  0xfe   : > { %v511_v10 = vpop.f32.mrf.mxu1 }
  0xff   : > { %v612_v11 = vpop.f32.mrf.mxu0  ;;  %v536_v49 = vadd.f32 %v511_v10, %v1599_v46 }
 0x100   : > { %v1258_v12 = vpop.f32.mrf.mxu1 }
 0x101   : > { %v1276_v13 = vpop.f32.mrf.mxu0  ;;  %v629_v59 = vadd.f32 %v604_v3, %v536_v49 }
 0x102   : > { %v516_v14 = vpop.f32.mrf.mxu1 }
 0x103   : > { %v1607_v15 = vpop.f32.mrf.mxu0  ;;  %v537_v57 = vadd.f32 %v516_v14, %v1601_v52 }
 0x104   : > { %v1261_v16 = vpop.f32.mrf.mxu1 }
 0x105   : > { %v1279_v17 = vpop.f32.mrf.mxu0  ;;  %v630_v6 = vadd.f32 %v609_v7, %v537_v57 }
 0x106   : > { %v519_v18 = vpop.f32.mrf.mxu1 }
 0x107   : > { %v620_v19 = vpop.f32.mrf.mxu0  ;;  %v538_v4 = vadd.f32 %v519_v18, %v1603_v58 }
 0x108   : > { %v1262_v20 = vpop.f32.mrf.mxu1 }
 0x109   : > { %v1280_v21 = vpop.f32.mrf.mxu0  ;;  %v631_v16 = vadd.f32 %v612_v11, %v538_v4 }
 0x10a   : > { %v524_v22 = vpop.f32.mrf.mxu1 }
 0x10b   : > { %v787_v23 = vpop.f32.mrf.mxu0  ;;  %v539_v3 = vadd.f32 %v524_v22, %v1605_v0 }
 0x10c   : > { %v1265_v24 = vpop.f32.mrf.mxu1 }
 0x10d   : > { %v1299_v25 = vpop.f32.mrf.mxu0  ;;  %v632_v0 = vadd.f32 %v1607_v15, %v539_v3 }
 0x10e   : > { %v527_v26 = vpop.f32.mrf.mxu1 }
 0x10f   : > { %v790_v27 = vpop.f32.mrf.mxu0 }
 0x110   : > { %v1266_v28 = vpop.f32.mrf.mxu1 }
 0x111   : > { %v1300_v29 = vpop.f32.mrf.mxu0 }
 0x112   : > { %v694_v30 = vpop.f32.mrf.mxu1 }
 0x113   : > { %v795_v31 = vpop.f32.mrf.mxu0  ;;  %v721_v54 = vadd.f32 %v694_v30, %v628_v50 }
 0x114   : > { %v1285_v32 = vpop.f32.mrf.mxu1 }
 0x115   : > { %v1303_v33 = vpop.f32.mrf.mxu0  ;;  %v814_v40 = vadd.f32 %v787_v23, %v721_v54 }
 0x116   : > { %v697_v34 = vpop.f32.mrf.mxu1 }
 0x117   : > { %v1609_v1 = vpop.f32.mrf.mxu0  ;;  %v722_v63 = vadd.f32 %v697_v34, %v629_v59 }
 0x118   : > { %v1286_v35 = vpop.f32.mrf.mxu1 }
 0x119   : > { %v1304_v36 = vpop.f32.mrf.mxu0  ;;  %v815_v12 = vadd.f32 %v790_v27, %v722_v63 }
 0x11a   : > { %v702_v37 = vpop.f32.mrf.mxu1 }
 0x11b   : > { %v1611_v38 = vpop.f32.mrf.mxu0  ;;  %v723_v9 = vadd.f32 %v702_v37, %v630_v6 }
 0x11c   : > { %v1289_v39 = vpop.f32.mrf.mxu1 }
 0x11d   : > { %v1307_v41 = vpop.f32.mrf.mxu0  ;;  %v816_v21 = vadd.f32 %v795_v31, %v723_v9 }
 0x11e   : > { %v705_v42 = vpop.f32.mrf.mxu1 }
 0x11f   : > { %v806_v44 = vpop.f32.mrf.mxu0  ;;  %v724_v18 = vadd.f32 %v705_v42, %v631_v16 }
 0x120   : > { %v1290_v45 = vpop.f32.mrf.mxu1 }
 0x121   : > { %v1308_v47 = vpop.f32.mrf.mxu0  ;;  %v817_v30 = vadd.f32 %v1609_v1, %v724_v18 }
 0x122   : > { %v710_v48 = vpop.f32.mrf.mxu1 }
 0x123   : > { %v973_v51 = vpop.f32.mrf.mxu0  ;;  %v725_v27 = vadd.f32 %v710_v48, %v632_v0 }
 0x124   : > { %v1293_v53 = vpop.f32.mrf.mxu1 }
 0x125   : > { %v1327_v55 = vpop.f32.mrf.mxu0  ;;  %v818_v39 = vadd.f32 %v1611_v38, %v725_v27 }
 0x126   : > { %v713_v56 = vpop.f32.mrf.mxu1 }
 0x127   : > { %v976_v60 = vpop.f32.mrf.mxu0 }
 0x128   : > { %v1294_v62 = vpop.f32.mrf.mxu1 }
 0x129   : > { %v1328_v2 = vpop.f32.mrf.mxu0 }
 0x12a   : > { %v880_v5 = vpop.f32.mrf.mxu1 }
 0x12b   : > { %v907_v46 = vadd.f32 %v880_v5, %v814_v40  ;;  %v981_v61 = vpop.f32.mrf.mxu0 }
 0x12c   : > { %v1313_v8 = vpop.f32.mrf.mxu1 }
 0x12d   : > { %v1000_v10 = vadd.f32 %v973_v51, %v907_v46  ;;  %v1331_v13 = vpop.f32.mrf.mxu0 }
 0x12e   : > { %v883_v52 = vpop.f32.mrf.mxu1 }
 0x12f   : > { %vm1015_vm3 = vcmp.gt.f32.partialorder %v1000_v10, 0.0  ;;  %v1020_v58 = vmul.f32 0.01, %v1000_v10  ;;  %v908_v7 = vadd.f32 %v883_v52, %v815_v12  ;;  %v984_v14 = vpop.f32.mrf.mxu0 }
 0x130   : > { %v1314_v17 = vpop.f32.mrf.mxu1 }
 0x131   : > { %v1025_v19 = vsel %vm1015_vm3, %v1000_v10, %v1020_v58  ;;  %v1001_v20 = vadd.f32 %v976_v60, %v908_v7  ;;  %v1332_v11 = vpop.f32.mrf.mxu0 }
 0x132   : > { %1030 = vst [vmem:[%s1622_s14] sm:$0xff] %v1025_v19  ;;  %v888_v23 = vpop.f32.mrf.mxu1 }
 0x133   : > { %vm1016_vm4 = vcmp.gt.f32.partialorder %v1001_v20, 0.0  ;;  %v1021_v22 = vmul.f32 0.01, %v1001_v20  ;;  %v909_v24 = vadd.f32 %v888_v23, %v816_v21  ;;  %v989_v25 = vpop.f32.mrf.mxu0 }
 0x134   : > { %v1317_v26 = vpop.f32.mrf.mxu1 }
 0x135   : > { %v1026_v28 = vsel %vm1016_vm4, %v1001_v20, %v1021_v22  ;;  %v1002_v29 = vadd.f32 %v981_v61, %v909_v24  ;;  %v1335_v32 = vpop.f32.mrf.mxu0 }
 0x136   : > { %1031 = vst [vmem:[%s1622_s14 + $0x8] sm:$0xff] %v1026_v28  ;;  %v891_v33 = vpop.f32.mrf.mxu1 }
 0x137   : > { %vm1017_vm5 = vcmp.gt.f32.partialorder %v1002_v29, 0.0  ;;  %v1022_v31 = vmul.f32 0.01, %v1002_v29  ;;  %v910_v34 = vadd.f32 %v891_v33, %v817_v30  ;;  %v992_v35 = vpop.f32.mrf.mxu0 }
 0x138   : > { %v1318_v15 = vpop.f32.mrf.mxu1 }
 0x139   : > { %v1027_v36 = vsel %vm1017_vm5, %v1002_v29, %v1022_v31  ;;  %v1003_v37 = vadd.f32 %v984_v14, %v910_v34  ;;  %v1336_v41 = vpop.f32.mrf.mxu0 }
 0x13a   : > { %1032 = vst [vmem:[%s1622_s14 + $0x10] sm:$0xff] %v1027_v36  ;;  %v896_v42 = vpop.f32.mrf.mxu1 }
 0x13b   : > { %vm1018_vm6 = vcmp.gt.f32.partialorder %v1003_v37, 0.0  ;;  %v1023_v43 = vmul.f32 0.01, %v1003_v37  ;;  %v911_v1 = vadd.f32 %v896_v42, %v818_v39 }
 0x13c   : > { %v1321_v44 = vpop.f32.mrf.mxu1 }
 0x13d   : > { %v1028_v45 = vsel %vm1018_vm6, %v1003_v37, %v1023_v43  ;;  %v1004_v47 = vadd.f32 %v989_v25, %v911_v1 }
 0x13e   : > { %1033 = vst [vmem:[%s1622_s14 + $0x18] sm:$0xff] %v1028_v45  ;;  %v899_v48 = vpop.f32.mrf.mxu1 }
 0x13f   : > { %vm1019_vm7 = vcmp.gt.f32.partialorder %v1004_v47, 0.0  ;;  %v1024_v49 = vmul.f32 0.01, %v1004_v47 }
 0x140   : > { %v1322_v50 = vpop.f32.mrf.mxu1 }
 0x141   : > { %v1029_v51 = vsel %vm1019_vm7, %v1004_v47, %v1024_v49 }
 0x142   : > { %1034 = vst [vmem:[%s1622_s14 + $0x20] sm:$0xff] %v1029_v51 }
 0x143 PF: > { %s12_s11 = sadd.s32 1, %s1388_s11   ;;  %s1644_s9 = smov %s1384_s10 }
 0x144   : > { %p9_p5 = scmp.ge.s32.totalorder %s12_s11, 6   ;;  %s1645_s10 = smov %s1647_s12 }
 0x146   :  { %11 = sbr.rel (!%p9_p5) target bundleno = 2 (0x2), region = 69 }

// kernel: plain_forward.3
= control target key start
LH: loop header
LB: loop body
LE: loop exit
PB: predicated region body
PF: predicated region fallthrough
CT: control target
= control target key end

     0   :  { %s13548_s9 = smov 0   ;;  %s13550_s10 = smov 0   ;;  %s16783_s0 = inlined_call_operand.vmem [shape: f32[2,404,8], index: 0, kind: input, shape index: {}]   ;;  %s16784_s1 = inlined_call_operand.vmem [shape: bf16[25,8,128], index: 1, kind: input, shape index: {}]   ;;  %s16785_s2 = inlined_call_operand.vmem [shape: f32[2,320,128], index: 2, kind: output, shape index: {}]  }
   0x1   :  { %s13552_s11 = smov 0  }
   0x2 LB: > { %s24_s12 = sadd.s32 1, %s13527_s10  ;;  %p11351_p0 = scmp.ge.s32.totalorder %s13531_s11, 1  ;;  %s13531_s11 = sphi %s13552_s11, %s12_s11   ;;  %s13527_s10 = sphi %s13550_s10, %s16849_s10   ;;  %s13523_s9 = sphi %s13548_s9, %s16848_s9  }
   0x3   : > { %p26_p1 = scmp.ge.s32.totalorder %s24_s12, 2  ;;  %p135_p2 = scmp.lt.s32.totalorder %s13531_s11, 3 }
   0x5   : > { %s16851_s12 = smov (%p26_p1, %s24_s12), 0  ;;  %p136_p3 = pnand %p11351_p0, %p135_p2 }
   0x7   : > { %139 = sbr.rel (%p136_p3) target bundleno = 1223 (0x4c7), region = 28 }
   0xc   : > { %v242_v0 = vld [vmem:[%s16784_s1] sm:$0xf]  ;;  %vm304_vm0 = vcmask 1043456   ;;  %p164_p4 = scmp.lt.s32.totalorder %s13523_s9, 1  ;;  %v11374_v2 = vld [vmem:[%s16784_s1 + $0x4] sm:$0xf] }
   0xd   : > { %13458 = vmatprep.subr.msk.bf16.mxu1 %vm304_vm0, %v242_v0  ;;  %13457 = vmatprep.subr.msk.bf16.mxu0 %vm304_vm0, %v242_v0  ;;  %v306_v1 = vsel %vm304_vm0, %v242_v0, 0  ;;  %v11395_v3 = vld [vmem:[%s16784_s1 + $0x8] sm:$0xf]  ;;  %vm243_vm1 = vcmask 64512   ;;  %v664_v18 = vsel %vm304_vm0, %v11374_v2, 0 }
   0xe   : > { %13456 = vmatpush3.bf16.msra.mxu1 %v306_v1  ;;  %12406 = vmatpush3.bf16.msra.mxu0 %v306_v1  ;;  %s16853_s9 = smov (!%p164_p4, %s13523_s9), 1  ;;  %v1102_v15 = vsel %vm304_vm0, %v11395_v3, 0  ;;  %v13608_v24 = vld [vmem:[%s16784_s1 + $0xc] sm:$0xf]  ;;  %v13613_v25 = vld [vmem:[%s16784_s1 + $0x10] sm:$0xf] }
   0xf   : > { %13459 = vmatprep.subr.msk.bf16.mxu1 %vm304_vm0, %v11374_v2  ;;  %13460 = vmatprep.subr.msk.bf16.mxu0 %vm304_vm0, %v11395_v3  ;;  %s13483_s19 = smul.u32 408, %s16853_s9 }
  0x11   : > { %s13586_s22 = scalar_lea.vmem %s16783_s0, %s13483_s19 }
  0x12   : > { %v182_v4 = vld [vmem:[%s13586_s22] sm:$0xff]  ;;  %v183_v5 = vld [vmem:[%s13586_s22 + $0x8] sm:$0xff]  ;;  %v184_v9 = vld [vmem:[%s13586_s22 + $0x10] sm:$0xff] }
  0x13   : > { %v202_v6 = vld [vmem:[%s13586_s22 + $0xa0] sm:$0xff]  ;;  %v222_v7 = vpack.c.bf16 %v183_v5, %v182_v4  ;;  %v203_v8 = vld [vmem:[%s13586_s22 + $0xa8] sm:$0xff]  ;;  %v185_v10 = vld [vmem:[%s13586_s22 + $0x18] sm:$0xff] }
  0x14   : > { %v232_v11 = vpack.c.bf16 %v203_v8, %v202_v6  ;;  %v223_v12 = vpack.c.bf16 %v185_v10, %v184_v9  ;;  %v204_v13 = vld [vmem:[%s13586_s22 + $0xb0] sm:$0xff]  ;;  %v205_v14 = vld [vmem:[%s13586_s22 + $0xb8] sm:$0xff]  ;;  %v186_v16 = vld [vmem:[%s13586_s22 + $0x20] sm:$0xff] }
  0x15   : > { %12407 = vmatprep.mubr.msk.bf16.mxu0 %vm243_vm1, %v222_v7  ;;  %v233_v17 = vpack.c.bf16 %v205_v14, %v204_v13  ;;  %v187_v19 = vld [vmem:[%s13586_s22 + $0x28] sm:$0xff]  ;;  %v206_v20 = vld [vmem:[%s13586_s22 + $0xc0] sm:$0xff]  ;;  %v188_v26 = vld [vmem:[%s13586_s22 + $0x30] sm:$0xff] }
  0x16   : > { %v207_v21 = vld [vmem:[%s13586_s22 + $0xc8] sm:$0xff]  ;;  %12427 = vmatprep.mubr.msk.bf16.mxu1 %vm243_vm1, %v232_v11  ;;  %12408 = vmatmul.mubr.msk.bf16.vlgmr.msra.gmra.mxu0 %vm243_vm1, %v223_v12  ;;  %v224_v22 = vpack.c.bf16 %v187_v19, %v186_v16  ;;  %v189_v27 = vld [vmem:[%s13586_s22 + $0x38] sm:$0xff]  ;;  %v208_v28 = vld [vmem:[%s13586_s22 + $0xd0] sm:$0xff] }
  0x17   : > { %v234_v23 = vpack.c.bf16 %v207_v21, %v206_v20  ;;  %12428 = vmatmul.mubr.msk.bf16.vlgmr.msra.gmra.mxu1 %vm243_vm1, %v233_v17  ;;  %12490 = vmatpush3.bf16.msra.mxu0 %v1102_v15  ;;  %v209_v29 = vld [vmem:[%s13586_s22 + $0xd8] sm:$0xff]  ;;  %v190_v30 = vld [vmem:[%s13586_s22 + $0x40] sm:$0xff]  ;;  %v191_v31 = vld [vmem:[%s13586_s22 + $0x48] sm:$0xff]  ;;  %v225_v34 = vpack.c.bf16 %v189_v27, %v188_v26  ;;  %v1978_v20 = vsel %vm304_vm0, %v13613_v25, 0 }
  0x18   : > { %12448 = vmatpush3.bf16.msra.mxu1 %v664_v18  ;;  %12411 = vmatprep.mubr.msk.bf16.mxu0 %vm243_vm1, %v224_v22  ;;  %v210_v32 = vld [vmem:[%s13586_s22 + $0xe0] sm:$0xff]  ;;  %v211_v33 = vld [vmem:[%s13586_s22 + $0xe8] sm:$0xff]  ;;  %v235_v35 = vpack.c.bf16 %v209_v29, %v208_v28  ;;  %v226_v36 = vpack.c.bf16 %v191_v31, %v190_v30  ;;  %v192_v38 = vld [vmem:[%s13586_s22 + $0x50] sm:$0xff]  ;;  %v1540_v22 = vsel %vm304_vm0, %v13608_v24, 0 }
  0x19   : > { %12431 = vmatprep.mubr.msk.bf16.mxu1 %vm243_vm1, %v234_v23  ;;  %13461 = vmatprep.subr.msk.bf16.mxu1 %vm304_vm0, %v13608_v24  ;;  %v236_v37 = vpack.c.bf16 %v211_v33, %v210_v32  ;;  %v193_v39 = vld [vmem:[%s13586_s22 + $0x58] sm:$0xff]  ;;  %v212_v40 = vld [vmem:[%s13586_s22 + $0xf0] sm:$0xff]  ;;  %v194_v42 = vld [vmem:[%s13586_s22 + $0x60] sm:$0xff] }
  0x1a   : > { %13462 = vmatprep.subr.msk.bf16.mxu0 %vm304_vm0, %v13613_v25  ;;  %v213_v41 = vld [vmem:[%s13586_s22 + $0xf8] sm:$0xff]  ;;  %v195_v43 = vld [vmem:[%s13586_s22 + $0x68] sm:$0xff]  ;;  %v214_v44 = vld [vmem:[%s13586_s22 + $0x100] sm:$0xff]  ;;  %v227_v46 = vpack.c.bf16 %v193_v39, %v192_v38 }
  0x1b   : > { %v215_v45 = vld [vmem:[%s13586_s22 + $0x108] sm:$0xff]  ;;  %v237_v47 = vpack.c.bf16 %v213_v41, %v212_v40  ;;  %v228_v48 = vpack.c.bf16 %v195_v43, %v194_v42  ;;  %v196_v50 = vld [vmem:[%s13586_s22 + $0x70] sm:$0xff]  ;;  %v197_v51 = vld [vmem:[%s13586_s22 + $0x78] sm:$0xff] }
  0x1c   : > { %v238_v49 = vpack.c.bf16 %v215_v45, %v214_v44  ;;  %v216_v52 = vld [vmem:[%s13586_s22 + $0x110] sm:$0xff]  ;;  %v217_v53 = vld [vmem:[%s13586_s22 + $0x118] sm:$0xff]  ;;  %v198_v54 = vld [vmem:[%s13586_s22 + $0x80] sm:$0xff]  ;;  %v229_v58 = vpack.c.bf16 %v197_v51, %v196_v50 }
  0x1d   : > { %v199_v55 = vld [vmem:[%s13586_s22 + $0x88] sm:$0xff]  ;;  %v218_v56 = vld [vmem:[%s13586_s22 + $0x120] sm:$0xff]  ;;  %v239_v59 = vpack.c.bf16 %v217_v53, %v216_v52  ;;  %v200_v62 = vld [vmem:[%s13586_s22 + $0x90] sm:$0xff] }
  0x1e   : > { %12412 = vmatmul.mubr.msk.bf16.gmra.mxu0 %vm243_vm1, %v225_v34  ;;  %v219_v57 = vld [vmem:[%s13586_s22 + $0x128] sm:$0xff]  ;;  %v230_v60 = vpack.c.bf16 %v199_v55, %v198_v54  ;;  %v201_v63 = vld [vmem:[%s13586_s22 + $0x98] sm:$0xff]  ;;  %v220_v0 = vld [vmem:[%s13586_s22 + $0x130] sm:$0xff] }
  0x1f   : > { %12432 = vmatmul.mubr.msk.bf16.gmra.mxu1 %vm243_vm1, %v235_v35  ;;  %12415 = vmatprep.mubr.msk.bf16.mxu0 %vm243_vm1, %v226_v36  ;;  %v240_v61 = vpack.c.bf16 %v219_v57, %v218_v56  ;;  %v221_v1 = vld [vmem:[%s13586_s22 + $0x138] sm:$0xff]  ;;  %v979_v2 = vld [vmem:[%s13586_s22 + $0x2] sm:$0xff]  ;;  %v980_v3 = vld [vmem:[%s13586_s22 + $0xa] sm:$0xff]  ;;  %v231_v6 = vpack.c.bf16 %v201_v63, %v200_v62 }
  0x20   : > { %12435 = vmatprep.mubr.msk.bf16.mxu1 %vm243_vm1, %v236_v37  ;;  %v541_v4 = vld [vmem:[%s13586_s22 + $0x1] sm:$0xff]  ;;  %v542_v5 = vld [vmem:[%s13586_s22 + $0x9] sm:$0xff]  ;;  %v241_v7 = vpack.c.bf16 %v221_v1, %v220_v0  ;;  %v1019_v8 = vpack.c.bf16 %v980_v3, %v979_v2  ;;  %v981_v10 = vld [vmem:[%s13586_s22 + $0x12] sm:$0xff] }
  0x21   : > { %v581_v9 = vpack.c.bf16 %v542_v5, %v541_v4  ;;  %v982_v11 = vld [vmem:[%s13586_s22 + $0x1a] sm:$0xff]  ;;  %v543_v12 = vld [vmem:[%s13586_s22 + $0x11] sm:$0xff]  ;;  %v546_v15 = vld [vmem:[%s13586_s22 + $0x29] sm:$0xff] }
  0x22   : > { %v544_v13 = vld [vmem:[%s13586_s22 + $0x19] sm:$0xff]  ;;  %v545_v14 = vld [vmem:[%s13586_s22 + $0x21] sm:$0xff]  ;;  %v1020_v16 = vpack.c.bf16 %v982_v11, %v981_v10  ;;  %v984_v18 = vld [vmem:[%s13586_s22 + $0x2a] sm:$0xff] }
  0x23   : > { %v983_v17 = vld [vmem:[%s13586_s22 + $0x22] sm:$0xff]  ;;  %v582_v19 = vpack.c.bf16 %v544_v13, %v543_v12  ;;  %v583_v21 = vpack.c.bf16 %v546_v15, %v545_v14  ;;  %v13686_v26 = vld [vmem:[%s16784_s1 + $0x14] sm:$0xf]  ;;  %v13691_v27 = vld [vmem:[%s16784_s1 + $0x18] sm:$0xf] }
  0x24   : > { %v1021_v23 = vpack.c.bf16 %v984_v18, %v983_v17  ;;  %v547_v25 = vld [vmem:[%s13586_s22 + $0x31] sm:$0xff]  ;;  %v986_v28 = vld [vmem:[%s13586_s22 + $0x3a] sm:$0xff]  ;;  %v987_v30 = vld [vmem:[%s13586_s22 + $0x42] sm:$0xff] }
  0x25   : > { %v985_v24 = vld [vmem:[%s13586_s22 + $0x32] sm:$0xff]  ;;  %v988_v31 = vld [vmem:[%s13586_s22 + $0x4a] sm:$0xff]  ;;  %v549_v32 = vld [vmem:[%s13586_s22 + $0x41] sm:$0xff] }
  0x26   : > { %12416 = vmatmul.mubr.msk.bf16.gmra.mxu0 %vm243_vm1, %v227_v46  ;;  %v548_v29 = vld [vmem:[%s13586_s22 + $0x39] sm:$0xff]  ;;  %v550_v33 = vld [vmem:[%s13586_s22 + $0x49] sm:$0xff]  ;;  %v1022_v34 = vpack.c.bf16 %v986_v28, %v985_v24  ;;  %v1023_v36 = vpack.c.bf16 %v988_v31, %v987_v30  ;;  %v551_v38 = vld [vmem:[%s13586_s22 + $0x51] sm:$0xff] }
  0x27   : > { %12436 = vmatmul.mubr.msk.bf16.gmra.mxu1 %vm243_vm1, %v237_v47  ;;  %12419 = vmatprep.mubr.msk.bf16.mxu0 %vm243_vm1, %v228_v48  ;;  %v584_v35 = vpack.c.bf16 %v548_v29, %v547_v25  ;;  %v585_v37 = vpack.c.bf16 %v550_v33, %v549_v32  ;;  %v989_v39 = vld [vmem:[%s13586_s22 + $0x52] sm:$0xff]  ;;  %v990_v40 = vld [vmem:[%s13586_s22 + $0x5a] sm:$0xff]  ;;  %v991_v42 = vld [vmem:[%s13586_s22 + $0x62] sm:$0xff] }
  0x28   : > { %12439 = vmatprep.mubr.msk.bf16.mxu1 %vm243_vm1, %v238_v49  ;;  %v552_v41 = vld [vmem:[%s13586_s22 + $0x59] sm:$0xff]  ;;  %v992_v43 = vld [vmem:[%s13586_s22 + $0x6a] sm:$0xff]  ;;  %v553_v44 = vld [vmem:[%s13586_s22 + $0x61] sm:$0xff]  ;;  %v1024_v46 = vpack.c.bf16 %v990_v40, %v989_v39 }
  0x29   : > { %v554_v45 = vld [vmem:[%s13586_s22 + $0x69] sm:$0xff]  ;;  %v586_v47 = vpack.c.bf16 %v552_v41, %v551_v38  ;;  %v1025_v48 = vpack.c.bf16 %v992_v43, %v991_v42  ;;  %v555_v50 = vld [vmem:[%s13586_s22 + $0x71] sm:$0xff]  ;;  %v994_v52 = vld [vmem:[%s13586_s22 + $0x7a] sm:$0xff] }
  0x2a   : > { %v587_v49 = vpack.c.bf16 %v554_v45, %v553_v44  ;;  %v993_v51 = vld [vmem:[%s13586_s22 + $0x72] sm:$0xff]  ;;  %v995_v54 = vld [vmem:[%s13586_s22 + $0x82] sm:$0xff]  ;;  %v996_v55 = vld [vmem:[%s13586_s22 + $0x8a] sm:$0xff] }
  0x2b   : > { %v556_v53 = vld [vmem:[%s13586_s22 + $0x79] sm:$0xff]  ;;  %v557_v56 = vld [vmem:[%s13586_s22 + $0x81] sm:$0xff]  ;;  %v558_v57 = vld [vmem:[%s13586_s22 + $0x89] sm:$0xff] }
  0x2c   : > { %v559_v62 = vld [vmem:[%s13586_s22 + $0x91] sm:$0xff]  ;;  %v998_v0 = vld [vmem:[%s13586_s22 + $0x9a] sm:$0xff]  ;;  %v999_v2 = vld [vmem:[%s13586_s22 + $0xa2] sm:$0xff] }
  0x2d   : > { %v997_v63 = vld [vmem:[%s13586_s22 + $0x92] sm:$0xff]  ;;  %v1000_v3 = vld [vmem:[%s13586_s22 + $0xaa] sm:$0xff]  ;;  %v561_v4 = vld [vmem:[%s13586_s22 + $0xa1] sm:$0xff] }
  0x2e   : > { %12420 = vmatmul.mubr.msk.bf16.gmra.mxu0 %vm243_vm1, %v229_v58  ;;  %v1026_v58 = vpack.c.bf16 %v994_v52, %v993_v51  ;;  %v560_v1 = vld [vmem:[%s13586_s22 + $0x99] sm:$0xff]  ;;  %v562_v5 = vld [vmem:[%s13586_s22 + $0xa9] sm:$0xff]  ;;  %v563_v10 = vld [vmem:[%s13586_s22 + $0xb1] sm:$0xff] }
  0x2f   : > { %12440 = vmatmul.mubr.msk.bf16.gmra.mxu1 %vm243_vm1, %v239_v59  ;;  %12423 = vmatprep.mubr.msk.bf16.mxu0 %vm243_vm1, %v230_v60  ;;  %v588_v59 = vpack.c.bf16 %v556_v53, %v555_v50  ;;  %v1027_v60 = vpack.c.bf16 %v996_v55, %v995_v54  ;;  %v1001_v11 = vld [vmem:[%s13586_s22 + $0xb2] sm:$0xff]  ;;  %v1002_v12 = vld [vmem:[%s13586_s22 + $0xba] sm:$0xff]  ;;  %v1003_v14 = vld [vmem:[%s13586_s22 + $0xc2] sm:$0xff] }
  0x30   : > { %12443 = vmatprep.mubr.msk.bf16.mxu1 %vm243_vm1, %v240_v61  ;;  %v589_v61 = vpack.c.bf16 %v558_v57, %v557_v56  ;;  %v564_v13 = vld [vmem:[%s13586_s22 + $0xb9] sm:$0xff]  ;;  %v1004_v15 = vld [vmem:[%s13586_s22 + $0xca] sm:$0xff]  ;;  %v1030_v18 = vpack.c.bf16 %v1002_v12, %v1001_v11  ;;  %v1007_v28 = vld [vmem:[%s13586_s22 + $0xe2] sm:$0xff] }
  0x31   : > { %v566_v17 = vld [vmem:[%s13586_s22 + $0xc9] sm:$0xff]  ;;  %v1006_v25 = vld [vmem:[%s13586_s22 + $0xda] sm:$0xff] }
  0x32   : > { %v568_v24 = vld [vmem:[%s13586_s22 + $0xd9] sm:$0xff]  ;;  %v1008_v29 = vld [vmem:[%s13586_s22 + $0xea] sm:$0xff]  ;;  %v569_v30 = vld [vmem:[%s13586_s22 + $0xe1] sm:$0xff] }
  0x33   : > { %v570_v31 = vld [vmem:[%s13586_s22 + $0xe9] sm:$0xff]  ;;  %v1010_v38 = vld [vmem:[%s13586_s22 + $0xfa] sm:$0xff] }
  0x34   : > { %v572_v39 = vld [vmem:[%s13586_s22 + $0xf9] sm:$0xff]  ;;  %v1011_v40 = vld [vmem:[%s13586_s22 + $0x102] sm:$0xff]  ;;  %v1012_v41 = vld [vmem:[%s13586_s22 + $0x10a] sm:$0xff] }
  0x35   : > { %v573_v42 = vld [vmem:[%s13586_s22 + $0x101] sm:$0xff]  ;;  %v574_v43 = vld [vmem:[%s13586_s22 + $0x109] sm:$0xff]  ;;  %v576_v51 = vld [vmem:[%s13586_s22 + $0x119] sm:$0xff] }
  0x36   : > { %12424 = vmatmul.mubr.msk.bf16.gmra.mxu0 %vm243_vm1, %v231_v6  ;;  %v1028_v6 = vpack.c.bf16 %v998_v0, %v997_v63  ;;  %v1014_v50 = vld [vmem:[%s13586_s22 + $0x11a] sm:$0xff]  ;;  %v1015_v52 = vld [vmem:[%s13586_s22 + $0x122] sm:$0xff]  ;;  %v1016_v53 = vld [vmem:[%s13586_s22 + $0x12a] sm:$0xff] }
  0x37   : > { %12444 = vmatmul.mubr.msk.bf16.gmra.mxu1 %vm243_vm1, %v241_v7  ;;  %12491 = vmatprep.mubr.msk.bf16.mxu0 %vm243_vm1, %v1019_v8  ;;  %v590_v7 = vpack.c.bf16 %v560_v1, %v559_v62  ;;  %v1029_v8 = vpack.c.bf16 %v1000_v3, %v999_v2  ;;  %v577_v54 = vld [vmem:[%s13586_s22 + $0x121] sm:$0xff]  ;;  %v578_v55 = vld [vmem:[%s13586_s22 + $0x129] sm:$0xff]  ;;  %v580_v63 = vld [vmem:[%s13586_s22 + $0x139] sm:$0xff] }
  0x38   : > { %12449 = vmatprep.mubr.msk.bf16.mxu1 %vm243_vm1, %v581_v9  ;;  %v591_v9 = vpack.c.bf16 %v562_v5, %v561_v4  ;;  %v1018_v62 = vld [vmem:[%s13586_s22 + $0x13a] sm:$0xff]  ;;  %v1855_v0 = vld [vmem:[%s13586_s22 + $0x4] sm:$0xff]  ;;  %v1856_v1 = vld [vmem:[%s13586_s22 + $0xc] sm:$0xff] }
  0x39   : > { %v1417_v2 = vld [vmem:[%s13586_s22 + $0x3] sm:$0xff]  ;;  %v1418_v3 = vld [vmem:[%s13586_s22 + $0xb] sm:$0xff]  ;;  %v1420_v11 = vld [vmem:[%s13586_s22 + $0x1b] sm:$0xff] }
  0x3a   : > { %v1421_v12 = vld [vmem:[%s13586_s22 + $0x23] sm:$0xff] }
  0x3e   : > { %12492 = vmatmul.mubr.msk.bf16.vlgmr.msra.gmra.mxu0 %vm243_vm1, %v1020_v16  ;;  %v565_v16 = vld [vmem:[%s13586_s22 + $0xc1] sm:$0xff] }
  0x3f   : > { %12450 = vmatmul.mubr.msk.bf16.vlgmr.msra.gmra.mxu1 %vm243_vm1, %v582_v19  ;;  %12574 = vmatpush3.bf16.msra.mxu0 %v1978_v20  ;;  %v592_v19 = vpack.c.bf16 %v564_v13, %v563_v10  ;;  %v1031_v20 = vpack.c.bf16 %v1004_v15, %v1003_v14  ;;  %v1419_v10 = vld [vmem:[%s13586_s22 + $0x13] sm:$0xff]  ;;  %v1422_v13 = vld [vmem:[%s13586_s22 + $0x2b] sm:$0xff] }
  0x40   : > { %12532 = vmatpush3.bf16.msra.mxu1 %v1540_v22  ;;  %12453 = vmatprep.mubr.msk.bf16.mxu1 %vm243_vm1, %v583_v21  ;;  %v593_v21 = vpack.c.bf16 %v566_v17, %v565_v16  ;;  %v567_v22 = vld [vmem:[%s13586_s22 + $0xd1] sm:$0xff]  ;;  %v1859_v15 = vld [vmem:[%s13586_s22 + $0x24] sm:$0xff]  ;;  %v1458_v17 = vpack.c.bf16 %v1420_v11, %v1419_v10  ;;  %v1878_v10 = vld [vmem:[%s13586_s22 + $0xbc] sm:$0xff] }
  0x41   : > { %12495 = vmatprep.mubr.msk.bf16.mxu0 %vm243_vm1, %v1021_v23  ;;  %13463 = vmatprep.subr.msk.bf16.mxu1 %vm304_vm0, %v13686_v26  ;;  %v1005_v23 = vld [vmem:[%s13586_s22 + $0xd2] sm:$0xff]  ;;  %v594_v33 = vpack.c.bf16 %v568_v24, %v567_v22  ;;  %v1424_v24 = vld [vmem:[%s13586_s22 + $0x3b] sm:$0xff] }
  0x42   : > { %13464 = vmatprep.subr.msk.bf16.mxu0 %vm304_vm0, %v13691_v27  ;;  %v1032_v32 = vpack.c.bf16 %v1006_v25, %v1005_v23  ;;  %v1860_v16 = vld [vmem:[%s13586_s22 + $0x2c] sm:$0xff]  ;;  %v13830_v23 = vld [vmem:[%s16784_s1 + $0x1c] sm:$0xf] }
  0x43   : > { %v1423_v22 = vld [vmem:[%s13586_s22 + $0x33] sm:$0xff]  ;;  %v1862_v25 = vld [vmem:[%s13586_s22 + $0x3c] sm:$0xff] }
  0x44   : > { %v1440_v11 = vld [vmem:[%s13586_s22 + $0xbb] sm:$0xff] }
  0x46   : > { %12496 = vmatmul.mubr.msk.bf16.gmra.mxu0 %vm243_vm1, %v1022_v34  ;;  %v1033_v34 = vpack.c.bf16 %v1008_v29, %v1007_v28  ;;  %v1863_v28 = vld [vmem:[%s13586_s22 + $0x44] sm:$0xff]  ;;  %v1864_v29 = vld [vmem:[%s13586_s22 + $0x4c] sm:$0xff] }
  0x47   : > { %12454 = vmatmul.mubr.msk.bf16.gmra.mxu1 %vm243_vm1, %v584_v35  ;;  %12499 = vmatprep.mubr.msk.bf16.mxu0 %vm243_vm1, %v1023_v36  ;;  %v595_v35 = vpack.c.bf16 %v570_v31, %v569_v30  ;;  %v571_v36 = vld [vmem:[%s13586_s22 + $0xf1] sm:$0xff]  ;;  %v1425_v30 = vld [vmem:[%s13586_s22 + $0x43] sm:$0xff] }
  0x48   : > { %12457 = vmatprep.mubr.msk.bf16.mxu1 %vm243_vm1, %v585_v37  ;;  %v1009_v37 = vld [vmem:[%s13586_s22 + $0xf2] sm:$0xff]  ;;  %v596_v45 = vpack.c.bf16 %v572_v39, %v571_v36  ;;  %v1428_v39 = vld [vmem:[%s13586_s22 + $0x5b] sm:$0xff] }
  0x49   : > { %v1034_v44 = vpack.c.bf16 %v1010_v38, %v1009_v37  ;;  %v1426_v31 = vld [vmem:[%s13586_s22 + $0x4b] sm:$0xff]  ;;  %v1427_v36 = vld [vmem:[%s13586_s22 + $0x53] sm:$0xff]  ;;  %v1866_v38 = vld [vmem:[%s13586_s22 + $0x5c] sm:$0xff] }
  0x4a   : > { %v1865_v37 = vld [vmem:[%s13586_s22 + $0x54] sm:$0xff] }
  0x4e   : > { %12500 = vmatmul.mubr.msk.bf16.gmra.mxu0 %vm243_vm1, %v1024_v46  ;;  %v1035_v46 = vpack.c.bf16 %v1012_v41, %v1011_v40  ;;  %v1867_v40 = vld [vmem:[%s13586_s22 + $0x64] sm:$0xff]  ;;  %v1868_v41 = vld [vmem:[%s13586_s22 + $0x6c] sm:$0xff] }
  0x4f   : > { %12458 = vmatmul.mubr.msk.bf16.gmra.mxu1 %vm243_vm1, %v586_v47  ;;  %12503 = vmatprep.mubr.msk.bf16.mxu0 %vm243_vm1, %v1025_v48  ;;  %v597_v47 = vpack.c.bf16 %v574_v43, %v573_v42  ;;  %v575_v48 = vld [vmem:[%s13586_s22 + $0x111] sm:$0xff]  ;;  %v1429_v42 = vld [vmem:[%s13586_s22 + $0x63] sm:$0xff] }
  0x50   : > { %12461 = vmatprep.mubr.msk.bf16.mxu1 %vm243_vm1, %v587_v49  ;;  %v1013_v49 = vld [vmem:[%s13586_s22 + $0x112] sm:$0xff]  ;;  %v598_v57 = vpack.c.bf16 %v576_v51, %v575_v48  ;;  %v1432_v51 = vld [vmem:[%s13586_s22 + $0x7b] sm:$0xff] }
  0x51   : > { %v1036_v56 = vpack.c.bf16 %v1014_v50, %v1013_v49  ;;  %v1430_v43 = vld [vmem:[%s13586_s22 + $0x6b] sm:$0xff]  ;;  %v1431_v48 = vld [vmem:[%s13586_s22 + $0x73] sm:$0xff]  ;;  %v1870_v50 = vld [vmem:[%s13586_s22 + $0x7c] sm:$0xff] }
  0x52   : > { %v1869_v49 = vld [vmem:[%s13586_s22 + $0x74] sm:$0xff] }
  0x56   : > { %12504 = vmatmul.mubr.msk.bf16.gmra.mxu0 %vm243_vm1, %v1026_v58  ;;  %v1037_v58 = vpack.c.bf16 %v1016_v53, %v1015_v52  ;;  %v1871_v52 = vld [vmem:[%s13586_s22 + $0x84] sm:$0xff]  ;;  %v1872_v53 = vld [vmem:[%s13586_s22 + $0x8c] sm:$0xff] }
  0x57   : > { %12462 = vmatmul.mubr.msk.bf16.gmra.mxu1 %vm243_vm1, %v588_v59  ;;  %12507 = vmatprep.mubr.msk.bf16.mxu0 %vm243_vm1, %v1027_v60  ;;  %v599_v59 = vpack.c.bf16 %v578_v55, %v577_v54  ;;  %v579_v60 = vld [vmem:[%s13586_s22 + $0x131] sm:$0xff]  ;;  %v1433_v54 = vld [vmem:[%s13586_s22 + $0x83] sm:$0xff] }
  0x58   : > { %12465 = vmatprep.mubr.msk.bf16.mxu1 %vm243_vm1, %v589_v61  ;;  %v1017_v61 = vld [vmem:[%s13586_s22 + $0x132] sm:$0xff]  ;;  %v600_v5 = vpack.c.bf16 %v580_v63, %v579_v60  ;;  %v1436_v63 = vld [vmem:[%s13586_s22 + $0x9b] sm:$0xff] }
  0x59   : > { %v1038_v4 = vpack.c.bf16 %v1018_v62, %v1017_v61  ;;  %v1434_v55 = vld [vmem:[%s13586_s22 + $0x8b] sm:$0xff]  ;;  %v1435_v60 = vld [vmem:[%s13586_s22 + $0x93] sm:$0xff]  ;;  %v1874_v62 = vld [vmem:[%s13586_s22 + $0x9c] sm:$0xff] }
  0x5a   : > { %v1873_v61 = vld [vmem:[%s13586_s22 + $0x94] sm:$0xff] }
  0x5e   : > { %12508 = vmatmul.mubr.msk.bf16.gmra.mxu0 %vm243_vm1, %v1028_v6  ;;  %v1895_v6 = vpack.c.bf16 %v1856_v1, %v1855_v0  ;;  %v1875_v0 = vld [vmem:[%s13586_s22 + $0xa4] sm:$0xff]  ;;  %v1876_v1 = vld [vmem:[%s13586_s22 + $0xac] sm:$0xff] }
  0x5f   : > { %12466 = vmatmul.mubr.msk.bf16.gmra.mxu1 %vm243_vm1, %v590_v7  ;;  %12511 = vmatprep.mubr.msk.bf16.mxu0 %vm243_vm1, %v1029_v8  ;;  %v1457_v7 = vpack.c.bf16 %v1418_v3, %v1417_v2  ;;  %v1857_v8 = vld [vmem:[%s13586_s22 + $0x14] sm:$0xff]  ;;  %v1437_v2 = vld [vmem:[%s13586_s22 + $0xa3] sm:$0xff]  ;;  %v1438_v3 = vld [vmem:[%s13586_s22 + $0xab] sm:$0xff] }
  0x60   : > { %12469 = vmatprep.mubr.msk.bf16.mxu1 %vm243_vm1, %v591_v9  ;;  %v1858_v9 = vld [vmem:[%s13586_s22 + $0x1c] sm:$0xff] }
  0x61   : > { %v13814_v14 = vpack.c.bf16 %v1858_v9, %v1857_v8  ;;  %v1439_v8 = vld [vmem:[%s13586_s22 + $0xb3] sm:$0xff] }
  0x62   : > { %v1877_v9 = vld [vmem:[%s13586_s22 + $0xb4] sm:$0xff] }
  0x66   : > { %12512 = vmatmul.mubr.msk.bf16.gmra.mxu0 %vm243_vm1, %v1030_v18  ;;  %v2854_v18 = vsel %vm304_vm0, %v13691_v27, 0  ;;  %v1861_v27 = vld [vmem:[%s13586_s22 + $0x34] sm:$0xff] }
  0x67   : > { %12470 = vmatmul.mubr.msk.bf16.gmra.mxu1 %vm243_vm1, %v592_v19  ;;  %12515 = vmatprep.mubr.msk.bf16.mxu0 %vm243_vm1, %v1031_v20  ;;  %v1459_v19 = vpack.c.bf16 %v1422_v13, %v1421_v12  ;;  %v2416_v20 = vsel %vm304_vm0, %v13686_v26, 0  ;;  %v13838_v26 = vld [vmem:[%s16784_s1 + $0x20] sm:$0xf]  ;;  %v1879_v12 = vld [vmem:[%s13586_s22 + $0xc4] sm:$0xff]  ;;  %v1880_v13 = vld [vmem:[%s13586_s22 + $0xcc] sm:$0xff] }
  0x68   : > { %12473 = vmatprep.mubr.msk.bf16.mxu1 %vm243_vm1, %v593_v21  ;;  %v13822_v21 = vpack.c.bf16 %v1860_v16, %v1859_v15  ;;  %v1441_v15 = vld [vmem:[%s13586_s22 + $0xc3] sm:$0xff]  ;;  %v1442_v16 = vld [vmem:[%s13586_s22 + $0xcb] sm:$0xff] }
  0x6e   : > { %12516 = vmatmul.mubr.msk.bf16.gmra.mxu0 %vm243_vm1, %v1032_v32  ;;  %v13850_v32 = vpack.c.bf16 %v1862_v25, %v1861_v27  ;;  %v1881_v27 = vld [vmem:[%s13586_s22 + $0xd4] sm:$0xff]  ;;  %v1882_v25 = vld [vmem:[%s13586_s22 + $0xdc] sm:$0xff] }
  0x6f   : > { %12474 = vmatmul.mubr.msk.bf16.gmra.mxu1 %vm243_vm1, %v594_v33  ;;  %12519 = vmatprep.mubr.msk.bf16.mxu0 %vm243_vm1, %v1033_v34  ;;  %v1460_v33 = vpack.c.bf16 %v1424_v24, %v1423_v22  ;;  %v13854_v34 = vpack.c.bf16 %v1864_v29, %v1863_v28  ;;  %v1443_v22 = vld [vmem:[%s13586_s22 + $0xd3] sm:$0xff]  ;;  %v1444_v24 = vld [vmem:[%s13586_s22 + $0xdb] sm:$0xff]  ;;  %v1883_v28 = vld [vmem:[%s13586_s22 + $0xe4] sm:$0xff] }
  0x70   : > { %12477 = vmatprep.mubr.msk.bf16.mxu1 %vm243_vm1, %v595_v35  ;;  %v1461_v35 = vpack.c.bf16 %v1426_v31, %v1425_v30  ;;  %v1884_v29 = vld [vmem:[%s13586_s22 + $0xec] sm:$0xff]  ;;  %v1445_v30 = vld [vmem:[%s13586_s22 + $0xe3] sm:$0xff] }
  0x71   : > { %v1446_v31 = vld [vmem:[%s13586_s22 + $0xeb] sm:$0xff] }
  0x76   : > { %12520 = vmatmul.mubr.msk.bf16.gmra.mxu0 %vm243_vm1, %v1034_v44  ;;  %v13870_v44 = vpack.c.bf16 %v1866_v38, %v1865_v37  ;;  %v1471_v37 = vpack.c.bf16 %v1446_v31, %v1445_v30  ;;  %v1447_v38 = vld [vmem:[%s13586_s22 + $0xf3] sm:$0xff]  ;;  %v3730_v31 = vsel %vm304_vm0, %v13838_v26, 0 }
  0x77   : > { %12478 = vmatmul.mubr.msk.bf16.gmra.mxu1 %vm243_vm1, %v596_v45  ;;  %12523 = vmatprep.mubr.msk.bf16.mxu0 %vm243_vm1, %v1035_v46  ;;  %v1462_v45 = vpack.c.bf16 %v1428_v39, %v1427_v36  ;;  %v13872_v46 = vpack.c.bf16 %v1868_v41, %v1867_v40  ;;  %v13944_v36 = vpack.c.bf16 %v1884_v29, %v1883_v28  ;;  %v1885_v39 = vld [vmem:[%s13586_s22 + $0xf4] sm:$0xff]  ;;  %v1886_v40 = vld [vmem:[%s13586_s22 + $0xfc] sm:$0xff] }
  0x78   : > { %12481 = vmatprep.mubr.msk.bf16.mxu1 %vm243_vm1, %v597_v47  ;;  %v1463_v47 = vpack.c.bf16 %v1430_v43, %v1429_v42  ;;  %v1448_v41 = vld [vmem:[%s13586_s22 + $0xfb] sm:$0xff]  ;;  %v1887_v42 = vld [vmem:[%s13586_s22 + $0x104] sm:$0xff]  ;;  %v1888_v43 = vld [vmem:[%s13586_s22 + $0x10c] sm:$0xff] }
  0x79   : > { %v2736_v28 = vld [vmem:[%s13586_s22 + $0x3d] sm:$0xff] }
  0x7e   : > { %12524 = vmatmul.mubr.msk.bf16.gmra.mxu0 %vm243_vm1, %v1036_v56  ;;  %v13888_v56 = vpack.c.bf16 %v1870_v50, %v1869_v49  ;;  %v1472_v49 = vpack.c.bf16 %v1448_v41, %v1447_v38  ;;  %v13962_v50 = vpack.c.bf16 %v1888_v43, %v1887_v42  ;;  %v2738_v41 = vld [vmem:[%s13586_s22 + $0x4d] sm:$0xff]  ;;  %v2739_v43 = vld [vmem:[%s13586_s22 + $0x55] sm:$0xff] }
  0x7f   : > { %12482 = vmatmul.mubr.msk.bf16.gmra.mxu1 %vm243_vm1, %v598_v57  ;;  %12527 = vmatprep.mubr.msk.bf16.mxu0 %vm243_vm1, %v1037_v58  ;;  %v1464_v57 = vpack.c.bf16 %v1432_v51, %v1431_v48  ;;  %v13890_v58 = vpack.c.bf16 %v1872_v53, %v1871_v52  ;;  %v13960_v48 = vpack.c.bf16 %v1886_v40, %v1885_v39  ;;  %v1451_v52 = vld [vmem:[%s13586_s22 + $0x113] sm:$0xff]  ;;  %v14032_v39 = vld [vmem:[%s16784_s1 + $0x24] sm:$0xf] }
  0x80   : > { %12485 = vmatprep.mubr.msk.bf16.mxu1 %vm243_vm1, %v599_v59  ;;  %v1465_v59 = vpack.c.bf16 %v1434_v55, %v1433_v54  ;;  %v1889_v53 = vld [vmem:[%s13586_s22 + $0x114] sm:$0xff]  ;;  %v1890_v54 = vld [vmem:[%s13586_s22 + $0x11c] sm:$0xff] }
  0x81   : > { %v1452_v55 = vld [vmem:[%s13586_s22 + $0x11b] sm:$0xff] }
  0x86   : > { %12528 = vmatmul.mubr.msk.bf16.gmra.mxu0 %vm243_vm1, %v1038_v4  ;;  %v13906_v4 = vpack.c.bf16 %v1874_v62, %v1873_v61  ;;  %v1454_v61 = vld [vmem:[%s13586_s22 + $0x12b] sm:$0xff]  ;;  %v13978_v62 = vpack.c.bf16 %v1890_v54, %v1889_v53 }
  0x87   : > { %12486 = vmatmul.mubr.msk.bf16.gmra.mxu1 %vm243_vm1, %v600_v5  ;;  %12575 = vmatprep.mubr.msk.bf16.mxu0 %vm243_vm1, %v1895_v6  ;;  %v1466_v5 = vpack.c.bf16 %v1436_v63, %v1435_v60  ;;  %v13908_v6 = vpack.c.bf16 %v1876_v1, %v1875_v0  ;;  %v1453_v60 = vld [vmem:[%s13586_s22 + $0x123] sm:$0xff]  ;;  %v1474_v63 = vpack.c.bf16 %v1452_v55, %v1451_v52 }
  0x88   : > { %12533 = vmatprep.mubr.msk.bf16.mxu1 %vm243_vm1, %v1457_v7  ;;  %v1467_v7 = vpack.c.bf16 %v1438_v3, %v1437_v2  ;;  %v1475_v1 = vpack.c.bf16 %v1454_v61, %v1453_v60  ;;  %v1455_v2 = vld [vmem:[%s13586_s22 + $0x133] sm:$0xff] }
  0x89   : > { %v1893_v3 = vld [vmem:[%s13586_s22 + $0x134] sm:$0xff] }
  0x8a   : > { %v2743_v61 = vld [vmem:[%s13586_s22 + $0x75] sm:$0xff] }
  0x8e   : > { %12576 = vmatmul.mubr.msk.bf16.vlgmr.msra.gmra.mxu0 %vm243_vm1, %v13814_v14 }
  0x8f   : > { %12534 = vmatmul.mubr.msk.bf16.vlgmr.msra.gmra.mxu1 %vm243_vm1, %v1458_v17  ;;  %12658 = vmatpush3.bf16.msra.mxu0 %v2854_v18  ;;  %v13924_v17 = vpack.c.bf16 %v1878_v10, %v1877_v9  ;;  %v1468_v18 = vpack.c.bf16 %v1440_v11, %v1439_v8  ;;  %v2731_v8 = vld [vmem:[%s13586_s22 + $0x15] sm:$0xff]  ;;  %v2732_v9 = vld [vmem:[%s13586_s22 + $0x1d] sm:$0xff] }
  0x90   : > { %12616 = vmatpush3.bf16.msra.mxu1 %v2416_v20  ;;  %12537 = vmatprep.mubr.msk.bf16.mxu1 %vm243_vm1, %v1459_v19  ;;  %v13926_v19 = vpack.c.bf16 %v1880_v13, %v1879_v12  ;;  %v1469_v20 = vpack.c.bf16 %v1442_v16, %v1441_v15  ;;  %v2771_v12 = vpack.c.bf16 %v2732_v9, %v2731_v8  ;;  %v2733_v16 = vld [vmem:[%s13586_s22 + $0x25] sm:$0xff] }
  0x91   : > { %12579 = vmatprep.mubr.msk.bf16.mxu0 %vm243_vm1, %v13822_v21  ;;  %13465 = vmatprep.subr.msk.bf16.mxu1 %vm304_vm0, %v13830_v23 }
  0x92   : > { %13466 = vmatprep.subr.msk.bf16.mxu0 %vm304_vm0, %v13838_v26  ;;  %v2737_v26 = vld [vmem:[%s13586_s22 + $0x45] sm:$0xff] }
  0x96   : > { %12580 = vmatmul.mubr.msk.bf16.gmra.mxu0 %vm243_vm1, %v13850_v32 }
  0x97   : > { %12538 = vmatmul.mubr.msk.bf16.gmra.mxu1 %vm243_vm1, %v1460_v33  ;;  %12583 = vmatprep.mubr.msk.bf16.mxu0 %vm243_vm1, %v13854_v34  ;;  %v13942_v33 = vpack.c.bf16 %v1882_v25, %v1881_v27 }
  0x98   : > { %12541 = vmatprep.mubr.msk.bf16.mxu1 %vm243_vm1, %v1461_v35  ;;  %v1470_v35 = vpack.c.bf16 %v1444_v24, %v1443_v22  ;;  %v2735_v24 = vld [vmem:[%s13586_s22 + $0x35] sm:$0xff] }
  0x9e   : > { %12584 = vmatmul.mubr.msk.bf16.gmra.mxu0 %vm243_vm1, %v13870_v44 }
  0x9f   : > { %12542 = vmatmul.mubr.msk.bf16.gmra.mxu1 %vm243_vm1, %v1462_v45  ;;  %12587 = vmatprep.mubr.msk.bf16.mxu0 %vm243_vm1, %v13872_v46  ;;  %v1449_v45 = vld [vmem:[%s13586_s22 + $0x103] sm:$0xff] }
  0xa0   : > { %12545 = vmatprep.mubr.msk.bf16.mxu1 %vm243_vm1, %v1463_v47  ;;  %v1450_v47 = vld [vmem:[%s13586_s22 + $0x10b] sm:$0xff] }
  0xa1   : > { %v1473_v51 = vpack.c.bf16 %v1450_v47, %v1449_v45  ;;  %v2740_v45 = vld [vmem:[%s13586_s22 + $0x5d] sm:$0xff] }
  0xa6   : > { %12588 = vmatmul.mubr.msk.bf16.gmra.mxu0 %vm243_vm1, %v13888_v56 }
  0xa7   : > { %12546 = vmatmul.mubr.msk.bf16.gmra.mxu1 %vm243_vm1, %v1464_v57  ;;  %12591 = vmatprep.mubr.msk.bf16.mxu0 %vm243_vm1, %v13890_v58  ;;  %v1891_v57 = vld [vmem:[%s13586_s22 + $0x124] sm:$0xff] }
  0xa8   : > { %12549 = vmatprep.mubr.msk.bf16.mxu1 %vm243_vm1, %v1465_v59  ;;  %v1892_v59 = vld [vmem:[%s13586_s22 + $0x12c] sm:$0xff] }
  0xa9   : > { %v13980_v0 = vpack.c.bf16 %v1892_v59, %v1891_v57  ;;  %v2741_v57 = vld [vmem:[%s13586_s22 + $0x65] sm:$0xff]  ;;  %v2742_v59 = vld [vmem:[%s13586_s22 + $0x6d] sm:$0xff] }
  0xae   : > { %12592 = vmatmul.mubr.msk.bf16.gmra.mxu0 %vm243_vm1, %v13906_v4 }
  0xaf   : > { %12550 = vmatmul.mubr.msk.bf16.gmra.mxu1 %vm243_vm1, %v1466_v5  ;;  %12595 = vmatprep.mubr.msk.bf16.mxu0 %vm243_vm1, %v13908_v6  ;;  %v1894_v5 = vld [vmem:[%s13586_s22 + $0x13c] sm:$0xff] }
  0xb0   : > { %12553 = vmatprep.mubr.msk.bf16.mxu1 %vm243_vm1, %v1467_v7  ;;  %v1456_v7 = vld [vmem:[%s13586_s22 + $0x13b] sm:$0xff]  ;;  %v13994_v10 = vpack.c.bf16 %v1894_v5, %v1893_v3 }
  0xb1   : > { %v1476_v11 = vpack.c.bf16 %v1456_v7, %v1455_v2 }
  0xb6   : > { %12596 = vmatmul.mubr.msk.bf16.gmra.mxu0 %vm243_vm1, %v13924_v17 }
  0xb7   : > { %12554 = vmatmul.mubr.msk.bf16.gmra.mxu1 %vm243_vm1, %v1468_v18  ;;  %12599 = vmatprep.mubr.msk.bf16.mxu0 %vm243_vm1, %v13926_v19  ;;  %v2734_v18 = vld [vmem:[%s13586_s22 + $0x2d] sm:$0xff] }
  0xb8   : > { %12557 = vmatprep.mubr.msk.bf16.mxu1 %vm243_vm1, %v1469_v20  ;;  %v2772_v25 = vpack.c.bf16 %v2734_v18, %v2733_v16  ;;  %v2747_v18 = vld [vmem:[%s13586_s22 + $0x95] sm:$0xff] }
  0xbe   : > { %12600 = vmatmul.mubr.msk.bf16.gmra.mxu0 %vm243_vm1, %v13942_v33 }
  0xbf   : > { %12558 = vmatmul.mubr.msk.bf16.gmra.mxu1 %vm243_vm1, %v1470_v35  ;;  %12603 = vmatprep.mubr.msk.bf16.mxu0 %vm243_vm1, %v13944_v36 }
  0xc0   : > { %12561 = vmatprep.mubr.msk.bf16.mxu1 %vm243_vm1, %v1471_v37  ;;  %v2773_v37 = vpack.c.bf16 %v2736_v28, %v2735_v24 }
  0xc6   : > { %12604 = vmatmul.mubr.msk.bf16.gmra.mxu0 %vm243_vm1, %v13960_v48 }
  0xc7   : > { %12562 = vmatmul.mubr.msk.bf16.gmra.mxu1 %vm243_vm1, %v1472_v49  ;;  %12607 = vmatprep.mubr.msk.bf16.mxu0 %vm243_vm1, %v13962_v50  ;;  %v2774_v49 = vpack.c.bf16 %v2738_v41, %v2737_v26 }
  0xc8   : > { %12565 = vmatprep.mubr.msk.bf16.mxu1 %vm243_vm1, %v1473_v51  ;;  %v2775_v51 = vpack.c.bf16 %v2740_v45, %v2739_v43  ;;  %v2749_v43 = vld [vmem:[%s13586_s22 + $0xa5] sm:$0xff]  ;;  %v2750_v45 = vld [vmem:[%s13586_s22 + $0xad] sm:$0xff] }
  0xce   : > { %12608 = vmatmul.mubr.msk.bf16.gmra.mxu0 %vm243_vm1, %v13978_v62 }
  0xcf   : > { %12566 = vmatmul.mubr.msk.bf16.gmra.mxu1 %vm243_vm1, %v1474_v63  ;;  %12611 = vmatprep.mubr.msk.bf16.mxu0 %vm243_vm1, %v13980_v0  ;;  %v2744_v63 = vld [vmem:[%s13586_s22 + $0x7d] sm:$0xff] }
  0xd0   : > { %12569 = vmatprep.mubr.msk.bf16.mxu1 %vm243_vm1, %v1475_v1  ;;  %v2777_v5 = vpack.c.bf16 %v2744_v63, %v2743_v61  ;;  %v2780_v63 = vpack.c.bf16 %v2750_v45, %v2749_v43  ;;  %v2755_v43 = vld [vmem:[%s13586_s22 + $0xd5] sm:$0xff]  ;;  %v2756_v45 = vld [vmem:[%s13586_s22 + $0xdd] sm:$0xff] }
  0xd6   : > { %v13996_v13 = vpop.f32.mrf.mxu0  ;;  %12612 = vmatmul.mubr.msk.bf16.gmra.mxu0 %vm243_vm1, %v13994_v10 }
  0xd7   : > { %v14000_v15 = vpop.f32.mrf.mxu1  ;;  %12570 = vmatmul.mubr.msk.bf16.gmra.mxu1 %vm243_vm1, %v1476_v11  ;;  %12659 = vmatprep.mubr.msk.bf16.mxu0 %vm243_vm1, %v2771_v12  ;;  %v2745_v11 = vld [vmem:[%s13586_s22 + $0x85] sm:$0xff]  ;;  %v2746_v12 = vld [vmem:[%s13586_s22 + $0x8d] sm:$0xff] }
  0xd8   : > { %v14006_v20 = vpop.f32.mrf.mxu0  ;;  %12617 = vmatprep.mubr.msk.bf16.mxu1 %vm243_vm1, %v13814_v14  ;;  %v3292_v14 = vsel %vm304_vm0, %v13830_v23, 0  ;;  %v14043_v23 = vld [vmem:[%s16784_s1 + $0x28] sm:$0xf] }
  0xd9   : > { %v14010_v22 = vpop.f32.mrf.mxu1 }
  0xda   : > { %v14012_v27 = vpop.f32.mrf.mxu0 }
  0xdb   : > { %v14016_v29 = vpop.f32.mrf.mxu1 }
  0xdc   : > { %v14018_v30 = vpop.f32.mrf.mxu0 }
  0xdd   : > { %v14022_v35 = vpop.f32.mrf.mxu1 }
  0xde   : > { %v14026_v38 = vpop.f32.mrf.mxu0  ;;  %12660 = vmatmul.mubr.msk.bf16.vlgmr.msra.gmra.mxu0 %vm243_vm1, %v2772_v25  ;;  %v2748_v25 = vld [vmem:[%s13586_s22 + $0x9d] sm:$0xff] }
  0xdf   : > { %v14034_v40 = vpop.f32.mrf.mxu1  ;;  %12618 = vmatmul.mubr.msk.bf16.vlgmr.msra.gmra.mxu1 %vm243_vm1, %v13822_v21  ;;  %12742 = vmatpush3.bf16.msra.mxu0 %v3730_v31 }
  0xe0   : > { %12700 = vmatpush3.bf16.msra.mxu1 %v3292_v14  ;;  %v14045_v42 = vpop.f32.mrf.mxu0  ;;  %12621 = vmatprep.mubr.msk.bf16.mxu1 %vm243_vm1, %v13850_v32  ;;  %v2779_v14 = vpack.c.bf16 %v2748_v25, %v2747_v18  ;;  %v2753_v18 = vld [vmem:[%s13586_s22 + $0xc5] sm:$0xff]  ;;  %v2754_v25 = vld [vmem:[%s13586_s22 + $0xcd] sm:$0xff] }
  0xe1   : > { %v14051_v47 = vpop.f32.mrf.mxu1  ;;  %12663 = vmatprep.mubr.msk.bf16.mxu0 %vm243_vm1, %v2773_v37  ;;  %13467 = vmatprep.subr.msk.bf16.mxu1 %vm304_vm0, %v14032_v39 }
  0xe2   : > { %v14056_v21 = vpop.f32.mrf.mxu0  ;;  %13468 = vmatprep.subr.msk.bf16.mxu0 %vm304_vm0, %v14043_v23 }
  0xe3   : > { %v14060_v32 = vpop.f32.mrf.mxu1 }
  0xe4   : > { %v14062_v52 = vpop.f32.mrf.mxu0 }
  0xe5   : > { %v14064_v53 = vpop.f32.mrf.mxu1 }
  0xe6   : > { %v14066_v54 = vpop.f32.mrf.mxu0  ;;  %12664 = vmatmul.mubr.msk.bf16.gmra.mxu0 %vm243_vm1, %v2774_v49 }
  0xe7   : > { %v14069_v55 = vpop.f32.mrf.mxu1  ;;  %12622 = vmatmul.mubr.msk.bf16.gmra.mxu1 %vm243_vm1, %v13854_v34  ;;  %12667 = vmatprep.mubr.msk.bf16.mxu0 %vm243_vm1, %v2775_v51  ;;  %v2776_v34 = vpack.c.bf16 %v2742_v59, %v2741_v57  ;;  %v2751_v51 = vld [vmem:[%s13586_s22 + $0xb5] sm:$0xff]  ;;  %v2752_v57 = vld [vmem:[%s13586_s22 + $0xbd] sm:$0xff] }
  0xe8   : > { %v14076_v60 = vpop.f32.mrf.mxu0  ;;  %12625 = vmatprep.mubr.msk.bf16.mxu1 %vm243_vm1, %v13870_v44 }
  0xe9   : > { %v14082_v1 = vpop.f32.mrf.mxu1 }
  0xea   : > { %v14084_v2 = vpop.f32.mrf.mxu0 }
  0xeb   : > { %v14086_v3 = vpop.f32.mrf.mxu1 }
  0xec   : > { %v14088_v7 = vpop.f32.mrf.mxu0 }
  0xed   : > { %v14090_v8 = vpop.f32.mrf.mxu1 }
  0xee   : > { %v14092_v9 = vpop.f32.mrf.mxu0  ;;  %12668 = vmatmul.mubr.msk.bf16.gmra.mxu0 %vm243_vm1, %v2776_v34  ;;  %v2781_v34 = vpack.c.bf16 %v2752_v57, %v2751_v51 }
  0xef   : > { %v14095_v44 = vpop.f32.mrf.mxu1  ;;  %12626 = vmatmul.mubr.msk.bf16.gmra.mxu1 %vm243_vm1, %v13872_v46  ;;  %12671 = vmatprep.mubr.msk.bf16.mxu0 %vm243_vm1, %v2777_v5  ;;  %v2778_v46 = vpack.c.bf16 %v2746_v12, %v2745_v11 }
  0xf0   : > { %v14102_v16 = vpop.f32.mrf.mxu0  ;;  %12629 = vmatprep.mubr.msk.bf16.mxu1 %vm243_vm1, %v13888_v56 }
  0xf1   : > { %v14108_v24 = vpop.f32.mrf.mxu1 }
  0xf2   : > { %v14110_v28 = vpop.f32.mrf.mxu0 }
  0xf3   : > { %v14112_v31 = vpop.f32.mrf.mxu1 }
  0xf4   : > { %v14114_v37 = vpop.f32.mrf.mxu0 }
  0xf5   : > { %v14116_v26 = vpop.f32.mrf.mxu1 }
  0xf6   : > { %v14118_v41 = vpop.f32.mrf.mxu0  ;;  %12672 = vmatmul.mubr.msk.bf16.gmra.mxu0 %vm243_vm1, %v2778_v46 }
  0xf7   : > { %v14121_v56 = vpop.f32.mrf.mxu1  ;;  %12630 = vmatmul.mubr.msk.bf16.gmra.mxu1 %vm243_vm1, %v13890_v58  ;;  %12675 = vmatprep.mubr.msk.bf16.mxu0 %vm243_vm1, %v2779_v14 }
  0xf8   : > { %16794 = vst [vmem:[#allocation3_spill] sm:$0xff] %v14121_v56  ;;  %v14128_v49 = vpop.f32.mrf.mxu0  ;;  %12633 = vmatprep.mubr.msk.bf16.mxu1 %vm243_vm1, %v13906_v4 }
  0xf9   : > { %v14134_v59 = vpop.f32.mrf.mxu1 }
  0xfa   : > { %16795 = vst [vmem:[#allocation4_spill] sm:$0xff] %v14134_v59  ;;  %v14136_v61 = vpop.f32.mrf.mxu0 }
  0xfb   : > { %v14138_v58 = vpop.f32.mrf.mxu1 }
  0xfc   : > { %16796 = vst [vmem:[#allocation5_spill] sm:$0xff] %v14138_v58  ;;  %v14140_v5 = vpop.f32.mrf.mxu0  ;;  %v2783_v58 = vpack.c.bf16 %v2756_v45, %v2755_v43 }
  0xfd   : > { %v14142_v11 = vpop.f32.mrf.mxu1 }
  0xfe   : > { %16797 = vst [vmem:[#allocation6_spill] sm:$0xff] %v14142_v11  ;;  %v12493_v12 = vpop.f32.mrf.mxu0  ;;  %12676 = vmatmul.mubr.msk.bf16.gmra.mxu0 %vm243_vm1, %v2780_v63 }
  0xff   : > { %v12451_v4 = vpop.f32.mrf.mxu1  ;;  %12634 = vmatmul.mubr.msk.bf16.gmra.mxu1 %vm243_vm1, %v13908_v6  ;;  %12679 = vmatprep.mubr.msk.bf16.mxu0 %vm243_vm1, %v2781_v34  ;;  %v2782_v6 = vpack.c.bf16 %v2754_v25, %v2753_v18  ;;  %v2757_v18 = vld [vmem:[%s13586_s22 + $0xe5] sm:$0xff]  ;;  %v2758_v25 = vld [vmem:[%s13586_s22 + $0xed] sm:$0xff] }
 0x100   : > { %v901_v46 = vadd.f32 %v12451_v4, %v13996_v13  ;;  %v1138_v14 = vpop.f32.mrf.mxu0  ;;  %12637 = vmatprep.mubr.msk.bf16.mxu1 %vm243_vm1, %v13924_v17 }
 0x101   : > { %v700_v51 = vpop.f32.mrf.mxu1 }
 0x102   : > { %v14155_v57 = vadd.f32 %v12493_v12, %v901_v46  ;;  %v899_v63 = vadd.f32 %v700_v51, %v14006_v20  ;;  %v12494_v11 = vpop.f32.mrf.mxu0 }
 0x103   : > { %v12452_v34 = vpop.f32.mrf.mxu1 }
 0x104   : > { %v14158_v59 = vadd.f32 %v1138_v14, %v899_v63  ;;  %v902_v13 = vadd.f32 %v12452_v34, %v14012_v27  ;;  %v1141_v4 = vpop.f32.mrf.mxu0 }
 0x105   : > { %v703_v17 = vpop.f32.mrf.mxu1 }
 0x106   : > { %v14161_v56 = vadd.f32 %v12494_v11, %v902_v13  ;;  %v900_v12 = vadd.f32 %v703_v17, %v14018_v30  ;;  %v12497_v46 = vpop.f32.mrf.mxu0  ;;  %12680 = vmatmul.mubr.msk.bf16.gmra.mxu0 %vm243_vm1, %v2782_v6  ;;  %v2759_v30 = vld [vmem:[%s13586_s22 + $0xf5] sm:$0xff]  ;;  %v2760_v11 = vld [vmem:[%s13586_s22 + $0xfd] sm:$0xff] }
 0x107   : > { %v12455_v20 = vpop.f32.mrf.mxu1  ;;  %12638 = vmatmul.mubr.msk.bf16.gmra.mxu1 %vm243_vm1, %v13926_v19  ;;  %12683 = vmatprep.mubr.msk.bf16.mxu0 %vm243_vm1, %v2783_v58  ;;  %v2784_v58 = vpack.c.bf16 %v2758_v25, %v2757_v18  ;;  %v2785_v34 = vpack.c.bf16 %v2760_v11, %v2759_v30  ;;  %v2762_v18 = vld [vmem:[%s13586_s22 + $0x10d] sm:$0xff] }
 0x108   : > { %v14170_v27 = vadd.f32 %v1141_v4, %v900_v12  ;;  %v905_v14 = vadd.f32 %v12455_v20, %v14026_v38  ;;  %v1154_v43 = vpop.f32.mrf.mxu0  ;;  %12641 = vmatprep.mubr.msk.bf16.mxu1 %vm243_vm1, %v13942_v33  ;;  %v2761_v20 = vld [vmem:[%s13586_s22 + $0x105] sm:$0xff] }
 0x109   : > { %v716_v45 = vpop.f32.mrf.mxu1 }
 0x10a   : > { %v14177_v51 = vadd.f32 %v12497_v46, %v905_v14  ;;  %v903_v63 = vadd.f32 %v716_v45, %v14045_v42  ;;  %v12498_v19 = vpop.f32.mrf.mxu0 }
 0x10b   : > { %v12456_v6 = vpop.f32.mrf.mxu1 }
 0x10c   : > { %v14180_v13 = vadd.f32 %v1154_v43, %v903_v63  ;;  %v906_v38 = vadd.f32 %v12456_v6, %v14056_v21  ;;  %v1157_v4 = vpop.f32.mrf.mxu0  ;;  %v2764_v43 = vld [vmem:[%s13586_s22 + $0x11d] sm:$0xff]  ;;  %v2786_v63 = vpack.c.bf16 %v2762_v18, %v2761_v20 }
 0x10d   : > { %v719_v33 = vpop.f32.mrf.mxu1  ;;  %v2768_v18 = vld [vmem:[%s13586_s22 + $0x13d] sm:$0xff] }
 0x10e   : > { %v14183_v17 = vadd.f32 %v12498_v19, %v906_v38  ;;  %v904_v12 = vadd.f32 %v719_v33, %v14062_v52  ;;  %v12501_v46 = vpop.f32.mrf.mxu0  ;;  %12684 = vmatmul.mubr.msk.bf16.gmra.mxu0 %vm243_vm1, %v2784_v58  ;;  %v2763_v52 = vld [vmem:[%s13586_s22 + $0x115] sm:$0xff] }
 0x10f   : > { %v12459_v42 = vpop.f32.mrf.mxu1  ;;  %12642 = vmatmul.mubr.msk.bf16.gmra.mxu1 %vm243_vm1, %v13944_v36  ;;  %12687 = vmatprep.mubr.msk.bf16.mxu0 %vm243_vm1, %v2785_v34  ;;  %v2787_v58 = vpack.c.bf16 %v2764_v43, %v2763_v52 }
 0x110   : > { %v14192_v21 = vadd.f32 %v1157_v4, %v904_v12  ;;  %v909_v25 = vadd.f32 %v12459_v42, %v14066_v54  ;;  %v1170_v14 = vpop.f32.mrf.mxu0  ;;  %12645 = vmatprep.mubr.msk.bf16.mxu1 %vm243_vm1, %v13960_v48  ;;  %v2765_v12 = vld [vmem:[%s13586_s22 + $0x125] sm:$0xff] }
 0x111   : > { %v732_v30 = vpop.f32.mrf.mxu1 }
 0x112   : > { %v14199_v11 = vadd.f32 %v12501_v46, %v909_v25  ;;  %v907_v45 = vadd.f32 %v732_v30, %v14076_v60  ;;  %v12502_v36 = vpop.f32.mrf.mxu0  ;;  %v2766_v46 = vld [vmem:[%s13586_s22 + $0x12d] sm:$0xff] }
 0x113   : > { %v12460_v19 = vpop.f32.mrf.mxu1  ;;  %v2788_v43 = vpack.c.bf16 %v2766_v46, %v2765_v12  ;;  %v3607_v12 = vld [vmem:[%s13586_s22 + $0x17] sm:$0xff]  ;;  %v3608_v46 = vld [vmem:[%s13586_s22 + $0x1f] sm:$0xff] }
 0x114   : > { %v14202_v6 = vadd.f32 %v1170_v14, %v907_v45  ;;  %v910_v54 = vadd.f32 %v12460_v19, %v14084_v2  ;;  %v1173_v34 = vpop.f32.mrf.mxu0 }
 0x115   : > { %v735_v48 = vpop.f32.mrf.mxu1 }
 0x116   : > { %v14205_v38 = vadd.f32 %v12502_v36, %v910_v54  ;;  %v908_v4 = vadd.f32 %v735_v48, %v14088_v7  ;;  %v12505_v33 = vpop.f32.mrf.mxu0  ;;  %12688 = vmatmul.mubr.msk.bf16.gmra.mxu0 %vm243_vm1, %v2786_v63  ;;  %v2767_v7 = vld [vmem:[%s13586_s22 + $0x135] sm:$0xff]  ;;  %v2770_v48 = vld [vmem:[%s13586_s22 + $0x14d] sm:$0xff] }
 0x117   : > { %v12463_v60 = vpop.f32.mrf.mxu1  ;;  %12646 = vmatmul.mubr.msk.bf16.gmra.mxu1 %vm243_vm1, %v13962_v50  ;;  %12691 = vmatprep.mubr.msk.bf16.mxu0 %vm243_vm1, %v2787_v58  ;;  %v2789_v45 = vpack.c.bf16 %v2768_v18, %v2767_v7  ;;  %v3170_v7 = vld [vmem:[%s13586_s22 + $0x1e] sm:$0xff] }
 0x118   : > { %v14214_v2 = vadd.f32 %v1173_v34, %v908_v4  ;;  %v913_v42 = vadd.f32 %v12463_v60, %v14092_v9  ;;  %v1186_v20 = vpop.f32.mrf.mxu0  ;;  %12649 = vmatprep.mubr.msk.bf16.mxu1 %vm243_vm1, %v13978_v62  ;;  %v2769_v34 = vld [vmem:[%s13586_s22 + $0x145] sm:$0xff] }
 0x119   : > { %v748_v25 = vpop.f32.mrf.mxu1 }
 0x11a   : > { %v14221_v14 = vadd.f32 %v12505_v33, %v913_v42  ;;  %v911_v52 = vadd.f32 %v748_v25, %v14102_v16  ;;  %v12506_v50 = vpop.f32.mrf.mxu0 }
 0x11b   : > { %v12464_v30 = vpop.f32.mrf.mxu1 }
 0x11c   : > { %v14224_v36 = vadd.f32 %v1186_v20, %v911_v52  ;;  %v914_v9 = vadd.f32 %v12464_v30, %v14110_v28  ;;  %v1189_v63 = vpop.f32.mrf.mxu0  ;;  %v2331_v28 = vld [vmem:[%s13586_s22 + $0x144] sm:$0xff]  ;;  %v3169_v20 = vld [vmem:[%s13586_s22 + $0x16] sm:$0xff]  ;;  %v2790_v52 = vpack.c.bf16 %v2770_v48, %v2769_v34 }
 0x11d   : > { %v751_v62 = vpop.f32.mrf.mxu1 }
 0x11e   : > { %v14227_v19 = vadd.f32 %v12506_v50, %v914_v9  ;;  %v912_v16 = vadd.f32 %v751_v62, %v14114_v37  ;;  %v12509_v58 = vpop.f32.mrf.mxu0  ;;  %12692 = vmatmul.mubr.msk.bf16.gmra.mxu0 %vm243_vm1, %v2788_v43  ;;  %v2332_v37 = vld [vmem:[%s13586_s22 + $0x14c] sm:$0xff]  ;;  %v3647_v43 = vpack.c.bf16 %v3608_v46, %v3607_v12  ;;  %v3209_v9 = vpack.c.bf16 %v3170_v7, %v3169_v20  ;;  %v3174_v12 = vld [vmem:[%s13586_s22 + $0x3e] sm:$0xff] }
 0x11f   : > { %v12467_v54 = vpop.f32.mrf.mxu1  ;;  %12650 = vmatmul.mubr.msk.bf16.gmra.mxu1 %vm243_vm1, %v13980_v0  ;;  %12695 = vmatprep.mubr.msk.bf16.mxu0 %vm243_vm1, %v2789_v45 }
 0x120   : > { %v14237_v4 = vadd.f32 %v1189_v63, %v912_v16  ;;  %v917_v33 = vadd.f32 %v12467_v54, %v14118_v41  ;;  %v1202_v60 = vpop.f32.mrf.mxu0  ;;  %12653 = vmatprep.mubr.msk.bf16.mxu1 %vm243_vm1, %v13994_v10  ;;  %v2352_v41 = vpack.c.bf16 %v2332_v37, %v2331_v28  ;;  %v3610_v54 = vld [vmem:[%s13586_s22 + $0x2f] sm:$0xff] }
 0x121   : > { %v764_v42 = vpop.f32.mrf.mxu1  ;;  %v3173_v37 = vld [vmem:[%s13586_s22 + $0x36] sm:$0xff] }
 0x122   : > { %v14247_v0 = vadd.f32 %v12509_v58, %v917_v33  ;;  %v915_v18 = vadd.f32 %v764_v42, %v14128_v49  ;;  %v12510_v25 = vpop.f32.mrf.mxu0  ;;  %v3172_v33 = vld [vmem:[%s13586_s22 + $0x2e] sm:$0xff] }
 0x123   : > { %v12468_v50 = vpop.f32.mrf.mxu1 }
 0x124   : > { %v14250_v30 = vadd.f32 %v1202_v60, %v915_v18  ;;  %v918_v10 = vadd.f32 %v12468_v50, %v14136_v61  ;;  %v1205_v45 = vpop.f32.mrf.mxu0  ;;  %v3609_v61 = vld [vmem:[%s13586_s22 + $0x27] sm:$0xff]  ;;  %v3611_v18 = vld [vmem:[%s13586_s22 + $0x37] sm:$0xff] }
 0x125   : > { %v767_v63 = vpop.f32.mrf.mxu1  ;;  %v3648_v7 = vpack.c.bf16 %v3610_v54, %v3609_v61  ;;  %v14297_v54 = vld [vmem:[%s16784_s1 + $0x30] sm:$0xf] }
 0x126   : > { %v14253_v62 = vadd.f32 %v12510_v25, %v918_v10  ;;  %v916_v49 = vadd.f32 %v767_v63, %v14140_v5  ;;  %v12513_v16 = vpop.f32.mrf.mxu0  ;;  %12696 = vmatmul.mubr.msk.bf16.gmra.mxu0 %vm243_vm1, %v2790_v52  ;;  %v3171_v5 = vld [vmem:[%s13586_s22 + $0x26] sm:$0xff]  ;;  %v4606_v10 = vsel %vm304_vm0, %v14043_v23, 0 }
 0x127   : > { %v12471_v58 = vpop.f32.mrf.mxu1  ;;  %12654 = vmatmul.mubr.msk.bf16.gmra.mxu1 %vm243_vm1, %v2352_v41  ;;  %12743 = vmatprep.mubr.msk.bf16.mxu0 %vm243_vm1, %v3647_v43  ;;  %v3612_v25 = vld [vmem:[%s13586_s22 + $0x3f] sm:$0xff]  ;;  %v3210_v50 = vpack.c.bf16 %v3172_v33, %v3171_v5  ;;  %v14289_v23 = vld [vmem:[%s16784_s1 + $0x2c] sm:$0xf] }
 0x128   : > { %v14261_v28 = vadd.f32 %v1205_v45, %v916_v49  ;;  %v921_v34 = vadd.f32 %v12471_v58, %v14000_v15  ;;  %v1218_v48 = vpop.f32.mrf.mxu0  ;;  %12701 = vmatprep.mubr.msk.bf16.mxu1 %vm243_vm1, %v3209_v9  ;;  %v3211_v45 = vpack.c.bf16 %v3174_v12, %v3173_v37  ;;  %v3649_v63 = vpack.c.bf16 %v3612_v25, %v3611_v18  ;;  %v3176_v33 = vld [vmem:[%s13586_s22 + $0x4e] sm:$0xff]  ;;  %v3616_v37 = vld [vmem:[%s13586_s22 + $0x5f] sm:$0xff] }
 0x129   : > { %v780_v60 = vpop.f32.mrf.mxu1 }
 0x12a   : > { %v14269_v46 = vadd.f32 %v12513_v16, %v921_v34  ;;  %v919_v42 = vadd.f32 %v780_v60, %v14010_v22  ;;  %v12514_v20 = vpop.f32.mrf.mxu0  ;;  %v4168_v22 = vsel %vm304_vm0, %v14032_v39, 0  ;;  %v3613_v39 = vld [vmem:[%s13586_s22 + $0x47] sm:$0xff]  ;;  %v3615_v60 = vld [vmem:[%s13586_s22 + $0x57] sm:$0xff] }
 0x12b   : > { %v12472_v52 = vpop.f32.mrf.mxu1 }
 0x12c   : > { %v14274_v15 = vadd.f32 %v1218_v48, %v919_v42  ;;  %v922_v41 = vadd.f32 %v12472_v52, %v14016_v29  ;;  %v1221_v43 = vpop.f32.mrf.mxu0  ;;  %v3175_v29 = vld [vmem:[%s13586_s22 + $0x46] sm:$0xff]  ;;  %v3177_v42 = vld [vmem:[%s13586_s22 + $0x56] sm:$0xff] }
 0x12d   : > { %v783_v9 = vpop.f32.mrf.mxu1 }
 0x12e   : > { %v14281_v49 = vadd.f32 %v12514_v20, %v922_v41  ;;  %v920_v16 = vadd.f32 %v783_v9, %v14022_v35  ;;  %v12517_v58 = vpop.f32.mrf.mxu0  ;;  %12744 = vmatmul.mubr.msk.bf16.vlgmr.msra.gmra.mxu0 %vm243_vm1, %v3648_v7  ;;  %v3614_v35 = vld [vmem:[%s13586_s22 + $0x4f] sm:$0xff]  ;;  %v3178_v20 = vld [vmem:[%s13586_s22 + $0x5e] sm:$0xff]  ;;  %v3651_v41 = vpack.c.bf16 %v3616_v37, %v3615_v60 }
 0x12f   : > { %v12475_v61 = vpop.f32.mrf.mxu1  ;;  %12702 = vmatmul.mubr.msk.bf16.vlgmr.msra.gmra.mxu1 %vm243_vm1, %v3210_v50  ;;  %12826 = vmatpush3.bf16.msra.mxu0 %v4606_v10  ;;  %v3650_v25 = vpack.c.bf16 %v3614_v35, %v3613_v39  ;;  %v3212_v50 = vpack.c.bf16 %v3176_v33, %v3175_v29  ;;  %v3213_v9 = vpack.c.bf16 %v3178_v20, %v3177_v42  ;;  %v3617_v29 = vld [vmem:[%s13586_s22 + $0x67] sm:$0xff]  ;;  %v3620_v33 = vld [vmem:[%s13586_s22 + $0x7f] sm:$0xff]  ;;  %v3181_v37 = vld [vmem:[%s13586_s22 + $0x76] sm:$0xff] }
 0x130   : > { %v14299_v34 = vadd.f32 %v1221_v43, %v920_v16  ;;  %v925_v48 = vadd.f32 %v12475_v61, %v14034_v40  ;;  %12784 = vmatpush3.bf16.msra.mxu1 %v4168_v22  ;;  %v1234_v5 = vpop.f32.mrf.mxu0  ;;  %12705 = vmatprep.mubr.msk.bf16.mxu1 %vm243_vm1, %v3211_v45  ;;  %v3618_v61 = vld [vmem:[%s13586_s22 + $0x6f] sm:$0xff] }
 0x131   : > { %v796_v12 = vpop.f32.mrf.mxu1  ;;  %12747 = vmatprep.mubr.msk.bf16.mxu0 %vm243_vm1, %v3649_v63  ;;  %13469 = vmatprep.subr.msk.bf16.mxu1 %vm304_vm0, %v14289_v23 }
 0x132   : > { %v14311_v7 = vadd.f32 %v12517_v58, %v925_v48  ;;  %v923_v18 = vadd.f32 %v796_v12, %v14051_v47  ;;  %v12518_v40 = vpop.f32.mrf.mxu0  ;;  %13470 = vmatprep.subr.msk.bf16.mxu0 %vm304_vm0, %v14297_v54  ;;  %v3182_v12 = vld [vmem:[%s13586_s22 + $0x7e] sm:$0xff] }
 0x133   : > { %v12476_v52 = vpop.f32.mrf.mxu1 }
 0x134   : > { %v14316_v43 = vadd.f32 %v1234_v5, %v923_v18  ;;  %v926_v10 = vadd.f32 %v12476_v52, %v14060_v32  ;;  %v1237_v45 = vpop.f32.mrf.mxu0  ;;  %v3179_v32 = vld [vmem:[%s13586_s22 + $0x66] sm:$0xff]  ;;  %v3619_v5 = vld [vmem:[%s13586_s22 + $0x77] sm:$0xff] }
 0x135   : > { %v799_v22 = vpop.f32.mrf.mxu1 }
 0x136   : > { %v14319_v47 = vadd.f32 %v12518_v40, %v926_v10  ;;  %v924_v63 = vadd.f32 %v799_v22, %v14064_v53  ;;  %v12521_v16 = vpop.f32.mrf.mxu0  ;;  %12748 = vmatmul.mubr.msk.bf16.gmra.mxu0 %vm243_vm1, %v3650_v25  ;;  %v3180_v53 = vld [vmem:[%s13586_s22 + $0x6e] sm:$0xff]  ;;  %v3652_v40 = vpack.c.bf16 %v3618_v61, %v3617_v29 }
 0x137   : > { %v12479_v58 = vpop.f32.mrf.mxu1  ;;  %12706 = vmatmul.mubr.msk.bf16.gmra.mxu1 %vm243_vm1, %v3212_v50  ;;  %12751 = vmatprep.mubr.msk.bf16.mxu0 %vm243_vm1, %v3651_v41  ;;  %v3214_v52 = vpack.c.bf16 %v3180_v53, %v3179_v32  ;;  %v3622_v32 = vld [vmem:[%s13586_s22 + $0x8f] sm:$0xff]  ;;  %v3624_v53 = vld [vmem:[%s13586_s22 + $0x9f] sm:$0xff] }
 0x138   : > { %v14328_v39 = vadd.f32 %v1237_v45, %v924_v63  ;;  %v929_v35 = vadd.f32 %v12479_v58, %v14069_v55  ;;  %v1250_v48 = vpop.f32.mrf.mxu0  ;;  %12709 = vmatprep.mubr.msk.bf16.mxu1 %vm243_vm1, %v3213_v9  ;;  %v3653_v55 = vpack.c.bf16 %v3620_v33, %v3619_v5  ;;  %v3215_v45 = vpack.c.bf16 %v3182_v12, %v3181_v37  ;;  %v3621_v58 = vld [vmem:[%s13586_s22 + $0x87] sm:$0xff]  ;;  %v3185_v33 = vld [vmem:[%s13586_s22 + $0x96] sm:$0xff] }
 0x139   : > { %v812_v60 = vpop.f32.mrf.mxu1 }
 0x13a   : > { %v14337_v42 = vadd.f32 %v12521_v16, %v929_v35  ;;  %v927_v20 = vadd.f32 %v812_v60, %v14082_v1  ;;  %v12522_v18 = vpop.f32.mrf.mxu0  ;;  %v3186_v60 = vld [vmem:[%s13586_s22 + $0x9e] sm:$0xff] }
 0x13b   : > { %v12480_v25 = vpop.f32.mrf.mxu1 }
 0x13c   : > { %v14340_v50 = vadd.f32 %v1250_v48, %v927_v20  ;;  %v930_v41 = vadd.f32 %v12480_v25, %v14086_v3  ;;  %v1253_v10 = vpop.f32.mrf.mxu0  ;;  %v3183_v3 = vld [vmem:[%s13586_s22 + $0x86] sm:$0xff]  ;;  %v3623_v48 = vld [vmem:[%s13586_s22 + $0x97] sm:$0xff] }
 0x13d   : > { %v815_v9 = vpop.f32.mrf.mxu1 }
 0x13e   : > { %v14343_v22 = vadd.f32 %v12522_v18, %v930_v41  ;;  %v928_v1 = vadd.f32 %v815_v9, %v14090_v8  ;;  %v12525_v63 = vpop.f32.mrf.mxu0  ;;  %12752 = vmatmul.mubr.msk.bf16.gmra.mxu0 %vm243_vm1, %v3652_v40  ;;  %v3184_v8 = vld [vmem:[%s13586_s22 + $0x8e] sm:$0xff]  ;;  %v3654_v18 = vpack.c.bf16 %v3622_v32, %v3621_v58  ;;  %v16798_v32 = vld [vmem:[#allocation3_spill] sm:$0xff] }
 0x13f   : > { %v12483_v16 = vpop.f32.mrf.mxu1  ;;  %12710 = vmatmul.mubr.msk.bf16.gmra.mxu1 %vm243_vm1, %v3214_v52  ;;  %12755 = vmatprep.mubr.msk.bf16.mxu0 %vm243_vm1, %v3653_v55  ;;  %v3216_v25 = vpack.c.bf16 %v3184_v8, %v3183_v3  ;;  %v3626_v3 = vld [vmem:[%s13586_s22 + $0xaf] sm:$0xff]  ;;  %v3627_v8 = vld [vmem:[%s13586_s22 + $0xb7] sm:$0xff] }
 0x140   : > { %v14352_v29 = vadd.f32 %v1253_v10, %v928_v1  ;;  %v933_v61 = vadd.f32 %v12483_v16, %v14095_v44  ;;  %v1266_v35 = vpop.f32.mrf.mxu0  ;;  %12713 = vmatprep.mubr.msk.bf16.mxu1 %vm243_vm1, %v3215_v45  ;;  %v3655_v44 = vpack.c.bf16 %v3624_v53, %v3623_v48  ;;  %v3217_v10 = vpack.c.bf16 %v3186_v60, %v3185_v33  ;;  %v3625_v16 = vld [vmem:[%s13586_s22 + $0xa7] sm:$0xff]  ;;  %v3628_v48 = vld [vmem:[%s13586_s22 + $0xbf] sm:$0xff] }
 0x141   : > { %v828_v5 = vpop.f32.mrf.mxu1  ;;  %v3190_v33 = vld [vmem:[%s13586_s22 + $0xbe] sm:$0xff] }
 0x142   : > { %v14361_v37 = vadd.f32 %v12525_v63, %v933_v61  ;;  %v931_v12 = vadd.f32 %v828_v5, %v14108_v24  ;;  %v12526_v20 = vpop.f32.mrf.mxu0  ;;  %v3189_v5 = vld [vmem:[%s13586_s22 + $0xb6] sm:$0xff] }
 0x143   : > { %v12484_v40 = vpop.f32.mrf.mxu1 }
 0x144   : > { %v14364_v52 = vadd.f32 %v1266_v35, %v931_v12  ;;  %v934_v55 = vadd.f32 %v12484_v40, %v14112_v31  ;;  %v1269_v41 = vpop.f32.mrf.mxu0  ;;  %v3187_v31 = vld [vmem:[%s13586_s22 + $0xa6] sm:$0xff]  ;;  %v3656_v40 = vpack.c.bf16 %v3626_v3, %v3625_v16 }
 0x145   : > { %v831_v45 = vpop.f32.mrf.mxu1  ;;  %v16799_v12 = vld [vmem:[#allocation4_spill] sm:$0xff] }
 0x146   : > { %v14367_v9 = vadd.f32 %v12526_v20, %v934_v55  ;;  %v932_v24 = vadd.f32 %v831_v45, %v14116_v26  ;;  %v12529_v1 = vpop.f32.mrf.mxu0  ;;  %12756 = vmatmul.mubr.msk.bf16.gmra.mxu0 %vm243_vm1, %v3654_v18  ;;  %v3188_v26 = vld [vmem:[%s13586_s22 + $0xae] sm:$0xff]  ;;  %v3657_v55 = vpack.c.bf16 %v3628_v48, %v3627_v8 }
 0x147   : > { %v12487_v63 = vpop.f32.mrf.mxu1  ;;  %12714 = vmatmul.mubr.msk.bf16.gmra.mxu1 %vm243_vm1, %v3216_v25  ;;  %12759 = vmatprep.mubr.msk.bf16.mxu0 %vm243_vm1, %v3655_v44  ;;  %v3218_v44 = vpack.c.bf16 %v3188_v26, %v3187_v31  ;;  %v3629_v26 = vld [vmem:[%s13586_s22 + $0xc7] sm:$0xff]  ;;  %v3630_v8 = vld [vmem:[%s13586_s22 + $0xcf] sm:$0xff] }
 0x148   : > { %v14376_v58 = vadd.f32 %v1269_v41, %v932_v24  ;;  %v937_v61 = vadd.f32 %v12487_v63, %v16798_v32  ;;  %v1282_v35 = vpop.f32.mrf.mxu0  ;;  %12717 = vmatprep.mubr.msk.bf16.mxu1 %vm243_vm1, %v3217_v10  ;;  %v16800_v10 = vld [vmem:[#allocation5_spill] sm:$0xff]  ;;  %v3219_v63 = vpack.c.bf16 %v3190_v33, %v3189_v5 }
 0x149   : > { %v844_v53 = vpop.f32.mrf.mxu1  ;;  %v3192_v33 = vld [vmem:[%s13586_s22 + $0xce] sm:$0xff] }
 0x14a   : > { %v14385_v60 = vadd.f32 %v12529_v1, %v937_v61  ;;  %v935_v20 = vadd.f32 %v844_v53, %v16799_v12  ;;  %v12530_v18 = vpop.f32.mrf.mxu0  ;;  %v16801_v61 = vld [vmem:[#allocation6_spill] sm:$0xff] }
 0x14b   : > { %v12488_v25 = vpop.f32.mrf.mxu1  ;;  %v3631_v12 = vld [vmem:[%s13586_s22 + $0xd7] sm:$0xff] }
 0x14c   : > { %v14388_v41 = vadd.f32 %v1282_v35, %v935_v20  ;;  %v938_v45 = vadd.f32 %v12488_v25, %v16800_v10  ;;  %v1285_v24 = vpop.f32.mrf.mxu0  ;;  %v3191_v35 = vld [vmem:[%s13586_s22 + $0xc6] sm:$0xff]  ;;  %v3194_v25 = vld [vmem:[%s13586_s22 + $0xde] sm:$0xff] }
 0x14d   : > { %v847_v32 = vpop.f32.mrf.mxu1  ;;  %v3632_v20 = vld [vmem:[%s13586_s22 + $0xdf] sm:$0xff] }
 0x14e   : > { %v14391_v1 = vadd.f32 %v12530_v18, %v938_v45  ;;  %v936_v16 = vadd.f32 %v847_v32, %v16801_v61  ;;  %v12577_v3 = vpop.f32.mrf.mxu0  ;;  %12760 = vmatmul.mubr.msk.bf16.gmra.mxu0 %vm243_vm1, %v3656_v40  ;;  %v3193_v40 = vld [vmem:[%s13586_s22 + $0xd6] sm:$0xff]  ;;  %v3658_v45 = vpack.c.bf16 %v3630_v8, %v3629_v26  ;;  %v3220_v32 = vpack.c.bf16 %v3192_v33, %v3191_v35  ;;  %v3633_v8 = vld [vmem:[%s13586_s22 + $0xe7] sm:$0xff] }
 0x14f   : > { %v12535_v31 = vpop.f32.mrf.mxu1  ;;  %12718 = vmatmul.mubr.msk.bf16.gmra.mxu1 %vm243_vm1, %v3218_v44  ;;  %12763 = vmatprep.mubr.msk.bf16.mxu0 %vm243_vm1, %v3657_v55 }
 0x150   : > { %v14400_v48 = vadd.f32 %v1285_v24, %v936_v16  ;;  %v1777_v53 = vadd.f32 %v12535_v31, %v14155_v57  ;;  %v2014_v5 = vpop.f32.mrf.mxu0  ;;  %12721 = vmatprep.mubr.msk.bf16.mxu1 %vm243_vm1, %v3219_v63  ;;  %v3659_v57 = vpack.c.bf16 %v3632_v20, %v3631_v12  ;;  %v3221_v31 = vpack.c.bf16 %v3194_v25, %v3193_v40  ;;  %v3636_v20 = vld [vmem:[%s13586_s22 + $0xff] sm:$0xff]  ;;  %v3197_v40 = vld [vmem:[%s13586_s22 + $0xf6] sm:$0xff] }
 0x151   : > { %v1576_v18 = vpop.f32.mrf.mxu1  ;;  %v3198_v25 = vld [vmem:[%s13586_s22 + $0xfe] sm:$0xff] }
 0x152   : > { %16802 = vst [vmem:[#allocation3_spill] sm:$0xff] %v14400_v48  ;;  %v14409_v10 = vadd.f32 %v12577_v3, %v1777_v53  ;;  %v1775_v44 = vadd.f32 %v1576_v18, %v14158_v59  ;;  %v12578_v55 = vpop.f32.mrf.mxu0  ;;  %v3634_v53 = vld [vmem:[%s13586_s22 + $0xef] sm:$0xff] }
 0x153   : > { %v12536_v24 = vpop.f32.mrf.mxu1 }
 0x154   : > { %v14412_v61 = vadd.f32 %v2014_v5, %v1775_v44  ;;  %v1778_v63 = vadd.f32 %v12536_v24, %v14161_v56  ;;  %v2017_v16 = vpop.f32.mrf.mxu0  ;;  %v3195_v56 = vld [vmem:[%s13586_s22 + $0xe6] sm:$0xff]  ;;  %v3660_v24 = vpack.c.bf16 %v3634_v53, %v3633_v8 }
 0x155   : > { %v1579_v48 = vpop.f32.mrf.mxu1  ;;  %v3637_v53 = vld [vmem:[%s13586_s22 + $0x107] sm:$0xff] }
 0x156   : > { %v14415_v3 = vadd.f32 %v12578_v55, %v1778_v63  ;;  %v1776_v59 = vadd.f32 %v1579_v48, %v14170_v27  ;;  %v12581_v26 = vpop.f32.mrf.mxu0  ;;  %12764 = vmatmul.mubr.msk.bf16.gmra.mxu0 %vm243_vm1, %v3658_v45  ;;  %v3196_v27 = vld [vmem:[%s13586_s22 + $0xee] sm:$0xff]  ;;  %v3635_v48 = vld [vmem:[%s13586_s22 + $0xf7] sm:$0xff] }
 0x157   : > { %v12539_v35 = vpop.f32.mrf.mxu1  ;;  %12722 = vmatmul.mubr.msk.bf16.gmra.mxu1 %vm243_vm1, %v3220_v32  ;;  %12767 = vmatprep.mubr.msk.bf16.mxu0 %vm243_vm1, %v3659_v57  ;;  %v3222_v57 = vpack.c.bf16 %v3196_v27, %v3195_v56 }
 0x158   : > { %v14424_v5 = vadd.f32 %v2017_v16, %v1776_v59  ;;  %v1781_v33 = vadd.f32 %v12539_v35, %v14177_v51  ;;  %v2030_v12 = vpop.f32.mrf.mxu0  ;;  %12725 = vmatprep.mubr.msk.bf16.mxu1 %vm243_vm1, %v3221_v31  ;;  %v3661_v51 = vpack.c.bf16 %v3636_v20, %v3635_v48  ;;  %v3223_v59 = vpack.c.bf16 %v3198_v25, %v3197_v40  ;;  %v3639_v20 = vld [vmem:[%s13586_s22 + $0x117] sm:$0xff] }
 0x159   : > { %v1592_v18 = vpop.f32.mrf.mxu1  ;;  %v3201_v25 = vld [vmem:[%s13586_s22 + $0x116] sm:$0xff] }
 0x15a   : > { %v14433_v44 = vadd.f32 %v12581_v26, %v1781_v33  ;;  %v1779_v55 = vadd.f32 %v1592_v18, %v14180_v13  ;;  %v12582_v45 = vpop.f32.mrf.mxu0  ;;  %v3638_v33 = vld [vmem:[%s13586_s22 + $0x10f] sm:$0xff]  ;;  %v3640_v18 = vld [vmem:[%s13586_s22 + $0x11f] sm:$0xff] }
 0x15b   : > { %v12540_v32 = vpop.f32.mrf.mxu1 }
 0x15c   : > { %v14436_v63 = vadd.f32 %v2030_v12, %v1779_v55  ;;  %v1782_v16 = vadd.f32 %v12540_v32, %v14183_v17  ;;  %v2033_v31 = vpop.f32.mrf.mxu0  ;;  %v3199_v17 = vld [vmem:[%s13586_s22 + $0x106] sm:$0xff]  ;;  %v3202_v55 = vld [vmem:[%s13586_s22 + $0x11e] sm:$0xff] }
 0x15d   : > { %v1595_v35 = vpop.f32.mrf.mxu1 }
 0x15e   : > { %v14439_v26 = vadd.f32 %v12582_v45, %v1782_v16  ;;  %v1780_v13 = vadd.f32 %v1595_v35, %v14192_v21  ;;  %v12585_v8 = vpop.f32.mrf.mxu0  ;;  %12768 = vmatmul.mubr.msk.bf16.gmra.mxu0 %vm243_vm1, %v3660_v24  ;;  %v3200_v21 = vld [vmem:[%s13586_s22 + $0x10e] sm:$0xff] }
 0x15f   : > { %v12543_v56 = vpop.f32.mrf.mxu1  ;;  %12726 = vmatmul.mubr.msk.bf16.gmra.mxu1 %vm243_vm1, %v3222_v57  ;;  %12771 = vmatprep.mubr.msk.bf16.mxu0 %vm243_vm1, %v3661_v51  ;;  %v3662_v57 = vpack.c.bf16 %v3638_v33, %v3637_v53  ;;  %v3224_v16 = vpack.c.bf16 %v3200_v21, %v3199_v17  ;;  %v3641_v33 = vld [vmem:[%s13586_s22 + $0x127] sm:$0xff] }
 0x160   : > { %v14448_v12 = vadd.f32 %v2033_v31, %v1780_v13  ;;  %v1785_v27 = vadd.f32 %v12543_v56, %v14199_v11  ;;  %v2046_v48 = vpop.f32.mrf.mxu0  ;;  %12729 = vmatprep.mubr.msk.bf16.mxu1 %vm243_vm1, %v3223_v59  ;;  %v3663_v11 = vpack.c.bf16 %v3640_v18, %v3639_v20  ;;  %v3225_v13 = vpack.c.bf16 %v3202_v55, %v3201_v25  ;;  %v3643_v18 = vld [vmem:[%s13586_s22 + $0x137] sm:$0xff] }
 0x161   : > { %v1608_v40 = vpop.f32.mrf.mxu1  ;;  %v3205_v55 = vld [vmem:[%s13586_s22 + $0x136] sm:$0xff] }
 0x162   : > { %v14457_v45 = vadd.f32 %v12585_v8, %v1785_v27  ;;  %v1783_v24 = vadd.f32 %v1608_v40, %v14202_v6  ;;  %v12586_v32 = vpop.f32.mrf.mxu0  ;;  %v3642_v27 = vld [vmem:[%s13586_s22 + $0x12f] sm:$0xff]  ;;  %v3644_v40 = vld [vmem:[%s13586_s22 + $0x13f] sm:$0xff] }
 0x163   : > { %v12544_v51 = vpop.f32.mrf.mxu1 }
 0x164   : > { %v14460_v31 = vadd.f32 %v2046_v48, %v1783_v24  ;;  %v1786_v59 = vadd.f32 %v12544_v51, %v14205_v38  ;;  %v2049_v35 = vpop.f32.mrf.mxu0  ;;  %v3203_v38 = vld [vmem:[%s13586_s22 + $0x126] sm:$0xff]  ;;  %v3206_v24 = vld [vmem:[%s13586_s22 + $0x13e] sm:$0xff] }
 0x165   : > { %v1611_v56 = vpop.f32.mrf.mxu1 }
 0x166   : > { %v14463_v8 = vadd.f32 %v12586_v32, %v1786_v59  ;;  %v1784_v6 = vadd.f32 %v1611_v56, %v14214_v2  ;;  %v12589_v53 = vpop.f32.mrf.mxu0  ;;  %12772 = vmatmul.mubr.msk.bf16.gmra.mxu0 %vm243_vm1, %v3662_v57  ;;  %v3204_v2 = vld [vmem:[%s13586_s22 + $0x12e] sm:$0xff] }
 0x167   : > { %v12547_v17 = vpop.f32.mrf.mxu1  ;;  %12730 = vmatmul.mubr.msk.bf16.gmra.mxu1 %vm243_vm1, %v3224_v16  ;;  %12775 = vmatprep.mubr.msk.bf16.mxu0 %vm243_vm1, %v3663_v11  ;;  %v3664_v16 = vpack.c.bf16 %v3642_v27, %v3641_v33  ;;  %v3226_v59 = vpack.c.bf16 %v3204_v2, %v3203_v38  ;;  %v3645_v27 = vld [vmem:[%s13586_s22 + $0x147] sm:$0xff] }
 0x168   : > { %v14472_v48 = vadd.f32 %v2049_v35, %v1784_v6  ;;  %v1789_v21 = vadd.f32 %v12547_v17, %v14221_v14  ;;  %v2062_v20 = vpop.f32.mrf.mxu0  ;;  %12733 = vmatprep.mubr.msk.bf16.mxu1 %vm243_vm1, %v3225_v13  ;;  %v3665_v14 = vpack.c.bf16 %v3644_v40, %v3643_v18  ;;  %v3227_v6 = vpack.c.bf16 %v3206_v24, %v3205_v55  ;;  %v4483_v40 = vld [vmem:[%s13586_s22 + $0x28] sm:$0xff]  ;;  %v4045_v24 = vld [vmem:[%s13586_s22 + $0x18] sm:$0xff] }
 0x169   : > { %v1624_v25 = vpop.f32.mrf.mxu1 }
 0x16a   : > { %v14481_v32 = vadd.f32 %v12589_v53, %v1789_v21  ;;  %v1787_v57 = vadd.f32 %v1624_v25, %v14224_v36  ;;  %v12590_v51 = vpop.f32.mrf.mxu0  ;;  %v3646_v21 = vld [vmem:[%s13586_s22 + $0x14f] sm:$0xff] }
 0x16b   : > { %v12548_v11 = vpop.f32.mrf.mxu1  ;;  %v4484_v25 = vld [vmem:[%s13586_s22 + $0x30] sm:$0xff] }
 0x16c   : > { %v14484_v35 = vadd.f32 %v2062_v20, %v1787_v57  ;;  %v1790_v13 = vadd.f32 %v12548_v11, %v14227_v19  ;;  %v2065_v56 = vpop.f32.mrf.mxu0  ;;  %v3207_v19 = vld [vmem:[%s13586_s22 + $0x146] sm:$0xff] }
 0x16d   : > { %v1627_v17 = vpop.f32.mrf.mxu1  ;;  %v4046_v57 = vld [vmem:[%s13586_s22 + $0x20] sm:$0xff] }
 0x16e   : > { %v14487_v53 = vadd.f32 %v12590_v51, %v1790_v13  ;;  %v1788_v36 = vadd.f32 %v1627_v17, %v14237_v4  ;;  %v12593_v33 = vpop.f32.mrf.mxu0  ;;  %12776 = vmatmul.mubr.msk.bf16.gmra.mxu0 %vm243_vm1, %v3664_v16  ;;  %v3208_v4 = vld [vmem:[%s13586_s22 + $0x14e] sm:$0xff] }
 0x16f   : > { %v12551_v38 = vpop.f32.mrf.mxu1  ;;  %12734 = vmatmul.mubr.msk.bf16.gmra.mxu1 %vm243_vm1, %v3226_v59  ;;  %12779 = vmatprep.mubr.msk.bf16.mxu0 %vm243_vm1, %v3665_v14  ;;  %v3666_v59 = vpack.c.bf16 %v3646_v21, %v3645_v27  ;;  %v3228_v13 = vpack.c.bf16 %v3208_v4, %v3207_v19  ;;  %v4485_v19 = vld [vmem:[%s13586_s22 + $0x38] sm:$0xff]  ;;  %v4486_v27 = vld [vmem:[%s13586_s22 + $0x40] sm:$0xff] }
 0x170   : > { %v14496_v20 = vadd.f32 %v2065_v56, %v1788_v36  ;;  %v1793_v2 = vadd.f32 %v12551_v38, %v14247_v0  ;;  %v2078_v18 = vpop.f32.mrf.mxu0  ;;  %12737 = vmatprep.mubr.msk.bf16.mxu1 %vm243_vm1, %v3227_v6  ;;  %v4523_v0 = vpack.c.bf16 %v4484_v25, %v4483_v40  ;;  %v4085_v36 = vpack.c.bf16 %v4046_v57, %v4045_v24  ;;  %v4487_v24 = vld [vmem:[%s13586_s22 + $0x48] sm:$0xff]  ;;  %v4488_v57 = vld [vmem:[%s13586_s22 + $0x50] sm:$0xff] }
 0x171   : > { %v1640_v55 = vpop.f32.mrf.mxu1 }
 0x172   : > { %16803 = vst [vmem:[#allocation4_spill] sm:$0xff] %v14496_v20  ;;  %v14505_v51 = vadd.f32 %v12593_v33, %v1793_v2  ;;  %v1791_v16 = vadd.f32 %v1640_v55, %v14250_v30  ;;  %v12594_v11 = vpop.f32.mrf.mxu0  ;;  %v4524_v55 = vpack.c.bf16 %v4486_v27, %v4485_v19  ;;  %v4491_v27 = vld [vmem:[%s13586_s22 + $0x68] sm:$0xff] }
 0x173   : > { %v12552_v14 = vpop.f32.mrf.mxu1 }
 0x174   : > { %v14508_v56 = vadd.f32 %v2078_v18, %v1791_v16  ;;  %v1794_v6 = vadd.f32 %v12552_v14, %v14253_v62  ;;  %v2081_v17 = vpop.f32.mrf.mxu0  ;;  %v5482_v14 = vsel %vm304_vm0, %v14297_v54, 0 }
 0x175   : > { %v1643_v38 = vpop.f32.mrf.mxu1 }
 0x176   : > { %v14511_v20 = vadd.f32 %v12594_v11, %v1794_v6  ;;  %v1792_v33 = vadd.f32 %v1643_v38, %v14261_v28  ;;  %v12597_v2 = vpop.f32.mrf.mxu0  ;;  %12780 = vmatmul.mubr.msk.bf16.gmra.mxu0 %vm243_vm1, %v3666_v59  ;;  %v5044_v6 = vsel %vm304_vm0, %v14289_v23, 0  ;;  %v4489_v23 = vld [vmem:[%s13586_s22 + $0x58] sm:$0xff] }
 0x177   : > { %v12555_v30 = vpop.f32.mrf.mxu1  ;;  %12738 = vmatmul.mubr.msk.bf16.gmra.mxu1 %vm243_vm1, %v3228_v13  ;;  %12827 = vmatprep.mubr.msk.bf16.mxu0 %vm243_vm1, %v4523_v0 }
 0x178   : > { %v14519_v62 = vadd.f32 %v2081_v17, %v1792_v33  ;;  %v1797_v21 = vadd.f32 %v12555_v30, %v14269_v46  ;;  %v2094_v18 = vpop.f32.mrf.mxu0  ;;  %12785 = vmatprep.mubr.msk.bf16.mxu1 %vm243_vm1, %v4085_v36  ;;  %v4490_v33 = vld [vmem:[%s13586_s22 + $0x60] sm:$0xff] }
 0x179   : > { %v1656_v28 = vpop.f32.mrf.mxu1 }
 0x17a   : > { %v14523_v4 = vadd.f32 %v12597_v2, %v1797_v21  ;;  %v1795_v40 = vadd.f32 %v1656_v28, %v14274_v15  ;;  %v12598_v25 = vpop.f32.mrf.mxu0  ;;  %v4525_v15 = vpack.c.bf16 %v4488_v57, %v4487_v24  ;;  %v14550_v2 = vld [vmem:[%s16784_s1 + $0x38] sm:$0xf]  ;;  %v4492_v21 = vld [vmem:[%s13586_s22 + $0x70] sm:$0xff] }
 0x17b   : > { %v12556_v16 = vpop.f32.mrf.mxu1 }
 0x17c   : > { %v14528_v11 = vadd.f32 %v2094_v18, %v1795_v40  ;;  %v1798_v59 = vadd.f32 %v12556_v16, %v14281_v49  ;;  %v2097_v46 = vpop.f32.mrf.mxu0  ;;  %v14542_v49 = vld [vmem:[%s16784_s1 + $0x34] sm:$0xf] }
 0x17d   : > { %v1659_v13 = vpop.f32.mrf.mxu1 }
 0x17e   : > { %v14535_v17 = vadd.f32 %v12598_v25, %v1798_v59  ;;  %v1796_v36 = vadd.f32 %v1659_v13, %v14299_v34  ;;  %v12601_v38 = vpop.f32.mrf.mxu0  ;;  %12828 = vmatmul.mubr.msk.bf16.vlgmr.msra.gmra.mxu0 %vm243_vm1, %v4524_v55  ;;  %v4526_v25 = vpack.c.bf16 %v4490_v33, %v4489_v23  ;;  %v4495_v23 = vld [vmem:[%s13586_s22 + $0x88] sm:$0xff]  ;;  %v4496_v33 = vld [vmem:[%s13586_s22 + $0x90] sm:$0xff] }
 0x17f   : > { %v12559_v54 = vpop.f32.mrf.mxu1  ;;  %12786 = vmatmul.mubr.msk.bf16.vlgmr.msra.gmra.mxu1 %vm243_vm1, %v4523_v0  ;;  %12910 = vmatpush3.bf16.msra.mxu0 %v5482_v14 }
 0x180   : > { %v14552_v34 = vadd.f32 %v2097_v46, %v1796_v36  ;;  %v1801_v30 = vadd.f32 %v12559_v54, %v14311_v7  ;;  %12868 = vmatpush3.bf16.msra.mxu1 %v5044_v6  ;;  %v2110_v19 = vpop.f32.mrf.mxu0  ;;  %12789 = vmatprep.mubr.msk.bf16.mxu1 %vm243_vm1, %v4524_v55  ;;  %v4527_v55 = vpack.c.bf16 %v4492_v21, %v4491_v27  ;;  %v4493_v6 = vld [vmem:[%s13586_s22 + $0x78] sm:$0xff]  ;;  %v4494_v36 = vld [vmem:[%s13586_s22 + $0x80] sm:$0xff] }
 0x181   : > { %v1672_v18 = vpop.f32.mrf.mxu1  ;;  %12831 = vmatprep.mubr.msk.bf16.mxu0 %vm243_vm1, %v4525_v15  ;;  %13471 = vmatprep.subr.msk.bf16.mxu1 %vm304_vm0, %v14542_v49  ;;  %v4528_v27 = vpack.c.bf16 %v4494_v36, %v4493_v6  ;;  %v4499_v6 = vld [vmem:[%s13586_s22 + $0xa8] sm:$0xff]  ;;  %v4500_v36 = vld [vmem:[%s13586_s22 + $0xb0] sm:$0xff] }
 0x182   : > { %v14561_v0 = vadd.f32 %v12601_v38, %v1801_v30  ;;  %v1799_v28 = vadd.f32 %v1672_v18, %v14316_v43  ;;  %v12602_v40 = vpop.f32.mrf.mxu0  ;;  %13472 = vmatprep.subr.msk.bf16.mxu0 %vm304_vm0, %v14550_v2  ;;  %v4529_v18 = vpack.c.bf16 %v4496_v33, %v4495_v23 }
 0x183   : > { %v12560_v7 = vpop.f32.mrf.mxu1 }
 0x184   : > { %v14566_v24 = vadd.f32 %v2110_v19, %v1799_v28  ;;  %v1802_v57 = vadd.f32 %v12560_v7, %v14319_v47  ;;  %v2113_v16 = vpop.f32.mrf.mxu0 }
 0x185   : > { %v1675_v59 = vpop.f32.mrf.mxu1 }
 0x186   : > { %v14569_v46 = vadd.f32 %v12602_v40, %v1802_v57  ;;  %v1800_v43 = vadd.f32 %v1675_v59, %v14328_v39  ;;  %v12605_v14 = vpop.f32.mrf.mxu0  ;;  %12832 = vmatmul.mubr.msk.bf16.gmra.mxu0 %vm243_vm1, %v4526_v25  ;;  %v4497_v59 = vld [vmem:[%s13586_s22 + $0x98] sm:$0xff] }
 0x187   : > { %v12563_v13 = vpop.f32.mrf.mxu1  ;;  %12790 = vmatmul.mubr.msk.bf16.gmra.mxu1 %vm243_vm1, %v4525_v15  ;;  %12835 = vmatprep.mubr.msk.bf16.mxu0 %vm243_vm1, %v4527_v55 }
 0x188   : > { %v14577_v38 = vadd.f32 %v2113_v16, %v1800_v43  ;;  %v1805_v47 = vadd.f32 %v12563_v13, %v14337_v42  ;;  %v2126_v54 = vpop.f32.mrf.mxu0  ;;  %12793 = vmatprep.mubr.msk.bf16.mxu1 %vm243_vm1, %v4526_v25  ;;  %v4498_v43 = vld [vmem:[%s13586_s22 + $0xa0] sm:$0xff] }
 0x189   : > { %v1688_v39 = vpop.f32.mrf.mxu1  ;;  %v4530_v23 = vpack.c.bf16 %v4498_v43, %v4497_v59  ;;  %v4503_v59 = vld [vmem:[%s13586_s22 + $0xc8] sm:$0xff]  ;;  %v4504_v43 = vld [vmem:[%s13586_s22 + $0xd0] sm:$0xff] }
 0x18a   : > { %v14583_v30 = vadd.f32 %v12605_v14, %v1805_v47  ;;  %v1803_v19 = vadd.f32 %v1688_v39, %v14340_v50  ;;  %v12606_v15 = vpop.f32.mrf.mxu0  ;;  %v4531_v39 = vpack.c.bf16 %v4500_v36, %v4499_v6 }
 0x18b   : > { %v12564_v21 = vpop.f32.mrf.mxu1 }
 0x18c   : > { %v14586_v28 = vadd.f32 %v2126_v54, %v1803_v19  ;;  %v1806_v42 = vadd.f32 %v12564_v21, %v14343_v22  ;;  %v2129_v40 = vpop.f32.mrf.mxu0 }
 0x18d   : > { %v1691_v25 = vpop.f32.mrf.mxu1 }
 0x18e   : > { %v14589_v7 = vadd.f32 %v12606_v15, %v1806_v42  ;;  %v1804_v57 = vadd.f32 %v1691_v25, %v14352_v29  ;;  %v12609_v16 = vpop.f32.mrf.mxu0  ;;  %12836 = vmatmul.mubr.msk.bf16.gmra.mxu0 %vm243_vm1, %v4528_v27  ;;  %v4501_v25 = vld [vmem:[%s13586_s22 + $0xb8] sm:$0xff] }
 0x18f   : > { %v12567_v50 = vpop.f32.mrf.mxu1  ;;  %12794 = vmatmul.mubr.msk.bf16.gmra.mxu1 %vm243_vm1, %v4527_v55  ;;  %12839 = vmatprep.mubr.msk.bf16.mxu0 %vm243_vm1, %v4529_v18 }
 0x190   : > { %v14597_v14 = vadd.f32 %v2129_v40, %v1804_v57  ;;  %v1809_v22 = vadd.f32 %v12567_v50, %v14361_v37  ;;  %v2142_v13 = vpop.f32.mrf.mxu0  ;;  %12797 = vmatprep.mubr.msk.bf16.mxu1 %vm243_vm1, %v4528_v27  ;;  %v4502_v57 = vld [vmem:[%s13586_s22 + $0xc0] sm:$0xff] }
 0x191   : > { %v1704_v29 = vpop.f32.mrf.mxu1  ;;  %v4532_v6 = vpack.c.bf16 %v4502_v57, %v4501_v25  ;;  %v4507_v57 = vld [vmem:[%s13586_s22 + $0xe8] sm:$0xff] }
 0x192   : > { %v14603_v47 = vadd.f32 %v12609_v16, %v1809_v22  ;;  %v1807_v54 = vadd.f32 %v1704_v29, %v14364_v52  ;;  %v12610_v55 = vpop.f32.mrf.mxu0  ;;  %v4533_v29 = vpack.c.bf16 %v4504_v43, %v4503_v59 }
 0x193   : > { %v12568_v33 = vpop.f32.mrf.mxu1 }
 0x194   : > { %v14606_v19 = vadd.f32 %v2142_v13, %v1807_v54  ;;  %v1810_v37 = vadd.f32 %v12568_v33, %v14367_v9  ;;  %v2145_v15 = vpop.f32.mrf.mxu0 }
 0x195   : > { %v1707_v27 = vpop.f32.mrf.mxu1 }
 0x196   : > { %v14609_v21 = vadd.f32 %v12610_v55, %v1810_v37  ;;  %v1808_v42 = vadd.f32 %v1707_v27, %v14376_v58  ;;  %v12613_v40 = vpop.f32.mrf.mxu0  ;;  %12840 = vmatmul.mubr.msk.bf16.gmra.mxu0 %vm243_vm1, %v4530_v23  ;;  %v16804_v37 = vld [vmem:[#allocation3_spill] sm:$0xff] }
 0x197   : > { %v12571_v52 = vpop.f32.mrf.mxu1  ;;  %12798 = vmatmul.mubr.msk.bf16.gmra.mxu1 %vm243_vm1, %v4529_v18  ;;  %12843 = vmatprep.mubr.msk.bf16.mxu0 %vm243_vm1, %v4531_v39 }
 0x198   : > { %v14617_v16 = vadd.f32 %v2145_v15, %v1808_v42  ;;  %v1813_v9 = vadd.f32 %v12571_v52, %v14385_v60  ;;  %v2158_v50 = vpop.f32.mrf.mxu0  ;;  %12801 = vmatprep.mubr.msk.bf16.mxu1 %vm243_vm1, %v4530_v23  ;;  %v4505_v42 = vld [vmem:[%s13586_s22 + $0xd8] sm:$0xff] }
 0x199   : > { %v1720_v58 = vpop.f32.mrf.mxu1 }
 0x19a   : > { %v14623_v22 = vadd.f32 %v12613_v40, %v1813_v9  ;;  %v1811_v13 = vadd.f32 %v1720_v58, %v14388_v41  ;;  %v12614_v18 = vpop.f32.mrf.mxu0  ;;  %v4506_v40 = vld [vmem:[%s13586_s22 + $0xe0] sm:$0xff]  ;;  %v4508_v9 = vld [vmem:[%s13586_s22 + $0xf0] sm:$0xff] }
 0x19b   : > { %v12572_v36 = vpop.f32.mrf.mxu1  ;;  %v4534_v58 = vpack.c.bf16 %v4506_v40, %v4505_v42  ;;  %v4511_v40 = vld [vmem:[%s13586_s22 + $0x108] sm:$0xff] }
 0x19c   : > { %v14626_v54 = vadd.f32 %v2158_v50, %v1811_v13  ;;  %v1814_v60 = vadd.f32 %v12572_v36, %v14391_v1  ;;  %v2161_v55 = vpop.f32.mrf.mxu0 }
 0x19d   : > { %v1723_v23 = vpop.f32.mrf.mxu1 }
 0x19e   : > { %v14629_v33 = vadd.f32 %v12614_v18, %v1814_v60  ;;  %v1812_v15 = vadd.f32 %v1723_v23, %v16804_v37  ;;  %v12661_v27 = vpop.f32.mrf.mxu0  ;;  %12844 = vmatmul.mubr.msk.bf16.gmra.mxu0 %vm243_vm1, %v4532_v6  ;;  %v4535_v18 = vpack.c.bf16 %v4508_v9, %v4507_v57 }
 0x19f   : > { %v12619_v41 = vpop.f32.mrf.mxu1  ;;  %12802 = vmatmul.mubr.msk.bf16.gmra.mxu1 %vm243_vm1, %v4531_v39  ;;  %12847 = vmatprep.mubr.msk.bf16.mxu0 %vm243_vm1, %v4533_v29 }
 0x1a0   : > { %v14637_v52 = vadd.f32 %v2161_v55, %v1812_v15  ;;  %v2653_v1 = vadd.f32 %v12619_v41, %v14409_v10  ;;  %v2890_v25 = vpop.f32.mrf.mxu0  ;;  %12805 = vmatprep.mubr.msk.bf16.mxu1 %vm243_vm1, %v4532_v6  ;;  %v4509_v15 = vld [vmem:[%s13586_s22 + $0xf8] sm:$0xff] }
 0x1a1   : > { %v2452_v50 = vpop.f32.mrf.mxu1 }
 0x1a2   : > { %v14643_v59 = vadd.f32 %v12661_v27, %v2653_v1  ;;  %v2651_v43 = vadd.f32 %v2452_v50, %v14412_v61  ;;  %v12662_v39 = vpop.f32.mrf.mxu0  ;;  %v4510_v27 = vld [vmem:[%s13586_s22 + $0x100] sm:$0xff]  ;;  %v4512_v1 = vld [vmem:[%s13586_s22 + $0x110] sm:$0xff] }
 0x1a3   : > { %v12620_v13 = vpop.f32.mrf.mxu1  ;;  %v4536_v9 = vpack.c.bf16 %v4510_v27, %v4509_v15  ;;  %v4515_v27 = vld [vmem:[%s13586_s22 + $0x128] sm:$0xff] }
 0x1a4   : > { %v14646_v36 = vadd.f32 %v2890_v25, %v2651_v43  ;;  %v2654_v10 = vadd.f32 %v12620_v13, %v14415_v3  ;;  %v2893_v60 = vpop.f32.mrf.mxu0  ;;  %v4537_v43 = vpack.c.bf16 %v4512_v1, %v4511_v40 }
 0x1a5   : > { %v2455_v6 = vpop.f32.mrf.mxu1 }
 0x1a6   : > { %v14649_v55 = vadd.f32 %v12662_v39, %v2654_v10  ;;  %v2652_v23 = vadd.f32 %v2455_v6, %v14424_v5  ;;  %v12665_v37 = vpop.f32.mrf.mxu0  ;;  %12848 = vmatmul.mubr.msk.bf16.gmra.mxu0 %vm243_vm1, %v4534_v58 }
 0x1a7   : > { %v12623_v61 = vpop.f32.mrf.mxu1  ;;  %12806 = vmatmul.mubr.msk.bf16.gmra.mxu1 %vm243_vm1, %v4533_v29  ;;  %12851 = vmatprep.mubr.msk.bf16.mxu0 %vm243_vm1, %v4535_v18 }
 0x1a8   : > { %v14657_v41 = vadd.f32 %v2893_v60, %v2652_v23  ;;  %v2657_v3 = vadd.f32 %v12623_v61, %v14433_v44  ;;  %v2906_v42 = vpop.f32.mrf.mxu0  ;;  %12809 = vmatprep.mubr.msk.bf16.mxu1 %vm243_vm1, %v4534_v58  ;;  %v4513_v23 = vld [vmem:[%s13586_s22 + $0x118] sm:$0xff] }
 0x1a9   : > { %v2468_v5 = vpop.f32.mrf.mxu1 }
 0x1aa   : > { %v14663_v25 = vadd.f32 %v12665_v37, %v2657_v3  ;;  %v2655_v57 = vadd.f32 %v2468_v5, %v14436_v63  ;;  %v12666_v29 = vpop.f32.mrf.mxu0  ;;  %v4514_v37 = vld [vmem:[%s13586_s22 + $0x120] sm:$0xff]  ;;  %v4516_v3 = vld [vmem:[%s13586_s22 + $0x130] sm:$0xff] }
 0x1ab   : > { %v12624_v50 = vpop.f32.mrf.mxu1  ;;  %v4538_v1 = vpack.c.bf16 %v4514_v37, %v4513_v23  ;;  %v4519_v37 = vld [vmem:[%s13586_s22 + $0x148] sm:$0xff] }
 0x1ac   : > { %v14666_v39 = vadd.f32 %v2906_v42, %v2655_v57  ;;  %v2658_v44 = vadd.f32 %v12624_v50, %v14439_v26  ;;  %v2909_v13 = vpop.f32.mrf.mxu0  ;;  %v4539_v57 = vpack.c.bf16 %v4516_v3, %v4515_v27 }
 0x1ad   : > { %v2471_v58 = vpop.f32.mrf.mxu1 }
 0x1ae   : > { %v14669_v10 = vadd.f32 %v12666_v29, %v2658_v44  ;;  %v2656_v60 = vadd.f32 %v2471_v58, %v14448_v12  ;;  %v12669_v6 = vpop.f32.mrf.mxu0  ;;  %12852 = vmatmul.mubr.msk.bf16.gmra.mxu0 %vm243_vm1, %v4536_v9 }
 0x1af   : > { %v12627_v63 = vpop.f32.mrf.mxu1  ;;  %12810 = vmatmul.mubr.msk.bf16.gmra.mxu1 %vm243_vm1, %v4535_v18  ;;  %12855 = vmatprep.mubr.msk.bf16.mxu0 %vm243_vm1, %v4537_v43 }
 0x1b0   : > { %v14677_v61 = vadd.f32 %v2909_v13, %v2656_v60  ;;  %v2661_v26 = vadd.f32 %v12627_v63, %v14457_v45  ;;  %v2922_v15 = vpop.f32.mrf.mxu0  ;;  %12813 = vmatprep.mubr.msk.bf16.mxu1 %vm243_vm1, %v4536_v9  ;;  %v4517_v60 = vld [vmem:[%s13586_s22 + $0x138] sm:$0xff] }
 0x1b1   : > { %v2484_v12 = vpop.f32.mrf.mxu1 }
 0x1b2   : > { %v14683_v42 = vadd.f32 %v12669_v6, %v2661_v26  ;;  %v2659_v40 = vadd.f32 %v2484_v12, %v14460_v31  ;;  %v12670_v18 = vpop.f32.mrf.mxu0  ;;  %v4518_v6 = vld [vmem:[%s13586_s22 + $0x140] sm:$0xff]  ;;  %v4520_v26 = vld [vmem:[%s13586_s22 + $0x150] sm:$0xff] }
 0x1b3   : > { %v12628_v5 = vpop.f32.mrf.mxu1  ;;  %v4540_v3 = vpack.c.bf16 %v4518_v6, %v4517_v60 }
 0x1b4   : > { %v14686_v29 = vadd.f32 %v2922_v15, %v2659_v40  ;;  %v2662_v45 = vadd.f32 %v12628_v5, %v14463_v8  ;;  %v2925_v50 = vpop.f32.mrf.mxu0  ;;  %v4541_v40 = vpack.c.bf16 %v4520_v26, %v4519_v37  ;;  %v4921_v26 = vld [vmem:[%s13586_s22 + $0x29] sm:$0xff] }
 0x1b5   : > { %v2487_v9 = vpop.f32.mrf.mxu1 }
 0x1b6   : > { %v14689_v44 = vadd.f32 %v12670_v18, %v2662_v45  ;;  %v2660_v13 = vadd.f32 %v2487_v9, %v14472_v48  ;;  %v12673_v58 = vpop.f32.mrf.mxu0  ;;  %12856 = vmatmul.mubr.msk.bf16.gmra.mxu0 %vm243_vm1, %v4538_v1 }
 0x1b7   : > { %v12631_v31 = vpop.f32.mrf.mxu1  ;;  %12814 = vmatmul.mubr.msk.bf16.gmra.mxu1 %vm243_vm1, %v4537_v43  ;;  %12859 = vmatprep.mubr.msk.bf16.mxu0 %vm243_vm1, %v4539_v57 }
 0x1b8   : > { %v14697_v63 = vadd.f32 %v2925_v50, %v2660_v13  ;;  %v2665_v8 = vadd.f32 %v12631_v31, %v14481_v32  ;;  %v2938_v23 = vpop.f32.mrf.mxu0  ;;  %12817 = vmatprep.mubr.msk.bf16.mxu1 %vm243_vm1, %v4538_v1  ;;  %v16805_v50 = vld [vmem:[#allocation4_spill] sm:$0xff] }
 0x1b9   : > { %v2500_v48 = vpop.f32.mrf.mxu1 }
 0x1ba   : > { %v14703_v15 = vadd.f32 %v12673_v58, %v2665_v8  ;;  %v2663_v27 = vadd.f32 %v2500_v48, %v14484_v35  ;;  %v12674_v43 = vpop.f32.mrf.mxu0  ;;  %v4521_v58 = vld [vmem:[%s13586_s22 + $0x158] sm:$0xff]  ;;  %v5359_v8 = vld [vmem:[%s13586_s22 + $0x2a] sm:$0xff] }
 0x1bb   : > { %v12632_v12 = vpop.f32.mrf.mxu1  ;;  %v4922_v48 = vld [vmem:[%s13586_s22 + $0x31] sm:$0xff] }
 0x1bc   : > { %v14706_v18 = vadd.f32 %v2938_v23, %v2663_v27  ;;  %v2666_v32 = vadd.f32 %v12632_v12, %v14487_v53  ;;  %v2941_v5 = vpop.f32.mrf.mxu0  ;;  %v4522_v53 = vld [vmem:[%s13586_s22 + $0x160] sm:$0xff]  ;;  %v5360_v23 = vld [vmem:[%s13586_s22 + $0x32] sm:$0xff] }
 0x1bd   : > { %v2503_v1 = vpop.f32.mrf.mxu1  ;;  %v4542_v12 = vpack.c.bf16 %v4522_v53, %v4521_v58  ;;  %v5362_v53 = vld [vmem:[%s13586_s22 + $0x42] sm:$0xff] }
 0x1be   : > { %v14709_v45 = vadd.f32 %v12674_v43, %v2666_v32  ;;  %v2664_v9 = vadd.f32 %v2503_v1, %v16805_v50  ;;  %v12677_v35 = vpop.f32.mrf.mxu0  ;;  %12860 = vmatmul.mubr.msk.bf16.gmra.mxu0 %vm243_vm1, %v4540_v3  ;;  %v4961_v50 = vpack.c.bf16 %v4922_v48, %v4921_v26  ;;  %v4925_v26 = vld [vmem:[%s13586_s22 + $0x49] sm:$0xff]  ;;  %v4926_v48 = vld [vmem:[%s13586_s22 + $0x51] sm:$0xff] }
 0x1bf   : > { %v12635_v13 = vpop.f32.mrf.mxu1  ;;  %12818 = vmatmul.mubr.msk.bf16.gmra.mxu1 %vm243_vm1, %v4539_v57  ;;  %12863 = vmatprep.mubr.msk.bf16.mxu0 %vm243_vm1, %v4541_v40 }
 0x1c0   : > { %v14717_v31 = vadd.f32 %v2941_v5, %v2664_v9  ;;  %v2669_v60 = vadd.f32 %v12635_v13, %v14505_v51  ;;  %v2954_v6 = vpop.f32.mrf.mxu0  ;;  %12821 = vmatprep.mubr.msk.bf16.mxu1 %vm243_vm1, %v4540_v3  ;;  %v5399_v5 = vpack.c.bf16 %v5360_v23, %v5359_v8  ;;  %v4924_v23 = vld [vmem:[%s13586_s22 + $0x41] sm:$0xff] }
 0x1c1   : > { %v2516_v37 = vpop.f32.mrf.mxu1 }
 0x1c2   : > { %v14725_v27 = vadd.f32 %v12677_v35, %v2669_v60  ;;  %v2667_v57 = vadd.f32 %v2516_v37, %v14508_v56  ;;  %v12678_v43 = vpop.f32.mrf.mxu0 }
 0x1c3   : > { %v12636_v32 = vpop.f32.mrf.mxu1 }
 0x1c4   : > { %v14728_v1 = vadd.f32 %v2954_v6, %v2667_v57  ;;  %v2670_v51 = vadd.f32 %v12636_v32, %v14511_v20  ;;  %v2957_v3 = vpop.f32.mrf.mxu0  ;;  %v5361_v20 = vld [vmem:[%s13586_s22 + $0x3a] sm:$0xff]  ;;  %v5363_v32 = vld [vmem:[%s13586_s22 + $0x4a] sm:$0xff] }
 0x1c5   : > { %v2519_v9 = vpop.f32.mrf.mxu1 }
 0x1c6   : > { %v14731_v13 = vadd.f32 %v12678_v43, %v2670_v51  ;;  %v2668_v56 = vadd.f32 %v2519_v9, %v14519_v62  ;;  %v12681_v35 = vpop.f32.mrf.mxu0  ;;  %12864 = vmatmul.mubr.msk.bf16.gmra.mxu0 %vm243_vm1, %v4542_v12  ;;  %v4923_v62 = vld [vmem:[%s13586_s22 + $0x39] sm:$0xff]  ;;  %v5400_v12 = vpack.c.bf16 %v5362_v53, %v5361_v20 }
 0x1c7   : > { %v12639_v58 = vpop.f32.mrf.mxu1  ;;  %12822 = vmatmul.mubr.msk.bf16.gmra.mxu1 %vm243_vm1, %v4541_v40  ;;  %12911 = vmatprep.mubr.msk.bf16.mxu0 %vm243_vm1, %v5399_v5  ;;  %v5364_v5 = vld [vmem:[%s13586_s22 + $0x52] sm:$0xff] }
 0x1c8   : > { %v14739_v60 = vadd.f32 %v2957_v3, %v2668_v56  ;;  %v2673_v6 = vadd.f32 %v12639_v58, %v14523_v4  ;;  %v2970_v8 = vpop.f32.mrf.mxu0  ;;  %12869 = vmatprep.mubr.msk.bf16.mxu1 %vm243_vm1, %v4961_v50  ;;  %v4962_v3 = vpack.c.bf16 %v4924_v23, %v4923_v62  ;;  %v6358_v56 = vsel %vm304_vm0, %v14550_v2, 0  ;;  %v14767_v2 = vld [vmem:[%s16784_s1 + $0x3c] sm:$0xf]  ;;  %v14775_v23 = vld [vmem:[%s16784_s1 + $0x40] sm:$0xf] }
 0x1c9   : > { %v2532_v37 = vpop.f32.mrf.mxu1  ;;  %v5401_v20 = vpack.c.bf16 %v5364_v5, %v5363_v32  ;;  %v4929_v5 = vld [vmem:[%s13586_s22 + $0x69] sm:$0xff] }
 0x1ca   : > { %v14747_v57 = vadd.f32 %v12681_v35, %v2673_v6  ;;  %v2671_v40 = vadd.f32 %v2532_v37, %v14528_v11  ;;  %v12682_v43 = vpop.f32.mrf.mxu0  ;;  %v4963_v35 = vpack.c.bf16 %v4926_v48, %v4925_v26  ;;  %v5920_v11 = vsel %vm304_vm0, %v14542_v49, 0  ;;  %v5365_v49 = vld [vmem:[%s13586_s22 + $0x5a] sm:$0xff] }
 0x1cb   : > { %v12640_v51 = vpop.f32.mrf.mxu1 }
 0x1cc   : > { %v14752_v4 = vadd.f32 %v2970_v8, %v2671_v40  ;;  %v2674_v50 = vadd.f32 %v12640_v51, %v14535_v17  ;;  %v2973_v9 = vpop.f32.mrf.mxu0  ;;  %v4927_v17 = vld [vmem:[%s13586_s22 + $0x59] sm:$0xff]  ;;  %v4928_v40 = vld [vmem:[%s13586_s22 + $0x61] sm:$0xff]  ;;  %v4930_v51 = vld [vmem:[%s13586_s22 + $0x71] sm:$0xff] }
 0x1cd   : > { %v2535_v58 = vpop.f32.mrf.mxu1 }
 0x1ce   : > { %v14759_v53 = vadd.f32 %v12682_v43, %v2674_v50  ;;  %v2672_v6 = vadd.f32 %v2535_v58, %v14552_v34  ;;  %v12685_v8 = vpop.f32.mrf.mxu0  ;;  %12912 = vmatmul.mubr.msk.bf16.vlgmr.msra.gmra.mxu0 %vm243_vm1, %v5400_v12  ;;  %v5366_v34 = vld [vmem:[%s13586_s22 + $0x62] sm:$0xff]  ;;  %v5367_v43 = vld [vmem:[%s13586_s22 + $0x6a] sm:$0xff]  ;;  %v5368_v12 = vld [vmem:[%s13586_s22 + $0x72] sm:$0xff] }
 0x1cf   : > { %v12643_v62 = vpop.f32.mrf.mxu1  ;;  %12870 = vmatmul.mubr.msk.bf16.vlgmr.msra.gmra.mxu1 %vm243_vm1, %v4962_v3  ;;  %12994 = vmatpush3.bf16.msra.mxu0 %v6358_v56  ;;  %v5403_v58 = vpack.c.bf16 %v5368_v12, %v5367_v43 }
 0x1d0   : > { %v14777_v37 = vadd.f32 %v2973_v9, %v2672_v6  ;;  %v2677_v26 = vadd.f32 %v12643_v62, %v14561_v0  ;;  %12952 = vmatpush3.bf16.msra.mxu1 %v5920_v11  ;;  %v2986_v48 = vpop.f32.mrf.mxu0  ;;  %12873 = vmatprep.mubr.msk.bf16.mxu1 %vm243_vm1, %v4963_v35  ;;  %v5402_v9 = vpack.c.bf16 %v5366_v34, %v5365_v49 }
 0x1d1   : > { %v2548_v32 = vpop.f32.mrf.mxu1  ;;  %12915 = vmatprep.mubr.msk.bf16.mxu0 %vm243_vm1, %v5401_v20  ;;  %13473 = vmatprep.subr.msk.bf16.mxu1 %vm304_vm0, %v14767_v2  ;;  %v4964_v35 = vpack.c.bf16 %v4928_v40, %v4927_v17 }
 0x1d2   : > { %v14789_v3 = vadd.f32 %v12685_v8, %v2677_v26  ;;  %v2675_v50 = vadd.f32 %v2548_v32, %v14566_v24  ;;  %v12686_v0 = vpop.f32.mrf.mxu0  ;;  %13474 = vmatprep.subr.msk.bf16.mxu0 %vm304_vm0, %v14775_v23  ;;  %v4965_v8 = vpack.c.bf16 %v4930_v51, %v4929_v5  ;;  %v5369_v26 = vld [vmem:[%s13586_s22 + $0x7a] sm:$0xff]  ;;  %v5371_v32 = vld [vmem:[%s13586_s22 + $0x8a] sm:$0xff]  ;;  %v5372_v5 = vld [vmem:[%s13586_s22 + $0x92] sm:$0xff] }
 0x1d3   : > { %v12644_v56 = vpop.f32.mrf.mxu1 }
 0x1d4   : > { %v14794_v11 = vadd.f32 %v2986_v48, %v2675_v50  ;;  %v2678_v20 = vadd.f32 %v12644_v56, %v14569_v46  ;;  %v2989_v6 = vpop.f32.mrf.mxu0  ;;  %v4931_v46 = vld [vmem:[%s13586_s22 + $0x79] sm:$0xff]  ;;  %v5370_v48 = vld [vmem:[%s13586_s22 + $0x82] sm:$0xff] }
 0x1d5   : > { %v2551_v62 = vpop.f32.mrf.mxu1  ;;  %v4933_v50 = vld [vmem:[%s13586_s22 + $0x89] sm:$0xff] }
 0x1d6   : > { %v14797_v24 = vadd.f32 %v12686_v0, %v2678_v20  ;;  %v2676_v49 = vadd.f32 %v2551_v62, %v14577_v38  ;;  %v12689_v34 = vpop.f32.mrf.mxu0  ;;  %12916 = vmatmul.mubr.msk.bf16.gmra.mxu0 %vm243_vm1, %v5402_v9  ;;  %v4932_v38 = vld [vmem:[%s13586_s22 + $0x81] sm:$0xff]  ;;  %v4934_v0 = vld [vmem:[%s13586_s22 + $0x91] sm:$0xff] }
 0x1d7   : > { %v12647_v17 = vpop.f32.mrf.mxu1  ;;  %12874 = vmatmul.mubr.msk.bf16.gmra.mxu1 %vm243_vm1, %v4964_v35  ;;  %12919 = vmatprep.mubr.msk.bf16.mxu0 %vm243_vm1, %v5403_v58  ;;  %v5404_v58 = vpack.c.bf16 %v5370_v48, %v5369_v26  ;;  %v5373_v48 = vld [vmem:[%s13586_s22 + $0x9a] sm:$0xff] }
 0x1d8   : > { %v14806_v40 = vadd.f32 %v2989_v6, %v2676_v49  ;;  %v2681_v43 = vadd.f32 %v12647_v17, %v14583_v30  ;;  %v3002_v12 = vpop.f32.mrf.mxu0  ;;  %12877 = vmatprep.mubr.msk.bf16.mxu1 %vm243_vm1, %v4965_v8  ;;  %v4966_v6 = vpack.c.bf16 %v4932_v38, %v4931_v46  ;;  %v5405_v30 = vpack.c.bf16 %v5372_v5, %v5371_v32  ;;  %v5376_v5 = vld [vmem:[%s13586_s22 + $0xb2] sm:$0xff] }
 0x1d9   : > { %v2564_v51 = vpop.f32.mrf.mxu1  ;;  %v4967_v17 = vpack.c.bf16 %v4934_v0, %v4933_v50  ;;  %v4937_v50 = vld [vmem:[%s13586_s22 + $0xa9] sm:$0xff]  ;;  %v4938_v0 = vld [vmem:[%s13586_s22 + $0xb1] sm:$0xff] }
 0x1da   : > { %16806 = vst [vmem:[#allocation5_spill] sm:$0xff] %v14806_v40  ;;  %v14815_v9 = vadd.f32 %v12689_v34, %v2681_v43  ;;  %v2679_v56 = vadd.f32 %v2564_v51, %v14586_v28  ;;  %v12690_v35 = vpop.f32.mrf.mxu0  ;;  %v5374_v43 = vld [vmem:[%s13586_s22 + $0xa2] sm:$0xff] }
 0x1db   : > { %v12648_v20 = vpop.f32.mrf.mxu1 }
 0x1dc   : > { %v14818_v62 = vadd.f32 %v3002_v12, %v2679_v56  ;;  %v2682_v8 = vadd.f32 %v12648_v20, %v14589_v7  ;;  %v3005_v49 = vpop.f32.mrf.mxu0  ;;  %v4935_v7 = vld [vmem:[%s13586_s22 + $0x99] sm:$0xff]  ;;  %v5406_v20 = vpack.c.bf16 %v5374_v43, %v5373_v48 }
 0x1dd   : > { %v2567_v40 = vpop.f32.mrf.mxu1  ;;  %v5377_v43 = vld [vmem:[%s13586_s22 + $0xba] sm:$0xff] }
 0x1de   : > { %v14821_v34 = vadd.f32 %v12690_v35, %v2682_v8  ;;  %v2680_v28 = vadd.f32 %v2567_v40, %v14597_v14  ;;  %v12693_v26 = vpop.f32.mrf.mxu0  ;;  %12920 = vmatmul.mubr.msk.bf16.gmra.mxu0 %vm243_vm1, %v5404_v58  ;;  %v4936_v14 = vld [vmem:[%s13586_s22 + $0xa1] sm:$0xff]  ;;  %v5375_v40 = vld [vmem:[%s13586_s22 + $0xaa] sm:$0xff] }
 0x1df   : > { %v12651_v46 = vpop.f32.mrf.mxu1  ;;  %12878 = vmatmul.mubr.msk.bf16.gmra.mxu1 %vm243_vm1, %v4966_v6  ;;  %12923 = vmatprep.mubr.msk.bf16.mxu0 %vm243_vm1, %v5405_v30  ;;  %v4968_v30 = vpack.c.bf16 %v4936_v14, %v4935_v7 }
 0x1e0   : > { %v14830_v12 = vadd.f32 %v3005_v49, %v2680_v28  ;;  %v2685_v38 = vadd.f32 %v12651_v46, %v14603_v47  ;;  %v3018_v32 = vpop.f32.mrf.mxu0  ;;  %12881 = vmatprep.mubr.msk.bf16.mxu1 %vm243_vm1, %v4967_v17  ;;  %v5407_v47 = vpack.c.bf16 %v5376_v5, %v5375_v40  ;;  %v4969_v28 = vpack.c.bf16 %v4938_v0, %v4937_v50  ;;  %v5379_v5 = vld [vmem:[%s13586_s22 + $0xca] sm:$0xff] }
 0x1e1   : > { %v2580_v51 = vpop.f32.mrf.mxu1  ;;  %v4941_v0 = vld [vmem:[%s13586_s22 + $0xc9] sm:$0xff] }
 0x1e2   : > { %v14839_v56 = vadd.f32 %v12693_v26, %v2685_v38  ;;  %v2683_v35 = vadd.f32 %v2580_v51, %v14606_v19  ;;  %v12694_v58 = vpop.f32.mrf.mxu0  ;;  %v5378_v38 = vld [vmem:[%s13586_s22 + $0xc2] sm:$0xff]  ;;  %v5380_v51 = vld [vmem:[%s13586_s22 + $0xd2] sm:$0xff] }
 0x1e3   : > { %v12652_v6 = vpop.f32.mrf.mxu1 }
 0x1e4   : > { %v14842_v8 = vadd.f32 %v3018_v32, %v2683_v35  ;;  %v2686_v49 = vadd.f32 %v12652_v6, %v14609_v21  ;;  %v3021_v17 = vpop.f32.mrf.mxu0  ;;  %v4939_v21 = vld [vmem:[%s13586_s22 + $0xb9] sm:$0xff]  ;;  %v4942_v35 = vld [vmem:[%s13586_s22 + $0xd1] sm:$0xff] }
 0x1e5   : > { %v2583_v46 = vpop.f32.mrf.mxu1 }
 0x1e6   : > { %v14845_v26 = vadd.f32 %v12694_v58, %v2686_v49  ;;  %v2684_v19 = vadd.f32 %v2583_v46, %v14617_v16  ;;  %v12697_v48 = vpop.f32.mrf.mxu0  ;;  %12924 = vmatmul.mubr.msk.bf16.gmra.mxu0 %vm243_vm1, %v5406_v20  ;;  %v4940_v16 = vld [vmem:[%s13586_s22 + $0xc1] sm:$0xff] }
 0x1e7   : > { %v12655_v7 = vpop.f32.mrf.mxu1  ;;  %12882 = vmatmul.mubr.msk.bf16.gmra.mxu1 %vm243_vm1, %v4968_v30  ;;  %12927 = vmatprep.mubr.msk.bf16.mxu0 %vm243_vm1, %v5407_v47  ;;  %v5408_v30 = vpack.c.bf16 %v5378_v38, %v5377_v43  ;;  %v4970_v49 = vpack.c.bf16 %v4940_v16, %v4939_v21  ;;  %v5381_v38 = vld [vmem:[%s13586_s22 + $0xda] sm:$0xff] }
 0x1e8   : > { %v14854_v32 = vadd.f32 %v3021_v17, %v2684_v19  ;;  %v2689_v14 = vadd.f32 %v12655_v7, %v14623_v22  ;;  %v3034_v40 = vpop.f32.mrf.mxu0  ;;  %12885 = vmatprep.mubr.msk.bf16.mxu1 %vm243_vm1, %v4969_v28  ;;  %v5409_v22 = vpack.c.bf16 %v5380_v51, %v5379_v5  ;;  %v4971_v19 = vpack.c.bf16 %v4942_v35, %v4941_v0  ;;  %v5383_v51 = vld [vmem:[%s13586_s22 + $0xea] sm:$0xff] }
 0x1e9   : > { %v2596_v50 = vpop.f32.mrf.mxu1  ;;  %v4945_v35 = vld [vmem:[%s13586_s22 + $0xe9] sm:$0xff] }
 0x1ea   : > { %v14863_v58 = vadd.f32 %v12697_v48, %v2689_v14  ;;  %v2687_v20 = vadd.f32 %v2596_v50, %v14626_v54  ;;  %v12698_v6 = vpop.f32.mrf.mxu0  ;;  %v5382_v14 = vld [vmem:[%s13586_s22 + $0xe2] sm:$0xff]  ;;  %v5384_v50 = vld [vmem:[%s13586_s22 + $0xf2] sm:$0xff] }
 0x1eb   : > { %v12656_v47 = vpop.f32.mrf.mxu1 }
 0x1ec   : > { %v14866_v17 = vadd.f32 %v3034_v40, %v2687_v20  ;;  %v2690_v28 = vadd.f32 %v12656_v47, %v14629_v33  ;;  %v3037_v46 = vpop.f32.mrf.mxu0  ;;  %v4943_v33 = vld [vmem:[%s13586_s22 + $0xd9] sm:$0xff]  ;;  %v4946_v20 = vld [vmem:[%s13586_s22 + $0xf1] sm:$0xff] }
 0x1ed   : > { %v2599_v7 = vpop.f32.mrf.mxu1 }
 0x1ee   : > { %v14869_v48 = vadd.f32 %v12698_v6, %v2690_v28  ;;  %v2688_v54 = vadd.f32 %v2599_v7, %v14637_v52  ;;  %v12745_v43 = vpop.f32.mrf.mxu0  ;;  %12928 = vmatmul.mubr.msk.bf16.gmra.mxu0 %vm243_vm1, %v5408_v30  ;;  %v4944_v52 = vld [vmem:[%s13586_s22 + $0xe1] sm:$0xff] }
 0x1ef   : > { %v12703_v21 = vpop.f32.mrf.mxu1  ;;  %12886 = vmatmul.mubr.msk.bf16.gmra.mxu1 %vm243_vm1, %v4970_v49  ;;  %12931 = vmatprep.mubr.msk.bf16.mxu0 %vm243_vm1, %v5409_v22  ;;  %v5410_v49 = vpack.c.bf16 %v5382_v14, %v5381_v38  ;;  %v4972_v28 = vpack.c.bf16 %v4944_v52, %v4943_v33  ;;  %v5385_v14 = vld [vmem:[%s13586_s22 + $0xfa] sm:$0xff] }
 0x1f0   : > { %v14878_v40 = vadd.f32 %v3037_v46, %v2688_v54  ;;  %v3529_v16 = vadd.f32 %v12703_v21, %v14643_v59  ;;  %v3766_v5 = vpop.f32.mrf.mxu0  ;;  %12889 = vmatprep.mubr.msk.bf16.mxu1 %vm243_vm1, %v4971_v19  ;;  %v5411_v59 = vpack.c.bf16 %v5384_v50, %v5383_v51  ;;  %v4973_v54 = vpack.c.bf16 %v4946_v20, %v4945_v35  ;;  %v5387_v50 = vld [vmem:[%s13586_s22 + $0x10a] sm:$0xff] }
 0x1f1   : > { %v3328_v0 = vpop.f32.mrf.mxu1  ;;  %v4949_v20 = vld [vmem:[%s13586_s22 + $0x109] sm:$0xff] }
 0x1f2   : > { %v14887_v6 = vadd.f32 %v12745_v43, %v3529_v16  ;;  %v3527_v30 = vadd.f32 %v3328_v0, %v14646_v36  ;;  %v12746_v47 = vpop.f32.mrf.mxu0  ;;  %v5386_v16 = vld [vmem:[%s13586_s22 + $0x102] sm:$0xff]  ;;  %v5388_v0 = vld [vmem:[%s13586_s22 + $0x112] sm:$0xff] }
 0x1f3   : > { %v12704_v22 = vpop.f32.mrf.mxu1 }
 0x1f4   : > { %v14890_v46 = vadd.f32 %v3766_v5, %v3527_v30  ;;  %v3530_v19 = vadd.f32 %v12704_v22, %v14649_v55  ;;  %v3769_v7 = vpop.f32.mrf.mxu0  ;;  %v4947_v55 = vld [vmem:[%s13586_s22 + $0xf9] sm:$0xff]  ;;  %v4950_v30 = vld [vmem:[%s13586_s22 + $0x111] sm:$0xff] }
 0x1f5   : > { %v3331_v21 = vpop.f32.mrf.mxu1 }
 0x1f6   : > { %v14893_v43 = vadd.f32 %v12746_v47, %v3530_v19  ;;  %v3528_v36 = vadd.f32 %v3331_v21, %v14657_v41  ;;  %v12749_v38 = vpop.f32.mrf.mxu0  ;;  %12932 = vmatmul.mubr.msk.bf16.gmra.mxu0 %vm243_vm1, %v5410_v49  ;;  %v4948_v41 = vld [vmem:[%s13586_s22 + $0x101] sm:$0xff] }
 0x1f7   : > { %v12707_v33 = vpop.f32.mrf.mxu1  ;;  %12890 = vmatmul.mubr.msk.bf16.gmra.mxu1 %vm243_vm1, %v4972_v28  ;;  %12935 = vmatprep.mubr.msk.bf16.mxu0 %vm243_vm1, %v5411_v59  ;;  %v5412_v28 = vpack.c.bf16 %v5386_v16, %v5385_v14  ;;  %v4974_v19 = vpack.c.bf16 %v4948_v41, %v4947_v55  ;;  %v5389_v16 = vld [vmem:[%s13586_s22 + $0x11a] sm:$0xff] }
 0x1f8   : > { %v14902_v5 = vadd.f32 %v3769_v7, %v3528_v36  ;;  %v3533_v52 = vadd.f32 %v12707_v33, %v14663_v25  ;;  %v3782_v51 = vpop.f32.mrf.mxu0  ;;  %12893 = vmatprep.mubr.msk.bf16.mxu1 %vm243_vm1, %v4973_v54  ;;  %v5413_v25 = vpack.c.bf16 %v5388_v0, %v5387_v50  ;;  %v4975_v36 = vpack.c.bf16 %v4950_v30, %v4949_v20  ;;  %v5391_v0 = vld [vmem:[%s13586_s22 + $0x12a] sm:$0xff] }
 0x1f9   : > { %v3344_v35 = vpop.f32.mrf.mxu1  ;;  %v4953_v30 = vld [vmem:[%s13586_s22 + $0x129] sm:$0xff] }
 0x1fa   : > { %v14911_v47 = vadd.f32 %v12749_v38, %v3533_v52  ;;  %v3531_v49 = vadd.f32 %v3344_v35, %v14666_v39  ;;  %v12750_v22 = vpop.f32.mrf.mxu0  ;;  %v5390_v52 = vld [vmem:[%s13586_s22 + $0x122] sm:$0xff]  ;;  %v5392_v35 = vld [vmem:[%s13586_s22 + $0x132] sm:$0xff] }
 0x1fb   : > { %v12708_v59 = vpop.f32.mrf.mxu1 }
 0x1fc   : > { %v14914_v7 = vadd.f32 %v3782_v51, %v3531_v49  ;;  %v3534_v54 = vadd.f32 %v12708_v59, %v14669_v10  ;;  %v3785_v21 = vpop.f32.mrf.mxu0  ;;  %v4951_v10 = vld [vmem:[%s13586_s22 + $0x119] sm:$0xff]  ;;  %v4954_v49 = vld [vmem:[%s13586_s22 + $0x131] sm:$0xff] }
 0x1fd   : > { %v3347_v33 = vpop.f32.mrf.mxu1 }
 0x1fe   : > { %v14917_v38 = vadd.f32 %v12750_v22, %v3534_v54  ;;  %v3532_v39 = vadd.f32 %v3347_v33, %v14677_v61  ;;  %v12753_v14 = vpop.f32.mrf.mxu0  ;;  %12936 = vmatmul.mubr.msk.bf16.gmra.mxu0 %vm243_vm1, %v5412_v28  ;;  %v4952_v61 = vld [vmem:[%s13586_s22 + $0x121] sm:$0xff] }
 0x1ff   : > { %v12711_v55 = vpop.f32.mrf.mxu1  ;;  %12894 = vmatmul.mubr.msk.bf16.gmra.mxu1 %vm243_vm1, %v4974_v19  ;;  %12939 = vmatprep.mubr.msk.bf16.mxu0 %vm243_vm1, %v5413_v25  ;;  %v5414_v19 = vpack.c.bf16 %v5390_v52, %v5389_v16  ;;  %v4976_v54 = vpack.c.bf16 %v4952_v61, %v4951_v10  ;;  %v5393_v52 = vld [vmem:[%s13586_s22 + $0x13a] sm:$0xff] }
 0x200   : > { %v14926_v51 = vadd.f32 %v3785_v21, %v3532_v39  ;;  %v3537_v41 = vadd.f32 %v12711_v55, %v14683_v42  ;;  %v3798_v50 = vpop.f32.mrf.mxu0  ;;  %12897 = vmatprep.mubr.msk.bf16.mxu1 %vm243_vm1, %v4975_v36  ;;  %v5415_v42 = vpack.c.bf16 %v5392_v35, %v5391_v0  ;;  %v4977_v39 = vpack.c.bf16 %v4954_v49, %v4953_v30  ;;  %v5395_v35 = vld [vmem:[%s13586_s22 + $0x14a] sm:$0xff] }
 0x201   : > { %v3360_v20 = vpop.f32.mrf.mxu1  ;;  %v4957_v49 = vld [vmem:[%s13586_s22 + $0x149] sm:$0xff] }
 0x202   : > { %v14935_v22 = vadd.f32 %v12753_v14, %v3537_v41  ;;  %v3535_v28 = vadd.f32 %v3360_v20, %v14686_v29  ;;  %v12754_v59 = vpop.f32.mrf.mxu0  ;;  %v5394_v41 = vld [vmem:[%s13586_s22 + $0x142] sm:$0xff]  ;;  %v5396_v20 = vld [vmem:[%s13586_s22 + $0x152] sm:$0xff] }
 0x203   : > { %v12712_v25 = vpop.f32.mrf.mxu1 }
 0x204   : > { %v14938_v21 = vadd.f32 %v3798_v50, %v3535_v28  ;;  %v3538_v36 = vadd.f32 %v12712_v25, %v14689_v44  ;;  %v3801_v33 = vpop.f32.mrf.mxu0  ;;  %v4955_v44 = vld [vmem:[%s13586_s22 + $0x139] sm:$0xff]  ;;  %v4958_v28 = vld [vmem:[%s13586_s22 + $0x151] sm:$0xff] }
 0x205   : > { %v3363_v55 = vpop.f32.mrf.mxu1 }
 0x206   : > { %v14941_v14 = vadd.f32 %v12754_v59, %v3538_v36  ;;  %v3536_v29 = vadd.f32 %v3363_v55, %v14697_v63  ;;  %v12757_v16 = vpop.f32.mrf.mxu0  ;;  %12940 = vmatmul.mubr.msk.bf16.gmra.mxu0 %vm243_vm1, %v5414_v19  ;;  %v4956_v63 = vld [vmem:[%s13586_s22 + $0x141] sm:$0xff] }
 0x207   : > { %v12715_v10 = vpop.f32.mrf.mxu1  ;;  %12898 = vmatmul.mubr.msk.bf16.gmra.mxu1 %vm243_vm1, %v4976_v54  ;;  %12943 = vmatprep.mubr.msk.bf16.mxu0 %vm243_vm1, %v5415_v42  ;;  %v5416_v54 = vpack.c.bf16 %v5394_v41, %v5393_v52  ;;  %v4978_v36 = vpack.c.bf16 %v4956_v63, %v4955_v44  ;;  %v5397_v41 = vld [vmem:[%s13586_s22 + $0x15a] sm:$0xff] }
 0x208   : > { %v14950_v50 = vadd.f32 %v3801_v33, %v3536_v29  ;;  %v3541_v61 = vadd.f32 %v12715_v10, %v14703_v15  ;;  %v3814_v0 = vpop.f32.mrf.mxu0  ;;  %12901 = vmatprep.mubr.msk.bf16.mxu1 %vm243_vm1, %v4977_v39  ;;  %v5417_v15 = vpack.c.bf16 %v5396_v20, %v5395_v35  ;;  %v4979_v29 = vpack.c.bf16 %v4958_v28, %v4957_v49  ;;  %v6235_v20 = vld [vmem:[%s13586_s22 + $0x2c] sm:$0xff] }
 0x209   : > { %v3376_v30 = vpop.f32.mrf.mxu1  ;;  %v5797_v28 = vld [vmem:[%s13586_s22 + $0x2b] sm:$0xff] }
 0x20a   : > { %v14959_v59 = vadd.f32 %v12757_v16, %v3541_v61  ;;  %v3539_v19 = vadd.f32 %v3376_v30, %v14706_v18  ;;  %v12758_v25 = vpop.f32.mrf.mxu0  ;;  %v5398_v61 = vld [vmem:[%s13586_s22 + $0x162] sm:$0xff]  ;;  %v6236_v30 = vld [vmem:[%s13586_s22 + $0x34] sm:$0xff] }
 0x20b   : > { %v12716_v42 = vpop.f32.mrf.mxu1 }
 0x20c   : > { %v14962_v33 = vadd.f32 %v3814_v0, %v3539_v19  ;;  %v3542_v39 = vadd.f32 %v12716_v42, %v14709_v45  ;;  %v3817_v55 = vpop.f32.mrf.mxu0  ;;  %v4959_v45 = vld [vmem:[%s13586_s22 + $0x159] sm:$0xff] }
 0x20d   : > { %v3379_v10 = vpop.f32.mrf.mxu1  ;;  %v5798_v19 = vld [vmem:[%s13586_s22 + $0x33] sm:$0xff] }
 0x20e   : > { %v14965_v16 = vadd.f32 %v12758_v25, %v3542_v39  ;;  %v3540_v18 = vadd.f32 %v3379_v10, %v14717_v31  ;;  %v12761_v52 = vpop.f32.mrf.mxu0  ;;  %12944 = vmatmul.mubr.msk.bf16.gmra.mxu0 %vm243_vm1, %v5416_v54  ;;  %v4960_v31 = vld [vmem:[%s13586_s22 + $0x161] sm:$0xff] }
 0x20f   : > { %v12719_v44 = vpop.f32.mrf.mxu1  ;;  %12902 = vmatmul.mubr.msk.bf16.gmra.mxu1 %vm243_vm1, %v4978_v36  ;;  %12947 = vmatprep.mubr.msk.bf16.mxu0 %vm243_vm1, %v5417_v15  ;;  %v5418_v36 = vpack.c.bf16 %v5398_v61, %v5397_v41  ;;  %v4980_v39 = vpack.c.bf16 %v4960_v31, %v4959_v45  ;;  %v6238_v61 = vld [vmem:[%s13586_s22 + $0x44] sm:$0xff] }
 0x210   : > { %v14974_v0 = vadd.f32 %v3817_v55, %v3540_v18  ;;  %v3545_v63 = vadd.f32 %v12719_v44, %v14725_v27  ;;  %v3830_v35 = vpop.f32.mrf.mxu0  ;;  %12905 = vmatprep.mubr.msk.bf16.mxu1 %vm243_vm1, %v4979_v29  ;;  %v6275_v27 = vpack.c.bf16 %v6236_v30, %v6235_v20  ;;  %v5837_v18 = vpack.c.bf16 %v5798_v19, %v5797_v28  ;;  %v5800_v20 = vld [vmem:[%s13586_s22 + $0x43] sm:$0xff]  ;;  %v5802_v28 = vld [vmem:[%s13586_s22 + $0x53] sm:$0xff] }
 0x211   : > { %v3392_v49 = vpop.f32.mrf.mxu1 }
 0x212   : > { %v14983_v25 = vadd.f32 %v12761_v52, %v3545_v63  ;;  %v3543_v54 = vadd.f32 %v3392_v49, %v14728_v1  ;;  %v12762_v42 = vpop.f32.mrf.mxu0  ;;  %v5801_v49 = vld [vmem:[%s13586_s22 + $0x4b] sm:$0xff] }
 0x213   : > { %v12720_v15 = vpop.f32.mrf.mxu1 }
 0x214   : > { %v14986_v55 = vadd.f32 %v3830_v35, %v3543_v54  ;;  %v3546_v29 = vadd.f32 %v12720_v15, %v14731_v13  ;;  %v3833_v10 = vpop.f32.mrf.mxu0  ;;  %v6237_v13 = vld [vmem:[%s13586_s22 + $0x3c] sm:$0xff]  ;;  %v6239_v15 = vld [vmem:[%s13586_s22 + $0x4c] sm:$0xff] }
 0x215   : > { %v3395_v44 = vpop.f32.mrf.mxu1 }
 0x216   : > { %v14989_v52 = vadd.f32 %v12762_v42, %v3546_v29  ;;  %v3544_v1 = vadd.f32 %v3395_v44, %v14739_v60  ;;  %v12765_v41 = vpop.f32.mrf.mxu0  ;;  %12948 = vmatmul.mubr.msk.bf16.gmra.mxu0 %vm243_vm1, %v5418_v36  ;;  %v5799_v60 = vld [vmem:[%s13586_s22 + $0x3b] sm:$0xff]  ;;  %v15008_v36 = vpack.c.bf16 %v6238_v61, %v6237_v13  ;;  %v7234_v44 = vsel %vm304_vm0, %v14775_v23, 0  ;;  %v15030_v23 = vld [vmem:[%s16784_s1 + $0x44] sm:$0xf] }
 0x217   : > { %v12723_v45 = vpop.f32.mrf.mxu1  ;;  %12906 = vmatmul.mubr.msk.bf16.gmra.mxu1 %vm243_vm1, %v4980_v39  ;;  %12995 = vmatprep.mubr.msk.bf16.mxu0 %vm243_vm1, %v6275_v27  ;;  %v6240_v39 = vld [vmem:[%s13586_s22 + $0x54] sm:$0xff] }
 0x218   : > { %v14997_v63 = vadd.f32 %v3833_v10, %v3544_v1  ;;  %v3549_v35 = vadd.f32 %v12723_v45, %v14747_v57  ;;  %v3846_v31 = vpop.f32.mrf.mxu0  ;;  %12953 = vmatprep.mubr.msk.bf16.mxu1 %vm243_vm1, %v5837_v18  ;;  %v5838_v57 = vpack.c.bf16 %v5800_v20, %v5799_v60  ;;  %v5839_v1 = vpack.c.bf16 %v5802_v28, %v5801_v49  ;;  %v15038_v60 = vld [vmem:[%s16784_s1 + $0x48] sm:$0xf] }
 0x219   : > { %v3408_v30 = vpop.f32.mrf.mxu1  ;;  %v15019_v45 = vpack.c.bf16 %v6240_v39, %v6239_v15  ;;  %v5804_v28 = vld [vmem:[%s13586_s22 + $0x63] sm:$0xff]  ;;  %v5805_v39 = vld [vmem:[%s13586_s22 + $0x6b] sm:$0xff] }
 0x21a   : > { %v15005_v19 = vadd.f32 %v12765_v41, %v3549_v35  ;;  %v3547_v54 = vadd.f32 %v3408_v30, %v14752_v4  ;;  %v12766_v42 = vpop.f32.mrf.mxu0  ;;  %v6796_v41 = vsel %vm304_vm0, %v14767_v2, 0 }
 0x21b   : > { %v12724_v27 = vpop.f32.mrf.mxu1 }
 0x21c   : > { %v15012_v29 = vadd.f32 %v3846_v31, %v3547_v54  ;;  %v3550_v10 = vadd.f32 %v12724_v27, %v14759_v53  ;;  %v3849_v18 = vpop.f32.mrf.mxu0  ;;  %v5803_v53 = vld [vmem:[%s13586_s22 + $0x5b] sm:$0xff]  ;;  %v6242_v31 = vld [vmem:[%s13586_s22 + $0x64] sm:$0xff]  ;;  %v6243_v54 = vld [vmem:[%s13586_s22 + $0x6c] sm:$0xff] }
 0x21d   : > { %v3411_v4 = vpop.f32.mrf.mxu1  ;;  %v5806_v27 = vld [vmem:[%s13586_s22 + $0x73] sm:$0xff] }
 0x21e   : > { %v15021_v13 = vadd.f32 %v12766_v42, %v3550_v10  ;;  %v3548_v61 = vadd.f32 %v3411_v4, %v14777_v37  ;;  %v12769_v35 = vpop.f32.mrf.mxu0  ;;  %12996 = vmatmul.mubr.msk.bf16.vlgmr.msra.gmra.mxu0 %vm243_vm1, %v15008_v36  ;;  %v6241_v37 = vld [vmem:[%s13586_s22 + $0x5c] sm:$0xff]  ;;  %v6244_v42 = vld [vmem:[%s13586_s22 + $0x74] sm:$0xff] }
 0x21f   : > { %v12727_v2 = vpop.f32.mrf.mxu1  ;;  %12954 = vmatmul.mubr.msk.bf16.vlgmr.msra.gmra.mxu1 %vm243_vm1, %v5838_v57  ;;  %13078 = vmatpush3.bf16.msra.mxu0 %v7234_v44  ;;  %v15060_v4 = vpack.c.bf16 %v6244_v42, %v6243_v54 }
 0x220   : > { %v15040_v20 = vadd.f32 %v3849_v18, %v3548_v61  ;;  %v3553_v30 = vadd.f32 %v12727_v2, %v14789_v3  ;;  %13036 = vmatpush3.bf16.msra.mxu1 %v6796_v41  ;;  %v3862_v49 = vpop.f32.mrf.mxu0  ;;  %12957 = vmatprep.mubr.msk.bf16.mxu1 %vm243_vm1, %v5839_v1  ;;  %v15056_v18 = vpack.c.bf16 %v6242_v31, %v6241_v37  ;;  %v16810_v31 = vld [vmem:[#allocation5_spill] sm:$0xff] }
 0x221   : > { %v3424_v15 = vpop.f32.mrf.mxu1  ;;  %12999 = vmatprep.mubr.msk.bf16.mxu0 %vm243_vm1, %v15019_v45  ;;  %13475 = vmatprep.subr.msk.bf16.mxu1 %vm304_vm0, %v15030_v23  ;;  %v5840_v1 = vpack.c.bf16 %v5804_v28, %v5803_v53  ;;  %16807 = vst [vmem:[#allocation6_spill] sm:$0xff] %v15060_v4  ;;  %v5841_v2 = vpack.c.bf16 %v5806_v27, %v5805_v39  ;;  %v6246_v28 = vld [vmem:[%s13586_s22 + $0x84] sm:$0xff] }
 0x222   : > { %v15053_v57 = vadd.f32 %v12769_v35, %v3553_v30  ;;  %v3551_v3 = vadd.f32 %v3424_v15, %v14794_v11  ;;  %v12770_v10 = vpop.f32.mrf.mxu0  ;;  %13476 = vmatprep.subr.msk.bf16.mxu0 %vm304_vm0, %v15038_v60  ;;  %v5808_v27 = vld [vmem:[%s13586_s22 + $0x83] sm:$0xff] }
 0x223   : > { %v12728_v44 = vpop.f32.mrf.mxu1 }
 0x224   : > { %v15062_v41 = vadd.f32 %v3862_v49, %v3551_v3  ;;  %v3554_v61 = vadd.f32 %v12728_v44, %v14797_v24  ;;  %v3865_v35 = vpop.f32.mrf.mxu0  ;;  %v5807_v24 = vld [vmem:[%s13586_s22 + $0x7b] sm:$0xff]  ;;  %v6247_v3 = vld [vmem:[%s13586_s22 + $0x8c] sm:$0xff] }
 0x225   : > { %v3427_v11 = vpop.f32.mrf.mxu1  ;;  %v6245_v49 = vld [vmem:[%s13586_s22 + $0x7c] sm:$0xff] }
 0x226   : > { %16808 = vst [vmem:[#allocation3_spill] sm:$0xff] %v15062_v41  ;;  %v15065_v37 = vadd.f32 %v12770_v10, %v3554_v61  ;;  %v3552_v30 = vadd.f32 %v3427_v11, %v16810_v31  ;;  %v12773_v15 = vpop.f32.mrf.mxu0  ;;  %13000 = vmatmul.mubr.msk.bf16.gmra.mxu0 %vm243_vm1, %v15056_v18  ;;  %v6248_v10 = vld [vmem:[%s13586_s22 + $0x94] sm:$0xff]  ;;  %v5809_v61 = vld [vmem:[%s13586_s22 + $0x8b] sm:$0xff] }
 0x227   : > { %v12731_v53 = vpop.f32.mrf.mxu1  ;;  %12958 = vmatmul.mubr.msk.bf16.gmra.mxu1 %vm243_vm1, %v5840_v1  ;;  %13003 = vmatprep.mubr.msk.bf16.mxu0 %vm243_vm1, %v15060_v4  ;;  %v5810_v11 = vld [vmem:[%s13586_s22 + $0x93] sm:$0xff] }
 0x228   : > { %16809 = vst [vmem:[#allocation4_spill] sm:$0xff] %v15065_v37  ;;  %v15076_v54 = vadd.f32 %v3865_v35, %v3552_v30  ;;  %v3557_v42 = vadd.f32 %v12731_v53, %v14815_v9  ;;  %v3878_v39 = vpop.f32.mrf.mxu0  ;;  %12961 = vmatprep.mubr.msk.bf16.mxu1 %vm243_vm1, %v5841_v2  ;;  %v15088_v37 = vpack.c.bf16 %v6246_v28, %v6245_v49 }
 0x229   : > { %v3440_v44 = vpop.f32.mrf.mxu1  ;;  %v5842_v9 = vpack.c.bf16 %v5808_v27, %v5807_v24  ;;  %v15090_v30 = vpack.c.bf16 %v6248_v10, %v6247_v3  ;;  %v5843_v41 = vpack.c.bf16 %v5810_v11, %v5809_v61  ;;  %v5812_v3 = vld [vmem:[%s13586_s22 + $0xa3] sm:$0xff]  ;;  %v6251_v10 = vld [vmem:[%s13586_s22 + $0xac] sm:$0xff] }
 0x22a   : > { %16811 = vst [vmem:[#allocation5_spill] sm:$0xff] %v15076_v54  ;;  %v15085_v1 = vadd.f32 %v12773_v15, %v3557_v42  ;;  %v3555_v31 = vadd.f32 %v3440_v44, %v14818_v62  ;;  %v12774_v4 = vpop.f32.mrf.mxu0  ;;  %v6249_v42 = vld [vmem:[%s13586_s22 + $0x9c] sm:$0xff]  ;;  %v6252_v44 = vld [vmem:[%s13586_s22 + $0xb4] sm:$0xff]  ;;  %v5813_v11 = vld [vmem:[%s13586_s22 + $0xab] sm:$0xff] }
 0x22b   : > { %v12732_v35 = vpop.f32.mrf.mxu1  ;;  %16812 = vst [vmem:[#allocation7_spill] sm:$0xff] %v15090_v30 }
 0x22c   : > { %v15092_v2 = vadd.f32 %v3878_v39, %v3555_v31  ;;  %v3558_v53 = vadd.f32 %v12732_v35, %v14821_v34  ;;  %v3881_v54 = vpop.f32.mrf.mxu0  ;;  %v5811_v34 = vld [vmem:[%s13586_s22 + $0x9b] sm:$0xff]  ;;  %v6250_v39 = vld [vmem:[%s13586_s22 + $0xa4] sm:$0xff]  ;;  %v5814_v31 = vld [vmem:[%s13586_s22 + $0xb3] sm:$0xff] }
 0x22d   : > { %v3443_v15 = vpop.f32.mrf.mxu1 }
 0x22e   : > { %v15095_v62 = vadd.f32 %v12774_v4, %v3558_v53  ;;  %v3556_v49 = vadd.f32 %v3443_v15, %v14830_v12  ;;  %v12777_v28 = vpop.f32.mrf.mxu0  ;;  %13004 = vmatmul.mubr.msk.bf16.gmra.mxu0 %vm243_vm1, %v15088_v37  ;;  %v15118_v15 = vpack.c.bf16 %v6250_v39, %v6249_v42 }
 0x22f   : > { %v12735_v24 = vpop.f32.mrf.mxu1  ;;  %12962 = vmatmul.mubr.msk.bf16.gmra.mxu1 %vm243_vm1, %v5842_v9  ;;  %13007 = vmatprep.mubr.msk.bf16.mxu0 %vm243_vm1, %v15090_v30 }
 0x230   : > { %v15106_v4 = vadd.f32 %v3881_v54, %v3556_v49  ;;  %v3561_v27 = vadd.f32 %v12735_v24, %v14839_v56  ;;  %v3894_v12 = vpop.f32.mrf.mxu0  ;;  %12965 = vmatprep.mubr.msk.bf16.mxu1 %vm243_vm1, %v5843_v41  ;;  %v5844_v56 = vpack.c.bf16 %v5812_v3, %v5811_v34  ;;  %v15120_v49 = vpack.c.bf16 %v6252_v44, %v6251_v10  ;;  %v5816_v44 = vld [vmem:[%s13586_s22 + $0xc3] sm:$0xff] }
 0x231   : > { %v3456_v61 = vpop.f32.mrf.mxu1 }
 0x232   : > { %16813 = vst [vmem:[#allocation8_spill] sm:$0xff] %v15106_v4  ;;  %v15115_v35 = vadd.f32 %v12777_v28, %v3561_v27  ;;  %v3559_v9 = vadd.f32 %v3456_v61, %v14842_v8  ;;  %v12778_v53 = vpop.f32.mrf.mxu0  ;;  %16814 = vst [vmem:[#allocation9_spill] sm:$0xff] %v15120_v49  ;;  %v5845_v4 = vpack.c.bf16 %v5814_v31, %v5813_v11  ;;  %v6253_v27 = vld [vmem:[%s13586_s22 + $0xbc] sm:$0xff]  ;;  %v6255_v61 = vld [vmem:[%s13586_s22 + $0xcc] sm:$0xff] }
 0x233   : > { %v12736_v54 = vpop.f32.mrf.mxu1  ;;  %v6256_v11 = vld [vmem:[%s13586_s22 + $0xd4] sm:$0xff] }
 0x234   : > { %v15122_v41 = vadd.f32 %v3894_v12, %v3559_v9  ;;  %v3562_v24 = vadd.f32 %v12736_v54, %v14845_v26  ;;  %v3897_v30 = vpop.f32.mrf.mxu0  ;;  %v5815_v26 = vld [vmem:[%s13586_s22 + $0xbb] sm:$0xff]  ;;  %v6254_v12 = vld [vmem:[%s13586_s22 + $0xc4] sm:$0xff] }
 0x235   : > { %v3459_v28 = vpop.f32.mrf.mxu1  ;;  %v5817_v9 = vld [vmem:[%s13586_s22 + $0xcb] sm:$0xff] }
 0x236   : > { %v15125_v8 = vadd.f32 %v12778_v53, %v3562_v24  ;;  %v3560_v42 = vadd.f32 %v3459_v28, %v14854_v32  ;;  %v12781_v39 = vpop.f32.mrf.mxu0  ;;  %13008 = vmatmul.mubr.msk.bf16.gmra.mxu0 %vm243_vm1, %v15118_v15  ;;  %v5818_v53 = vld [vmem:[%s13586_s22 + $0xd3] sm:$0xff]  ;;  %v15148_v28 = vpack.c.bf16 %v6254_v12, %v6253_v27 }
 0x237   : > { %v12739_v34 = vpop.f32.mrf.mxu1  ;;  %12966 = vmatmul.mubr.msk.bf16.gmra.mxu1 %vm243_vm1, %v5844_v56  ;;  %13011 = vmatprep.mubr.msk.bf16.mxu0 %vm243_vm1, %v15120_v49 }
 0x238   : > { %v15136_v3 = vadd.f32 %v3897_v30, %v3560_v42  ;;  %v3565_v10 = vadd.f32 %v12739_v34, %v14863_v58  ;;  %v3910_v32 = vpop.f32.mrf.mxu0  ;;  %12969 = vmatprep.mubr.msk.bf16.mxu1 %vm243_vm1, %v5845_v4  ;;  %v5846_v58 = vpack.c.bf16 %v5816_v44, %v5815_v26  ;;  %v15150_v42 = vpack.c.bf16 %v6256_v11, %v6255_v61  ;;  %v5820_v11 = vld [vmem:[%s13586_s22 + $0xe3] sm:$0xff] }
 0x239   : > { %v3472_v31 = vpop.f32.mrf.mxu1 }
 0x23a   : > { %16815 = vst [vmem:[#allocation10_spill] sm:$0xff] %v15136_v3  ;;  %v15145_v54 = vadd.f32 %v12781_v39, %v3565_v10  ;;  %v3563_v56 = vadd.f32 %v3472_v31, %v14866_v17  ;;  %v12782_v24 = vpop.f32.mrf.mxu0  ;;  %16816 = vst [vmem:[#allocation11_spill] sm:$0xff] %v15150_v42  ;;  %v5847_v3 = vpack.c.bf16 %v5818_v53, %v5817_v9  ;;  %v6257_v10 = vld [vmem:[%s13586_s22 + $0xdc] sm:$0xff]  ;;  %v6259_v31 = vld [vmem:[%s13586_s22 + $0xec] sm:$0xff] }
 0x23b   : > { %v12740_v30 = vpop.f32.mrf.mxu1  ;;  %v6260_v9 = vld [vmem:[%s13586_s22 + $0xf4] sm:$0xff] }
 0x23c   : > { %v15152_v4 = vadd.f32 %v3910_v32, %v3563_v56  ;;  %v3566_v34 = vadd.f32 %v12740_v30, %v14869_v48  ;;  %v3913_v49 = vpop.f32.mrf.mxu0  ;;  %v5819_v48 = vld [vmem:[%s13586_s22 + $0xdb] sm:$0xff]  ;;  %v6258_v32 = vld [vmem:[%s13586_s22 + $0xe4] sm:$0xff] }
 0x23d   : > { %v3475_v39 = vpop.f32.mrf.mxu1  ;;  %v5821_v56 = vld [vmem:[%s13586_s22 + $0xeb] sm:$0xff] }
 0x23e   : > { %v15155_v17 = vadd.f32 %v12782_v24, %v3566_v34  ;;  %v3564_v27 = vadd.f32 %v3475_v39, %v14878_v40  ;;  %v12829_v12 = vpop.f32.mrf.mxu0  ;;  %13012 = vmatmul.mubr.msk.bf16.gmra.mxu0 %vm243_vm1, %v15148_v28  ;;  %v5822_v24 = vld [vmem:[%s13586_s22 + $0xf3] sm:$0xff]  ;;  %v15178_v39 = vpack.c.bf16 %v6258_v32, %v6257_v10 }
 0x23f   : > { %v12787_v26 = vpop.f32.mrf.mxu1  ;;  %12970 = vmatmul.mubr.msk.bf16.gmra.mxu1 %vm243_vm1, %v5846_v58  ;;  %13015 = vmatprep.mubr.msk.bf16.mxu0 %vm243_vm1, %v15150_v42 }
 0x240   : > { %v15166_v44 = vadd.f32 %v3913_v49, %v3564_v27  ;;  %v4405_v61 = vadd.f32 %v12787_v26, %v14887_v6  ;;  %v4642_v40 = vpop.f32.mrf.mxu0  ;;  %12973 = vmatprep.mubr.msk.bf16.mxu1 %vm243_vm1, %v5847_v3  ;;  %v5848_v6 = vpack.c.bf16 %v5820_v11, %v5819_v48  ;;  %v15180_v27 = vpack.c.bf16 %v6260_v9, %v6259_v31  ;;  %v5824_v9 = vld [vmem:[%s13586_s22 + $0x103] sm:$0xff] }
 0x241   : > { %v4204_v53 = vpop.f32.mrf.mxu1 }
 0x242   : > { %16817 = vst [vmem:[#allocation12_spill] sm:$0xff] %v15166_v44  ;;  %v15175_v30 = vadd.f32 %v12829_v12, %v4405_v61  ;;  %v4403_v58 = vadd.f32 %v4204_v53, %v14890_v46  ;;  %v12830_v34 = vpop.f32.mrf.mxu0  ;;  %16818 = vst [vmem:[#allocation13_spill] sm:$0xff] %v15180_v27  ;;  %v5849_v44 = vpack.c.bf16 %v5822_v24, %v5821_v56  ;;  %v6261_v61 = vld [vmem:[%s13586_s22 + $0xfc] sm:$0xff]  ;;  %v6263_v53 = vld [vmem:[%s13586_s22 + $0x10c] sm:$0xff] }
 0x243   : > { %v12788_v49 = vpop.f32.mrf.mxu1  ;;  %v6264_v56 = vld [vmem:[%s13586_s22 + $0x114] sm:$0xff] }
 0x244   : > { %v15182_v3 = vadd.f32 %v4642_v40, %v4403_v58  ;;  %v4406_v26 = vadd.f32 %v12788_v49, %v14893_v43  ;;  %v4645_v42 = vpop.f32.mrf.mxu0  ;;  %v5823_v43 = vld [vmem:[%s13586_s22 + $0xfb] sm:$0xff]  ;;  %v6262_v40 = vld [vmem:[%s13586_s22 + $0x104] sm:$0xff] }
 0x245   : > { %v4207_v12 = vpop.f32.mrf.mxu1  ;;  %v5825_v58 = vld [vmem:[%s13586_s22 + $0x10b] sm:$0xff] }
 0x246   : > { %v15185_v46 = vadd.f32 %v12830_v34, %v4406_v26  ;;  %v4404_v10 = vadd.f32 %v4207_v12, %v14902_v5  ;;  %v12833_v32 = vpop.f32.mrf.mxu0  ;;  %13016 = vmatmul.mubr.msk.bf16.gmra.mxu0 %vm243_vm1, %v15178_v39  ;;  %v5826_v34 = vld [vmem:[%s13586_s22 + $0x113] sm:$0xff]  ;;  %v15208_v12 = vpack.c.bf16 %v6262_v40, %v6261_v61 }
 0x247   : > { %v12791_v48 = vpop.f32.mrf.mxu1  ;;  %12974 = vmatmul.mubr.msk.bf16.gmra.mxu1 %vm243_vm1, %v5848_v6  ;;  %13019 = vmatprep.mubr.msk.bf16.mxu0 %vm243_vm1, %v15180_v27 }
 0x248   : > { %v15196_v11 = vadd.f32 %v4645_v42, %v4404_v10  ;;  %v4409_v31 = vadd.f32 %v12791_v48, %v14911_v47  ;;  %v4658_v5 = vpop.f32.mrf.mxu0  ;;  %12977 = vmatprep.mubr.msk.bf16.mxu1 %vm243_vm1, %v5849_v44  ;;  %v5850_v47 = vpack.c.bf16 %v5824_v9, %v5823_v43  ;;  %v15210_v10 = vpack.c.bf16 %v6264_v56, %v6263_v53  ;;  %v5828_v56 = vld [vmem:[%s13586_s22 + $0x123] sm:$0xff] }
 0x249   : > { %v4220_v24 = vpop.f32.mrf.mxu1 }
 0x24a   : > { %16819 = vst [vmem:[#allocation14_spill] sm:$0xff] %v15196_v11  ;;  %v15205_v49 = vadd.f32 %v12833_v32, %v4409_v31  ;;  %v4407_v6 = vadd.f32 %v4220_v24, %v14914_v7  ;;  %v12834_v26 = vpop.f32.mrf.mxu0  ;;  %16820 = vst [vmem:[#allocation15_spill] sm:$0xff] %v15210_v10  ;;  %v5851_v11 = vpack.c.bf16 %v5826_v34, %v5825_v58  ;;  %v6265_v31 = vld [vmem:[%s13586_s22 + $0x11c] sm:$0xff]  ;;  %v6267_v24 = vld [vmem:[%s13586_s22 + $0x12c] sm:$0xff] }
 0x24b   : > { %v12792_v42 = vpop.f32.mrf.mxu1  ;;  %v6268_v58 = vld [vmem:[%s13586_s22 + $0x134] sm:$0xff] }
 0x24c   : > { %v15212_v44 = vadd.f32 %v4658_v5, %v4407_v6  ;;  %v4410_v48 = vadd.f32 %v12792_v42, %v14917_v38  ;;  %v4661_v27 = vpop.f32.mrf.mxu0  ;;  %v5827_v38 = vld [vmem:[%s13586_s22 + $0x11b] sm:$0xff]  ;;  %v6266_v5 = vld [vmem:[%s13586_s22 + $0x124] sm:$0xff] }
 0x24d   : > { %v4223_v32 = vpop.f32.mrf.mxu1  ;;  %v5829_v6 = vld [vmem:[%s13586_s22 + $0x12b] sm:$0xff] }
 0x24e   : > { %v15215_v7 = vadd.f32 %v12834_v26, %v4410_v48  ;;  %v4408_v61 = vadd.f32 %v4223_v32, %v14926_v51  ;;  %v12837_v40 = vpop.f32.mrf.mxu0  ;;  %13020 = vmatmul.mubr.msk.bf16.gmra.mxu0 %vm243_vm1, %v15208_v12  ;;  %v5830_v26 = vld [vmem:[%s13586_s22 + $0x133] sm:$0xff]  ;;  %v15238_v32 = vpack.c.bf16 %v6266_v5, %v6265_v31 }
 0x24f   : > { %v12795_v43 = vpop.f32.mrf.mxu1  ;;  %12978 = vmatmul.mubr.msk.bf16.gmra.mxu1 %vm243_vm1, %v5850_v47  ;;  %13023 = vmatprep.mubr.msk.bf16.mxu0 %vm243_vm1, %v15210_v10 }
 0x250   : > { %v15226_v9 = vadd.f32 %v4661_v27, %v4408_v61  ;;  %v4413_v53 = vadd.f32 %v12795_v43, %v14935_v22  ;;  %v4674_v51 = vpop.f32.mrf.mxu0  ;;  %12981 = vmatprep.mubr.msk.bf16.mxu1 %vm243_vm1, %v5851_v11  ;;  %v5852_v22 = vpack.c.bf16 %v5828_v56, %v5827_v38  ;;  %v15240_v61 = vpack.c.bf16 %v6268_v58, %v6267_v24  ;;  %v5832_v58 = vld [vmem:[%s13586_s22 + $0x143] sm:$0xff] }
 0x251   : > { %v4236_v34 = vpop.f32.mrf.mxu1 }
 0x252   : > { %16821 = vst [vmem:[#allocation16_spill] sm:$0xff] %v15226_v9  ;;  %v15235_v42 = vadd.f32 %v12837_v40, %v4413_v53  ;;  %v4411_v47 = vadd.f32 %v4236_v34, %v14938_v21  ;;  %v12838_v48 = vpop.f32.mrf.mxu0  ;;  %16822 = vst [vmem:[#allocation17_spill] sm:$0xff] %v15240_v61  ;;  %v5853_v9 = vpack.c.bf16 %v5830_v26, %v5829_v6  ;;  %v6269_v53 = vld [vmem:[%s13586_s22 + $0x13c] sm:$0xff]  ;;  %v6271_v34 = vld [vmem:[%s13586_s22 + $0x14c] sm:$0xff] }
 0x253   : > { %v12796_v27 = vpop.f32.mrf.mxu1  ;;  %v6272_v6 = vld [vmem:[%s13586_s22 + $0x154] sm:$0xff] }
 0x254   : > { %v15242_v11 = vadd.f32 %v4674_v51, %v4411_v47  ;;  %v4414_v43 = vadd.f32 %v12796_v27, %v14941_v14  ;;  %v4677_v10 = vpop.f32.mrf.mxu0  ;;  %v5831_v14 = vld [vmem:[%s13586_s22 + $0x13b] sm:$0xff]  ;;  %v6270_v51 = vld [vmem:[%s13586_s22 + $0x144] sm:$0xff] }
 0x255   : > { %v4239_v40 = vpop.f32.mrf.mxu1  ;;  %v5833_v47 = vld [vmem:[%s13586_s22 + $0x14b] sm:$0xff] }
 0x256   : > { %v15245_v21 = vadd.f32 %v12838_v48, %v4414_v43  ;;  %v4412_v31 = vadd.f32 %v4239_v40, %v14950_v50  ;;  %v12841_v5 = vpop.f32.mrf.mxu0  ;;  %13024 = vmatmul.mubr.msk.bf16.gmra.mxu0 %vm243_vm1, %v15238_v32  ;;  %v5834_v48 = vld [vmem:[%s13586_s22 + $0x153] sm:$0xff]  ;;  %v15268_v40 = vpack.c.bf16 %v6270_v51, %v6269_v53 }
 0x257   : > { %v12799_v38 = vpop.f32.mrf.mxu1  ;;  %12982 = vmatmul.mubr.msk.bf16.gmra.mxu1 %vm243_vm1, %v5852_v22  ;;  %13027 = vmatprep.mubr.msk.bf16.mxu0 %vm243_vm1, %v15240_v61 }
 0x258   : > { %v15256_v56 = vadd.f32 %v4677_v10, %v4412_v31  ;;  %v4417_v24 = vadd.f32 %v12799_v38, %v14959_v59  ;;  %v4690_v50 = vpop.f32.mrf.mxu0  ;;  %12985 = vmatprep.mubr.msk.bf16.mxu1 %vm243_vm1, %v5853_v9  ;;  %v5854_v59 = vpack.c.bf16 %v5832_v58, %v5831_v14  ;;  %v15270_v31 = vpack.c.bf16 %v6272_v6, %v6271_v34 }
 0x259   : > { %v4252_v26 = vpop.f32.mrf.mxu1 }
 0x25a   : > { %16823 = vst [vmem:[#allocation18_spill] sm:$0xff] %v15256_v56  ;;  %v15265_v27 = vadd.f32 %v12841_v5, %v4417_v24  ;;  %v4415_v22 = vadd.f32 %v4252_v26, %v14962_v33  ;;  %v12842_v43 = vpop.f32.mrf.mxu0  ;;  %16824 = vst [vmem:[#allocation19_spill] sm:$0xff] %v15270_v31  ;;  %v5855_v56 = vpack.c.bf16 %v5834_v48, %v5833_v47  ;;  %v6273_v24 = vld [vmem:[%s13586_s22 + $0x15c] sm:$0xff]  ;;  %v7112_v47 = vld [vmem:[%s13586_s22 + $0x45] sm:$0xff] }
 0x25b   : > { %v12800_v10 = vpop.f32.mrf.mxu1  ;;  %v7111_v26 = vld [vmem:[%s13586_s22 + $0x3d] sm:$0xff] }
 0x25c   : > { %v15272_v9 = vadd.f32 %v4690_v50, %v4415_v22  ;;  %v4418_v38 = vadd.f32 %v12800_v10, %v14965_v16  ;;  %v4693_v61 = vpop.f32.mrf.mxu0  ;;  %v5835_v16 = vld [vmem:[%s13586_s22 + $0x15b] sm:$0xff]  ;;  %v6274_v50 = vld [vmem:[%s13586_s22 + $0x164] sm:$0xff] }
 0x25d   : > { %v4255_v5 = vpop.f32.mrf.mxu1 }
 0x25e   : > { %v15275_v33 = vadd.f32 %v12842_v43, %v4418_v38  ;;  %v4416_v53 = vadd.f32 %v4255_v5, %v14974_v0  ;;  %v12845_v51 = vpop.f32.mrf.mxu0  ;;  %13028 = vmatmul.mubr.msk.bf16.gmra.mxu0 %vm243_vm1, %v15268_v40  ;;  %v5836_v0 = vld [vmem:[%s13586_s22 + $0x163] sm:$0xff]  ;;  %v7151_v5 = vpack.c.bf16 %v7112_v47, %v7111_v26 }
 0x25f   : > { %v12803_v14 = vpop.f32.mrf.mxu1  ;;  %12986 = vmatmul.mubr.msk.bf16.gmra.mxu1 %vm243_vm1, %v5854_v59  ;;  %13031 = vmatprep.mubr.msk.bf16.mxu0 %vm243_vm1, %v15270_v31  ;;  %v15296_v59 = vpack.c.bf16 %v6274_v50, %v6273_v24  ;;  %v5856_v38 = vpack.c.bf16 %v5836_v0, %v5835_v16  ;;  %v7113_v16 = vld [vmem:[%s13586_s22 + $0x4d] sm:$0xff]  ;;  %v7114_v24 = vld [vmem:[%s13586_s22 + $0x55] sm:$0xff] }
 0x260   : > { %v15286_v58 = vadd.f32 %v4693_v61, %v4416_v53  ;;  %v4421_v34 = vadd.f32 %v12803_v14, %v14983_v25  ;;  %v4706_v6 = vpop.f32.mrf.mxu0  ;;  %12989 = vmatprep.mubr.msk.bf16.mxu1 %vm243_vm1, %v5855_v56 }
 0x261   : > { %v4268_v48 = vpop.f32.mrf.mxu1 }
 0x262   : > { %v15293_v22 = vadd.f32 %v12845_v51, %v4421_v34  ;;  %v4419_v43 = vadd.f32 %v4268_v48, %v14986_v55  ;;  %v12846_v10 = vpop.f32.mrf.mxu0  ;;  %v7152_v48 = vpack.c.bf16 %v7114_v24, %v7113_v16 }
 0x263   : > { %v12804_v61 = vpop.f32.mrf.mxu1 }
 0x264   : > { %v15298_v25 = vadd.f32 %v4706_v6, %v4419_v43  ;;  %v4422_v56 = vadd.f32 %v12804_v61, %v14989_v52  ;;  %v4709_v53 = vpop.f32.mrf.mxu0  ;;  %v7115_v43 = vld [vmem:[%s13586_s22 + $0x5d] sm:$0xff] }
 0x265   : > { %v4271_v14 = vpop.f32.mrf.mxu1 }
 0x266   : > { %v15301_v31 = vadd.f32 %v12846_v10, %v4422_v56  ;;  %v4420_v51 = vadd.f32 %v4271_v14, %v14997_v63  ;;  %v12849_v34 = vpop.f32.mrf.mxu0  ;;  %13032 = vmatmul.mubr.msk.bf16.gmra.mxu0 %vm243_vm1, %v15296_v59  ;;  %v7116_v10 = vld [vmem:[%s13586_s22 + $0x65] sm:$0xff] }
 0x267   : > { %v12807_v55 = vpop.f32.mrf.mxu1  ;;  %12990 = vmatmul.mubr.msk.bf16.gmra.mxu1 %vm243_vm1, %v5856_v38  ;;  %13079 = vmatprep.mubr.msk.bf16.mxu0 %vm243_vm1, %v7151_v5 }
 0x268   : > { %v15310_v52 = vadd.f32 %v4709_v53, %v4420_v51  ;;  %v4425_v50 = vadd.f32 %v12807_v55, %v15005_v19  ;;  %v4722_v6 = vpop.f32.mrf.mxu0  ;;  %13037 = vmatprep.mubr.msk.bf16.mxu1 %vm243_vm1, %v15008_v36  ;;  %v8110_v36 = vsel %vm304_vm0, %v15038_v60, 0  ;;  %v7672_v53 = vsel %vm304_vm0, %v15030_v23, 0  ;;  %v7117_v23 = vld [vmem:[%s13586_s22 + $0x6d] sm:$0xff]  ;;  %v7118_v55 = vld [vmem:[%s13586_s22 + $0x75] sm:$0xff] }
 0x269   : > { %v4284_v63 = vpop.f32.mrf.mxu1 }
 0x26a   : > { %v15315_v0 = vadd.f32 %v12849_v34, %v4425_v50  ;;  %v4423_v26 = vadd.f32 %v4284_v63, %v15012_v29  ;;  %v12850_v47 = vpop.f32.mrf.mxu0  ;;  %v7153_v29 = vpack.c.bf16 %v7116_v10, %v7115_v43  ;;  %v7120_v63 = vld [vmem:[%s13586_s22 + $0x85] sm:$0xff] }
 0x26b   : > { %v12808_v61 = vpop.f32.mrf.mxu1 }
 0x26c   : > { %v15320_v38 = vadd.f32 %v4722_v6, %v4423_v26  ;;  %v4426_v19 = vadd.f32 %v12808_v61, %v15021_v13  ;;  %v4725_v5 = vpop.f32.mrf.mxu0  ;;  %v15334_v13 = vld [vmem:[%s16784_s1 + $0x4c] sm:$0xf]  ;;  %v7119_v6 = vld [vmem:[%s13586_s22 + $0x7d] sm:$0xff] }
 0x26d   : > { %v4287_v56 = vpop.f32.mrf.mxu1  ;;  %v7155_v10 = vpack.c.bf16 %v7120_v63, %v7119_v6 }
 0x26e   : > { %v15327_v14 = vadd.f32 %v12850_v47, %v4426_v19  ;;  %v4424_v51 = vadd.f32 %v4287_v56, %v15040_v20  ;;  %v12853_v34 = vpop.f32.mrf.mxu0  ;;  %13080 = vmatmul.mubr.msk.bf16.vlgmr.msra.gmra.mxu0 %vm243_vm1, %v7152_v48  ;;  %v15343_v20 = vld [vmem:[%s16784_s1 + $0x50] sm:$0xf]  ;;  %v16825_v47 = vld [vmem:[#allocation3_spill] sm:$0xff]  ;;  %v16826_v19 = vld [vmem:[#allocation4_spill] sm:$0xff] }
 0x26f   : > { %v12811_v60 = vpop.f32.mrf.mxu1  ;;  %13038 = vmatmul.mubr.msk.bf16.vlgmr.msra.gmra.mxu1 %vm243_vm1, %v15019_v45  ;;  %13162 = vmatpush3.bf16.msra.mxu0 %v8110_v36 }
 0x270   : > { %v15345_v16 = vadd.f32 %v4725_v5, %v4424_v51  ;;  %v4429_v24 = vadd.f32 %v12811_v60, %v15053_v57  ;;  %13120 = vmatpush3.bf16.msra.mxu1 %v7672_v53  ;;  %v4738_v50 = vpop.f32.mrf.mxu0  ;;  %13041 = vmatprep.mubr.msk.bf16.mxu1 %vm243_vm1, %v15056_v18  ;;  %v7154_v57 = vpack.c.bf16 %v7118_v55, %v7117_v23  ;;  %v16828_v23 = vld [vmem:[#allocation6_spill] sm:$0xff]  ;;  %v7121_v55 = vld [vmem:[%s13586_s22 + $0x8d] sm:$0xff] }
 0x271   : > { %v4300_v45 = vpop.f32.mrf.mxu1  ;;  %13083 = vmatprep.mubr.msk.bf16.mxu0 %vm243_vm1, %v7153_v29  ;;  %13477 = vmatprep.subr.msk.bf16.mxu1 %vm304_vm0, %v15334_v13  ;;  %v16827_v29 = vld [vmem:[#allocation5_spill] sm:$0xff] }
 0x272   : > { %v15355_v26 = vadd.f32 %v12853_v34, %v4429_v24  ;;  %v4427_v48 = vadd.f32 %v4300_v45, %v16825_v47  ;;  %v12854_v43 = vpop.f32.mrf.mxu0  ;;  %13478 = vmatprep.subr.msk.bf16.mxu0 %vm304_vm0, %v15343_v20  ;;  %v7122_v24 = vld [vmem:[%s13586_s22 + $0x95] sm:$0xff]  ;;  %v7123_v45 = vld [vmem:[%s13586_s22 + $0x9d] sm:$0xff]  ;;  %v7124_v47 = vld [vmem:[%s13586_s22 + $0xa5] sm:$0xff] }
 0x273   : > { %v12812_v18 = vpop.f32.mrf.mxu1 }
 0x274   : > { %v15360_v61 = vadd.f32 %v4738_v50, %v4427_v48  ;;  %v4430_v5 = vadd.f32 %v12812_v18, %v16826_v19  ;;  %v4741_v36 = vpop.f32.mrf.mxu0 }
 0x275   : > { %v4303_v56 = vpop.f32.mrf.mxu1 }
 0x276   : > { %v15363_v53 = vadd.f32 %v12854_v43, %v4430_v5  ;;  %v4428_v51 = vadd.f32 %v4303_v56, %v16827_v29  ;;  %v12857_v34 = vpop.f32.mrf.mxu0  ;;  %13084 = vmatmul.mubr.msk.bf16.gmra.mxu0 %vm243_vm1, %v7154_v57  ;;  %v7157_v5 = vpack.c.bf16 %v7124_v47, %v7123_v45  ;;  %v7127_v45 = vld [vmem:[%s13586_s22 + $0xbd] sm:$0xff]  ;;  %v7128_v47 = vld [vmem:[%s13586_s22 + $0xc5] sm:$0xff] }
 0x277   : > { %v12815_v60 = vpop.f32.mrf.mxu1  ;;  %13042 = vmatmul.mubr.msk.bf16.gmra.mxu1 %vm243_vm1, %v16828_v23  ;;  %13087 = vmatprep.mubr.msk.bf16.mxu0 %vm243_vm1, %v7155_v10  ;;  %v7156_v10 = vpack.c.bf16 %v7122_v24, %v7121_v55  ;;  %v16830_v23 = vld [vmem:[#allocation7_spill] sm:$0xff]  ;;  %v7125_v55 = vld [vmem:[%s13586_s22 + $0xad] sm:$0xff]  ;;  %v7126_v24 = vld [vmem:[%s13586_s22 + $0xb5] sm:$0xff] }
 0x278   : > { %v15372_v50 = vadd.f32 %v4741_v36, %v4428_v51  ;;  %v4433_v6 = vadd.f32 %v12815_v60, %v15085_v1  ;;  %v4754_v63 = vpop.f32.mrf.mxu0  ;;  %13045 = vmatprep.mubr.msk.bf16.mxu1 %vm243_vm1, %v15088_v37  ;;  %v16829_v51 = vld [vmem:[#allocation8_spill] sm:$0xff] }
 0x279   : > { %v4316_v48 = vpop.f32.mrf.mxu1 }
 0x27a   : > { %v15379_v43 = vadd.f32 %v12857_v34, %v4433_v6  ;;  %v4431_v57 = vadd.f32 %v4316_v48, %v15092_v2  ;;  %v12858_v18 = vpop.f32.mrf.mxu0 }
 0x27b   : > { %v12816_v19 = vpop.f32.mrf.mxu1 }
 0x27c   : > { %v15382_v36 = vadd.f32 %v4754_v63, %v4431_v57  ;;  %v4434_v1 = vadd.f32 %v12816_v19, %v15095_v62  ;;  %v4757_v56 = vpop.f32.mrf.mxu0  ;;  %v7158_v19 = vpack.c.bf16 %v7126_v24, %v7125_v55  ;;  %v7129_v55 = vld [vmem:[%s13586_s22 + $0xcd] sm:$0xff]  ;;  %v7130_v24 = vld [vmem:[%s13586_s22 + $0xd5] sm:$0xff] }
 0x27d   : > { %v4319_v37 = vpop.f32.mrf.mxu1 }
 0x27e   : > { %v15385_v29 = vadd.f32 %v12858_v18, %v4434_v1  ;;  %v4432_v34 = vadd.f32 %v4319_v37, %v16829_v51  ;;  %v12861_v60 = vpop.f32.mrf.mxu0  ;;  %13088 = vmatmul.mubr.msk.bf16.gmra.mxu0 %vm243_vm1, %v7156_v10  ;;  %v7159_v1 = vpack.c.bf16 %v7128_v47, %v7127_v45  ;;  %v7131_v45 = vld [vmem:[%s13586_s22 + $0xdd] sm:$0xff]  ;;  %v7132_v47 = vld [vmem:[%s13586_s22 + $0xe5] sm:$0xff] }
 0x27f   : > { %v12819_v2 = vpop.f32.mrf.mxu1  ;;  %13046 = vmatmul.mubr.msk.bf16.gmra.mxu1 %vm243_vm1, %v16830_v23  ;;  %13091 = vmatprep.mubr.msk.bf16.mxu0 %vm243_vm1, %v7157_v5  ;;  %v16832_v23 = vld [vmem:[#allocation9_spill] sm:$0xff] }
 0x280   : > { %v15394_v62 = vadd.f32 %v4757_v56, %v4432_v34  ;;  %v4437_v6 = vadd.f32 %v12819_v2, %v15115_v35  ;;  %v4770_v63 = vpop.f32.mrf.mxu0  ;;  %13049 = vmatprep.mubr.msk.bf16.mxu1 %vm243_vm1, %v15118_v15  ;;  %v16831_v34 = vld [vmem:[#allocation10_spill] sm:$0xff] }
 0x281   : > { %v4332_v48 = vpop.f32.mrf.mxu1 }
 0x282   : > { %v15401_v57 = vadd.f32 %v12861_v60, %v4437_v6  ;;  %v4435_v18 = vadd.f32 %v4332_v48, %v15122_v41  ;;  %v12862_v10 = vpop.f32.mrf.mxu0 }
 0x283   : > { %v12820_v5 = vpop.f32.mrf.mxu1 }
 0x284   : > { %v15404_v56 = vadd.f32 %v4770_v63, %v4435_v18  ;;  %v4438_v35 = vadd.f32 %v12820_v5, %v15125_v8  ;;  %v4773_v37 = vpop.f32.mrf.mxu0  ;;  %v7160_v5 = vpack.c.bf16 %v7130_v24, %v7129_v55  ;;  %v7133_v55 = vld [vmem:[%s13586_s22 + $0xed] sm:$0xff]  ;;  %v7134_v24 = vld [vmem:[%s13586_s22 + $0xf5] sm:$0xff] }
 0x285   : > { %v4335_v15 = vpop.f32.mrf.mxu1 }
 0x286   : > { %v15407_v51 = vadd.f32 %v12862_v10, %v4438_v35  ;;  %v4436_v60 = vadd.f32 %v4335_v15, %v16831_v34  ;;  %v12865_v2 = vpop.f32.mrf.mxu0  ;;  %13092 = vmatmul.mubr.msk.bf16.gmra.mxu0 %vm243_vm1, %v7158_v19  ;;  %v7161_v35 = vpack.c.bf16 %v7132_v47, %v7131_v45  ;;  %v7135_v45 = vld [vmem:[%s13586_s22 + $0xfd] sm:$0xff]  ;;  %v7136_v47 = vld [vmem:[%s13586_s22 + $0x105] sm:$0xff] }
 0x287   : > { %v12823_v41 = vpop.f32.mrf.mxu1  ;;  %13050 = vmatmul.mubr.msk.bf16.gmra.mxu1 %vm243_vm1, %v16832_v23  ;;  %13095 = vmatprep.mubr.msk.bf16.mxu0 %vm243_vm1, %v7159_v1  ;;  %v16834_v23 = vld [vmem:[#allocation11_spill] sm:$0xff] }
 0x288   : > { %v15416_v8 = vadd.f32 %v4773_v37, %v4436_v60  ;;  %v4441_v6 = vadd.f32 %v12823_v41, %v15145_v54  ;;  %v4786_v63 = vpop.f32.mrf.mxu0  ;;  %13053 = vmatprep.mubr.msk.bf16.mxu1 %vm243_vm1, %v15148_v28  ;;  %v16833_v60 = vld [vmem:[#allocation12_spill] sm:$0xff] }
 0x289   : > { %v4348_v48 = vpop.f32.mrf.mxu1 }
 0x28a   : > { %v15423_v18 = vadd.f32 %v12865_v2, %v4441_v6  ;;  %v4439_v10 = vadd.f32 %v4348_v48, %v15152_v4  ;;  %v12866_v19 = vpop.f32.mrf.mxu0 }
 0x28b   : > { %v12824_v1 = vpop.f32.mrf.mxu1 }
 0x28c   : > { %v15426_v37 = vadd.f32 %v4786_v63, %v4439_v10  ;;  %v4442_v54 = vadd.f32 %v12824_v1, %v15155_v17  ;;  %v4789_v15 = vpop.f32.mrf.mxu0  ;;  %v7162_v1 = vpack.c.bf16 %v7134_v24, %v7133_v55  ;;  %v7137_v55 = vld [vmem:[%s13586_s22 + $0x10d] sm:$0xff]  ;;  %v7138_v24 = vld [vmem:[%s13586_s22 + $0x115] sm:$0xff] }
 0x28d   : > { %v4351_v28 = vpop.f32.mrf.mxu1 }
 0x28e   : > { %v15429_v34 = vadd.f32 %v12866_v19, %v4442_v54  ;;  %v4440_v2 = vadd.f32 %v4351_v28, %v16833_v60  ;;  %v12913_v41 = vpop.f32.mrf.mxu0  ;;  %13096 = vmatmul.mubr.msk.bf16.gmra.mxu0 %vm243_vm1, %v7160_v5  ;;  %v7163_v54 = vpack.c.bf16 %v7136_v47, %v7135_v45  ;;  %v7139_v45 = vld [vmem:[%s13586_s22 + $0x11d] sm:$0xff]  ;;  %v7140_v47 = vld [vmem:[%s13586_s22 + $0x125] sm:$0xff] }
 0x28f   : > { %v12871_v4 = vpop.f32.mrf.mxu1  ;;  %13054 = vmatmul.mubr.msk.bf16.gmra.mxu1 %vm243_vm1, %v16834_v23  ;;  %13099 = vmatprep.mubr.msk.bf16.mxu0 %vm243_vm1, %v7161_v35  ;;  %v16836_v23 = vld [vmem:[#allocation13_spill] sm:$0xff] }
 0x290   : > { %v15438_v17 = vadd.f32 %v4789_v15, %v4440_v2  ;;  %v5281_v6 = vadd.f32 %v12871_v4, %v15175_v30  ;;  %v5518_v63 = vpop.f32.mrf.mxu0  ;;  %13057 = vmatprep.mubr.msk.bf16.mxu1 %vm243_vm1, %v15178_v39  ;;  %v16835_v2 = vld [vmem:[#allocation14_spill] sm:$0xff] }
 0x291   : > { %v5080_v48 = vpop.f32.mrf.mxu1 }
 0x292   : > { %v15445_v10 = vadd.f32 %v12913_v41, %v5281_v6  ;;  %v5279_v19 = vadd.f32 %v5080_v48, %v15182_v3  ;;  %v12914_v5 = vpop.f32.mrf.mxu0 }
 0x293   : > { %v12872_v35 = vpop.f32.mrf.mxu1 }
 0x294   : > { %v15448_v15 = vadd.f32 %v5518_v63, %v5279_v19  ;;  %v5282_v30 = vadd.f32 %v12872_v35, %v15185_v46  ;;  %v5521_v28 = vpop.f32.mrf.mxu0  ;;  %v7164_v35 = vpack.c.bf16 %v7138_v24, %v7137_v55  ;;  %v7141_v55 = vld [vmem:[%s13586_s22 + $0x12d] sm:$0xff]  ;;  %v7142_v24 = vld [vmem:[%s13586_s22 + $0x135] sm:$0xff] }
 0x295   : > { %v5083_v39 = vpop.f32.mrf.mxu1 }
 0x296   : > { %v15451_v60 = vadd.f32 %v12914_v5, %v5282_v30  ;;  %v5280_v41 = vadd.f32 %v5083_v39, %v16835_v2  ;;  %v12917_v4 = vpop.f32.mrf.mxu0  ;;  %13100 = vmatmul.mubr.msk.bf16.gmra.mxu0 %vm243_vm1, %v7162_v1  ;;  %v7165_v30 = vpack.c.bf16 %v7140_v47, %v7139_v45  ;;  %v7143_v45 = vld [vmem:[%s13586_s22 + $0x13d] sm:$0xff]  ;;  %v7144_v47 = vld [vmem:[%s13586_s22 + $0x145] sm:$0xff] }
 0x297   : > { %v12875_v3 = vpop.f32.mrf.mxu1  ;;  %13058 = vmatmul.mubr.msk.bf16.gmra.mxu1 %vm243_vm1, %v16836_v23  ;;  %13103 = vmatprep.mubr.msk.bf16.mxu0 %vm243_vm1, %v7163_v54  ;;  %v16838_v23 = vld [vmem:[#allocation15_spill] sm:$0xff] }
 0x298   : > { %v15460_v46 = vadd.f32 %v5521_v28, %v5280_v41  ;;  %v5285_v6 = vadd.f32 %v12875_v3, %v15205_v49  ;;  %v5534_v63 = vpop.f32.mrf.mxu0  ;;  %13061 = vmatprep.mubr.msk.bf16.mxu1 %vm243_vm1, %v15208_v12  ;;  %v16837_v41 = vld [vmem:[#allocation16_spill] sm:$0xff] }
 0x299   : > { %v5096_v48 = vpop.f32.mrf.mxu1 }
 0x29a   : > { %v15467_v19 = vadd.f32 %v12917_v4, %v5285_v6  ;;  %v5283_v5 = vadd.f32 %v5096_v48, %v15212_v44  ;;  %v12918_v1 = vpop.f32.mrf.mxu0 }
 0x29b   : > { %v12876_v54 = vpop.f32.mrf.mxu1 }
 0x29c   : > { %v15470_v28 = vadd.f32 %v5534_v63, %v5283_v5  ;;  %v5286_v49 = vadd.f32 %v12876_v54, %v15215_v7  ;;  %v5537_v39 = vpop.f32.mrf.mxu0  ;;  %v7166_v54 = vpack.c.bf16 %v7142_v24, %v7141_v55  ;;  %v7145_v55 = vld [vmem:[%s13586_s22 + $0x14d] sm:$0xff]  ;;  %v7146_v24 = vld [vmem:[%s13586_s22 + $0x155] sm:$0xff] }
 0x29d   : > { %v5099_v12 = vpop.f32.mrf.mxu1 }
 0x29e   : > { %v15473_v2 = vadd.f32 %v12918_v1, %v5286_v49  ;;  %v5284_v4 = vadd.f32 %v5099_v12, %v16837_v41  ;;  %v12921_v3 = vpop.f32.mrf.mxu0  ;;  %13104 = vmatmul.mubr.msk.bf16.gmra.mxu0 %vm243_vm1, %v7164_v35  ;;  %v7167_v49 = vpack.c.bf16 %v7144_v47, %v7143_v45  ;;  %v7147_v45 = vld [vmem:[%s13586_s22 + $0x15d] sm:$0xff]  ;;  %v7148_v47 = vld [vmem:[%s13586_s22 + $0x165] sm:$0xff] }
 0x29f   : > { %v12879_v44 = vpop.f32.mrf.mxu1  ;;  %13062 = vmatmul.mubr.msk.bf16.gmra.mxu1 %vm243_vm1, %v16838_v23  ;;  %13107 = vmatprep.mubr.msk.bf16.mxu0 %vm243_vm1, %v7165_v30  ;;  %v16840_v23 = vld [vmem:[#allocation17_spill] sm:$0xff] }
 0x2a0   : > { %v15482_v7 = vadd.f32 %v5537_v39, %v5284_v4  ;;  %v5289_v6 = vadd.f32 %v12879_v44, %v15235_v42  ;;  %v5550_v63 = vpop.f32.mrf.mxu0  ;;  %13065 = vmatprep.mubr.msk.bf16.mxu1 %vm243_vm1, %v15238_v32  ;;  %v16839_v4 = vld [vmem:[#allocation18_spill] sm:$0xff] }
 0x2a1   : > { %v5112_v48 = vpop.f32.mrf.mxu1 }
 0x2a2   : > { %v15489_v5 = vadd.f32 %v12921_v3, %v5289_v6  ;;  %v5287_v1 = vadd.f32 %v5112_v48, %v15242_v11  ;;  %v12922_v35 = vpop.f32.mrf.mxu0 }
 0x2a3   : > { %v12880_v30 = vpop.f32.mrf.mxu1 }
 0x2a4   : > { %v15492_v39 = vadd.f32 %v5550_v63, %v5287_v1  ;;  %v5290_v42 = vadd.f32 %v12880_v30, %v15245_v21  ;;  %v5553_v12 = vpop.f32.mrf.mxu0  ;;  %v7168_v30 = vpack.c.bf16 %v7146_v24, %v7145_v55  ;;  %v7150_v55 = vld [vmem:[%s13586_s22 + $0x175] sm:$0xff] }
 0x2a5   : > { %v5115_v32 = vpop.f32.mrf.mxu1 }
 0x2a6   : > { %v15495_v41 = vadd.f32 %v12922_v35, %v5290_v42  ;;  %v5288_v3 = vadd.f32 %v5115_v32, %v16839_v4  ;;  %v12925_v44 = vpop.f32.mrf.mxu0  ;;  %13108 = vmatmul.mubr.msk.bf16.gmra.mxu0 %vm243_vm1, %v7166_v54  ;;  %v7169_v42 = vpack.c.bf16 %v7148_v47, %v7147_v45  ;;  %v7987_v45 = vld [vmem:[%s13586_s22 + $0x3f] sm:$0xff]  ;;  %v7988_v47 = vld [vmem:[%s13586_s22 + $0x47] sm:$0xff] }
 0x2a7   : > { %v12883_v11 = vpop.f32.mrf.mxu1  ;;  %13066 = vmatmul.mubr.msk.bf16.gmra.mxu1 %vm243_vm1, %v16840_v23  ;;  %13111 = vmatprep.mubr.msk.bf16.mxu0 %vm243_vm1, %v7167_v49  ;;  %v7149_v23 = vld [vmem:[%s13586_s22 + $0x16d] sm:$0xff] }
 0x2a8   : > { %v15504_v21 = vadd.f32 %v5553_v12, %v5288_v3  ;;  %v5293_v6 = vadd.f32 %v12883_v11, %v15265_v27  ;;  %v5566_v63 = vpop.f32.mrf.mxu0  ;;  %13069 = vmatprep.mubr.msk.bf16.mxu1 %vm243_vm1, %v15268_v40  ;;  %v16841_v11 = vld [vmem:[#allocation19_spill] sm:$0xff] }
 0x2a9   : > { %v5128_v48 = vpop.f32.mrf.mxu1 }
 0x2aa   : > { %v15511_v1 = vadd.f32 %v12925_v44, %v5293_v6  ;;  %v5291_v35 = vadd.f32 %v5128_v48, %v15272_v9  ;;  %v12926_v54 = vpop.f32.mrf.mxu0 }
 0x2ab   : > { %v12884_v49 = vpop.f32.mrf.mxu1 }
 0x2ac   : > { %v15514_v12 = vadd.f32 %v5566_v63, %v5291_v35  ;;  %v5294_v27 = vadd.f32 %v12884_v49, %v15275_v33  ;;  %v5569_v32 = vpop.f32.mrf.mxu0  ;;  %v6711_v33 = vld [vmem:[%s13586_s22 + $0x16c] sm:$0xff]  ;;  %v7549_v35 = vld [vmem:[%s13586_s22 + $0x3e] sm:$0xff] }
 0x2ad   : > { %v5131_v40 = vpop.f32.mrf.mxu1 }
 0x2ae   : > { %v15517_v4 = vadd.f32 %v12926_v54, %v5294_v27  ;;  %v5292_v9 = vadd.f32 %v5131_v40, %v15286_v58  ;;  %v12929_v3 = vpop.f32.mrf.mxu0  ;;  %13112 = vmatmul.mubr.msk.bf16.gmra.mxu0 %vm243_vm1, %v7168_v30  ;;  %v6712_v58 = vld [vmem:[%s13586_s22 + $0x174] sm:$0xff]  ;;  %v7550_v54 = vld [vmem:[%s13586_s22 + $0x46] sm:$0xff]  ;;  %v7170_v27 = vpack.c.bf16 %v7150_v55, %v7149_v23  ;;  %v8027_v40 = vpack.c.bf16 %v7988_v47, %v7987_v45  ;;  %v7553_v47 = vld [vmem:[%s13586_s22 + $0x5e] sm:$0xff] }
 0x2af   : > { %v12887_v44 = vpop.f32.mrf.mxu1  ;;  %13070 = vmatmul.mubr.msk.bf16.gmra.mxu1 %vm243_vm1, %v16841_v11  ;;  %13115 = vmatprep.mubr.msk.bf16.mxu0 %vm243_vm1, %v7169_v42  ;;  %v7589_v11 = vpack.c.bf16 %v7550_v54, %v7549_v35  ;;  %v7990_v55 = vld [vmem:[%s13586_s22 + $0x57] sm:$0xff] }
 0x2b0   : > { %v15527_v24 = vadd.f32 %v5569_v32, %v5292_v9  ;;  %v5297_v6 = vadd.f32 %v12887_v44, %v15293_v22  ;;  %v5582_v63 = vpop.f32.mrf.mxu0  ;;  %13073 = vmatprep.mubr.msk.bf16.mxu1 %vm243_vm1, %v15296_v59  ;;  %v6732_v22 = vpack.c.bf16 %v6712_v58, %v6711_v33 }
 0x2b1   : > { %v5144_v48 = vpop.f32.mrf.mxu1 }
 0x2b2   : > { %16842 = vst [vmem:[#allocation3_spill] sm:$0xff] %v15527_v24  ;;  %v15537_v30 = vadd.f32 %v12929_v3, %v5297_v6  ;;  %v5295_v49 = vadd.f32 %v5144_v48, %v15298_v25  ;;  %v12930_v42 = vpop.f32.mrf.mxu0  ;;  %v7554_v48 = vld [vmem:[%s13586_s22 + $0x66] sm:$0xff] }
 0x2b3   : > { %v12888_v32 = vpop.f32.mrf.mxu1 }
 0x2b4   : > { %v15540_v9 = vadd.f32 %v5582_v63, %v5295_v49  ;;  %v5298_v59 = vadd.f32 %v12888_v32, %v15301_v31  ;;  %v5585_v44 = vpop.f32.mrf.mxu0  ;;  %v7989_v31 = vld [vmem:[%s13586_s22 + $0x4f] sm:$0xff]  ;;  %v7992_v32 = vld [vmem:[%s13586_s22 + $0x67] sm:$0xff] }
 0x2b5   : > { %v5147_v24 = vpop.f32.mrf.mxu1 }
 0x2b6   : > { %v15543_v3 = vadd.f32 %v12930_v42, %v5298_v59  ;;  %v5296_v25 = vadd.f32 %v5147_v24, %v15310_v52  ;;  %v12933_v23 = vpop.f32.mrf.mxu0  ;;  %13116 = vmatmul.mubr.msk.bf16.gmra.mxu0 %vm243_vm1, %v7170_v27  ;;  %v7551_v52 = vld [vmem:[%s13586_s22 + $0x4e] sm:$0xff]  ;;  %v7552_v24 = vld [vmem:[%s13586_s22 + $0x56] sm:$0xff]  ;;  %v8028_v42 = vpack.c.bf16 %v7990_v55, %v7989_v31  ;;  %v7991_v27 = vld [vmem:[%s13586_s22 + $0x5f] sm:$0xff] }
 0x2b7   : > { %v12891_v33 = vpop.f32.mrf.mxu1  ;;  %13074 = vmatmul.mubr.msk.bf16.gmra.mxu1 %vm243_vm1, %v6732_v22  ;;  %13163 = vmatprep.mubr.msk.bf16.mxu0 %vm243_vm1, %v8027_v40  ;;  %v7590_v40 = vpack.c.bf16 %v7552_v24, %v7551_v52  ;;  %v15587_v52 = vld [vmem:[%s16784_s1 + $0x58] sm:$0xf] }
 0x2b8   : > { %v15551_v6 = vadd.f32 %v5585_v44, %v5296_v25  ;;  %v5301_v63 = vadd.f32 %v12891_v33, %v15315_v0  ;;  %v5598_v58 = vpop.f32.mrf.mxu0  ;;  %13121 = vmatprep.mubr.msk.bf16.mxu1 %vm243_vm1, %v7589_v11  ;;  %v8986_v11 = vsel %vm304_vm0, %v15343_v20, 0  ;;  %v7591_v25 = vpack.c.bf16 %v7554_v48, %v7553_v47  ;;  %v15579_v20 = vld [vmem:[%s16784_s1 + $0x54] sm:$0xf] }
 0x2b9   : > { %v5160_v45 = vpop.f32.mrf.mxu1  ;;  %v8029_v33 = vpack.c.bf16 %v7992_v32, %v7991_v27  ;;  %v7556_v48 = vld [vmem:[%s13586_s22 + $0x76] sm:$0xff]  ;;  %v7557_v27 = vld [vmem:[%s13586_s22 + $0x7e] sm:$0xff]  ;;  %v7558_v32 = vld [vmem:[%s13586_s22 + $0x86] sm:$0xff] }
 0x2ba   : > { %v15559_v35 = vadd.f32 %v12933_v23, %v5301_v63  ;;  %v5299_v54 = vadd.f32 %v5160_v45, %v15320_v38  ;;  %v12934_v49 = vpop.f32.mrf.mxu0  ;;  %v8548_v38 = vsel %vm304_vm0, %v15334_v13, 0  ;;  %v7993_v13 = vld [vmem:[%s13586_s22 + $0x6f] sm:$0xff] }
 0x2bb   : > { %v12892_v22 = vpop.f32.mrf.mxu1 }
 0x2bc   : > { %v15564_v0 = vadd.f32 %v5598_v58, %v5299_v54  ;;  %v5302_v59 = vadd.f32 %v12892_v22, %v15327_v14  ;;  %v5601_v44 = vpop.f32.mrf.mxu0  ;;  %v7555_v14 = vld [vmem:[%s13586_s22 + $0x6e] sm:$0xff]  ;;  %v7995_v54 = vld [vmem:[%s13586_s22 + $0x7f] sm:$0xff] }
 0x2bd   : > { %v5163_v23 = vpop.f32.mrf.mxu1 }
 0x2be   : > { %v15571_v31 = vadd.f32 %v12934_v49, %v5302_v59  ;;  %v5300_v55 = vadd.f32 %v5163_v23, %v15345_v16  ;;  %v12937_v63 = vpop.f32.mrf.mxu0  ;;  %13164 = vmatmul.mubr.msk.bf16.vlgmr.msra.gmra.mxu0 %vm243_vm1, %v8028_v42  ;;  %v7994_v16 = vld [vmem:[%s13586_s22 + $0x77] sm:$0xff]  ;;  %v7996_v49 = vld [vmem:[%s13586_s22 + $0x87] sm:$0xff] }
 0x2bf   : > { %v12895_v58 = vpop.f32.mrf.mxu1  ;;  %13122 = vmatmul.mubr.msk.bf16.vlgmr.msra.gmra.mxu1 %vm243_vm1, %v7590_v40  ;;  %13246 = vmatpush3.bf16.msra.mxu0 %v8986_v11  ;;  %v8030_v59 = vpack.c.bf16 %v7994_v16, %v7993_v13  ;;  %v7592_v11 = vpack.c.bf16 %v7556_v48, %v7555_v14  ;;  %v7997_v16 = vld [vmem:[%s13586_s22 + $0x8f] sm:$0xff] }
 0x2c0   : > { %v15589_v24 = vadd.f32 %v5601_v44, %v5300_v55  ;;  %v5305_v45 = vadd.f32 %v12895_v58, %v15355_v26  ;;  %13204 = vmatpush3.bf16.msra.mxu1 %v8548_v38  ;;  %v5614_v47 = vpop.f32.mrf.mxu0  ;;  %13125 = vmatprep.mubr.msk.bf16.mxu1 %vm243_vm1, %v7591_v25  ;;  %v8031_v25 = vpack.c.bf16 %v7996_v49, %v7995_v54  ;;  %v7999_v49 = vld [vmem:[%s13586_s22 + $0x9f] sm:$0xff] }
 0x2c1   : > { %v5176_v42 = vpop.f32.mrf.mxu1  ;;  %13167 = vmatprep.mubr.msk.bf16.mxu0 %vm243_vm1, %v8029_v33  ;;  %13479 = vmatprep.subr.msk.bf16.mxu1 %vm304_vm0, %v15579_v20  ;;  %v7593_v55 = vpack.c.bf16 %v7558_v32, %v7557_v27  ;;  %v7561_v32 = vld [vmem:[%s13586_s22 + $0x9e] sm:$0xff] }
 0x2c2   : > { %v15601_v22 = vadd.f32 %v12937_v63, %v5305_v45  ;;  %v5303_v40 = vadd.f32 %v5176_v42, %v15360_v61  ;;  %v12938_v26 = vpop.f32.mrf.mxu0  ;;  %13480 = vmatprep.subr.msk.bf16.mxu0 %vm304_vm0, %v15587_v52  ;;  %v7998_v45 = vld [vmem:[%s13586_s22 + $0x97] sm:$0xff]  ;;  %v8000_v42 = vld [vmem:[%s13586_s22 + $0xa7] sm:$0xff] }
 0x2c3   : > { %v12896_v44 = vpop.f32.mrf.mxu1 }
 0x2c4   : > { %v15606_v23 = vadd.f32 %v5614_v47, %v5303_v40  ;;  %v5306_v38 = vadd.f32 %v12896_v44, %v15363_v53  ;;  %v5617_v33 = vpop.f32.mrf.mxu0  ;;  %v7559_v53 = vld [vmem:[%s13586_s22 + $0x8e] sm:$0xff]  ;;  %v7562_v40 = vld [vmem:[%s13586_s22 + $0xa6] sm:$0xff] }
 0x2c5   : > { %v5179_v63 = vpop.f32.mrf.mxu1 }
 0x2c6   : > { %v15609_v61 = vadd.f32 %v12938_v26, %v5306_v38  ;;  %v5304_v58 = vadd.f32 %v5179_v63, %v15372_v50  ;;  %v12941_v13 = vpop.f32.mrf.mxu0  ;;  %13168 = vmatmul.mubr.msk.bf16.gmra.mxu0 %vm243_vm1, %v8030_v59  ;;  %v7560_v50 = vld [vmem:[%s13586_s22 + $0x96] sm:$0xff] }
 0x2c7   : > { %v12899_v14 = vpop.f32.mrf.mxu1  ;;  %13126 = vmatmul.mubr.msk.bf16.gmra.mxu1 %vm243_vm1, %v7592_v11  ;;  %13171 = vmatprep.mubr.msk.bf16.mxu0 %vm243_vm1, %v8031_v25  ;;  %v8032_v11 = vpack.c.bf16 %v7998_v45, %v7997_v16  ;;  %v7594_v38 = vpack.c.bf16 %v7560_v50, %v7559_v53  ;;  %v8001_v45 = vld [vmem:[%s13586_s22 + $0xaf] sm:$0xff] }
 0x2c8   : > { %v15618_v47 = vadd.f32 %v5617_v33, %v5304_v58  ;;  %v5309_v48 = vadd.f32 %v12899_v14, %v15379_v43  ;;  %v5630_v54 = vpop.f32.mrf.mxu0  ;;  %13129 = vmatprep.mubr.msk.bf16.mxu1 %vm243_vm1, %v7593_v55  ;;  %v8033_v43 = vpack.c.bf16 %v8000_v42, %v7999_v49  ;;  %v7595_v58 = vpack.c.bf16 %v7562_v40, %v7561_v32  ;;  %v8003_v42 = vld [vmem:[%s13586_s22 + $0xbf] sm:$0xff] }
 0x2c9   : > { %v5192_v27 = vpop.f32.mrf.mxu1  ;;  %v7565_v40 = vld [vmem:[%s13586_s22 + $0xbe] sm:$0xff] }
 0x2ca   : > { %v15627_v26 = vadd.f32 %v12941_v13, %v5309_v48  ;;  %v5307_v59 = vadd.f32 %v5192_v27, %v15382_v36  ;;  %v12942_v44 = vpop.f32.mrf.mxu0  ;;  %v8002_v48 = vld [vmem:[%s13586_s22 + $0xb7] sm:$0xff]  ;;  %v8004_v27 = vld [vmem:[%s13586_s22 + $0xc7] sm:$0xff] }
 0x2cb   : > { %v12900_v25 = vpop.f32.mrf.mxu1 }
 0x2cc   : > { %v15630_v33 = vadd.f32 %v5630_v54, %v5307_v59  ;;  %v5310_v55 = vadd.f32 %v12900_v25, %v15385_v29  ;;  %v5633_v63 = vpop.f32.mrf.mxu0  ;;  %v7563_v29 = vld [vmem:[%s13586_s22 + $0xae] sm:$0xff]  ;;  %v7566_v59 = vld [vmem:[%s13586_s22 + $0xc6] sm:$0xff] }
 0x2cd   : > { %v5195_v14 = vpop.f32.mrf.mxu1 }
 0x2ce   : > { %v15633_v13 = vadd.f32 %v12942_v44, %v5310_v55  ;;  %v5308_v36 = vadd.f32 %v5195_v14, %v15394_v62  ;;  %v12945_v16 = vpop.f32.mrf.mxu0  ;;  %13172 = vmatmul.mubr.msk.bf16.gmra.mxu0 %vm243_vm1, %v8032_v11  ;;  %v7564_v62 = vld [vmem:[%s13586_s22 + $0xb6] sm:$0xff] }
 0x2cf   : > { %v12903_v53 = vpop.f32.mrf.mxu1  ;;  %13130 = vmatmul.mubr.msk.bf16.gmra.mxu1 %vm243_vm1, %v7594_v38  ;;  %13175 = vmatprep.mubr.msk.bf16.mxu0 %vm243_vm1, %v8033_v43  ;;  %v8034_v38 = vpack.c.bf16 %v8002_v48, %v8001_v45  ;;  %v7596_v55 = vpack.c.bf16 %v7564_v62, %v7563_v29  ;;  %v8005_v48 = vld [vmem:[%s13586_s22 + $0xcf] sm:$0xff] }
 0x2d0   : > { %v15642_v54 = vadd.f32 %v5633_v63, %v5308_v36  ;;  %v5313_v50 = vadd.f32 %v12903_v53, %v15401_v57  ;;  %v5646_v49 = vpop.f32.mrf.mxu0  ;;  %13133 = vmatprep.mubr.msk.bf16.mxu1 %vm243_vm1, %v7595_v58  ;;  %v8035_v57 = vpack.c.bf16 %v8004_v27, %v8003_v42  ;;  %v7597_v36 = vpack.c.bf16 %v7566_v59, %v7565_v40  ;;  %v8007_v27 = vld [vmem:[%s13586_s22 + $0xdf] sm:$0xff] }
 0x2d1   : > { %v5208_v32 = vpop.f32.mrf.mxu1  ;;  %v7569_v59 = vld [vmem:[%s13586_s22 + $0xde] sm:$0xff] }
 0x2d2   : > { %v15651_v44 = vadd.f32 %v12945_v16, %v5313_v50  ;;  %v5311_v11 = vadd.f32 %v5208_v32, %v15404_v56  ;;  %v12946_v25 = vpop.f32.mrf.mxu0  ;;  %v8006_v50 = vld [vmem:[%s13586_s22 + $0xd7] sm:$0xff]  ;;  %v8008_v32 = vld [vmem:[%s13586_s22 + $0xe7] sm:$0xff] }
 0x2d3   : > { %v12904_v43 = vpop.f32.mrf.mxu1 }
 0x2d4   : > { %v15654_v63 = vadd.f32 %v5646_v49, %v5311_v11  ;;  %v5314_v58 = vadd.f32 %v12904_v43, %v15407_v51  ;;  %v5649_v14 = vpop.f32.mrf.mxu0  ;;  %v7567_v51 = vld [vmem:[%s13586_s22 + $0xce] sm:$0xff]  ;;  %v7570_v11 = vld [vmem:[%s13586_s22 + $0xe6] sm:$0xff] }
 0x2d5   : > { %v5211_v53 = vpop.f32.mrf.mxu1 }
 0x2d6   : > { %v15657_v16 = vadd.f32 %v12946_v25, %v5314_v58  ;;  %v5312_v56 = vadd.f32 %v5211_v53, %v15416_v8  ;;  %v12949_v45 = vpop.f32.mrf.mxu0  ;;  %13176 = vmatmul.mubr.msk.bf16.gmra.mxu0 %vm243_vm1, %v8034_v38  ;;  %v7568_v8 = vld [vmem:[%s13586_s22 + $0xd6] sm:$0xff] }
 0x2d7   : > { %v12907_v29 = vpop.f32.mrf.mxu1  ;;  %13134 = vmatmul.mubr.msk.bf16.gmra.mxu1 %vm243_vm1, %v7596_v55  ;;  %13179 = vmatprep.mubr.msk.bf16.mxu0 %vm243_vm1, %v8035_v57  ;;  %v8036_v55 = vpack.c.bf16 %v8006_v50, %v8005_v48  ;;  %v7598_v58 = vpack.c.bf16 %v7568_v8, %v7567_v51  ;;  %v8009_v50 = vld [vmem:[%s13586_s22 + $0xef] sm:$0xff] }
 0x2d8   : > { %v15666_v49 = vadd.f32 %v5649_v14, %v5312_v56  ;;  %v5317_v62 = vadd.f32 %v12907_v29, %v15423_v18  ;;  %v5662_v42 = vpop.f32.mrf.mxu0  ;;  %13137 = vmatprep.mubr.msk.bf16.mxu1 %vm243_vm1, %v7597_v36  ;;  %v8037_v18 = vpack.c.bf16 %v8008_v32, %v8007_v27  ;;  %v7599_v56 = vpack.c.bf16 %v7570_v11, %v7569_v59  ;;  %v8011_v32 = vld [vmem:[%s13586_s22 + $0xff] sm:$0xff] }
 0x2d9   : > { %v5224_v40 = vpop.f32.mrf.mxu1  ;;  %v7573_v11 = vld [vmem:[%s13586_s22 + $0xfe] sm:$0xff] }
 0x2da   : > { %v15675_v25 = vadd.f32 %v12949_v45, %v5317_v62  ;;  %v5315_v38 = vadd.f32 %v5224_v40, %v15426_v37  ;;  %v12950_v43 = vpop.f32.mrf.mxu0  ;;  %v8010_v62 = vld [vmem:[%s13586_s22 + $0xf7] sm:$0xff]  ;;  %v8012_v40 = vld [vmem:[%s13586_s22 + $0x107] sm:$0xff] }
 0x2db   : > { %v12908_v57 = vpop.f32.mrf.mxu1 }
 0x2dc   : > { %v15678_v14 = vadd.f32 %v5662_v42, %v5315_v38  ;;  %v5318_v36 = vadd.f32 %v12908_v57, %v15429_v34  ;;  %v5665_v53 = vpop.f32.mrf.mxu0  ;;  %v7571_v34 = vld [vmem:[%s13586_s22 + $0xee] sm:$0xff]  ;;  %v7574_v38 = vld [vmem:[%s13586_s22 + $0x106] sm:$0xff] }
 0x2dd   : > { %v5227_v29 = vpop.f32.mrf.mxu1 }
 0x2de   : > { %v15681_v45 = vadd.f32 %v12950_v43, %v5318_v36  ;;  %v5316_v37 = vadd.f32 %v5227_v29, %v15438_v17  ;;  %v12997_v48 = vpop.f32.mrf.mxu0  ;;  %13180 = vmatmul.mubr.msk.bf16.gmra.mxu0 %vm243_vm1, %v8036_v55  ;;  %v7572_v17 = vld [vmem:[%s13586_s22 + $0xf6] sm:$0xff] }
 0x2df   : > { %v12955_v51 = vpop.f32.mrf.mxu1  ;;  %13138 = vmatmul.mubr.msk.bf16.gmra.mxu1 %vm243_vm1, %v7598_v58  ;;  %13183 = vmatprep.mubr.msk.bf16.mxu0 %vm243_vm1, %v8037_v18  ;;  %v8038_v58 = vpack.c.bf16 %v8010_v62, %v8009_v50  ;;  %v7600_v36 = vpack.c.bf16 %v7572_v17, %v7571_v34  ;;  %v8013_v62 = vld [vmem:[%s13586_s22 + $0x10f] sm:$0xff] }
 0x2e0   : > { %v15690_v42 = vadd.f32 %v5665_v53, %v5316_v37  ;;  %v6157_v8 = vadd.f32 %v12955_v51, %v15445_v10  ;;  %v6394_v27 = vpop.f32.mrf.mxu0  ;;  %13141 = vmatprep.mubr.msk.bf16.mxu1 %vm243_vm1, %v7599_v56  ;;  %v8039_v10 = vpack.c.bf16 %v8012_v40, %v8011_v32  ;;  %v7601_v37 = vpack.c.bf16 %v7574_v38, %v7573_v11  ;;  %v8015_v40 = vld [vmem:[%s13586_s22 + $0x11f] sm:$0xff] }
 0x2e1   : > { %v5956_v59 = vpop.f32.mrf.mxu1  ;;  %v7577_v38 = vld [vmem:[%s13586_s22 + $0x11e] sm:$0xff] }
 0x2e2   : > { %v15699_v43 = vadd.f32 %v12997_v48, %v6157_v8  ;;  %v6155_v55 = vadd.f32 %v5956_v59, %v15448_v15  ;;  %v12998_v57 = vpop.f32.mrf.mxu0  ;;  %v8014_v8 = vld [vmem:[%s13586_s22 + $0x117] sm:$0xff]  ;;  %v8016_v59 = vld [vmem:[%s13586_s22 + $0x127] sm:$0xff] }
 0x2e3   : > { %v12956_v18 = vpop.f32.mrf.mxu1 }
 0x2e4   : > { %v15702_v53 = vadd.f32 %v6394_v27, %v6155_v55  ;;  %v6158_v56 = vadd.f32 %v12956_v18, %v15451_v60  ;;  %v6397_v29 = vpop.f32.mrf.mxu0  ;;  %v7575_v60 = vld [vmem:[%s13586_s22 + $0x10e] sm:$0xff]  ;;  %v7578_v55 = vld [vmem:[%s13586_s22 + $0x126] sm:$0xff] }
 0x2e5   : > { %v5959_v51 = vpop.f32.mrf.mxu1 }
 0x2e6   : > { %v15705_v48 = vadd.f32 %v12998_v57, %v6158_v56  ;;  %v6156_v15 = vadd.f32 %v5959_v51, %v15460_v46  ;;  %v13001_v50 = vpop.f32.mrf.mxu0  ;;  %13184 = vmatmul.mubr.msk.bf16.gmra.mxu0 %vm243_vm1, %v8038_v58  ;;  %v7576_v46 = vld [vmem:[%s13586_s22 + $0x116] sm:$0xff] }
 0x2e7   : > { %v12959_v34 = vpop.f32.mrf.mxu1  ;;  %13142 = vmatmul.mubr.msk.bf16.gmra.mxu1 %vm243_vm1, %v7600_v36  ;;  %13187 = vmatprep.mubr.msk.bf16.mxu0 %vm243_vm1, %v8039_v10  ;;  %v8040_v36 = vpack.c.bf16 %v8014_v8, %v8013_v62  ;;  %v7602_v56 = vpack.c.bf16 %v7576_v46, %v7575_v60  ;;  %v8017_v8 = vld [vmem:[%s13586_s22 + $0x12f] sm:$0xff] }
 0x2e8   : > { %v15714_v27 = vadd.f32 %v6397_v29, %v6156_v15  ;;  %v6161_v17 = vadd.f32 %v12959_v34, %v15467_v19  ;;  %v6410_v32 = vpop.f32.mrf.mxu0  ;;  %13145 = vmatprep.mubr.msk.bf16.mxu1 %vm243_vm1, %v7601_v37  ;;  %v8041_v19 = vpack.c.bf16 %v8016_v59, %v8015_v40  ;;  %v7603_v15 = vpack.c.bf16 %v7578_v55, %v7577_v38  ;;  %v8019_v59 = vld [vmem:[%s13586_s22 + $0x13f] sm:$0xff] }
 0x2e9   : > { %v5972_v11 = vpop.f32.mrf.mxu1  ;;  %v7581_v55 = vld [vmem:[%s13586_s22 + $0x13e] sm:$0xff] }
 0x2ea   : > { %v15723_v57 = vadd.f32 %v13001_v50, %v6161_v17  ;;  %v6159_v58 = vadd.f32 %v5972_v11, %v15470_v28  ;;  %v13002_v18 = vpop.f32.mrf.mxu0  ;;  %v8018_v17 = vld [vmem:[%s13586_s22 + $0x137] sm:$0xff]  ;;  %v8020_v11 = vld [vmem:[%s13586_s22 + $0x147] sm:$0xff] }
 0x2eb   : > { %v12960_v10 = vpop.f32.mrf.mxu1 }
 0x2ec   : > { %v15726_v29 = vadd.f32 %v6410_v32, %v6159_v58  ;;  %v6162_v37 = vadd.f32 %v12960_v10, %v15473_v2  ;;  %v6413_v51 = vpop.f32.mrf.mxu0  ;;  %v7579_v2 = vld [vmem:[%s13586_s22 + $0x12e] sm:$0xff]  ;;  %v7582_v58 = vld [vmem:[%s13586_s22 + $0x146] sm:$0xff] }
 0x2ed   : > { %v5975_v34 = vpop.f32.mrf.mxu1 }
 0x2ee   : > { %v15729_v50 = vadd.f32 %v13002_v18, %v6162_v37  ;;  %v6160_v28 = vadd.f32 %v5975_v34, %v15482_v7  ;;  %v13005_v62 = vpop.f32.mrf.mxu0  ;;  %13188 = vmatmul.mubr.msk.bf16.gmra.mxu0 %vm243_vm1, %v8040_v36  ;;  %v7580_v7 = vld [vmem:[%s13586_s22 + $0x136] sm:$0xff] }
 0x2ef   : > { %v12963_v60 = vpop.f32.mrf.mxu1  ;;  %13146 = vmatmul.mubr.msk.bf16.gmra.mxu1 %vm243_vm1, %v7602_v56  ;;  %13191 = vmatprep.mubr.msk.bf16.mxu0 %vm243_vm1, %v8041_v19  ;;  %v8042_v56 = vpack.c.bf16 %v8018_v17, %v8017_v8  ;;  %v7604_v37 = vpack.c.bf16 %v7580_v7, %v7579_v2  ;;  %v8021_v17 = vld [vmem:[%s13586_s22 + $0x14f] sm:$0xff] }
 0x2f0   : > { %v15738_v32 = vadd.f32 %v6413_v51, %v6160_v28  ;;  %v6165_v46 = vadd.f32 %v12963_v60, %v15489_v5  ;;  %v6426_v40 = vpop.f32.mrf.mxu0  ;;  %13149 = vmatprep.mubr.msk.bf16.mxu1 %vm243_vm1, %v7603_v15  ;;  %v8043_v5 = vpack.c.bf16 %v8020_v11, %v8019_v59  ;;  %v7605_v28 = vpack.c.bf16 %v7582_v58, %v7581_v55  ;;  %v8023_v11 = vld [vmem:[%s13586_s22 + $0x15f] sm:$0xff] }
 0x2f1   : > { %v5988_v38 = vpop.f32.mrf.mxu1  ;;  %v7585_v58 = vld [vmem:[%s13586_s22 + $0x15e] sm:$0xff] }
 0x2f2   : > { %v15747_v18 = vadd.f32 %v13005_v62, %v6165_v46  ;;  %v6163_v36 = vadd.f32 %v5988_v38, %v15492_v39  ;;  %v13006_v10 = vpop.f32.mrf.mxu0  ;;  %v8022_v46 = vld [vmem:[%s13586_s22 + $0x157] sm:$0xff]  ;;  %v8024_v38 = vld [vmem:[%s13586_s22 + $0x167] sm:$0xff] }
 0x2f3   : > { %v12964_v19 = vpop.f32.mrf.mxu1 }
 0x2f4   : > { %v15750_v51 = vadd.f32 %v6426_v40, %v6163_v36  ;;  %v6166_v15 = vadd.f32 %v12964_v19, %v15495_v41  ;;  %v6429_v34 = vpop.f32.mrf.mxu0  ;;  %v7583_v41 = vld [vmem:[%s13586_s22 + $0x14e] sm:$0xff]  ;;  %v7586_v36 = vld [vmem:[%s13586_s22 + $0x166] sm:$0xff] }
 0x2f5   : > { %v5991_v60 = vpop.f32.mrf.mxu1 }
 0x2f6   : > { %v15753_v62 = vadd.f32 %v13006_v10, %v6166_v15  ;;  %v6164_v39 = vadd.f32 %v5991_v60, %v15504_v21  ;;  %v13009_v8 = vpop.f32.mrf.mxu0  ;;  %13192 = vmatmul.mubr.msk.bf16.gmra.mxu0 %vm243_vm1, %v8042_v56  ;;  %v7584_v21 = vld [vmem:[%s13586_s22 + $0x156] sm:$0xff] }
 0x2f7   : > { %v12967_v2 = vpop.f32.mrf.mxu1  ;;  %13150 = vmatmul.mubr.msk.bf16.gmra.mxu1 %vm243_vm1, %v7604_v37  ;;  %13195 = vmatprep.mubr.msk.bf16.mxu0 %vm243_vm1, %v8043_v5  ;;  %v8044_v37 = vpack.c.bf16 %v8022_v46, %v8021_v17  ;;  %v7606_v15 = vpack.c.bf16 %v7584_v21, %v7583_v41 }
 0x2f8   : > { %v15762_v40 = vadd.f32 %v6429_v34, %v6164_v39  ;;  %v6169_v7 = vadd.f32 %v12967_v2, %v15511_v1  ;;  %v6442_v59 = vpop.f32.mrf.mxu0  ;;  %13153 = vmatprep.mubr.msk.bf16.mxu1 %vm243_vm1, %v7605_v28  ;;  %v8045_v1 = vpack.c.bf16 %v8024_v38, %v8023_v11  ;;  %v7607_v39 = vpack.c.bf16 %v7586_v36, %v7585_v58  ;;  %v8863_v58 = vld [vmem:[%s13586_s22 + $0x50] sm:$0xff]  ;;  %v8864_v36 = vld [vmem:[%s13586_s22 + $0x58] sm:$0xff] }
 0x2f9   : > { %v6004_v55 = vpop.f32.mrf.mxu1 }
 0x2fa   : > { %v15771_v10 = vadd.f32 %v13009_v8, %v6169_v7  ;;  %v6167_v56 = vadd.f32 %v6004_v55, %v15514_v12  ;;  %v13010_v19 = vpop.f32.mrf.mxu0  ;;  %v16844_v12 = vld [vmem:[#allocation3_spill] sm:$0xff]  ;;  %v8025_v7 = vld [vmem:[%s13586_s22 + $0x16f] sm:$0xff] }
 0x2fb   : > { %v12968_v5 = vpop.f32.mrf.mxu1  ;;  %v7588_v55 = vld [vmem:[%s13586_s22 + $0x176] sm:$0xff] }
 0x2fc   : > { %v15774_v34 = vadd.f32 %v6442_v59, %v6167_v56  ;;  %v6170_v28 = vadd.f32 %v12968_v5, %v15517_v4  ;;  %v6445_v60 = vpop.f32.mrf.mxu0  ;;  %v7587_v4 = vld [vmem:[%s13586_s22 + $0x16e] sm:$0xff]  ;;  %v8026_v59 = vld [vmem:[%s13586_s22 + $0x177] sm:$0xff] }
 0x2fd   : > { %v6007_v2 = vpop.f32.mrf.mxu1 }
 0x2fe   : > { %v15777_v8 = vadd.f32 %v13010_v19, %v6170_v28  ;;  %v6168_v17 = vadd.f32 %v6007_v2, %v16844_v12  ;;  %v13013_v46 = vpop.f32.mrf.mxu0  ;;  %13196 = vmatmul.mubr.msk.bf16.gmra.mxu0 %vm243_vm1, %v8044_v37  ;;  %v8425_v19 = vld [vmem:[%s13586_s22 + $0x40] sm:$0xff]  ;;  %v8426_v37 = vld [vmem:[%s13586_s22 + $0x48] sm:$0xff]  ;;  %v8046_v28 = vpack.c.bf16 %v8026_v59, %v8025_v7  ;;  %v7608_v2 = vpack.c.bf16 %v7588_v55, %v7587_v4 }
 0x2ff   : > { %v12971_v41 = vpop.f32.mrf.mxu1  ;;  %13154 = vmatmul.mubr.msk.bf16.gmra.mxu1 %vm243_vm1, %v7606_v15  ;;  %13199 = vmatprep.mubr.msk.bf16.mxu0 %vm243_vm1, %v8045_v1  ;;  %v8865_v4 = vld [vmem:[%s13586_s22 + $0x60] sm:$0xff]  ;;  %v8866_v7 = vld [vmem:[%s13586_s22 + $0x68] sm:$0xff] }
 0x300   : > { %16843 = vst [vmem:[#allocation4_spill] sm:$0xff] %v15777_v8  ;;  %v15786_v21 = vadd.f32 %v6445_v60, %v6168_v17  ;;  %v6173_v11 = vadd.f32 %v12971_v41, %v15537_v30  ;;  %v6458_v38 = vpop.f32.mrf.mxu0  ;;  %13157 = vmatprep.mubr.msk.bf16.mxu1 %vm243_vm1, %v7607_v39  ;;  %v8903_v30 = vpack.c.bf16 %v8864_v36, %v8863_v58 }
 0x301   : > { %v6020_v56 = vpop.f32.mrf.mxu1  ;;  %v8465_v41 = vpack.c.bf16 %v8426_v37, %v8425_v19  ;;  %v8904_v36 = vpack.c.bf16 %v8866_v7, %v8865_v4  ;;  %v8868_v19 = vld [vmem:[%s13586_s22 + $0x78] sm:$0xff]  ;;  %v8871_v7 = vld [vmem:[%s13586_s22 + $0x90] sm:$0xff] }
 0x302   : > { %16845 = vst [vmem:[#allocation5_spill] sm:$0xff] %v15786_v21  ;;  %v15795_v5 = vadd.f32 %v13013_v46, %v6173_v11  ;;  %v6171_v15 = vadd.f32 %v6020_v56, %v15540_v9  ;;  %v13014_v1 = vpop.f32.mrf.mxu0  ;;  %v8867_v56 = vld [vmem:[%s13586_s22 + $0x70] sm:$0xff] }
 0x303   : > { %v12972_v60 = vpop.f32.mrf.mxu1 }
 0x304   : > { %v15798_v12 = vadd.f32 %v6458_v38, %v6171_v15  ;;  %v6174_v39 = vadd.f32 %v12972_v60, %v15543_v3  ;;  %v6461_v17 = vpop.f32.mrf.mxu0 }
 0x305   : > { %v6023_v21 = vpop.f32.mrf.mxu1 }
 0x306   : > { %v15801_v8 = vadd.f32 %v13014_v1, %v6174_v39  ;;  %v6172_v46 = vadd.f32 %v6023_v21, %v15551_v6  ;;  %v13017_v11 = vpop.f32.mrf.mxu0  ;;  %13200 = vmatmul.mubr.msk.bf16.gmra.mxu0 %vm243_vm1, %v8046_v28  ;;  %v9862_v28 = vsel %vm304_vm0, %v15587_v52, 0 }
 0x307   : > { %v12975_v9 = vpop.f32.mrf.mxu1  ;;  %13158 = vmatmul.mubr.msk.bf16.gmra.mxu1 %vm243_vm1, %v7608_v2  ;;  %13247 = vmatprep.mubr.msk.bf16.mxu0 %vm243_vm1, %v8903_v30  ;;  %v9424_v2 = vsel %vm304_vm0, %v15579_v20, 0  ;;  %v8869_v20 = vld [vmem:[%s13586_s22 + $0x80] sm:$0xff] }
 0x308   : > { %v15809_v3 = vadd.f32 %v6461_v17, %v6172_v46  ;;  %v6177_v59 = vadd.f32 %v12975_v9, %v15559_v35  ;;  %v6474_v38 = vpop.f32.mrf.mxu0  ;;  %13205 = vmatprep.mubr.msk.bf16.mxu1 %vm243_vm1, %v8465_v41  ;;  %v8870_v46 = vld [vmem:[%s13586_s22 + $0x88] sm:$0xff] }
 0x309   : > { %v6036_v6 = vpop.f32.mrf.mxu1 }
 0x30a   : > { %v15813_v21 = vadd.f32 %v13017_v11, %v6177_v59  ;;  %v6175_v55 = vadd.f32 %v6036_v6, %v15564_v0  ;;  %v13018_v58 = vpop.f32.mrf.mxu0  ;;  %v8905_v0 = vpack.c.bf16 %v8868_v19, %v8867_v56  ;;  %v15840_v11 = vld [vmem:[%s16784_s1 + $0x60] sm:$0xf]  ;;  %v8872_v59 = vld [vmem:[%s13586_s22 + $0x98] sm:$0xff] }
 0x30b   : > { %v12976_v37 = vpop.f32.mrf.mxu1 }
 0x30c   : > { %v15818_v15 = vadd.f32 %v6474_v38, %v6175_v55  ;;  %v6178_v1 = vadd.f32 %v12976_v37, %v15571_v31  ;;  %v6477_v35 = vpop.f32.mrf.mxu0  ;;  %v15832_v31 = vld [vmem:[%s16784_s1 + $0x5c] sm:$0xf] }
 0x30d   : > { %v6039_v60 = vpop.f32.mrf.mxu1 }
 0x30e   : > { %v15825_v39 = vadd.f32 %v13018_v58, %v6178_v1  ;;  %v6176_v17 = vadd.f32 %v6039_v60, %v15589_v24  ;;  %v13021_v41 = vpop.f32.mrf.mxu0  ;;  %13248 = vmatmul.mubr.msk.bf16.vlgmr.msra.gmra.mxu0 %vm243_vm1, %v8904_v36  ;;  %v8906_v58 = vpack.c.bf16 %v8870_v46, %v8869_v20  ;;  %v8875_v20 = vld [vmem:[%s13586_s22 + $0xb0] sm:$0xff]  ;;  %v8876_v46 = vld [vmem:[%s13586_s22 + $0xb8] sm:$0xff] }
 0x30f   : > { %v12979_v52 = vpop.f32.mrf.mxu1  ;;  %13206 = vmatmul.mubr.msk.bf16.vlgmr.msra.gmra.mxu1 %vm243_vm1, %v8903_v30  ;;  %13330 = vmatpush3.bf16.msra.mxu0 %v9862_v28 }
 0x310   : > { %v15842_v24 = vadd.f32 %v6477_v35, %v6176_v17  ;;  %v6181_v9 = vadd.f32 %v12979_v52, %v15601_v22  ;;  %13288 = vmatpush3.bf16.msra.mxu1 %v9424_v2  ;;  %v6490_v4 = vpop.f32.mrf.mxu0  ;;  %13209 = vmatprep.mubr.msk.bf16.mxu1 %vm243_vm1, %v8904_v36  ;;  %v8907_v36 = vpack.c.bf16 %v8872_v59, %v8871_v7  ;;  %v8873_v2 = vld [vmem:[%s13586_s22 + $0xa0] sm:$0xff]  ;;  %v8874_v17 = vld [vmem:[%s13586_s22 + $0xa8] sm:$0xff] }
 0x311   : > { %v6052_v38 = vpop.f32.mrf.mxu1  ;;  %13251 = vmatprep.mubr.msk.bf16.mxu0 %vm243_vm1, %v8905_v0  ;;  %13481 = vmatprep.subr.msk.bf16.mxu1 %vm304_vm0, %v15832_v31  ;;  %v8908_v7 = vpack.c.bf16 %v8874_v17, %v8873_v2  ;;  %v8879_v2 = vld [vmem:[%s13586_s22 + $0xd0] sm:$0xff]  ;;  %v8880_v17 = vld [vmem:[%s13586_s22 + $0xd8] sm:$0xff] }
 0x312   : > { %v15851_v30 = vadd.f32 %v13021_v41, %v6181_v9  ;;  %v6179_v6 = vadd.f32 %v6052_v38, %v15606_v23  ;;  %v13022_v55 = vpop.f32.mrf.mxu0  ;;  %13482 = vmatprep.subr.msk.bf16.mxu0 %vm304_vm0, %v15840_v11  ;;  %v8909_v38 = vpack.c.bf16 %v8876_v46, %v8875_v20 }
 0x313   : > { %v12980_v22 = vpop.f32.mrf.mxu1 }
 0x314   : > { %v15856_v56 = vadd.f32 %v6490_v4, %v6179_v6  ;;  %v6182_v19 = vadd.f32 %v12980_v22, %v15609_v61  ;;  %v6493_v37 = vpop.f32.mrf.mxu0 }
 0x315   : > { %v6055_v1 = vpop.f32.mrf.mxu1 }
 0x316   : > { %v15859_v35 = vadd.f32 %v13022_v55, %v6182_v19  ;;  %v6180_v23 = vadd.f32 %v6055_v1, %v15618_v47  ;;  %v13025_v28 = vpop.f32.mrf.mxu0  ;;  %13252 = vmatmul.mubr.msk.bf16.gmra.mxu0 %vm243_vm1, %v8906_v58  ;;  %v8877_v1 = vld [vmem:[%s13586_s22 + $0xc0] sm:$0xff] }
 0x317   : > { %v12983_v60 = vpop.f32.mrf.mxu1  ;;  %13210 = vmatmul.mubr.msk.bf16.gmra.mxu1 %vm243_vm1, %v8905_v0  ;;  %13255 = vmatprep.mubr.msk.bf16.mxu0 %vm243_vm1, %v8907_v36 }
 0x318   : > { %v15867_v41 = vadd.f32 %v6493_v37, %v6180_v23  ;;  %v6185_v61 = vadd.f32 %v12983_v60, %v15627_v26  ;;  %v6506_v52 = vpop.f32.mrf.mxu0  ;;  %13213 = vmatprep.mubr.msk.bf16.mxu1 %vm243_vm1, %v8906_v58  ;;  %v8878_v23 = vld [vmem:[%s13586_s22 + $0xc8] sm:$0xff] }
 0x319   : > { %v6068_v47 = vpop.f32.mrf.mxu1  ;;  %v8910_v20 = vpack.c.bf16 %v8878_v23, %v8877_v1  ;;  %v8883_v1 = vld [vmem:[%s13586_s22 + $0xf0] sm:$0xff]  ;;  %v8884_v23 = vld [vmem:[%s13586_s22 + $0xf8] sm:$0xff] }
 0x31a   : > { %v15873_v9 = vadd.f32 %v13025_v28, %v6185_v61  ;;  %v6183_v4 = vadd.f32 %v6068_v47, %v15630_v33  ;;  %v13026_v0 = vpop.f32.mrf.mxu0  ;;  %v8911_v47 = vpack.c.bf16 %v8880_v17, %v8879_v2 }
 0x31b   : > { %v12984_v59 = vpop.f32.mrf.mxu1 }
 0x31c   : > { %v15876_v6 = vadd.f32 %v6506_v52, %v6183_v4  ;;  %v6186_v26 = vadd.f32 %v12984_v59, %v15633_v13  ;;  %v6509_v55 = vpop.f32.mrf.mxu0 }
 0x31d   : > { %v6071_v58 = vpop.f32.mrf.mxu1 }
 0x31e   : > { %v15879_v22 = vadd.f32 %v13026_v0, %v6186_v26  ;;  %v6184_v19 = vadd.f32 %v6071_v58, %v15642_v54  ;;  %v13029_v37 = vpop.f32.mrf.mxu0  ;;  %13256 = vmatmul.mubr.msk.bf16.gmra.mxu0 %vm243_vm1, %v8908_v7  ;;  %v8881_v58 = vld [vmem:[%s13586_s22 + $0xe0] sm:$0xff] }
 0x31f   : > { %v12987_v33 = vpop.f32.mrf.mxu1  ;;  %13214 = vmatmul.mubr.msk.bf16.gmra.mxu1 %vm243_vm1, %v8907_v36  ;;  %13259 = vmatprep.mubr.msk.bf16.mxu0 %vm243_vm1, %v8909_v38 }
 0x320   : > { %v15887_v28 = vadd.f32 %v6509_v55, %v6184_v19  ;;  %v6189_v13 = vadd.f32 %v12987_v33, %v15651_v44  ;;  %v6522_v60 = vpop.f32.mrf.mxu0  ;;  %13217 = vmatprep.mubr.msk.bf16.mxu1 %vm243_vm1, %v8908_v7  ;;  %v8882_v19 = vld [vmem:[%s13586_s22 + $0xe8] sm:$0xff] }
 0x321   : > { %v6084_v54 = vpop.f32.mrf.mxu1  ;;  %v8912_v2 = vpack.c.bf16 %v8882_v19, %v8881_v58  ;;  %v8887_v58 = vld [vmem:[%s13586_s22 + $0x110] sm:$0xff]  ;;  %v8888_v19 = vld [vmem:[%s13586_s22 + $0x118] sm:$0xff] }
 0x322   : > { %v15893_v61 = vadd.f32 %v13029_v37, %v6189_v13  ;;  %v6187_v52 = vadd.f32 %v6084_v54, %v15654_v63  ;;  %v13030_v36 = vpop.f32.mrf.mxu0  ;;  %v8913_v54 = vpack.c.bf16 %v8884_v23, %v8883_v1 }
 0x323   : > { %v12988_v46 = vpop.f32.mrf.mxu1 }
 0x324   : > { %v15896_v4 = vadd.f32 %v6522_v60, %v6187_v52  ;;  %v6190_v44 = vadd.f32 %v12988_v46, %v15657_v16  ;;  %v6525_v0 = vpop.f32.mrf.mxu0 }
 0x325   : > { %v6087_v7 = vpop.f32.mrf.mxu1 }
 0x326   : > { %v15899_v59 = vadd.f32 %v13030_v36, %v6190_v44  ;;  %v6188_v26 = vadd.f32 %v6087_v7, %v15666_v49  ;;  %v13033_v55 = vpop.f32.mrf.mxu0  ;;  %13260 = vmatmul.mubr.msk.bf16.gmra.mxu0 %vm243_vm1, %v8910_v20  ;;  %v8885_v7 = vld [vmem:[%s13586_s22 + $0x100] sm:$0xff] }
 0x327   : > { %v12991_v63 = vpop.f32.mrf.mxu1  ;;  %13218 = vmatmul.mubr.msk.bf16.gmra.mxu1 %vm243_vm1, %v8909_v38  ;;  %13263 = vmatprep.mubr.msk.bf16.mxu0 %vm243_vm1, %v8911_v47 }
 0x328   : > { %v15907_v37 = vadd.f32 %v6525_v0, %v6188_v26  ;;  %v6193_v16 = vadd.f32 %v12991_v63, %v15675_v25  ;;  %v6538_v33 = vpop.f32.mrf.mxu0  ;;  %13221 = vmatprep.mubr.msk.bf16.mxu1 %vm243_vm1, %v8910_v20  ;;  %v8886_v26 = vld [vmem:[%s13586_s22 + $0x108] sm:$0xff] }
 0x329   : > { %v6100_v49 = vpop.f32.mrf.mxu1  ;;  %v8914_v1 = vpack.c.bf16 %v8886_v26, %v8885_v7  ;;  %v8891_v7 = vld [vmem:[%s13586_s22 + $0x130] sm:$0xff]  ;;  %v8892_v26 = vld [vmem:[%s13586_s22 + $0x138] sm:$0xff] }
 0x32a   : > { %v15913_v13 = vadd.f32 %v13033_v55, %v6193_v16  ;;  %v6191_v60 = vadd.f32 %v6100_v49, %v15678_v14  ;;  %v13034_v38 = vpop.f32.mrf.mxu0  ;;  %v8915_v49 = vpack.c.bf16 %v8888_v19, %v8887_v58 }
 0x32b   : > { %v12992_v17 = vpop.f32.mrf.mxu1 }
 0x32c   : > { %v15916_v52 = vadd.f32 %v6538_v33, %v6191_v60  ;;  %v6194_v25 = vadd.f32 %v12992_v17, %v15681_v45  ;;  %v6541_v36 = vpop.f32.mrf.mxu0 }
 0x32d   : > { %v6103_v20 = vpop.f32.mrf.mxu1 }
 0x32e   : > { %v15919_v46 = vadd.f32 %v13034_v38, %v6194_v25  ;;  %v6192_v44 = vadd.f32 %v6103_v20, %v15690_v42  ;;  %v13081_v0 = vpop.f32.mrf.mxu0  ;;  %13264 = vmatmul.mubr.msk.bf16.gmra.mxu0 %vm243_vm1, %v8912_v2  ;;  %v8889_v20 = vld [vmem:[%s13586_s22 + $0x120] sm:$0xff] }
 0x32f   : > { %v13039_v14 = vpop.f32.mrf.mxu1  ;;  %13222 = vmatmul.mubr.msk.bf16.gmra.mxu1 %vm243_vm1, %v8911_v47  ;;  %13267 = vmatprep.mubr.msk.bf16.mxu0 %vm243_vm1, %v8913_v54 }
 0x330   : > { %v15927_v55 = vadd.f32 %v6541_v36, %v6192_v44  ;;  %v7033_v45 = vadd.f32 %v13039_v14, %v15699_v43  ;;  %v7270_v63 = vpop.f32.mrf.mxu0  ;;  %13225 = vmatprep.mubr.msk.bf16.mxu1 %vm243_vm1, %v8912_v2  ;;  %v8890_v44 = vld [vmem:[%s13586_s22 + $0x128] sm:$0xff] }
 0x331   : > { %v6832_v42 = vpop.f32.mrf.mxu1  ;;  %v8916_v58 = vpack.c.bf16 %v8890_v44, %v8889_v20  ;;  %v8895_v20 = vld [vmem:[%s13586_s22 + $0x150] sm:$0xff]  ;;  %v8896_v44 = vld [vmem:[%s13586_s22 + $0x158] sm:$0xff] }
 0x332   : > { %v15933_v16 = vadd.f32 %v13081_v0, %v7033_v45  ;;  %v7031_v33 = vadd.f32 %v6832_v42, %v15702_v53  ;;  %v13082_v47 = vpop.f32.mrf.mxu0  ;;  %v8917_v42 = vpack.c.bf16 %v8892_v26, %v8891_v7 }
 0x333   : > { %v13040_v23 = vpop.f32.mrf.mxu1 }
 0x334   : > { %v15936_v60 = vadd.f32 %v7270_v63, %v7031_v33  ;;  %v7034_v43 = vadd.f32 %v13040_v23, %v15705_v48  ;;  %v7273_v38 = vpop.f32.mrf.mxu0 }
 0x335   : > { %v6835_v2 = vpop.f32.mrf.mxu1 }
 0x336   : > { %v15939_v17 = vadd.f32 %v13082_v47, %v7034_v43  ;;  %v7032_v25 = vadd.f32 %v6835_v2, %v15714_v27  ;;  %v13085_v36 = vpop.f32.mrf.mxu0  ;;  %13268 = vmatmul.mubr.msk.bf16.gmra.mxu0 %vm243_vm1, %v8914_v1  ;;  %v8893_v2 = vld [vmem:[%s13586_s22 + $0x140] sm:$0xff] }
 0x337   : > { %v13043_v53 = vpop.f32.mrf.mxu1  ;;  %13226 = vmatmul.mubr.msk.bf16.gmra.mxu1 %vm243_vm1, %v8913_v54  ;;  %13271 = vmatprep.mubr.msk.bf16.mxu0 %vm243_vm1, %v8915_v49 }
 0x338   : > { %v15947_v0 = vadd.f32 %v7273_v38, %v7032_v25  ;;  %v7037_v48 = vadd.f32 %v13043_v53, %v15723_v57  ;;  %v7286_v14 = vpop.f32.mrf.mxu0  ;;  %13229 = vmatprep.mubr.msk.bf16.mxu1 %vm243_vm1, %v8914_v1  ;;  %v8894_v25 = vld [vmem:[%s13586_s22 + $0x148] sm:$0xff] }
 0x339   : > { %v6848_v27 = vpop.f32.mrf.mxu1  ;;  %v8918_v7 = vpack.c.bf16 %v8894_v25, %v8893_v2  ;;  %v8899_v2 = vld [vmem:[%s13586_s22 + $0x170] sm:$0xff]  ;;  %v8900_v25 = vld [vmem:[%s13586_s22 + $0x178] sm:$0xff] }
 0x33a   : > { %v15953_v45 = vadd.f32 %v13085_v36, %v7037_v48  ;;  %v7035_v63 = vadd.f32 %v6848_v27, %v15726_v29  ;;  %v13086_v54 = vpop.f32.mrf.mxu0  ;;  %v8919_v27 = vpack.c.bf16 %v8896_v44, %v8895_v20 }
 0x33b   : > { %v13044_v19 = vpop.f32.mrf.mxu1 }
 0x33c   : > { %v15956_v33 = vadd.f32 %v7286_v14, %v7035_v63  ;;  %v7038_v57 = vadd.f32 %v13044_v19, %v15729_v50  ;;  %v7289_v47 = vpop.f32.mrf.mxu0 }
 0x33d   : > { %v6851_v1 = vpop.f32.mrf.mxu1 }
 0x33e   : > { %v15959_v23 = vadd.f32 %v13086_v54, %v7038_v57  ;;  %v7036_v43 = vadd.f32 %v6851_v1, %v15738_v32  ;;  %v13089_v38 = vpop.f32.mrf.mxu0  ;;  %13272 = vmatmul.mubr.msk.bf16.gmra.mxu0 %vm243_vm1, %v8916_v58  ;;  %v8897_v1 = vld [vmem:[%s13586_s22 + $0x160] sm:$0xff] }
 0x33f   : > { %v13047_v29 = vpop.f32.mrf.mxu1  ;;  %13230 = vmatmul.mubr.msk.bf16.gmra.mxu1 %vm243_vm1, %v8915_v49  ;;  %13275 = vmatprep.mubr.msk.bf16.mxu0 %vm243_vm1, %v8917_v42 }
 0x340   : > { %v15967_v36 = vadd.f32 %v7289_v47, %v7036_v43  ;;  %v7041_v50 = vadd.f32 %v13047_v29, %v15747_v18  ;;  %v7302_v53 = vpop.f32.mrf.mxu0  ;;  %13233 = vmatprep.mubr.msk.bf16.mxu1 %vm243_vm1, %v8916_v58  ;;  %v8898_v43 = vld [vmem:[%s13586_s22 + $0x168] sm:$0xff] }
 0x341   : > { %v6864_v32 = vpop.f32.mrf.mxu1  ;;  %v8920_v20 = vpack.c.bf16 %v8898_v43, %v8897_v1 }
 0x342   : > { %v15973_v48 = vadd.f32 %v13089_v38, %v7041_v50  ;;  %v7039_v14 = vadd.f32 %v6864_v32, %v15750_v51  ;;  %v13090_v49 = vpop.f32.mrf.mxu0  ;;  %v8921_v32 = vpack.c.bf16 %v8900_v25, %v8899_v2  ;;  %v9740_v2 = vld [vmem:[%s13586_s22 + $0x5a] sm:$0xff] }
 0x343   : > { %v13048_v26 = vpop.f32.mrf.mxu1 }
 0x344   : > { %v15976_v63 = vadd.f32 %v7302_v53, %v7039_v14  ;;  %v7042_v18 = vadd.f32 %v13048_v26, %v15753_v62  ;;  %v7305_v54 = vpop.f32.mrf.mxu0 }
 0x345   : > { %v6867_v58 = vpop.f32.mrf.mxu1 }
 0x346   : > { %v15979_v19 = vadd.f32 %v13090_v49, %v7042_v18  ;;  %v7040_v57 = vadd.f32 %v6867_v58, %v15762_v40  ;;  %v13093_v47 = vpop.f32.mrf.mxu0  ;;  %13276 = vmatmul.mubr.msk.bf16.gmra.mxu0 %vm243_vm1, %v8918_v7  ;;  %v16846_v49 = vld [vmem:[#allocation4_spill] sm:$0xff] }
 0x347   : > { %v13051_v51 = vpop.f32.mrf.mxu1  ;;  %13234 = vmatmul.mubr.msk.bf16.gmra.mxu1 %vm243_vm1, %v8917_v42  ;;  %13279 = vmatprep.mubr.msk.bf16.mxu0 %vm243_vm1, %v8919_v27 }
 0x348   : > { %v15987_v38 = vadd.f32 %v7305_v54, %v7040_v57  ;;  %v7045_v62 = vadd.f32 %v13051_v51, %v15771_v10  ;;  %v7318_v29 = vpop.f32.mrf.mxu0  ;;  %13237 = vmatprep.mubr.msk.bf16.mxu1 %vm243_vm1, %v8918_v7  ;;  %v16847_v54 = vld [vmem:[#allocation5_spill] sm:$0xff]  ;;  %v8902_v51 = vld [vmem:[%s13586_s22 + $0x188] sm:$0xff] }
 0x349   : > { %v6880_v40 = vpop.f32.mrf.mxu1 }
 0x34a   : > { %v15993_v50 = vadd.f32 %v13093_v47, %v7045_v62  ;;  %v7043_v53 = vadd.f32 %v6880_v40, %v15774_v34  ;;  %v13094_v42 = vpop.f32.mrf.mxu0  ;;  %v8901_v47 = vld [vmem:[%s13586_s22 + $0x180] sm:$0xff]  ;;  %v9301_v40 = vld [vmem:[%s13586_s22 + $0x51] sm:$0xff] }
 0x34b   : > { %v13052_v44 = vpop.f32.mrf.mxu1 }
 0x34c   : > { %v15996_v14 = vadd.f32 %v7318_v29, %v7043_v53  ;;  %v7046_v10 = vadd.f32 %v13052_v44, %v16846_v49  ;;  %v7321_v26 = vpop.f32.mrf.mxu0  ;;  %v9739_v29 = vld [vmem:[%s13586_s22 + $0x52] sm:$0xff]  ;;  %v8922_v49 = vpack.c.bf16 %v8902_v51, %v8901_v47  ;;  %v9742_v51 = vld [vmem:[%s13586_s22 + $0x6a] sm:$0xff] }
 0x34d   : > { %v6883_v7 = vpop.f32.mrf.mxu1  ;;  %v9302_v53 = vld [vmem:[%s13586_s22 + $0x59] sm:$0xff] }
 0x34e   : > { %v15999_v18 = vadd.f32 %v13094_v42, %v7046_v10  ;;  %v7044_v58 = vadd.f32 %v6883_v7, %v16847_v54  ;;  %v13097_v34 = vpop.f32.mrf.mxu0  ;;  %13280 = vmatmul.mubr.msk.bf16.gmra.mxu0 %vm243_vm1, %v8920_v20  ;;  %v9341_v54 = vpack.c.bf16 %v9302_v53, %v9301_v40  ;;  %v9305_v40 = vld [vmem:[%s13586_s22 + $0x71] sm:$0xff]  ;;  %v9306_v53 = vld [vmem:[%s13586_s22 + $0x79] sm:$0xff] }
 0x34f   : > { %v13055_v57 = vpop.f32.mrf.mxu1  ;;  %13238 = vmatmul.mubr.msk.bf16.gmra.mxu1 %vm243_vm1, %v8919_v27  ;;  %13283 = vmatprep.mubr.msk.bf16.mxu0 %vm243_vm1, %v8921_v32 }
 0x350   : > { %v16007_v1 = vadd.f32 %v7321_v26, %v7044_v58  ;;  %v7049_v43 = vadd.f32 %v13055_v57, %v15795_v5  ;;  %v7334_v62 = vpop.f32.mrf.mxu0  ;;  %13241 = vmatprep.mubr.msk.bf16.mxu1 %vm243_vm1, %v8920_v20  ;;  %v9779_v26 = vpack.c.bf16 %v9740_v2, %v9739_v29  ;;  %v9304_v2 = vld [vmem:[%s13586_s22 + $0x69] sm:$0xff] }
 0x351   : > { %v6896_v25 = vpop.f32.mrf.mxu1 }
 0x352   : > { %v16015_v42 = vadd.f32 %v13097_v34, %v7049_v43  ;;  %v7047_v27 = vadd.f32 %v6896_v25, %v15798_v12  ;;  %v13098_v44 = vpop.f32.mrf.mxu0 }
 0x353   : > { %v13056_v10 = vpop.f32.mrf.mxu1 }
 0x354   : > { %v16018_v7 = vadd.f32 %v7334_v62, %v7047_v27  ;;  %v7050_v5 = vadd.f32 %v13056_v10, %v15801_v8  ;;  %v7337_v20 = vpop.f32.mrf.mxu0  ;;  %v9741_v8 = vld [vmem:[%s13586_s22 + $0x62] sm:$0xff]  ;;  %v9743_v10 = vld [vmem:[%s13586_s22 + $0x72] sm:$0xff] }
 0x355   : > { %v6899_v58 = vpop.f32.mrf.mxu1 }
 0x356   : > { %v16021_v57 = vadd.f32 %v13098_v44, %v7050_v5  ;;  %v7048_v12 = vadd.f32 %v6899_v58, %v15809_v3  ;;  %v13101_v34 = vpop.f32.mrf.mxu0  ;;  %13284 = vmatmul.mubr.msk.bf16.gmra.mxu0 %vm243_vm1, %v8922_v49  ;;  %v9303_v3 = vld [vmem:[%s13586_s22 + $0x61] sm:$0xff]  ;;  %v9780_v49 = vpack.c.bf16 %v9742_v51, %v9741_v8 }
 0x357   : > { %v13059_v47 = vpop.f32.mrf.mxu1  ;;  %13242 = vmatmul.mubr.msk.bf16.gmra.mxu1 %vm243_vm1, %v8921_v32  ;;  %13331 = vmatprep.mubr.msk.bf16.mxu0 %vm243_vm1, %v9779_v26  ;;  %v9744_v26 = vld [vmem:[%s13586_s22 + $0x7a] sm:$0xff] }
 0x358   : > { %v16029_v43 = vadd.f32 %v7337_v20, %v7048_v12  ;;  %v7053_v62 = vadd.f32 %v13059_v47, %v15813_v21  ;;  %v7350_v29 = vpop.f32.mrf.mxu0  ;;  %13289 = vmatprep.mubr.msk.bf16.mxu1 %vm243_vm1, %v9341_v54  ;;  %v9342_v20 = vpack.c.bf16 %v9304_v2, %v9303_v3  ;;  %v10738_v12 = vsel %vm304_vm0, %v15840_v11, 0  ;;  %v9307_v11 = vld [vmem:[%s13586_s22 + $0x81] sm:$0xff] }
 0x359   : > { %v6912_v25 = vpop.f32.mrf.mxu1  ;;  %v9781_v8 = vpack.c.bf16 %v9744_v26, %v9743_v10  ;;  %v9745_v3 = vld [vmem:[%s13586_s22 + $0x82] sm:$0xff]  ;;  %v9310_v10 = vld [vmem:[%s13586_s22 + $0x99] sm:$0xff] }
 0x35a   : > { %v16037_v27 = vadd.f32 %v13101_v34, %v7053_v62  ;;  %v7051_v32 = vadd.f32 %v6912_v25, %v15818_v15  ;;  %v13102_v44 = vpop.f32.mrf.mxu0  ;;  %v9343_v34 = vpack.c.bf16 %v9306_v53, %v9305_v40  ;;  %v10300_v15 = vsel %vm304_vm0, %v15832_v31, 0  ;;  %v9746_v31 = vld [vmem:[%s13586_s22 + $0x8a] sm:$0xff]  ;;  %v9747_v53 = vld [vmem:[%s13586_s22 + $0x92] sm:$0xff] }
 0x35b   : > { %v13060_v5 = vpop.f32.mrf.mxu1 }
 0x35c   : > { %v16042_v21 = vadd.f32 %v7350_v29, %v7051_v32  ;;  %v7054_v54 = vadd.f32 %v13060_v5, %v15825_v39  ;;  %v7353_v58 = vpop.f32.mrf.mxu0  ;;  %v9748_v32 = vld [vmem:[%s13586_s22 + $0x9a] sm:$0xff] }
 0x35d   : > { %v6915_v47 = vpop.f32.mrf.mxu1 }
 0x35e   : > { %v16049_v51 = vadd.f32 %v13102_v44, %v7054_v54  ;;  %v7052_v62 = vadd.f32 %v6915_v47, %v15842_v24  ;;  %v13105_v29 = vpop.f32.mrf.mxu0  ;;  %13332 = vmatmul.mubr.msk.bf16.vlgmr.msra.gmra.mxu0 %vm243_vm1, %v9780_v49  ;;  %v9308_v24 = vld [vmem:[%s13586_s22 + $0x89] sm:$0xff]  ;;  %v9309_v49 = vld [vmem:[%s13586_s22 + $0x91] sm:$0xff]  ;;  %v9782_v54 = vpack.c.bf16 %v9746_v31, %v9745_v3 }
 0x35f   : > { %v13063_v39 = vpop.f32.mrf.mxu1  ;;  %13290 = vmatmul.mubr.msk.bf16.vlgmr.msra.gmra.mxu1 %vm243_vm1, %v9342_v20  ;;  %13414 = vmatpush3.bf16.msra.mxu0 %v10738_v12  ;;  %v9783_v12 = vpack.c.bf16 %v9748_v32, %v9747_v53  ;;  %v9749_v3 = vld [vmem:[%s13586_s22 + $0xa2] sm:$0xff]  ;;  %v9750_v31 = vld [vmem:[%s13586_s22 + $0xaa] sm:$0xff]  ;;  %v9751_v53 = vld [vmem:[%s13586_s22 + $0xb2] sm:$0xff] }
 0x360   : > { %v16057_v2 = vadd.f32 %v7353_v58, %v7052_v62  ;;  %v7057_v25 = vadd.f32 %v13063_v39, %v15851_v30  ;;  %13372 = vmatpush3.bf16.msra.mxu1 %v10300_v15  ;;  %v7366_v40 = vpop.f32.mrf.mxu0  ;;  %13293 = vmatprep.mubr.msk.bf16.mxu1 %vm243_vm1, %v9343_v34  ;;  %v9344_v58 = vpack.c.bf16 %v9308_v24, %v9307_v11  ;;  %v9752_v32 = vld [vmem:[%s13586_s22 + $0xba] sm:$0xff] }
 0x361   : > { %v6928_v44 = vpop.f32.mrf.mxu1  ;;  %13335 = vmatprep.mubr.msk.bf16.mxu0 %vm243_vm1, %v9781_v8  ;;  %v9345_v8 = vpack.c.bf16 %v9310_v10, %v9309_v49  ;;  %v9313_v49 = vld [vmem:[%s13586_s22 + $0xb1] sm:$0xff]  ;;  %v9314_v10 = vld [vmem:[%s13586_s22 + $0xb9] sm:$0xff] }
 0x362   : > { %v16067_v26 = vadd.f32 %v13105_v29, %v7057_v25  ;;  %v7055_v5 = vadd.f32 %v6928_v44, %v15856_v56  ;;  %v13106_v20 = vpop.f32.mrf.mxu0 }
 0x363   : > { %v13064_v30 = vpop.f32.mrf.mxu1 }
 0x364   : > { %v16070_v34 = vadd.f32 %v7366_v40, %v7055_v5  ;;  %v7058_v47 = vadd.f32 %v13064_v30, %v15859_v35  ;;  %v7369_v15 = vpop.f32.mrf.mxu0  ;;  %v9311_v35 = vld [vmem:[%s13586_s22 + $0xa1] sm:$0xff]  ;;  %v9784_v30 = vpack.c.bf16 %v9750_v31, %v9749_v3  ;;  %v9754_v31 = vld [vmem:[%s13586_s22 + $0xca] sm:$0xff] }
 0x365   : > { %v6931_v62 = vpop.f32.mrf.mxu1  ;;  %v9753_v3 = vld [vmem:[%s13586_s22 + $0xc2] sm:$0xff] }
 0x366   : > { %v16073_v29 = vadd.f32 %v13106_v20, %v7058_v47  ;;  %v7056_v56 = vadd.f32 %v6931_v62, %v15867_v41  ;;  %v13109_v39 = vpop.f32.mrf.mxu0  ;;  %13336 = vmatmul.mubr.msk.bf16.gmra.mxu0 %vm243_vm1, %v9782_v54  ;;  %v9312_v41 = vld [vmem:[%s13586_s22 + $0xa9] sm:$0xff]  ;;  %v9347_v62 = vpack.c.bf16 %v9314_v10, %v9313_v49  ;;  %v9317_v49 = vld [vmem:[%s13586_s22 + $0xd1] sm:$0xff]  ;;  %v9318_v10 = vld [vmem:[%s13586_s22 + $0xd9] sm:$0xff] }
 0x367   : > { %v13067_v11 = vpop.f32.mrf.mxu1  ;;  %13294 = vmatmul.mubr.msk.bf16.gmra.mxu1 %vm243_vm1, %v9344_v58  ;;  %13339 = vmatprep.mubr.msk.bf16.mxu0 %vm243_vm1, %v9783_v12  ;;  %v9346_v12 = vpack.c.bf16 %v9312_v41, %v9311_v35 }
 0x368   : > { %v16082_v25 = vadd.f32 %v7369_v15, %v7056_v56  ;;  %v7061_v40 = vadd.f32 %v13067_v11, %v15873_v9  ;;  %v7382_v24 = vpop.f32.mrf.mxu0  ;;  %13297 = vmatprep.mubr.msk.bf16.mxu1 %vm243_vm1, %v9345_v8  ;;  %v9785_v9 = vpack.c.bf16 %v9752_v32, %v9751_v53  ;;  %v9755_v53 = vld [vmem:[%s13586_s22 + $0xd2] sm:$0xff]  ;;  %v9756_v32 = vld [vmem:[%s13586_s22 + $0xda] sm:$0xff] }
 0x369   : > { %v6944_v44 = vpop.f32.mrf.mxu1 }
 0x36a   : > { %v16091_v5 = vadd.f32 %v13109_v39, %v7061_v40  ;;  %v7059_v20 = vadd.f32 %v6944_v44, %v15876_v6  ;;  %v13110_v54 = vpop.f32.mrf.mxu0 }
 0x36b   : > { %v13068_v58 = vpop.f32.mrf.mxu1 }
 0x36c   : > { %v16094_v47 = vadd.f32 %v7382_v24, %v7059_v20  ;;  %v7062_v15 = vadd.f32 %v13068_v58, %v15879_v22  ;;  %v7385_v8 = vpop.f32.mrf.mxu0  ;;  %v9315_v22 = vld [vmem:[%s13586_s22 + $0xc1] sm:$0xff]  ;;  %v9786_v58 = vpack.c.bf16 %v9754_v31, %v9753_v3  ;;  %v9758_v31 = vld [vmem:[%s13586_s22 + $0xea] sm:$0xff] }
 0x36d   : > { %v6947_v56 = vpop.f32.mrf.mxu1  ;;  %v9757_v3 = vld [vmem:[%s13586_s22 + $0xe2] sm:$0xff] }
 0x36e   : > { %v16097_v39 = vadd.f32 %v13110_v54, %v7062_v15  ;;  %v7060_v6 = vadd.f32 %v6947_v56, %v15887_v28  ;;  %v13113_v11 = vpop.f32.mrf.mxu0  ;;  %13340 = vmatmul.mubr.msk.bf16.gmra.mxu0 %vm243_vm1, %v9784_v30  ;;  %v9316_v28 = vld [vmem:[%s13586_s22 + $0xc9] sm:$0xff]  ;;  %v9349_v56 = vpack.c.bf16 %v9318_v10, %v9317_v49  ;;  %v9321_v49 = vld [vmem:[%s13586_s22 + $0xf1] sm:$0xff]  ;;  %v9322_v10 = vld [vmem:[%s13586_s22 + $0xf9] sm:$0xff] }
 0x36f   : > { %v13071_v35 = vpop.f32.mrf.mxu1  ;;  %13298 = vmatmul.mubr.msk.bf16.gmra.mxu1 %vm243_vm1, %v9346_v12  ;;  %13343 = vmatprep.mubr.msk.bf16.mxu0 %vm243_vm1, %v9785_v9  ;;  %v9348_v9 = vpack.c.bf16 %v9316_v28, %v9315_v22 }
 0x370   : > { %v16106_v40 = vadd.f32 %v7385_v8, %v7060_v6  ;;  %v7065_v24 = vadd.f32 %v13071_v35, %v15893_v61  ;;  %v7398_v41 = vpop.f32.mrf.mxu0  ;;  %13301 = vmatprep.mubr.msk.bf16.mxu1 %vm243_vm1, %v9347_v62  ;;  %v9787_v61 = vpack.c.bf16 %v9756_v32, %v9755_v53  ;;  %v9759_v53 = vld [vmem:[%s13586_s22 + $0xf2] sm:$0xff]  ;;  %v9760_v32 = vld [vmem:[%s13586_s22 + $0xfa] sm:$0xff] }
 0x371   : > { %v6960_v44 = vpop.f32.mrf.mxu1 }
 0x372   : > { %v16115_v20 = vadd.f32 %v13113_v11, %v7065_v24  ;;  %v7063_v54 = vadd.f32 %v6960_v44, %v15896_v4  ;;  %v13114_v30 = vpop.f32.mrf.mxu0 }
 0x373   : > { %v13072_v12 = vpop.f32.mrf.mxu1 }
 0x374   : > { %v16118_v15 = vadd.f32 %v7398_v41, %v7063_v54  ;;  %v7066_v8 = vadd.f32 %v13072_v12, %v15899_v59  ;;  %v7401_v62 = vpop.f32.mrf.mxu0  ;;  %v9319_v59 = vld [vmem:[%s13586_s22 + $0xe1] sm:$0xff]  ;;  %v9788_v12 = vpack.c.bf16 %v9758_v31, %v9757_v3  ;;  %v9762_v31 = vld [vmem:[%s13586_s22 + $0x10a] sm:$0xff] }
 0x375   : > { %v6963_v6 = vpop.f32.mrf.mxu1  ;;  %v9761_v3 = vld [vmem:[%s13586_s22 + $0x102] sm:$0xff] }
 0x376   : > { %v16121_v11 = vadd.f32 %v13114_v30, %v7066_v8  ;;  %v7064_v4 = vadd.f32 %v6963_v6, %v15907_v37  ;;  %v13117_v35 = vpop.f32.mrf.mxu0  ;;  %13344 = vmatmul.mubr.msk.bf16.gmra.mxu0 %vm243_vm1, %v9786_v58  ;;  %v9320_v37 = vld [vmem:[%s13586_s22 + $0xe9] sm:$0xff]  ;;  %v9351_v6 = vpack.c.bf16 %v9322_v10, %v9321_v49  ;;  %v9325_v49 = vld [vmem:[%s13586_s22 + $0x111] sm:$0xff]  ;;  %v9326_v10 = vld [vmem:[%s13586_s22 + $0x119] sm:$0xff] }
 0x377   : > { %v13075_v22 = vpop.f32.mrf.mxu1  ;;  %13302 = vmatmul.mubr.msk.bf16.gmra.mxu1 %vm243_vm1, %v9348_v9  ;;  %13347 = vmatprep.mubr.msk.bf16.mxu0 %vm243_vm1, %v9787_v61  ;;  %v9350_v61 = vpack.c.bf16 %v9320_v37, %v9319_v59 }
 0x378   : > { %v16130_v24 = vadd.f32 %v7401_v62, %v7064_v4  ;;  %v7069_v41 = vadd.f32 %v13075_v22, %v15913_v13  ;;  %v7414_v28 = vpop.f32.mrf.mxu0  ;;  %13305 = vmatprep.mubr.msk.bf16.mxu1 %vm243_vm1, %v9349_v56  ;;  %v9789_v13 = vpack.c.bf16 %v9760_v32, %v9759_v53  ;;  %v9763_v53 = vld [vmem:[%s13586_s22 + $0x112] sm:$0xff]  ;;  %v9764_v32 = vld [vmem:[%s13586_s22 + $0x11a] sm:$0xff] }
 0x379   : > { %v6976_v44 = vpop.f32.mrf.mxu1 }
 0x37a   : > { %v16139_v54 = vadd.f32 %v13117_v35, %v7069_v41  ;;  %v7067_v30 = vadd.f32 %v6976_v44, %v15916_v52  ;;  %v13118_v58 = vpop.f32.mrf.mxu0 }
 0x37b   : > { %v13076_v9 = vpop.f32.mrf.mxu1 }
 0x37c   : > { %v16142_v8 = vadd.f32 %v7414_v28, %v7067_v30  ;;  %v7070_v62 = vadd.f32 %v13076_v9, %v15919_v46  ;;  %v7417_v56 = vpop.f32.mrf.mxu0  ;;  %v9323_v46 = vld [vmem:[%s13586_s22 + $0x101] sm:$0xff]  ;;  %v9790_v9 = vpack.c.bf16 %v9762_v31, %v9761_v3  ;;  %v9766_v31 = vld [vmem:[%s13586_s22 + $0x12a] sm:$0xff] }
 0x37d   : > { %v6979_v4 = vpop.f32.mrf.mxu1  ;;  %v9765_v3 = vld [vmem:[%s13586_s22 + $0x122] sm:$0xff] }
 0x37e   : > { %v16145_v35 = vadd.f32 %v13118_v58, %v7070_v62  ;;  %v7068_v52 = vadd.f32 %v6979_v4, %v15927_v55  ;;  %v13165_v22 = vpop.f32.mrf.mxu0  ;;  %13348 = vmatmul.mubr.msk.bf16.gmra.mxu0 %vm243_vm1, %v9788_v12  ;;  %v9324_v55 = vld [vmem:[%s13586_s22 + $0x109] sm:$0xff]  ;;  %v9353_v4 = vpack.c.bf16 %v9326_v10, %v9325_v49  ;;  %v9329_v49 = vld [vmem:[%s13586_s22 + $0x131] sm:$0xff]  ;;  %v9330_v10 = vld [vmem:[%s13586_s22 + $0x139] sm:$0xff] }
 0x37f   : > { %v13123_v59 = vpop.f32.mrf.mxu1  ;;  %13306 = vmatmul.mubr.msk.bf16.gmra.mxu1 %vm243_vm1, %v9350_v61  ;;  %13351 = vmatprep.mubr.msk.bf16.mxu0 %vm243_vm1, %v9789_v13  ;;  %v9352_v13 = vpack.c.bf16 %v9324_v55, %v9323_v46 }
 0x380   : > { %v16154_v41 = vadd.f32 %v7417_v56, %v7068_v52  ;;  %v7909_v28 = vadd.f32 %v13123_v59, %v15933_v16  ;;  %v8146_v37 = vpop.f32.mrf.mxu0  ;;  %13309 = vmatprep.mubr.msk.bf16.mxu1 %vm243_vm1, %v9351_v6  ;;  %v9791_v16 = vpack.c.bf16 %v9764_v32, %v9763_v53  ;;  %v9767_v53 = vld [vmem:[%s13586_s22 + $0x132] sm:$0xff]  ;;  %v9768_v32 = vld [vmem:[%s13586_s22 + $0x13a] sm:$0xff] }
 0x381   : > { %v7708_v44 = vpop.f32.mrf.mxu1 }
 0x382   : > { %v16163_v30 = vadd.f32 %v13165_v22, %v7909_v28  ;;  %v7907_v58 = vadd.f32 %v7708_v44, %v15936_v60  ;;  %v13166_v12 = vpop.f32.mrf.mxu0 }
 0x383   : > { %v13124_v61 = vpop.f32.mrf.mxu1 }
 0x384   : > { %v16166_v62 = vadd.f32 %v8146_v37, %v7907_v58  ;;  %v7910_v56 = vadd.f32 %v13124_v61, %v15939_v17  ;;  %v8149_v6 = vpop.f32.mrf.mxu0  ;;  %v9327_v17 = vld [vmem:[%s13586_s22 + $0x121] sm:$0xff]  ;;  %v9792_v61 = vpack.c.bf16 %v9766_v31, %v9765_v3  ;;  %v9770_v31 = vld [vmem:[%s13586_s22 + $0x14a] sm:$0xff] }
 0x385   : > { %v7711_v52 = vpop.f32.mrf.mxu1  ;;  %v9769_v3 = vld [vmem:[%s13586_s22 + $0x142] sm:$0xff] }
 0x386   : > { %v16169_v22 = vadd.f32 %v13166_v12, %v7910_v56  ;;  %v7908_v60 = vadd.f32 %v7711_v52, %v15947_v0  ;;  %v13169_v59 = vpop.f32.mrf.mxu0  ;;  %13352 = vmatmul.mubr.msk.bf16.gmra.mxu0 %vm243_vm1, %v9790_v9  ;;  %v9328_v0 = vld [vmem:[%s13586_s22 + $0x129] sm:$0xff]  ;;  %v9355_v52 = vpack.c.bf16 %v9330_v10, %v9329_v49  ;;  %v9333_v49 = vld [vmem:[%s13586_s22 + $0x151] sm:$0xff]  ;;  %v9334_v10 = vld [vmem:[%s13586_s22 + $0x159] sm:$0xff] }
 0x387   : > { %v13127_v46 = vpop.f32.mrf.mxu1  ;;  %13310 = vmatmul.mubr.msk.bf16.gmra.mxu1 %vm243_vm1, %v9352_v13  ;;  %13355 = vmatprep.mubr.msk.bf16.mxu0 %vm243_vm1, %v9791_v16  ;;  %v9354_v16 = vpack.c.bf16 %v9328_v0, %v9327_v17 }
 0x388   : > { %v16178_v28 = vadd.f32 %v8149_v6, %v7908_v60  ;;  %v7913_v37 = vadd.f32 %v13127_v46, %v15953_v45  ;;  %v8162_v55 = vpop.f32.mrf.mxu0  ;;  %13313 = vmatprep.mubr.msk.bf16.mxu1 %vm243_vm1, %v9353_v4  ;;  %v9793_v45 = vpack.c.bf16 %v9768_v32, %v9767_v53  ;;  %v9771_v53 = vld [vmem:[%s13586_s22 + $0x152] sm:$0xff]  ;;  %v9772_v32 = vld [vmem:[%s13586_s22 + $0x15a] sm:$0xff] }
 0x389   : > { %v7724_v44 = vpop.f32.mrf.mxu1 }
 0x38a   : > { %v16187_v58 = vadd.f32 %v13169_v59, %v7913_v37  ;;  %v7911_v12 = vadd.f32 %v7724_v44, %v15956_v33  ;;  %v13170_v9 = vpop.f32.mrf.mxu0 }
 0x38b   : > { %v13128_v13 = vpop.f32.mrf.mxu1 }
 0x38c   : > { %v16190_v56 = vadd.f32 %v8162_v55, %v7911_v12  ;;  %v7914_v6 = vadd.f32 %v13128_v13, %v15959_v23  ;;  %v8165_v4 = vpop.f32.mrf.mxu0  ;;  %v9331_v23 = vld [vmem:[%s13586_s22 + $0x141] sm:$0xff]  ;;  %v9794_v13 = vpack.c.bf16 %v9770_v31, %v9769_v3  ;;  %v9774_v31 = vld [vmem:[%s13586_s22 + $0x16a] sm:$0xff] }
 0x38d   : > { %v7727_v60 = vpop.f32.mrf.mxu1  ;;  %v9773_v3 = vld [vmem:[%s13586_s22 + $0x162] sm:$0xff] }
 0x38e   : > { %v16193_v59 = vadd.f32 %v13170_v9, %v7914_v6  ;;  %v7912_v33 = vadd.f32 %v7727_v60, %v15967_v36  ;;  %v13173_v46 = vpop.f32.mrf.mxu0  ;;  %13356 = vmatmul.mubr.msk.bf16.gmra.mxu0 %vm243_vm1, %v9792_v61  ;;  %v9332_v36 = vld [vmem:[%s13586_s22 + $0x149] sm:$0xff]  ;;  %v9357_v60 = vpack.c.bf16 %v9334_v10, %v9333_v49  ;;  %v9337_v49 = vld [vmem:[%s13586_s22 + $0x171] sm:$0xff]  ;;  %v9338_v10 = vld [vmem:[%s13586_s22 + $0x179] sm:$0xff] }
 0x38f   : > { %v13131_v17 = vpop.f32.mrf.mxu1  ;;  %13314 = vmatmul.mubr.msk.bf16.gmra.mxu1 %vm243_vm1, %v9354_v16  ;;  %13359 = vmatprep.mubr.msk.bf16.mxu0 %vm243_vm1, %v9793_v45  ;;  %v9356_v45 = vpack.c.bf16 %v9332_v36, %v9331_v23 }
 0x390   : > { %v16202_v37 = vadd.f32 %v8165_v4, %v7912_v33  ;;  %v7917_v55 = vadd.f32 %v13131_v17, %v15973_v48  ;;  %v8178_v0 = vpop.f32.mrf.mxu0  ;;  %13317 = vmatprep.mubr.msk.bf16.mxu1 %vm243_vm1, %v9355_v52  ;;  %v9795_v48 = vpack.c.bf16 %v9772_v32, %v9771_v53  ;;  %v9775_v53 = vld [vmem:[%s13586_s22 + $0x172] sm:$0xff]  ;;  %v9776_v32 = vld [vmem:[%s13586_s22 + $0x17a] sm:$0xff] }
 0x391   : > { %v7740_v44 = vpop.f32.mrf.mxu1 }
 0x392   : > { %v16211_v12 = vadd.f32 %v13173_v46, %v7917_v55  ;;  %v7915_v9 = vadd.f32 %v7740_v44, %v15976_v63  ;;  %v13174_v61 = vpop.f32.mrf.mxu0 }
 0x393   : > { %v13132_v16 = vpop.f32.mrf.mxu1 }
 0x394   : > { %v16214_v6 = vadd.f32 %v8178_v0, %v7915_v9  ;;  %v7918_v4 = vadd.f32 %v13132_v16, %v15979_v19  ;;  %v8181_v52 = vpop.f32.mrf.mxu0  ;;  %v9335_v19 = vld [vmem:[%s13586_s22 + $0x161] sm:$0xff]  ;;  %v9796_v16 = vpack.c.bf16 %v9774_v31, %v9773_v3  ;;  %v9778_v31 = vld [vmem:[%s13586_s22 + $0x18a] sm:$0xff] }
 0x395   : > { %v7743_v33 = vpop.f32.mrf.mxu1  ;;  %v9777_v3 = vld [vmem:[%s13586_s22 + $0x182] sm:$0xff] }
 0x396   : > { %v16217_v46 = vadd.f32 %v13174_v61, %v7918_v4  ;;  %v7916_v63 = vadd.f32 %v7743_v33, %v15987_v38  ;;  %v13177_v17 = vpop.f32.mrf.mxu0  ;;  %13360 = vmatmul.mubr.msk.bf16.gmra.mxu0 %vm243_vm1, %v9794_v13  ;;  %v9336_v38 = vld [vmem:[%s13586_s22 + $0x169] sm:$0xff]  ;;  %v9359_v33 = vpack.c.bf16 %v9338_v10, %v9337_v49  ;;  %v10177_v49 = vld [vmem:[%s13586_s22 + $0x53] sm:$0xff]  ;;  %v10178_v10 = vld [vmem:[%s13586_s22 + $0x5b] sm:$0xff] }
 0x397   : > { %v13135_v23 = vpop.f32.mrf.mxu1  ;;  %13318 = vmatmul.mubr.msk.bf16.gmra.mxu1 %vm243_vm1, %v9356_v45  ;;  %13363 = vmatprep.mubr.msk.bf16.mxu0 %vm243_vm1, %v9795_v48  ;;  %v9358_v48 = vpack.c.bf16 %v9336_v38, %v9335_v19 }
 0x398   : > { %v16226_v55 = vadd.f32 %v8181_v52, %v7916_v63  ;;  %v7921_v0 = vadd.f32 %v13135_v23, %v15993_v50  ;;  %v8194_v36 = vpop.f32.mrf.mxu0  ;;  %13321 = vmatprep.mubr.msk.bf16.mxu1 %vm243_vm1, %v9357_v60  ;;  %v9797_v50 = vpack.c.bf16 %v9776_v32, %v9775_v53  ;;  %v10615_v53 = vld [vmem:[%s13586_s22 + $0x54] sm:$0xff]  ;;  %v10616_v32 = vld [vmem:[%s13586_s22 + $0x5c] sm:$0xff] }
 0x399   : > { %v7756_v44 = vpop.f32.mrf.mxu1 }
 0x39a   : > { %v16235_v9 = vadd.f32 %v13177_v17, %v7921_v0  ;;  %v7919_v61 = vadd.f32 %v7756_v44, %v15996_v14  ;;  %v13178_v13 = vpop.f32.mrf.mxu0 }
 0x39b   : > { %v13136_v45 = vpop.f32.mrf.mxu1 }
 0x39c   : > { %v16238_v4 = vadd.f32 %v8194_v36, %v7919_v61  ;;  %v7922_v52 = vadd.f32 %v13136_v45, %v15999_v18  ;;  %v8197_v60 = vpop.f32.mrf.mxu0  ;;  %v9339_v18 = vld [vmem:[%s13586_s22 + $0x181] sm:$0xff]  ;;  %v9798_v45 = vpack.c.bf16 %v9778_v31, %v9777_v3  ;;  %v10618_v31 = vld [vmem:[%s13586_s22 + $0x6c] sm:$0xff] }
 0x39d   : > { %v7759_v63 = vpop.f32.mrf.mxu1  ;;  %v10617_v3 = vld [vmem:[%s13586_s22 + $0x64] sm:$0xff] }
 0x39e   : > { %v16241_v17 = vadd.f32 %v13178_v13, %v7922_v52  ;;  %v7920_v14 = vadd.f32 %v7759_v63, %v16007_v1  ;;  %v13181_v23 = vpop.f32.mrf.mxu0  ;;  %13364 = vmatmul.mubr.msk.bf16.gmra.mxu0 %vm243_vm1, %v9796_v16  ;;  %v9340_v1 = vld [vmem:[%s13586_s22 + $0x189] sm:$0xff]  ;;  %v10217_v63 = vpack.c.bf16 %v10178_v10, %v10177_v49  ;;  %v10181_v49 = vld [vmem:[%s13586_s22 + $0x73] sm:$0xff]  ;;  %v10182_v10 = vld [vmem:[%s13586_s22 + $0x7b] sm:$0xff] }
 0x39f   : > { %v13139_v19 = vpop.f32.mrf.mxu1  ;;  %13322 = vmatmul.mubr.msk.bf16.gmra.mxu1 %vm243_vm1, %v9358_v48  ;;  %13367 = vmatprep.mubr.msk.bf16.mxu0 %vm243_vm1, %v9797_v50  ;;  %v9360_v50 = vpack.c.bf16 %v9340_v1, %v9339_v18 }
 0x3a0   : > { %v16250_v0 = vadd.f32 %v8197_v60, %v7920_v14  ;;  %v7925_v36 = vadd.f32 %v13139_v19, %v16015_v42  ;;  %v8210_v38 = vpop.f32.mrf.mxu0  ;;  %13325 = vmatprep.mubr.msk.bf16.mxu1 %vm243_vm1, %v9359_v33  ;;  %v10655_v42 = vpack.c.bf16 %v10616_v32, %v10615_v53  ;;  %v10619_v53 = vld [vmem:[%s13586_s22 + $0x74] sm:$0xff]  ;;  %v10620_v32 = vld [vmem:[%s13586_s22 + $0x7c] sm:$0xff] }
 0x3a1   : > { %v7772_v44 = vpop.f32.mrf.mxu1 }
 0x3a2   : > { %v16259_v61 = vadd.f32 %v13181_v23, %v7925_v36  ;;  %v7923_v13 = vadd.f32 %v7772_v44, %v16018_v7  ;;  %v13182_v16 = vpop.f32.mrf.mxu0 }
 0x3a3   : > { %v13140_v48 = vpop.f32.mrf.mxu1 }
 0x3a4   : > { %v16262_v52 = vadd.f32 %v8210_v38, %v7923_v13  ;;  %v7926_v60 = vadd.f32 %v13140_v48, %v16021_v57  ;;  %v8213_v33 = vpop.f32.mrf.mxu0  ;;  %v10179_v57 = vld [vmem:[%s13586_s22 + $0x63] sm:$0xff]  ;;  %v10656_v48 = vpack.c.bf16 %v10618_v31, %v10617_v3  ;;  %v10622_v31 = vld [vmem:[%s13586_s22 + $0x8c] sm:$0xff] }
 0x3a5   : > { %v7775_v14 = vpop.f32.mrf.mxu1  ;;  %v10621_v3 = vld [vmem:[%s13586_s22 + $0x84] sm:$0xff] }
 0x3a6   : > { %v16265_v23 = vadd.f32 %v13182_v16, %v7926_v60  ;;  %v7924_v7 = vadd.f32 %v7775_v14, %v16029_v43  ;;  %v13185_v19 = vpop.f32.mrf.mxu0  ;;  %13368 = vmatmul.mubr.msk.bf16.gmra.mxu0 %vm243_vm1, %v9798_v45  ;;  %v10180_v43 = vld [vmem:[%s13586_s22 + $0x6b] sm:$0xff]  ;;  %v10219_v14 = vpack.c.bf16 %v10182_v10, %v10181_v49  ;;  %v10185_v49 = vld [vmem:[%s13586_s22 + $0x93] sm:$0xff]  ;;  %v10186_v10 = vld [vmem:[%s13586_s22 + $0x9b] sm:$0xff] }
 0x3a7   : > { %v13143_v18 = vpop.f32.mrf.mxu1  ;;  %13326 = vmatmul.mubr.msk.bf16.gmra.mxu1 %vm243_vm1, %v9360_v50  ;;  %13415 = vmatprep.mubr.msk.bf16.mxu0 %vm243_vm1, %v10655_v42  ;;  %v10218_v42 = vpack.c.bf16 %v10180_v43, %v10179_v57 }
 0x3a8   : > { %v16274_v36 = vadd.f32 %v8213_v33, %v7924_v7  ;;  %v7929_v38 = vadd.f32 %v13143_v18, %v16037_v27  ;;  %v8226_v1 = vpop.f32.mrf.mxu0  ;;  %13373 = vmatprep.mubr.msk.bf16.mxu1 %vm243_vm1, %v10217_v63  ;;  %v10657_v27 = vpack.c.bf16 %v10620_v32, %v10619_v53  ;;  %v10623_v53 = vld [vmem:[%s13586_s22 + $0x94] sm:$0xff]  ;;  %v10624_v32 = vld [vmem:[%s13586_s22 + $0x9c] sm:$0xff] }
 0x3a9   : > { %v7788_v44 = vpop.f32.mrf.mxu1 }
 0x3aa   : > { %v16283_v13 = vadd.f32 %v13185_v19, %v7929_v38  ;;  %v7927_v16 = vadd.f32 %v7788_v44, %v16042_v21  ;;  %v13186_v45 = vpop.f32.mrf.mxu0 }
 0x3ab   : > { %v13144_v50 = vpop.f32.mrf.mxu1 }
 0x3ac   : > { %v16286_v60 = vadd.f32 %v8226_v1, %v7927_v16  ;;  %v7930_v33 = vadd.f32 %v13144_v50, %v16049_v51  ;;  %v8229_v63 = vpop.f32.mrf.mxu0  ;;  %v10183_v51 = vld [vmem:[%s13586_s22 + $0x83] sm:$0xff]  ;;  %v10658_v50 = vpack.c.bf16 %v10622_v31, %v10621_v3  ;;  %v10626_v31 = vld [vmem:[%s13586_s22 + $0xac] sm:$0xff] }
 0x3ad   : > { %v7791_v7 = vpop.f32.mrf.mxu1  ;;  %v10625_v3 = vld [vmem:[%s13586_s22 + $0xa4] sm:$0xff] }
 0x3ae   : > { %v16289_v19 = vadd.f32 %v13186_v45, %v7930_v33  ;;  %v7928_v21 = vadd.f32 %v7791_v7, %v16057_v2  ;;  %v13189_v18 = vpop.f32.mrf.mxu0  ;;  %13416 = vmatmul.mubr.msk.bf16.vlgmr.msra.gmra.mxu0 %vm243_vm1, %v10656_v48  ;;  %v10184_v2 = vld [vmem:[%s13586_s22 + $0x8b] sm:$0xff]  ;;  %v10221_v7 = vpack.c.bf16 %v10186_v10, %v10185_v49  ;;  %v10189_v49 = vld [vmem:[%s13586_s22 + $0xb3] sm:$0xff]  ;;  %v10190_v10 = vld [vmem:[%s13586_s22 + $0xbb] sm:$0xff] }
 0x3af   : > { %v13147_v57 = vpop.f32.mrf.mxu1  ;;  %13374 = vmatmul.mubr.msk.bf16.vlgmr.msra.gmra.mxu1 %vm243_vm1, %v10218_v42  ;;  %13419 = vmatprep.mubr.msk.bf16.mxu0 %vm243_vm1, %v10657_v27  ;;  %v10220_v27 = vpack.c.bf16 %v10184_v2, %v10183_v51 }
 0x3b0   : > { %v16298_v38 = vadd.f32 %v8229_v63, %v7928_v21  ;;  %v7933_v1 = vadd.f32 %v13147_v57, %v16067_v26  ;;  %v8242_v43 = vpop.f32.mrf.mxu0  ;;  %13377 = vmatprep.mubr.msk.bf16.mxu1 %vm243_vm1, %v10219_v14  ;;  %v10659_v26 = vpack.c.bf16 %v10624_v32, %v10623_v53  ;;  %v10627_v53 = vld [vmem:[%s13586_s22 + $0xb4] sm:$0xff]  ;;  %v10628_v32 = vld [vmem:[%s13586_s22 + $0xbc] sm:$0xff] }
 0x3b1   : > { %v7804_v44 = vpop.f32.mrf.mxu1 }
 0x3b2   : > { %v16307_v16 = vadd.f32 %v13189_v18, %v7933_v1  ;;  %v7931_v45 = vadd.f32 %v7804_v44, %v16070_v34  ;;  %v13190_v48 = vpop.f32.mrf.mxu0 }
 0x3b3   : > { %v13148_v42 = vpop.f32.mrf.mxu1 }
 0x3b4   : > { %v16310_v33 = vadd.f32 %v8242_v43, %v7931_v45  ;;  %v7934_v63 = vadd.f32 %v13148_v42, %v16073_v29  ;;  %v8245_v14 = vpop.f32.mrf.mxu0  ;;  %v10187_v29 = vld [vmem:[%s13586_s22 + $0xa3] sm:$0xff]  ;;  %v10660_v42 = vpack.c.bf16 %v10626_v31, %v10625_v3  ;;  %v10630_v31 = vld [vmem:[%s13586_s22 + $0xcc] sm:$0xff] }
 0x3b5   : > { %v7807_v21 = vpop.f32.mrf.mxu1  ;;  %v10629_v3 = vld [vmem:[%s13586_s22 + $0xc4] sm:$0xff] }
 0x3b6   : > { %v16313_v18 = vadd.f32 %v13190_v48, %v7934_v63  ;;  %v7932_v34 = vadd.f32 %v7807_v21, %v16082_v25  ;;  %v13193_v57 = vpop.f32.mrf.mxu0  ;;  %13420 = vmatmul.mubr.msk.bf16.gmra.mxu0 %vm243_vm1, %v10658_v50  ;;  %v10188_v25 = vld [vmem:[%s13586_s22 + $0xab] sm:$0xff]  ;;  %v10223_v21 = vpack.c.bf16 %v10190_v10, %v10189_v49  ;;  %v10193_v49 = vld [vmem:[%s13586_s22 + $0xd3] sm:$0xff]  ;;  %v10194_v10 = vld [vmem:[%s13586_s22 + $0xdb] sm:$0xff] }
 0x3b7   : > { %v13151_v51 = vpop.f32.mrf.mxu1  ;;  %13378 = vmatmul.mubr.msk.bf16.gmra.mxu1 %vm243_vm1, %v10220_v27  ;;  %13423 = vmatprep.mubr.msk.bf16.mxu0 %vm243_vm1, %v10659_v26  ;;  %v10222_v26 = vpack.c.bf16 %v10188_v25, %v10187_v29 }
 0x3b8   : > { %v16322_v1 = vadd.f32 %v8245_v14, %v7932_v34  ;;  %v7937_v43 = vadd.f32 %v13151_v51, %v16091_v5  ;;  %v8258_v2 = vpop.f32.mrf.mxu0  ;;  %13381 = vmatprep.mubr.msk.bf16.mxu1 %vm243_vm1, %v10221_v7  ;;  %v10661_v5 = vpack.c.bf16 %v10628_v32, %v10627_v53  ;;  %v10631_v53 = vld [vmem:[%s13586_s22 + $0xd4] sm:$0xff]  ;;  %v10632_v32 = vld [vmem:[%s13586_s22 + $0xdc] sm:$0xff] }
 0x3b9   : > { %v7820_v44 = vpop.f32.mrf.mxu1 }
 0x3ba   : > { %v16331_v45 = vadd.f32 %v13193_v57, %v7937_v43  ;;  %v7935_v48 = vadd.f32 %v7820_v44, %v16094_v47  ;;  %v13194_v50 = vpop.f32.mrf.mxu0 }
 0x3bb   : > { %v13152_v27 = vpop.f32.mrf.mxu1 }
 0x3bc   : > { %v16334_v63 = vadd.f32 %v8258_v2, %v7935_v48  ;;  %v7938_v14 = vadd.f32 %v13152_v27, %v16097_v39  ;;  %v8261_v7 = vpop.f32.mrf.mxu0  ;;  %v10191_v39 = vld [vmem:[%s13586_s22 + $0xc3] sm:$0xff]  ;;  %v10662_v27 = vpack.c.bf16 %v10630_v31, %v10629_v3  ;;  %v10634_v31 = vld [vmem:[%s13586_s22 + $0xec] sm:$0xff] }
 0x3bd   : > { %v7823_v34 = vpop.f32.mrf.mxu1  ;;  %v10633_v3 = vld [vmem:[%s13586_s22 + $0xe4] sm:$0xff] }
 0x3be   : > { %v16337_v57 = vadd.f32 %v13194_v50, %v7938_v14  ;;  %v7936_v47 = vadd.f32 %v7823_v34, %v16106_v40  ;;  %v13197_v51 = vpop.f32.mrf.mxu0  ;;  %13424 = vmatmul.mubr.msk.bf16.gmra.mxu0 %vm243_vm1, %v10660_v42  ;;  %v10192_v40 = vld [vmem:[%s13586_s22 + $0xcb] sm:$0xff]  ;;  %v10225_v34 = vpack.c.bf16 %v10194_v10, %v10193_v49  ;;  %v10197_v49 = vld [vmem:[%s13586_s22 + $0xf3] sm:$0xff]  ;;  %v10198_v10 = vld [vmem:[%s13586_s22 + $0xfb] sm:$0xff] }
 0x3bf   : > { %v13155_v29 = vpop.f32.mrf.mxu1  ;;  %13382 = vmatmul.mubr.msk.bf16.gmra.mxu1 %vm243_vm1, %v10222_v26  ;;  %13427 = vmatprep.mubr.msk.bf16.mxu0 %vm243_vm1, %v10661_v5  ;;  %v10224_v5 = vpack.c.bf16 %v10192_v40, %v10191_v39 }
 0x3c0   : > { %v16346_v43 = vadd.f32 %v8261_v7, %v7936_v47  ;;  %v7941_v2 = vadd.f32 %v13155_v29, %v16115_v20  ;;  %v8274_v25 = vpop.f32.mrf.mxu0  ;;  %13385 = vmatprep.mubr.msk.bf16.mxu1 %vm243_vm1, %v10223_v21  ;;  %v10663_v20 = vpack.c.bf16 %v10632_v32, %v10631_v53  ;;  %v10635_v53 = vld [vmem:[%s13586_s22 + $0xf4] sm:$0xff]  ;;  %v10636_v32 = vld [vmem:[%s13586_s22 + $0xfc] sm:$0xff] }
 0x3c1   : > { %v7836_v44 = vpop.f32.mrf.mxu1 }
 0x3c2   : > { %v16355_v48 = vadd.f32 %v13197_v51, %v7941_v2  ;;  %v7939_v50 = vadd.f32 %v7836_v44, %v16118_v15  ;;  %v13198_v42 = vpop.f32.mrf.mxu0 }
 0x3c3   : > { %v13156_v26 = vpop.f32.mrf.mxu1 }
 0x3c4   : > { %v16358_v14 = vadd.f32 %v8274_v25, %v7939_v50  ;;  %v7942_v7 = vadd.f32 %v13156_v26, %v16121_v11  ;;  %v8277_v21 = vpop.f32.mrf.mxu0  ;;  %v10195_v11 = vld [vmem:[%s13586_s22 + $0xe3] sm:$0xff]  ;;  %v10664_v26 = vpack.c.bf16 %v10634_v31, %v10633_v3  ;;  %v10638_v31 = vld [vmem:[%s13586_s22 + $0x10c] sm:$0xff] }
 0x3c5   : > { %v7839_v47 = vpop.f32.mrf.mxu1  ;;  %v10637_v3 = vld [vmem:[%s13586_s22 + $0x104] sm:$0xff] }
 0x3c6   : > { %v16361_v51 = vadd.f32 %v13198_v42, %v7942_v7  ;;  %v7940_v15 = vadd.f32 %v7839_v47, %v16130_v24  ;;  %v13201_v29 = vpop.f32.mrf.mxu0  ;;  %13428 = vmatmul.mubr.msk.bf16.gmra.mxu0 %vm243_vm1, %v10662_v27  ;;  %v10196_v24 = vld [vmem:[%s13586_s22 + $0xeb] sm:$0xff]  ;;  %v10227_v47 = vpack.c.bf16 %v10198_v10, %v10197_v49  ;;  %v10201_v49 = vld [vmem:[%s13586_s22 + $0x113] sm:$0xff]  ;;  %v10202_v10 = vld [vmem:[%s13586_s22 + $0x11b] sm:$0xff] }
 0x3c7   : > { %v13159_v39 = vpop.f32.mrf.mxu1  ;;  %13386 = vmatmul.mubr.msk.bf16.gmra.mxu1 %vm243_vm1, %v10224_v5  ;;  %13431 = vmatprep.mubr.msk.bf16.mxu0 %vm243_vm1, %v10663_v20  ;;  %v10226_v20 = vpack.c.bf16 %v10196_v24, %v10195_v11 }
 0x3c8   : > { %v16370_v2 = vadd.f32 %v8277_v21, %v7940_v15  ;;  %v7945_v25 = vadd.f32 %v13159_v39, %v16139_v54  ;;  %v8290_v40 = vpop.f32.mrf.mxu0  ;;  %13389 = vmatprep.mubr.msk.bf16.mxu1 %vm243_vm1, %v10225_v34  ;;  %v10665_v54 = vpack.c.bf16 %v10636_v32, %v10635_v53  ;;  %v10639_v53 = vld [vmem:[%s13586_s22 + $0x114] sm:$0xff]  ;;  %v10640_v32 = vld [vmem:[%s13586_s22 + $0x11c] sm:$0xff] }
 0x3c9   : > { %v7852_v44 = vpop.f32.mrf.mxu1 }
 0x3ca   : > { %v16379_v50 = vadd.f32 %v13201_v29, %v7945_v25  ;;  %v7943_v42 = vadd.f32 %v7852_v44, %v16142_v8  ;;  %v13202_v27 = vpop.f32.mrf.mxu0 }
 0x3cb   : > { %v13160_v5 = vpop.f32.mrf.mxu1 }
 0x3cc   : > { %v16382_v7 = vadd.f32 %v8290_v40, %v7943_v42  ;;  %v7946_v21 = vadd.f32 %v13160_v5, %v16145_v35  ;;  %v8293_v34 = vpop.f32.mrf.mxu0  ;;  %v10199_v35 = vld [vmem:[%s13586_s22 + $0x103] sm:$0xff]  ;;  %v10666_v5 = vpack.c.bf16 %v10638_v31, %v10637_v3  ;;  %v10642_v31 = vld [vmem:[%s13586_s22 + $0x12c] sm:$0xff] }
 0x3cd   : > { %v7855_v15 = vpop.f32.mrf.mxu1  ;;  %v10641_v3 = vld [vmem:[%s13586_s22 + $0x124] sm:$0xff] }
 0x3ce   : > { %v16385_v29 = vadd.f32 %v13202_v27, %v7946_v21  ;;  %v7944_v8 = vadd.f32 %v7855_v15, %v16154_v41  ;;  %v13249_v39 = vpop.f32.mrf.mxu0  ;;  %13432 = vmatmul.mubr.msk.bf16.gmra.mxu0 %vm243_vm1, %v10664_v26  ;;  %v10200_v41 = vld [vmem:[%s13586_s22 + $0x10b] sm:$0xff]  ;;  %v10229_v15 = vpack.c.bf16 %v10202_v10, %v10201_v49  ;;  %v10205_v49 = vld [vmem:[%s13586_s22 + $0x133] sm:$0xff]  ;;  %v10206_v10 = vld [vmem:[%s13586_s22 + $0x13b] sm:$0xff] }
 0x3cf   : > { %v13207_v11 = vpop.f32.mrf.mxu1  ;;  %13390 = vmatmul.mubr.msk.bf16.gmra.mxu1 %vm243_vm1, %v10226_v20  ;;  %13435 = vmatprep.mubr.msk.bf16.mxu0 %vm243_vm1, %v10665_v54  ;;  %v10228_v54 = vpack.c.bf16 %v10200_v41, %v10199_v35 }
 0x3d0   : > { %v16394_v25 = vadd.f32 %v8293_v34, %v7944_v8  ;;  %v8785_v40 = vadd.f32 %v13207_v11, %v16163_v30  ;;  %v9022_v24 = vpop.f32.mrf.mxu0  ;;  %13393 = vmatprep.mubr.msk.bf16.mxu1 %vm243_vm1, %v10227_v47  ;;  %v10667_v30 = vpack.c.bf16 %v10640_v32, %v10639_v53  ;;  %v10643_v53 = vld [vmem:[%s13586_s22 + $0x134] sm:$0xff]  ;;  %v10644_v32 = vld [vmem:[%s13586_s22 + $0x13c] sm:$0xff] }
 0x3d1   : > { %v8584_v44 = vpop.f32.mrf.mxu1 }
 0x3d2   : > { %v16403_v42 = vadd.f32 %v13249_v39, %v8785_v40  ;;  %v8783_v27 = vadd.f32 %v8584_v44, %v16166_v62  ;;  %v13250_v26 = vpop.f32.mrf.mxu0 }
 0x3d3   : > { %v13208_v20 = vpop.f32.mrf.mxu1 }
 0x3d4   : > { %v16406_v21 = vadd.f32 %v9022_v24, %v8783_v27  ;;  %v8786_v34 = vadd.f32 %v13208_v20, %v16169_v22  ;;  %v9025_v47 = vpop.f32.mrf.mxu0  ;;  %v10203_v22 = vld [vmem:[%s13586_s22 + $0x123] sm:$0xff]  ;;  %v10668_v20 = vpack.c.bf16 %v10642_v31, %v10641_v3  ;;  %v10646_v31 = vld [vmem:[%s13586_s22 + $0x14c] sm:$0xff] }
 0x3d5   : > { %v8587_v8 = vpop.f32.mrf.mxu1  ;;  %v10645_v3 = vld [vmem:[%s13586_s22 + $0x144] sm:$0xff] }
 0x3d6   : > { %v16409_v39 = vadd.f32 %v13250_v26, %v8786_v34  ;;  %v8784_v62 = vadd.f32 %v8587_v8, %v16178_v28  ;;  %v13253_v11 = vpop.f32.mrf.mxu0  ;;  %13436 = vmatmul.mubr.msk.bf16.gmra.mxu0 %vm243_vm1, %v10666_v5  ;;  %v10204_v28 = vld [vmem:[%s13586_s22 + $0x12b] sm:$0xff]  ;;  %v10231_v8 = vpack.c.bf16 %v10206_v10, %v10205_v49  ;;  %v10209_v49 = vld [vmem:[%s13586_s22 + $0x153] sm:$0xff]  ;;  %v10210_v10 = vld [vmem:[%s13586_s22 + $0x15b] sm:$0xff] }
 0x3d7   : > { %v13211_v35 = vpop.f32.mrf.mxu1  ;;  %13394 = vmatmul.mubr.msk.bf16.gmra.mxu1 %vm243_vm1, %v10228_v54  ;;  %13439 = vmatprep.mubr.msk.bf16.mxu0 %vm243_vm1, %v10667_v30  ;;  %v10230_v30 = vpack.c.bf16 %v10204_v28, %v10203_v22 }
 0x3d8   : > { %v16418_v40 = vadd.f32 %v9025_v47, %v8784_v62  ;;  %v8789_v24 = vadd.f32 %v13211_v35, %v16187_v58  ;;  %v9038_v41 = vpop.f32.mrf.mxu0  ;;  %13397 = vmatprep.mubr.msk.bf16.mxu1 %vm243_vm1, %v10229_v15  ;;  %v10669_v58 = vpack.c.bf16 %v10644_v32, %v10643_v53  ;;  %v10647_v53 = vld [vmem:[%s13586_s22 + $0x154] sm:$0xff]  ;;  %v10648_v32 = vld [vmem:[%s13586_s22 + $0x15c] sm:$0xff] }
 0x3d9   : > { %v8600_v44 = vpop.f32.mrf.mxu1 }
 0x3da   : > { %v16427_v27 = vadd.f32 %v13253_v11, %v8789_v24  ;;  %v8787_v26 = vadd.f32 %v8600_v44, %v16190_v56  ;;  %v13254_v5 = vpop.f32.mrf.mxu0 }
 0x3db   : > { %v13212_v54 = vpop.f32.mrf.mxu1 }
 0x3dc   : > { %v16430_v34 = vadd.f32 %v9038_v41, %v8787_v26  ;;  %v8790_v47 = vadd.f32 %v13212_v54, %v16193_v59  ;;  %v9041_v15 = vpop.f32.mrf.mxu0  ;;  %v10207_v59 = vld [vmem:[%s13586_s22 + $0x143] sm:$0xff]  ;;  %v10670_v54 = vpack.c.bf16 %v10646_v31, %v10645_v3  ;;  %v10650_v31 = vld [vmem:[%s13586_s22 + $0x16c] sm:$0xff] }
 0x3dd   : > { %v8603_v62 = vpop.f32.mrf.mxu1  ;;  %v10649_v3 = vld [vmem:[%s13586_s22 + $0x164] sm:$0xff] }
 0x3de   : > { %v16433_v11 = vadd.f32 %v13254_v5, %v8790_v47  ;;  %v8788_v56 = vadd.f32 %v8603_v62, %v16202_v37  ;;  %v13257_v35 = vpop.f32.mrf.mxu0  ;;  %13440 = vmatmul.mubr.msk.bf16.gmra.mxu0 %vm243_vm1, %v10668_v20  ;;  %v10208_v37 = vld [vmem:[%s13586_s22 + $0x14b] sm:$0xff]  ;;  %v10233_v62 = vpack.c.bf16 %v10210_v10, %v10209_v49  ;;  %v10213_v49 = vld [vmem:[%s13586_s22 + $0x173] sm:$0xff]  ;;  %v10214_v10 = vld [vmem:[%s13586_s22 + $0x17b] sm:$0xff] }
 0x3df   : > { %v13215_v22 = vpop.f32.mrf.mxu1  ;;  %13398 = vmatmul.mubr.msk.bf16.gmra.mxu1 %vm243_vm1, %v10230_v30  ;;  %13443 = vmatprep.mubr.msk.bf16.mxu0 %vm243_vm1, %v10669_v58  ;;  %v10232_v58 = vpack.c.bf16 %v10208_v37, %v10207_v59 }
 0x3e0   : > { %v16442_v24 = vadd.f32 %v9041_v15, %v8788_v56  ;;  %v8793_v41 = vadd.f32 %v13215_v22, %v16211_v12  ;;  %v9054_v28 = vpop.f32.mrf.mxu0  ;;  %13401 = vmatprep.mubr.msk.bf16.mxu1 %vm243_vm1, %v10231_v8  ;;  %v10671_v12 = vpack.c.bf16 %v10648_v32, %v10647_v53  ;;  %v10651_v53 = vld [vmem:[%s13586_s22 + $0x174] sm:$0xff]  ;;  %v10652_v32 = vld [vmem:[%s13586_s22 + $0x17c] sm:$0xff] }
 0x3e1   : > { %v8616_v44 = vpop.f32.mrf.mxu1 }
 0x3e2   : > { %v16451_v26 = vadd.f32 %v13257_v35, %v8793_v41  ;;  %v8791_v5 = vadd.f32 %v8616_v44, %v16214_v6  ;;  %v13258_v20 = vpop.f32.mrf.mxu0 }
 0x3e3   : > { %v13216_v30 = vpop.f32.mrf.mxu1 }
 0x3e4   : > { %v16454_v47 = vadd.f32 %v9054_v28, %v8791_v5  ;;  %v8794_v15 = vadd.f32 %v13216_v30, %v16217_v46  ;;  %v9057_v8 = vpop.f32.mrf.mxu0  ;;  %v10211_v46 = vld [vmem:[%s13586_s22 + $0x163] sm:$0xff]  ;;  %v10672_v30 = vpack.c.bf16 %v10650_v31, %v10649_v3  ;;  %v10654_v31 = vld [vmem:[%s13586_s22 + $0x18c] sm:$0xff] }
 0x3e5   : > { %v8619_v56 = vpop.f32.mrf.mxu1 }
 0x3e6   : > { %v16457_v35 = vadd.f32 %v13258_v20, %v8794_v15  ;;  %v8792_v6 = vadd.f32 %v8619_v56, %v16226_v55  ;;  %v13261_v22 = vpop.f32.mrf.mxu0  ;;  %13444 = vmatmul.mubr.msk.bf16.gmra.mxu0 %vm243_vm1, %v10670_v54  ;;  %v10212_v55 = vld [vmem:[%s13586_s22 + $0x16b] sm:$0xff]  ;;  %v10235_v56 = vpack.c.bf16 %v10214_v10, %v10213_v49 }
 0x3e7   : > { %v13219_v59 = vpop.f32.mrf.mxu1  ;;  %13402 = vmatmul.mubr.msk.bf16.gmra.mxu1 %vm243_vm1, %v10232_v58  ;;  %13447 = vmatprep.mubr.msk.bf16.mxu0 %vm243_vm1, %v10671_v12  ;;  %v10234_v12 = vpack.c.bf16 %v10212_v55, %v10211_v46  ;;  %v10653_v46 = vld [vmem:[%s13586_s22 + $0x184] sm:$0xff] }
 0x3e8   : > { %v16466_v41 = vadd.f32 %v9057_v8, %v8792_v6  ;;  %v8797_v28 = vadd.f32 %v13219_v59, %v16235_v9  ;;  %v9070_v37 = vpop.f32.mrf.mxu0  ;;  %13405 = vmatprep.mubr.msk.bf16.mxu1 %vm243_vm1, %v10233_v62  ;;  %v10673_v9 = vpack.c.bf16 %v10652_v32, %v10651_v53  ;;  %v10215_v55 = vld [vmem:[%s13586_s22 + $0x183] sm:$0xff]  ;;  %v10216_v53 = vld [vmem:[%s13586_s22 + $0x18b] sm:$0xff]  ;;  %v10674_v10 = vpack.c.bf16 %v10654_v31, %v10653_v46  ;;  %s13484_s22 = smul.u32 320, %s16853_s9 }
 0x3e9   : > { %v8632_v44 = vpop.f32.mrf.mxu1 }
 0x3ea   : > { %v16475_v5 = vadd.f32 %v13261_v22, %v8797_v28  ;;  %v8795_v20 = vadd.f32 %v8632_v44, %v16238_v4  ;;  %v13262_v54 = vpop.f32.mrf.mxu0  ;;  %s16694_s23 = scalar_lea.vmem %s16785_s2, %s13484_s22 }
 0x3eb   : > { %v13220_v58 = vpop.f32.mrf.mxu1 }
 0x3ec   : > { %v16478_v15 = vadd.f32 %v9070_v37, %v8795_v20  ;;  %v8798_v8 = vadd.f32 %v13220_v58, %v16241_v17  ;;  %v9073_v62 = vpop.f32.mrf.mxu0 }
 0x3ed   : > { %v8635_v6 = vpop.f32.mrf.mxu1 }
 0x3ee   : > { %v16481_v22 = vadd.f32 %v13262_v54, %v8798_v8  ;;  %v8796_v4 = vadd.f32 %v8635_v6, %v16250_v0  ;;  %v13265_v59 = vpop.f32.mrf.mxu0  ;;  %13448 = vmatmul.mubr.msk.bf16.gmra.mxu0 %vm243_vm1, %v10672_v30  ;;  %v10236_v54 = vpack.c.bf16 %v10216_v53, %v10215_v55 }
 0x3ef   : > { %v13223_v3 = vpop.f32.mrf.mxu1  ;;  %13406 = vmatmul.mubr.msk.bf16.gmra.mxu1 %vm243_vm1, %v10234_v12  ;;  %13451 = vmatprep.mubr.msk.bf16.mxu0 %vm243_vm1, %v10673_v9 }
 0x3f0   : > { %v16489_v17 = vadd.f32 %v9073_v62, %v8796_v4  ;;  %v8801_v28 = vadd.f32 %v13223_v3, %v16259_v61  ;;  %v9086_v37 = vpop.f32.mrf.mxu0  ;;  %13409 = vmatprep.mubr.msk.bf16.mxu1 %vm243_vm1, %v10235_v56 }
 0x3f1   : > { %v8648_v0 = vpop.f32.mrf.mxu1 }
 0x3f2   : > { %v16495_v32 = vadd.f32 %v13265_v59, %v8801_v28  ;;  %v8799_v44 = vadd.f32 %v8648_v0, %v16262_v52  ;;  %v13266_v49 = vpop.f32.mrf.mxu0 }
 0x3f3   : > { %v13224_v20 = vpop.f32.mrf.mxu1 }
 0x3f4   : > { %v16498_v30 = vadd.f32 %v9086_v37, %v8799_v44  ;;  %v8802_v58 = vadd.f32 %v13224_v20, %v16265_v23  ;;  %v9089_v12 = vpop.f32.mrf.mxu0 }
 0x3f5   : > { %v8651_v61 = vpop.f32.mrf.mxu1 }
 0x3f6   : > { %v16501_v9 = vadd.f32 %v13266_v49, %v8802_v58  ;;  %v8800_v8 = vadd.f32 %v8651_v61, %v16274_v36  ;;  %v13269_v62 = vpop.f32.mrf.mxu0  ;;  %13452 = vmatmul.mubr.msk.bf16.gmra.mxu0 %vm243_vm1, %v10674_v10 }
 0x3f7   : > { %v13227_v56 = vpop.f32.mrf.mxu1  ;;  %13410 = vmatmul.mubr.msk.bf16.gmra.mxu1 %vm243_vm1, %v10236_v54 }
 0x3f8   : > { %v16506_v52 = vadd.f32 %v9089_v12, %v8800_v8  ;;  %v8805_v6 = vadd.f32 %v13227_v56, %v16283_v13  ;;  %v9102_v4 = vpop.f32.mrf.mxu0 }
 0x3f9   : > { %v8664_v59 = vpop.f32.mrf.mxu1 }
 0x3fa   : > { %v16509_v3 = vadd.f32 %v13269_v62, %v8805_v6  ;;  %v8803_v23 = vadd.f32 %v8664_v59, %v16286_v60  ;;  %v13270_v46 = vpop.f32.mrf.mxu0 }
 0x3fb   : > { %v13228_v31 = vpop.f32.mrf.mxu1 }
 0x3fc   : > { %v16512_v28 = vadd.f32 %v9102_v4, %v8803_v23  ;;  %v8806_v36 = vadd.f32 %v13228_v31, %v16289_v19  ;;  %v9105_v37 = vpop.f32.mrf.mxu0 }
 0x3fd   : > { %v8667_v55 = vpop.f32.mrf.mxu1 }
 0x3fe   : > { %v16515_v53 = vadd.f32 %v13270_v46, %v8806_v36  ;;  %v8804_v0 = vadd.f32 %v8667_v55, %v16298_v38  ;;  %v13273_v44 = vpop.f32.mrf.mxu0 }
 0x3ff   : > { %v13231_v13 = vpop.f32.mrf.mxu1 }
 0x400   : > { %v16518_v49 = vadd.f32 %v9105_v37, %v8804_v0  ;;  %v8809_v10 = vadd.f32 %v13231_v13, %v16307_v16  ;;  %v9118_v20 = vpop.f32.mrf.mxu0 }
 0x401   : > { %v8680_v60 = vpop.f32.mrf.mxu1 }
 0x402   : > { %v16521_v54 = vadd.f32 %v13273_v44, %v8809_v10  ;;  %v8807_v58 = vadd.f32 %v8680_v60, %v16310_v33  ;;  %v13274_v12 = vpop.f32.mrf.mxu0 }
 0x403   : > { %v13232_v19 = vpop.f32.mrf.mxu1 }
 0x404   : > { %v16524_v61 = vadd.f32 %v9118_v20, %v8807_v58  ;;  %v8810_v8 = vadd.f32 %v13232_v19, %v16313_v18  ;;  %v9121_v62 = vpop.f32.mrf.mxu0 }
 0x405   : > { %v8683_v38 = vpop.f32.mrf.mxu1 }
 0x406   : > { %v16527_v56 = vadd.f32 %v13274_v12, %v8810_v8  ;;  %v8808_v6 = vadd.f32 %v8683_v38, %v16322_v1  ;;  %v13277_v4 = vpop.f32.mrf.mxu0 }
 0x407   : > { %v13235_v16 = vpop.f32.mrf.mxu1 }
 0x408   : > { %v16530_v59 = vadd.f32 %v9121_v62, %v8808_v6  ;;  %v8813_v23 = vadd.f32 %v13235_v16, %v16331_v45  ;;  %v9134_v46 = vpop.f32.mrf.mxu0 }
 0x409   : > { %v8696_v33 = vpop.f32.mrf.mxu1 }
 0x40a   : > { %v16533_v31 = vadd.f32 %v13277_v4, %v8813_v23  ;;  %v8811_v36 = vadd.f32 %v8696_v33, %v16334_v63  ;;  %v13278_v37 = vpop.f32.mrf.mxu0 }
 0x40b   : > { %v13236_v18 = vpop.f32.mrf.mxu1 }
 0x40c   : > { %v16536_v55 = vadd.f32 %v9134_v46, %v8811_v36  ;;  %v8814_v0 = vadd.f32 %v13236_v18, %v16337_v57  ;;  %v9137_v44 = vpop.f32.mrf.mxu0 }
 0x40d   : > { %v8699_v1 = vpop.f32.mrf.mxu1 }
 0x40e   : > { %v16539_v13 = vadd.f32 %v13278_v37, %v8814_v0  ;;  %v8812_v10 = vadd.f32 %v8699_v1, %v16346_v43  ;;  %v13281_v20 = vpop.f32.mrf.mxu0 }
 0x40f   : > { %v13239_v45 = vpop.f32.mrf.mxu1 }
 0x410   : > { %v16542_v60 = vadd.f32 %v9137_v44, %v8812_v10  ;;  %v8817_v58 = vadd.f32 %v13239_v45, %v16355_v48  ;;  %v9150_v12 = vpop.f32.mrf.mxu0 }
 0x411   : > { %v8712_v63 = vpop.f32.mrf.mxu1 }
 0x412   : > { %v16545_v19 = vadd.f32 %v13281_v20, %v8817_v58  ;;  %v8815_v8 = vadd.f32 %v8712_v63, %v16358_v14  ;;  %v13282_v62 = vpop.f32.mrf.mxu0 }
 0x413   : > { %v13240_v57 = vpop.f32.mrf.mxu1 }
 0x414   : > { %v16548_v38 = vadd.f32 %v9150_v12, %v8815_v8  ;;  %v8818_v6 = vadd.f32 %v13240_v57, %v16361_v51  ;;  %v9153_v4 = vpop.f32.mrf.mxu0 }
 0x415   : > { %v8715_v43 = vpop.f32.mrf.mxu1 }
 0x416   : > { %v16551_v16 = vadd.f32 %v13282_v62, %v8818_v6  ;;  %v8816_v23 = vadd.f32 %v8715_v43, %v16370_v2  ;;  %v13285_v46 = vpop.f32.mrf.mxu0 }
 0x417   : > { %v13243_v48 = vpop.f32.mrf.mxu1 }
 0x418   : > { %v16554_v33 = vadd.f32 %v9153_v4, %v8816_v23  ;;  %v8821_v36 = vadd.f32 %v13243_v48, %v16379_v50  ;;  %v9166_v37 = vpop.f32.mrf.mxu0 }
 0x419   : > { %v8728_v14 = vpop.f32.mrf.mxu1 }
 0x41a   : > { %v16557_v18 = vadd.f32 %v13285_v46, %v8821_v36  ;;  %v8819_v0 = vadd.f32 %v8728_v14, %v16382_v7  ;;  %v13286_v44 = vpop.f32.mrf.mxu0 }
 0x41b   : > { %v13244_v51 = vpop.f32.mrf.mxu1 }
 0x41c   : > { %v16560_v1 = vadd.f32 %v9166_v37, %v8819_v0  ;;  %v8822_v10 = vadd.f32 %v13244_v51, %v16385_v29  ;;  %v9169_v20 = vpop.f32.mrf.mxu0 }
 0x41d   : > { %v8731_v2 = vpop.f32.mrf.mxu1 }
 0x41e   : > { %v16563_v45 = vadd.f32 %v13286_v44, %v8822_v10  ;;  %v8820_v58 = vadd.f32 %v8731_v2, %v16394_v25  ;;  %v13333_v12 = vpop.f32.mrf.mxu0 }
 0x41f   : > { %v13291_v50 = vpop.f32.mrf.mxu1 }
 0x420   : > { %v16566_v63 = vadd.f32 %v9169_v20, %v8820_v58  ;;  %v9661_v8 = vadd.f32 %v13291_v50, %v16403_v42  ;;  %v9898_v62 = vpop.f32.mrf.mxu0 }
 0x421   : > { %v9460_v7 = vpop.f32.mrf.mxu1 }
 0x422   : > { %v16569_v57 = vadd.f32 %v13333_v12, %v9661_v8  ;;  %v9659_v6 = vadd.f32 %v9460_v7, %v16406_v21  ;;  %v13334_v4 = vpop.f32.mrf.mxu0 }
 0x423   : > { %v13292_v29 = vpop.f32.mrf.mxu1 }
 0x424   : > { %v16572_v43 = vadd.f32 %v9898_v62, %v9659_v6  ;;  %v9662_v23 = vadd.f32 %v13292_v29, %v16409_v39  ;;  %v9901_v46 = vpop.f32.mrf.mxu0 }
 0x425   : > { %v9463_v25 = vpop.f32.mrf.mxu1 }
 0x426   : > { %v16575_v48 = vadd.f32 %v13334_v4, %v9662_v23  ;;  %v9660_v36 = vadd.f32 %v9463_v25, %v16418_v40  ;;  %v13337_v37 = vpop.f32.mrf.mxu0 }
 0x427   : > { %v13295_v42 = vpop.f32.mrf.mxu1 }
 0x428   : > { %v16578_v14 = vadd.f32 %v9901_v46, %v9660_v36  ;;  %v9665_v0 = vadd.f32 %v13295_v42, %v16427_v27  ;;  %v9914_v44 = vpop.f32.mrf.mxu0 }
 0x429   : > { %v9476_v21 = vpop.f32.mrf.mxu1 }
 0x42a   : > { %v16581_v51 = vadd.f32 %v13337_v37, %v9665_v0  ;;  %v9663_v10 = vadd.f32 %v9476_v21, %v16430_v34  ;;  %v13338_v20 = vpop.f32.mrf.mxu0 }
 0x42b   : > { %v13296_v39 = vpop.f32.mrf.mxu1 }
 0x42c   : > { %v16584_v2 = vadd.f32 %v9914_v44, %v9663_v10  ;;  %v9666_v58 = vadd.f32 %v13296_v39, %v16433_v11  ;;  %v9917_v12 = vpop.f32.mrf.mxu0 }
 0x42d   : > { %v9479_v40 = vpop.f32.mrf.mxu1 }
 0x42e   : > { %v16587_v50 = vadd.f32 %v13338_v20, %v9666_v58  ;;  %v9664_v8 = vadd.f32 %v9479_v40, %v16442_v24  ;;  %v13341_v62 = vpop.f32.mrf.mxu0 }
 0x42f   : > { %v13299_v27 = vpop.f32.mrf.mxu1 }
 0x430   : > { %v16590_v7 = vadd.f32 %v9917_v12, %v9664_v8  ;;  %v9669_v6 = vadd.f32 %v13299_v27, %v16451_v26  ;;  %v9930_v4 = vpop.f32.mrf.mxu0 }
 0x431   : > { %v9492_v34 = vpop.f32.mrf.mxu1 }
 0x432   : > { %v16593_v29 = vadd.f32 %v13341_v62, %v9669_v6  ;;  %v9667_v23 = vadd.f32 %v9492_v34, %v16454_v47  ;;  %v13342_v46 = vpop.f32.mrf.mxu0 }
 0x433   : > { %v13300_v11 = vpop.f32.mrf.mxu1 }
 0x434   : > { %v16596_v25 = vadd.f32 %v9930_v4, %v9667_v23  ;;  %v9670_v36 = vadd.f32 %v13300_v11, %v16457_v35  ;;  %v9933_v37 = vpop.f32.mrf.mxu0 }
 0x435   : > { %v9495_v24 = vpop.f32.mrf.mxu1 }
 0x436   : > { %v16599_v42 = vadd.f32 %v13342_v46, %v9670_v36  ;;  %v9668_v0 = vadd.f32 %v9495_v24, %v16466_v41  ;;  %v13345_v44 = vpop.f32.mrf.mxu0 }
 0x437   : > { %v13303_v26 = vpop.f32.mrf.mxu1 }
 0x438   : > { %v16602_v21 = vadd.f32 %v9933_v37, %v9668_v0  ;;  %v9673_v10 = vadd.f32 %v13303_v26, %v16475_v5  ;;  %v9946_v20 = vpop.f32.mrf.mxu0 }
 0x439   : > { %v9508_v47 = vpop.f32.mrf.mxu1 }
 0x43a   : > { %v16605_v39 = vadd.f32 %v13345_v44, %v9673_v10  ;;  %v9671_v58 = vadd.f32 %v9508_v47, %v16478_v15  ;;  %v13346_v12 = vpop.f32.mrf.mxu0 }
 0x43b   : > { %v13304_v35 = vpop.f32.mrf.mxu1 }
 0x43c   : > { %v16608_v40 = vadd.f32 %v9946_v20, %v9671_v58  ;;  %v9674_v8 = vadd.f32 %v13304_v35, %v16481_v22  ;;  %v9949_v62 = vpop.f32.mrf.mxu0 }
 0x43d   : > { %v9511_v41 = vpop.f32.mrf.mxu1 }
 0x43e   : > { %v16611_v27 = vadd.f32 %v13346_v12, %v9674_v8  ;;  %v9672_v6 = vadd.f32 %v9511_v41, %v16489_v17  ;;  %v13349_v4 = vpop.f32.mrf.mxu0 }
 0x43f   : > { %v13307_v5 = vpop.f32.mrf.mxu1 }
 0x440   : > { %v16614_v34 = vadd.f32 %v9949_v62, %v9672_v6  ;;  %v9677_v23 = vadd.f32 %v13307_v5, %v16495_v32  ;;  %v9962_v46 = vpop.f32.mrf.mxu0 }
 0x441   : > { %v9524_v15 = vpop.f32.mrf.mxu1 }
 0x442   : > { %v16617_v11 = vadd.f32 %v13349_v4, %v9677_v23  ;;  %v9675_v36 = vadd.f32 %v9524_v15, %v16498_v30  ;;  %v13350_v37 = vpop.f32.mrf.mxu0 }
 0x443   : > { %v13308_v22 = vpop.f32.mrf.mxu1 }
 0x444   : > { %v16620_v24 = vadd.f32 %v9962_v46, %v9675_v36  ;;  %v9678_v0 = vadd.f32 %v13308_v22, %v16501_v9  ;;  %v9965_v44 = vpop.f32.mrf.mxu0 }
 0x445   : > { %v9527_v17 = vpop.f32.mrf.mxu1 }
 0x446   : > { %v16623_v26 = vadd.f32 %v13350_v37, %v9678_v0  ;;  %v9676_v10 = vadd.f32 %v9527_v17, %v16506_v52  ;;  %v13353_v20 = vpop.f32.mrf.mxu0 }
 0x447   : > { %v13311_v32 = vpop.f32.mrf.mxu1 }
 0x448   : > { %v16626_v47 = vadd.f32 %v9965_v44, %v9676_v10  ;;  %v9681_v58 = vadd.f32 %v13311_v32, %v16509_v3  ;;  %v9978_v12 = vpop.f32.mrf.mxu0 }
 0x449   : > { %v9540_v30 = vpop.f32.mrf.mxu1 }
 0x44a   : > { %v16629_v35 = vadd.f32 %v13353_v20, %v9681_v58  ;;  %v9679_v8 = vadd.f32 %v9540_v30, %v16512_v28  ;;  %v13354_v62 = vpop.f32.mrf.mxu0 }
 0x44b   : > { %v13312_v9 = vpop.f32.mrf.mxu1 }
 0x44c   : > { %v16632_v41 = vadd.f32 %v9978_v12, %v9679_v8  ;;  %v9682_v6 = vadd.f32 %v13312_v9, %v16515_v53  ;;  %v9981_v4 = vpop.f32.mrf.mxu0 }
 0x44d   : > { %v9543_v52 = vpop.f32.mrf.mxu1 }
 0x44e   : > { %v16635_v5 = vadd.f32 %v13354_v62, %v9682_v6  ;;  %v9680_v23 = vadd.f32 %v9543_v52, %v16518_v49  ;;  %v13357_v46 = vpop.f32.mrf.mxu0 }
 0x44f   : > { %v13315_v3 = vpop.f32.mrf.mxu1 }
 0x450   : > { %v16638_v15 = vadd.f32 %v9981_v4, %v9680_v23  ;;  %v9685_v36 = vadd.f32 %v13315_v3, %v16521_v54  ;;  %v9994_v37 = vpop.f32.mrf.mxu0 }
 0x451   : > { %v9556_v28 = vpop.f32.mrf.mxu1 }
 0x452   : > { %v16641_v22 = vadd.f32 %v13357_v46, %v9685_v36  ;;  %v9683_v0 = vadd.f32 %v9556_v28, %v16524_v61  ;;  %v13358_v44 = vpop.f32.mrf.mxu0 }
 0x453   : > { %v13316_v53 = vpop.f32.mrf.mxu1 }
 0x454   : > { %v16644_v17 = vadd.f32 %v9994_v37, %v9683_v0  ;;  %v9686_v10 = vadd.f32 %v13316_v53, %v16527_v56  ;;  %v9997_v20 = vpop.f32.mrf.mxu0 }
 0x455   : > { %v9559_v49 = vpop.f32.mrf.mxu1 }
 0x456   : > { %v16647_v32 = vadd.f32 %v13358_v44, %v9686_v10  ;;  %v9684_v58 = vadd.f32 %v9559_v49, %v16530_v59  ;;  %v13361_v12 = vpop.f32.mrf.mxu0 }
 0x457   : > { %v13319_v54 = vpop.f32.mrf.mxu1 }
 0x458   : > { %v16650_v30 = vadd.f32 %v9997_v20, %v9684_v58  ;;  %v9689_v8 = vadd.f32 %v13319_v54, %v16533_v31  ;;  %v10010_v62 = vpop.f32.mrf.mxu0 }
 0x459   : > { %v9572_v61 = vpop.f32.mrf.mxu1 }
 0x45a   : > { %v16653_v9 = vadd.f32 %v13361_v12, %v9689_v8  ;;  %v9687_v6 = vadd.f32 %v9572_v61, %v16536_v55  ;;  %v13362_v4 = vpop.f32.mrf.mxu0 }
 0x45b   : > { %v13320_v56 = vpop.f32.mrf.mxu1 }
 0x45c   : > { %v16656_v52 = vadd.f32 %v10010_v62, %v9687_v6  ;;  %v9690_v23 = vadd.f32 %v13320_v56, %v16539_v13  ;;  %v10013_v46 = vpop.f32.mrf.mxu0 }
 0x45d   : > { %v9575_v59 = vpop.f32.mrf.mxu1 }
 0x45e   : > { %v16659_v3 = vadd.f32 %v13362_v4, %v9690_v23  ;;  %v9688_v36 = vadd.f32 %v9575_v59, %v16542_v60  ;;  %v13365_v37 = vpop.f32.mrf.mxu0 }
 0x45f   : > { %v13323_v31 = vpop.f32.mrf.mxu1 }
 0x460   : > { %v16662_v28 = vadd.f32 %v10013_v46, %v9688_v36  ;;  %v9693_v0 = vadd.f32 %v13323_v31, %v16545_v19  ;;  %v10026_v44 = vpop.f32.mrf.mxu0 }
 0x461   : > { %v9588_v55 = vpop.f32.mrf.mxu1 }
 0x462   : > { %v16665_v53 = vadd.f32 %v13365_v37, %v9693_v0  ;;  %v9691_v10 = vadd.f32 %v9588_v55, %v16548_v38  ;;  %v13366_v20 = vpop.f32.mrf.mxu0 }
 0x463   : > { %v13324_v13 = vpop.f32.mrf.mxu1 }
 0x464   : > { %v16668_v49 = vadd.f32 %v10026_v44, %v9691_v10  ;;  %v9694_v58 = vadd.f32 %v13324_v13, %v16551_v16  ;;  %v10029_v12 = vpop.f32.mrf.mxu0 }
 0x465   : > { %v9591_v60 = vpop.f32.mrf.mxu1 }
 0x466   : > { %v16671_v54 = vadd.f32 %v13366_v20, %v9694_v58  ;;  %v9692_v8 = vadd.f32 %v9591_v60, %v16554_v33  ;;  %v13369_v62 = vpop.f32.mrf.mxu0 }
 0x467   : > { %v13327_v19 = vpop.f32.mrf.mxu1 }
 0x468   : > { %v16674_v61 = vadd.f32 %v10029_v12, %v9692_v8  ;;  %v9697_v6 = vadd.f32 %v13327_v19, %v16557_v18  ;;  %v10042_v4 = vpop.f32.mrf.mxu0 }
 0x469   : > { %v9604_v38 = vpop.f32.mrf.mxu1 }
 0x46a   : > { %v16677_v56 = vadd.f32 %v13369_v62, %v9697_v6  ;;  %v9695_v23 = vadd.f32 %v9604_v38, %v16560_v1  ;;  %v13370_v16 = vpop.f32.mrf.mxu0 }
 0x46b   : > { %v13328_v46 = vpop.f32.mrf.mxu1 }
 0x46c   : > { %v16680_v59 = vadd.f32 %v10042_v4, %v9695_v23  ;;  %v9698_v36 = vadd.f32 %v13328_v46, %v16563_v45  ;;  %v10045_v33 = vpop.f32.mrf.mxu0 }
 0x46d   : > { %v9607_v37 = vpop.f32.mrf.mxu1 }
 0x46e   : > { %v16683_v31 = vadd.f32 %v13370_v16, %v9698_v36  ;;  %v9696_v0 = vadd.f32 %v9607_v37, %v16566_v63  ;;  %v13417_v18 = vpop.f32.mrf.mxu0 }
 0x46f   : > { %v13375_v44 = vpop.f32.mrf.mxu1 }
 0x470   : > { %v16686_v55 = vadd.f32 %v10045_v33, %v9696_v0  ;;  %v10537_v10 = vadd.f32 %v13375_v44, %v16569_v57  ;;  %v10774_v1 = vpop.f32.mrf.mxu0 }
 0x471   : > { %v10336_v20 = vpop.f32.mrf.mxu1 }
 0x472   : > { %v10975_v13 = vadd.f32 %v13417_v18, %v10537_v10  ;;  %v10535_v58 = vadd.f32 %v10336_v20, %v16572_v43  ;;  %v13418_v12 = vpop.f32.mrf.mxu0 }
 0x473   : > { %v13376_v45 = vpop.f32.mrf.mxu1 }
 0x474   : > { %vm11095_vm2 = vcmp.gt.f32.partialorder %v10975_v13, 0.0  ;;  %v11135_v63 = vmul.f32 0.01, %v10975_v13  ;;  %v10973_v60 = vadd.f32 %v10774_v1, %v10535_v58  ;;  %v10538_v8 = vadd.f32 %v13376_v45, %v16575_v48  ;;  %v10777_v57 = vpop.f32.mrf.mxu0 }
 0x475   : > { %v10339_v62 = vpop.f32.mrf.mxu1 }
 0x476   : > { %v11175_v19 = vsel %vm11095_vm2, %v10975_v13, %v11135_v63  ;;  %vm11093_vm3 = vcmp.gt.f32.partialorder %v10973_v60, 0.0  ;;  %v11133_v6 = vmul.f32 0.01, %v10973_v60  ;;  %v10976_v43 = vadd.f32 %v13418_v12, %v10538_v8  ;;  %v13421_v4 = vpop.f32.mrf.mxu0 }
 0x477   : > { %11215 = vst [vmem:[%s16694_s23 + $0x10] sm:$0xff] %v11175_v19  ;;  %v10536_v38 = vadd.f32 %v10339_v62, %v16578_v14  ;;  %v13379_v23 = vpop.f32.mrf.mxu1 }
 0x478   : > { %v11173_v16 = vsel %vm11093_vm3, %v10973_v60, %v11133_v6  ;;  %vm11096_vm4 = vcmp.gt.f32.partialorder %v10976_v43, 0.0  ;;  %v11136_v46 = vmul.f32 0.01, %v10976_v43  ;;  %v10541_v36 = vadd.f32 %v13379_v23, %v16581_v51  ;;  %v10790_v33 = vpop.f32.mrf.mxu0 }
 0x479   : > { %11213 = vst [vmem:[%s16694_s23] sm:$0xff] %v11173_v16  ;;  %v10974_v48 = vadd.f32 %v10777_v57, %v10536_v38  ;;  %v10352_v37 = vpop.f32.mrf.mxu1 }
 0x47a   : > { %v11176_v0 = vsel %vm11096_vm4, %v10976_v43, %v11136_v46  ;;  %v10979_v18 = vadd.f32 %v13421_v4, %v10541_v36  ;;  %v10539_v44 = vadd.f32 %v10352_v37, %v16584_v2  ;;  %v13422_v10 = vpop.f32.mrf.mxu0 }
 0x47b   : > { %11216 = vst [vmem:[%s16694_s23 + $0x18] sm:$0xff] %v11176_v0  ;;  %vm11094_vm5 = vcmp.gt.f32.partialorder %v10974_v48, 0.0  ;;  %v11134_v14 = vmul.f32 0.01, %v10974_v48  ;;  %v13380_v1 = vpop.f32.mrf.mxu1 }
 0x47c   : > { %vm11099_vm6 = vcmp.gt.f32.partialorder %v10979_v18, 0.0  ;;  %v11139_v20 = vmul.f32 0.01, %v10979_v18  ;;  %v10977_v13 = vadd.f32 %v10790_v33, %v10539_v44  ;;  %v10542_v51 = vadd.f32 %v13380_v1, %v16587_v50  ;;  %v10793_v58 = vpop.f32.mrf.mxu0 }
 0x47d   : > { %v11174_v12 = vsel %vm11094_vm5, %v10974_v48, %v11134_v14  ;;  %v10355_v45 = vpop.f32.mrf.mxu1 }
 0x47e   : > { %11214 = vst [vmem:[%s16694_s23 + $0x8] sm:$0xff] %v11174_v12  ;;  %v11179_v63 = vsel %vm11099_vm6, %v10979_v18, %v11139_v20  ;;  %vm11097_vm7 = vcmp.gt.f32.partialorder %v10977_v13, 0.0  ;;  %v11137_v60 = vmul.f32 0.01, %v10977_v13  ;;  %v10980_v2 = vadd.f32 %v13422_v10, %v10542_v51  ;;  %v13425_v8 = vpop.f32.mrf.mxu0 }
 0x47f   : > { %11219 = vst [vmem:[%s16694_s23 + $0x30] sm:$0xff] %v11179_v63  ;;  %v10540_v57 = vadd.f32 %v10355_v45, %v16590_v7  ;;  %v13383_v62 = vpop.f32.mrf.mxu1 }
 0x480   : > { %v11177_v19 = vsel %vm11097_vm7, %v10977_v13, %v11137_v60  ;;  %vm11100_vm8 = vcmp.gt.f32.partialorder %v10980_v2, 0.0  ;;  %v11140_v6 = vmul.f32 0.01, %v10980_v2  ;;  %v10545_v50 = vadd.f32 %v13383_v62, %v16593_v29  ;;  %v10806_v43 = vpop.f32.mrf.mxu0 }
 0x481   : > { %11217 = vst [vmem:[%s16694_s23 + $0x20] sm:$0xff] %v11177_v19  ;;  %v10978_v4 = vadd.f32 %v10793_v58, %v10540_v57  ;;  %v10368_v38 = vpop.f32.mrf.mxu1 }
 0x482   : > { %v11180_v23 = vsel %vm11100_vm8, %v10980_v2, %v11140_v6  ;;  %v10983_v16 = vadd.f32 %v13425_v8, %v10545_v50  ;;  %v10543_v46 = vadd.f32 %v10368_v38, %v16596_v25  ;;  %v13426_v36 = vpop.f32.mrf.mxu0 }
 0x483   : > { %11220 = vst [vmem:[%s16694_s23 + $0x38] sm:$0xff] %v11180_v23  ;;  %vm11098_vm9 = vcmp.gt.f32.partialorder %v10978_v4, 0.0  ;;  %v11138_v7 = vmul.f32 0.01, %v10978_v4  ;;  %v13384_v33 = vpop.f32.mrf.mxu1 }
 0x484   : > { %vm11103_vm10 = vcmp.gt.f32.partialorder %v10983_v16, 0.0  ;;  %v11143_v48 = vmul.f32 0.01, %v10983_v16  ;;  %v10981_v37 = vadd.f32 %v10806_v43, %v10543_v46  ;;  %v10546_v29 = vadd.f32 %v13384_v33, %v16599_v42  ;;  %v10809_v0 = vpop.f32.mrf.mxu0 }
 0x485   : > { %v11178_v18 = vsel %vm11098_vm9, %v10978_v4, %v11138_v7  ;;  %v10371_v44 = vpop.f32.mrf.mxu1 }
 0x486   : > { %11218 = vst [vmem:[%s16694_s23 + $0x28] sm:$0xff] %v11178_v18  ;;  %v11183_v10 = vsel %vm11103_vm10, %v10983_v16, %v11143_v48  ;;  %vm11101_vm11 = vcmp.gt.f32.partialorder %v10981_v37, 0.0  ;;  %v11141_v14 = vmul.f32 0.01, %v10981_v37  ;;  %v10984_v25 = vadd.f32 %v13426_v36, %v10546_v29  ;;  %v13429_v1 = vpop.f32.mrf.mxu0 }
 0x487   : > { %11223 = vst [vmem:[%s16694_s23 + $0x50] sm:$0xff] %v11183_v10  ;;  %v10544_v20 = vadd.f32 %v10371_v44, %v16602_v21  ;;  %v13387_v13 = vpop.f32.mrf.mxu1 }
 0x488   : > { %v11181_v51 = vsel %vm11101_vm11, %v10981_v37, %v11141_v14  ;;  %vm11104_vm12 = vcmp.gt.f32.partialorder %v10984_v25, 0.0  ;;  %v11144_v58 = vmul.f32 0.01, %v10984_v25  ;;  %v10549_v42 = vadd.f32 %v13387_v13, %v16605_v39  ;;  %v10822_v12 = vpop.f32.mrf.mxu0 }
 0x489   : > { %11221 = vst [vmem:[%s16694_s23 + $0x40] sm:$0xff] %v11181_v51  ;;  %v10982_v45 = vadd.f32 %v10809_v0, %v10544_v20  ;;  %v10384_v63 = vpop.f32.mrf.mxu1 }
 0x48a   : > { %v11184_v60 = vsel %vm11104_vm12, %v10984_v25, %v11144_v58  ;;  %v10987_v2 = vadd.f32 %v13429_v1, %v10549_v42  ;;  %v10547_v8 = vadd.f32 %v10384_v63, %v16608_v40  ;;  %v13430_v57 = vpop.f32.mrf.mxu0 }
 0x48b   : > { %11224 = vst [vmem:[%s16694_s23 + $0x58] sm:$0xff] %v11184_v60  ;;  %vm11102_vm13 = vcmp.gt.f32.partialorder %v10982_v45, 0.0  ;;  %v11142_v21 = vmul.f32 0.01, %v10982_v45  ;;  %v13388_v62 = vpop.f32.mrf.mxu1 }
 0x48c   : > { %vm11107_vm14 = vcmp.gt.f32.partialorder %v10987_v2, 0.0  ;;  %v11147_v19 = vmul.f32 0.01, %v10987_v2  ;;  %v10985_v6 = vadd.f32 %v10822_v12, %v10547_v8  ;;  %v10550_v39 = vadd.f32 %v13388_v62, %v16611_v27  ;;  %v10825_v50 = vpop.f32.mrf.mxu0 }
 0x48d   : > { %v11182_v43 = vsel %vm11102_vm13, %v10982_v45, %v11142_v21  ;;  %v10387_v4 = vpop.f32.mrf.mxu1 }
 0x48e   : > { %11222 = vst [vmem:[%s16694_s23 + $0x48] sm:$0xff] %v11182_v43  ;;  %v11187_v38 = vsel %vm11107_vm14, %v10987_v2, %v11147_v19  ;;  %vm11105_vm15 = vcmp.gt.f32.partialorder %v10985_v6, 0.0  ;;  %v11145_v23 = vmul.f32 0.01, %v10985_v6  ;;  %v10988_v40 = vadd.f32 %v13430_v57, %v10550_v39  ;;  %v13433_v16 = vpop.f32.mrf.mxu0 }
 0x48f   : > { %11227 = vst [vmem:[%s16694_s23 + $0x70] sm:$0xff] %v11187_v38  ;;  %v10548_v46 = vadd.f32 %v10387_v4, %v16614_v34  ;;  %v13391_v36 = vpop.f32.mrf.mxu1 }
 0x490   : > { %v11185_v7 = vsel %vm11105_vm15, %v10985_v6, %v11145_v23  ;;  %vm11108_vm0 = vcmp.gt.f32.partialorder %v10988_v40, 0.0  ;;  %v11148_v33 = vmul.f32 0.01, %v10988_v40  ;;  %v10553_v27 = vadd.f32 %v13391_v36, %v16617_v11  ;;  %v10838_v48 = vpop.f32.mrf.mxu0 }
 0x491   : > { %11225 = vst [vmem:[%s16694_s23 + $0x60] sm:$0xff] %v11185_v7  ;;  %v10986_v37 = vadd.f32 %v10825_v50, %v10548_v46  ;;  %v10400_v29 = vpop.f32.mrf.mxu1 }
 0x492   : > { %v11188_v0 = vsel %vm11108_vm0, %v10988_v40, %v11148_v33  ;;  %v10991_v18 = vadd.f32 %v13433_v16, %v10553_v27  ;;  %v10551_v44 = vadd.f32 %v10400_v29, %v16620_v24  ;;  %v13434_v10 = vpop.f32.mrf.mxu0 }
 0x493   : > { %11228 = vst [vmem:[%s16694_s23 + $0x78] sm:$0xff] %v11188_v0  ;;  %vm11106_vm1 = vcmp.gt.f32.partialorder %v10986_v37, 0.0  ;;  %v11146_v34 = vmul.f32 0.01, %v10986_v37  ;;  %v13392_v14 = vpop.f32.mrf.mxu1 }
 0x494   : > { %vm11111_vm2 = vcmp.gt.f32.partialorder %v10991_v18, 0.0  ;;  %v11151_v25 = vmul.f32 0.01, %v10991_v18  ;;  %v10989_v1 = vadd.f32 %v10838_v48, %v10551_v44  ;;  %v10554_v11 = vadd.f32 %v13392_v14, %v16623_v26  ;;  %v10841_v20 = vpop.f32.mrf.mxu0 }
 0x495   : > { %v11186_v13 = vsel %vm11106_vm1, %v10986_v37, %v11146_v34  ;;  %v10403_v51 = vpop.f32.mrf.mxu1 }
 0x496   : > { %11226 = vst [vmem:[%s16694_s23 + $0x68] sm:$0xff] %v11186_v13  ;;  %v11191_v58 = vsel %vm11111_vm2, %v10991_v18, %v11151_v25  ;;  %vm11109_vm3 = vcmp.gt.f32.partialorder %v10989_v1, 0.0  ;;  %v11149_v42 = vmul.f32 0.01, %v10989_v1  ;;  %v10992_v24 = vadd.f32 %v13434_v10, %v10554_v11  ;;  %v13437_v12 = vpop.f32.mrf.mxu0 }
 0x497   : > { %11231 = vst [vmem:[%s16694_s23 + $0x90] sm:$0xff] %v11191_v58  ;;  %v10552_v45 = vadd.f32 %v10403_v51, %v16626_v47  ;;  %v13395_v63 = vpop.f32.mrf.mxu1 }
 0x498   : > { %v11189_v60 = vsel %vm11109_vm3, %v10989_v1, %v11149_v42  ;;  %vm11112_vm4 = vcmp.gt.f32.partialorder %v10992_v24, 0.0  ;;  %v11152_v2 = vmul.f32 0.01, %v10992_v24  ;;  %v10557_v26 = vadd.f32 %v13395_v63, %v16629_v35  ;;  %v10854_v8 = vpop.f32.mrf.mxu0 }
 0x499   : > { %11229 = vst [vmem:[%s16694_s23 + $0x80] sm:$0xff] %v11189_v60  ;;  %v10990_v57 = vadd.f32 %v10841_v20, %v10552_v45  ;;  %v10416_v21 = vpop.f32.mrf.mxu1 }
 0x49a   : > { %v11192_v62 = vsel %vm11112_vm4, %v10992_v24, %v11152_v2  ;;  %v10995_v19 = vadd.f32 %v13437_v12, %v10557_v26  ;;  %v10555_v6 = vadd.f32 %v10416_v21, %v16632_v41  ;;  %v13438_v39 = vpop.f32.mrf.mxu0 }
 0x49b   : > { %11232 = vst [vmem:[%s16694_s23 + $0x98] sm:$0xff] %v11192_v62  ;;  %vm11110_vm5 = vcmp.gt.f32.partialorder %v10990_v57, 0.0  ;;  %v11150_v47 = vmul.f32 0.01, %v10990_v57  ;;  %v13396_v50 = vpop.f32.mrf.mxu1 }
 0x49c   : > { %vm11115_vm6 = vcmp.gt.f32.partialorder %v10995_v19, 0.0  ;;  %v11155_v43 = vmul.f32 0.01, %v10995_v19  ;;  %v10993_v4 = vadd.f32 %v10854_v8, %v10555_v6  ;;  %v10558_v35 = vadd.f32 %v13396_v50, %v16635_v5  ;;  %v10857_v38 = vpop.f32.mrf.mxu0 }
 0x49d   : > { %v11190_v23 = vsel %vm11110_vm5, %v10990_v57, %v11150_v47  ;;  %v10419_v40 = vpop.f32.mrf.mxu1 }
 0x49e   : > { %11230 = vst [vmem:[%s16694_s23 + $0x88] sm:$0xff] %v11190_v23  ;;  %v11195_v16 = vsel %vm11115_vm6, %v10995_v19, %v11155_v43  ;;  %vm11113_vm7 = vcmp.gt.f32.partialorder %v10993_v4, 0.0  ;;  %v11153_v46 = vmul.f32 0.01, %v10993_v4  ;;  %v10996_v41 = vadd.f32 %v13438_v39, %v10558_v35  ;;  %v13441_v36 = vpop.f32.mrf.mxu0 }
 0x49f   : > { %11235 = vst [vmem:[%s16694_s23 + $0xb0] sm:$0xff] %v11195_v16  ;;  %v10556_v7 = vadd.f32 %v10419_v40, %v16638_v15  ;;  %v13399_v33 = vpop.f32.mrf.mxu1 }
 0x4a0   : > { %v11193_v27 = vsel %vm11113_vm7, %v10993_v4, %v11153_v46  ;;  %vm11116_vm8 = vcmp.gt.f32.partialorder %v10996_v41, 0.0  ;;  %v11156_v48 = vmul.f32 0.01, %v10996_v41  ;;  %v10561_v5 = vadd.f32 %v13399_v33, %v16641_v22  ;;  %v10870_v37 = vpop.f32.mrf.mxu0 }
 0x4a1   : > { %11233 = vst [vmem:[%s16694_s23 + $0xa0] sm:$0xff] %v11193_v27  ;;  %v10994_v29 = vadd.f32 %v10857_v38, %v10556_v7  ;;  %v10432_v0 = vpop.f32.mrf.mxu1 }
 0x4a2   : > { %v11196_v18 = vsel %vm11116_vm8, %v10996_v41, %v11156_v48  ;;  %v10999_v44 = vadd.f32 %v13441_v36, %v10561_v5  ;;  %v10559_v10 = vadd.f32 %v10432_v0, %v16644_v17  ;;  %v13442_v34 = vpop.f32.mrf.mxu0 }
 0x4a3   : > { %11236 = vst [vmem:[%s16694_s23 + $0xb8] sm:$0xff] %v11196_v18  ;;  %vm11114_vm9 = vcmp.gt.f32.partialorder %v10994_v29, 0.0  ;;  %v11154_v15 = vmul.f32 0.01, %v10994_v29  ;;  %v13400_v14 = vpop.f32.mrf.mxu1 }
 0x4a4   : > { %vm11119_vm10 = vcmp.gt.f32.partialorder %v10999_v44, 0.0  ;;  %v11159_v25 = vmul.f32 0.01, %v10999_v44  ;;  %v10997_v1 = vadd.f32 %v10870_v37, %v10559_v10  ;;  %v10562_v22 = vadd.f32 %v13400_v14, %v16647_v32  ;;  %v10873_v11 = vpop.f32.mrf.mxu0 }
 0x4a5   : > { %v11194_v20 = vsel %vm11114_vm9, %v10994_v29, %v11154_v15  ;;  %v10435_v13 = vpop.f32.mrf.mxu1 }
 0x4a6   : > { %11234 = vst [vmem:[%s16694_s23 + $0xa8] sm:$0xff] %v11194_v20  ;;  %v11199_v51 = vsel %vm11119_vm10, %v10999_v44, %v11159_v25  ;;  %vm11117_vm11 = vcmp.gt.f32.partialorder %v10997_v1, 0.0  ;;  %v11157_v58 = vmul.f32 0.01, %v10997_v1  ;;  %v11000_v17 = vadd.f32 %v13442_v34, %v10562_v22  ;;  %v13445_v42 = vpop.f32.mrf.mxu0 }
 0x4a7   : > { %11239 = vst [vmem:[%s16694_s23 + $0xd0] sm:$0xff] %v11199_v51  ;;  %v10560_v24 = vadd.f32 %v10435_v13, %v16650_v30  ;;  %v13403_v12 = vpop.f32.mrf.mxu1 }
 0x4a8   : > { %v11197_v45 = vsel %vm11117_vm11, %v10997_v1, %v11157_v58  ;;  %vm11120_vm12 = vcmp.gt.f32.partialorder %v11000_v17, 0.0  ;;  %v11160_v63 = vmul.f32 0.01, %v11000_v17  ;;  %v10565_v32 = vadd.f32 %v13403_v12, %v16653_v9  ;;  %v10886_v60 = vpop.f32.mrf.mxu0 }
 0x4a9   : > { %11237 = vst [vmem:[%s16694_s23 + $0xc0] sm:$0xff] %v11197_v45  ;;  %v10998_v2 = vadd.f32 %v10873_v11, %v10560_v24  ;;  %v10448_v26 = vpop.f32.mrf.mxu1 }
 0x4aa   : > { %v11200_v8 = vsel %vm11120_vm12, %v11000_v17, %v11160_v63  ;;  %v11003_v57 = vadd.f32 %v13445_v42, %v10565_v32  ;;  %v10563_v21 = vadd.f32 %v10448_v26, %v16656_v52  ;;  %v13446_v62 = vpop.f32.mrf.mxu0 }
 0x4ab   : > { %11240 = vst [vmem:[%s16694_s23 + $0xd8] sm:$0xff] %v11200_v8  ;;  %vm11118_vm13 = vcmp.gt.f32.partialorder %v10998_v2, 0.0  ;;  %v11158_v30 = vmul.f32 0.01, %v10998_v2  ;;  %v13404_v19 = vpop.f32.mrf.mxu1 }
 0x4ac   : > { %vm11123_vm14 = vcmp.gt.f32.partialorder %v11003_v57, 0.0  ;;  %v11163_v6 = vmul.f32 0.01, %v11003_v57  ;;  %v11001_v39 = vadd.f32 %v10886_v60, %v10563_v21  ;;  %v10566_v9 = vadd.f32 %v13404_v19, %v16659_v3  ;;  %v10889_v47 = vpop.f32.mrf.mxu0 }
 0x4ad   : > { %v11198_v50 = vsel %vm11118_vm13, %v10998_v2, %v11158_v30  ;;  %v10451_v43 = vpop.f32.mrf.mxu1 }
 0x4ae   : > { %11238 = vst [vmem:[%s16694_s23 + $0xc8] sm:$0xff] %v11198_v50  ;;  %v11203_v4 = vsel %vm11123_vm14, %v11003_v57, %v11163_v6  ;;  %vm11121_vm15 = vcmp.gt.f32.partialorder %v11001_v39, 0.0  ;;  %v11161_v35 = vmul.f32 0.01, %v11001_v39  ;;  %v11004_v52 = vadd.f32 %v13446_v62, %v10566_v9  ;;  %v13449_v38 = vpop.f32.mrf.mxu0 }
 0x4af   : > { %11243 = vst [vmem:[%s16694_s23 + $0xf0] sm:$0xff] %v11203_v4  ;;  %v10564_v23 = vadd.f32 %v10451_v43, %v16662_v28  ;;  %v13407_v40 = vpop.f32.mrf.mxu1 }
 0x4b0   : > { %v11201_v16 = vsel %vm11121_vm15, %v11001_v39, %v11161_v35  ;;  %vm11124_vm0 = vcmp.gt.f32.partialorder %v11004_v52, 0.0  ;;  %v11164_v46 = vmul.f32 0.01, %v11004_v52  ;;  %v10569_v3 = vadd.f32 %v13407_v40, %v16665_v53  ;;  %v10902_v41 = vpop.f32.mrf.mxu0 }
 0x4b1   : > { %11241 = vst [vmem:[%s16694_s23 + $0xe0] sm:$0xff] %v11201_v16  ;;  %v11002_v36 = vadd.f32 %v10889_v47, %v10564_v23  ;;  %v10464_v7 = vpop.f32.mrf.mxu1 }
 0x4b2   : > { %v11204_v33 = vsel %vm11124_vm0, %v11004_v52, %v11164_v46  ;;  %v11007_v27 = vadd.f32 %v13449_v38, %v10569_v3  ;;  %v10567_v48 = vadd.f32 %v10464_v7, %v16668_v49  ;;  %v13450_v5 = vpop.f32.mrf.mxu0 }
 0x4b3   : > { %11244 = vst [vmem:[%s16694_s23 + $0xf8] sm:$0xff] %v11204_v33  ;;  %vm11122_vm1 = vcmp.gt.f32.partialorder %v11002_v36, 0.0  ;;  %v11162_v28 = vmul.f32 0.01, %v11002_v36  ;;  %v13408_v37 = vpop.f32.mrf.mxu1 }
 0x4b4   : > { %vm11127_vm2 = vcmp.gt.f32.partialorder %v11007_v27, 0.0  ;;  %v11167_v29 = vmul.f32 0.01, %v11007_v27  ;;  %v11005_v0 = vadd.f32 %v10902_v41, %v10567_v48  ;;  %v10570_v53 = vadd.f32 %v13408_v37, %v16671_v54  ;;  %v10905_v18 = vpop.f32.mrf.mxu0 }
 0x4b5   : > { %v11202_v44 = vsel %vm11122_vm1, %v11002_v36, %v11162_v28  ;;  %v10467_v10 = vpop.f32.mrf.mxu1 }
 0x4b6   : > { %11242 = vst [vmem:[%s16694_s23 + $0xe8] sm:$0xff] %v11202_v44  ;;  %v11207_v34 = vsel %vm11127_vm2, %v11007_v27, %v11167_v29  ;;  %vm11125_vm3 = vcmp.gt.f32.partialorder %v11005_v0, 0.0  ;;  %v11165_v15 = vmul.f32 0.01, %v11005_v0  ;;  %v11008_v49 = vadd.f32 %v13450_v5, %v10570_v53  ;;  %v13453_v14 = vpop.f32.mrf.mxu0 }
 0x4b7   : > { %11247 = vst [vmem:[%s16694_s23 + $0x110] sm:$0xff] %v11207_v34  ;;  %v10568_v25 = vadd.f32 %v10467_v10, %v16674_v61  ;;  %v13411_v1 = vpop.f32.mrf.mxu1 }
 0x4b8   : > { %v11205_v22 = vsel %vm11125_vm3, %v11005_v0, %v11165_v15  ;;  %vm11128_vm4 = vcmp.gt.f32.partialorder %v11008_v49, 0.0  ;;  %v11168_v11 = vmul.f32 0.01, %v11008_v49  ;;  %v10573_v54 = vadd.f32 %v13411_v1, %v16677_v56  ;;  %v10918_v20 = vpop.f32.mrf.mxu0 }
 0x4b9   : > { %11245 = vst [vmem:[%s16694_s23 + $0x100] sm:$0xff] %v11205_v22  ;;  %v11006_v13 = vadd.f32 %v10905_v18, %v10568_v25  ;;  %v10480_v51 = vpop.f32.mrf.mxu1 }
 0x4ba   : > { %v11208_v58 = vsel %vm11128_vm4, %v11008_v49, %v11168_v11  ;;  %v11011_v17 = vadd.f32 %v13453_v14, %v10573_v54  ;;  %v10571_v42 = vadd.f32 %v10480_v51, %v16680_v59  ;;  %v13454_v63 = vpop.f32.mrf.mxu0 }
 0x4bb   : > { %11248 = vst [vmem:[%s16694_s23 + $0x118] sm:$0xff] %v11208_v58  ;;  %vm11126_vm5 = vcmp.gt.f32.partialorder %v11006_v13, 0.0  ;;  %v11166_v24 = vmul.f32 0.01, %v11006_v13  ;;  %v13412_v61 = vpop.f32.mrf.mxu1 }
 0x4bc   : > { %vm11131_vm6 = vcmp.gt.f32.partialorder %v11011_v17, 0.0  ;;  %v11171_v12 = vmul.f32 0.01, %v11011_v17  ;;  %v11009_v45 = vadd.f32 %v10918_v20, %v10571_v42  ;;  %v10574_v56 = vadd.f32 %v13412_v61, %v16683_v31  ;;  %v10921_v62 = vpop.f32.mrf.mxu0 }
 0x4bd   : > { %v11206_v32 = vsel %vm11126_vm5, %v11006_v13, %v11166_v24  ;;  %v10483_v60 = vpop.f32.mrf.mxu1 }
 0x4be   : > { %11246 = vst [vmem:[%s16694_s23 + $0x108] sm:$0xff] %v11206_v32  ;;  %v11211_v2 = vsel %vm11131_vm6, %v11011_v17, %v11171_v12  ;;  %vm11129_vm7 = vcmp.gt.f32.partialorder %v11009_v45, 0.0  ;;  %v11169_v59 = vmul.f32 0.01, %v11009_v45  ;;  %v11012_v26 = vadd.f32 %v13454_v63, %v10574_v56 }
 0x4bf   : > { %11251 = vst [vmem:[%s16694_s23 + $0x130] sm:$0xff] %v11211_v2  ;;  %v10572_v8 = vadd.f32 %v10483_v60, %v16686_v55 }
 0x4c0   : > { %v11209_v57 = vsel %vm11129_vm7, %v11009_v45, %v11169_v59  ;;  %vm11132_vm8 = vcmp.gt.f32.partialorder %v11012_v26, 0.0  ;;  %v11172_v21 = vmul.f32 0.01, %v11012_v26 }
 0x4c1   : > { %11249 = vst [vmem:[%s16694_s23 + $0x120] sm:$0xff] %v11209_v57  ;;  %v11010_v30 = vadd.f32 %v10921_v62, %v10572_v8 }
 0x4c2   : > { %v11212_v31 = vsel %vm11132_vm8, %v11012_v26, %v11172_v21 }
 0x4c3   : > { %11252 = vst [vmem:[%s16694_s23 + $0x138] sm:$0xff] %v11212_v31  ;;  %vm11130_vm9 = vcmp.gt.f32.partialorder %v11010_v30, 0.0  ;;  %v11170_v19 = vmul.f32 0.01, %v11010_v30 }
 0x4c5   : > { %v11210_v6 = vsel %vm11130_vm9, %v11010_v30, %v11170_v19 }
 0x4c6   : > { %11250 = vst [vmem:[%s16694_s23 + $0x128] sm:$0xff] %v11210_v6 }
 0x4c7 PF: > { %s12_s11 = sadd.s32 1, %s13531_s11   ;;  %s16848_s9 = smov %s13527_s10 }
 0x4c8   : > { %p9_p5 = scmp.ge.s32.totalorder %s12_s11, 4   ;;  %s16849_s10 = smov %s16851_s12 }
 0x4ca   :  { %11 = sbr.rel (!%p9_p5) target bundleno = 2 (0x2), region = 85 }

</bundles_post_ra>
